<compile_context>
chip_gen: v7x
topology: tpu7x:2x2x1
jax: 0.10.0
libtpu: 0.0.40
codegen_flags: <defaults>
</compile_context>

<pallas_src>
import functools
import math

import jax
import jax.numpy as jnp
from jax.experimental import pallas as pl
from jax.experimental.pallas import tpu as pltpu

NUM_AGENTS = 1          # args.num_agents (synthetic choice)
IN_CH = 8 * NUM_AGENTS
H = W = 84              # implied by 64*7*7 in the first Linear layer

_VMEM_LIMIT_BYTES = 32 * 1024 * 1024   # safe on v5e/v6e (128 MiB) and v7x (64 MiB)


def _round_up(x, m):
    return (x + m - 1) // m * m


def _plan_m(m, tile_m, split_threshold=256):
    """Choose (padded_M, tile_m).

    Tiles are multiples of 8 sublanes; when M is large enough the grid gets
    >=2 steps so the 'parallel' M axis engages both TensorCores on v7x.
    Tiny Ms (RL-style batches) stay a single latency-bound tile.
    """
    mp = _round_up(m, 8)
    if mp >= split_threshold:
        tm = min(tile_m, _round_up((mp + 1) // 2, 8))
    else:
        tm = mp
    return _round_up(mp, tm), tm


# ----------------------------------------------------------------------------
# Pallas kernels
# ----------------------------------------------------------------------------
def _matmul_bias_act_kernel(x_ref, w_ref, b_ref, o_ref, *, apply_relu):
    # x: (tm, K) bf16 (already bf16 -> no in-kernel cast); w: (K, N) bf16
    # (resident); f32 accumulate + bias (+ ReLU), cast at the store.
    acc = jnp.dot(x_ref[...], w_ref[...], preferred_element_type=jnp.float32)
    acc = acc + b_ref[...]                 # (1, N) f32 broadcasts over rows
    if apply_relu:
        acc = jnp.maximum(acc, 0.0)
    o_ref[...] = acc.astype(o_ref.dtype)


def _fc_head_kernel(x_ref, w_ref, b_ref, wh_ref, bh_ref, o_ref):
    # Fused: value = relu(x @ w4 + b4) @ w5 + b5.  The head is a VPU multiply
    # + cross-lane (XLU) reduction in f32: no N=1 MXU matmul, no HBM round
    # trip for the (tm, 512) feature block.
    h = jnp.dot(x_ref[...], w_ref[...], preferred_element_type=jnp.float32)
    h = jnp.maximum(h + b_ref[...], 0.0)                      # (tm, 512) f32
    v = jnp.sum(h * wh_ref[...], axis=-1, keepdims=True)      # (tm, 1) f32
    o_ref[...] = (v + bh_ref[...]).astype(o_ref.dtype)


# ----------------------------------------------------------------------------
# Pallas wrappers (M-tiled grid, resident bf16 weights, f32 epilogue)
# ----------------------------------------------------------------------------
def matmul_bias_act(x, w, b, *, relu, tile_m, out_dtype):
    """x: (M, K) bf16, w: (K, N) bf16, b: (N,) f32 -> (M, N) out_dtype."""
    m, k = x.shape
    kw_, n = w.shape
    assert k == kw_
    mp, tm = _plan_m(m, tile_m)
    if mp != m:
        x = jnp.pad(x, ((0, mp - m), (0, 0)))

    out = pl.pallas_call(
        functools.partial(_matmul_bias_act_kernel, apply_relu=relu),
        out_shape=jax.ShapeDtypeStruct((mp, n), out_dtype),
        grid=(mp // tm,),
        in_specs=[
            pl.BlockSpec((tm, k), lambda i: (i, 0)),   # streamed activations
            # Constant index_map -> Pallas DMAs these once (block index never
            # changes across grid steps); they stay VMEM-resident.
            pl.BlockSpec((k, n), lambda i: (0, 0)),    # weight
            pl.BlockSpec((1, n), lambda i: (0, 0)),    # bias
        ],
        out_specs=pl.BlockSpec((tm, n), lambda i: (i, 0)),
        compiler_params=pltpu.CompilerParams(
            dimension_semantics=("parallel",),
            vmem_limit_bytes=_VMEM_LIMIT_BYTES),
    )(x, w, b.reshape(1, n))
    return out[:m] if mp != m else out


def conv_matmul(cols, w_bd, b_tiled, *, group, n_out, tile_m=512):
    """Grouped conv matmul with lane-dense (128-wide) output stores.

    cols:    (M, K) bf16 im2col columns, M = B*Ho*Wo in row-major NHWC order.
    w_bd:    (group*K, group*n_out) bf16 block-diagonal weight, group*n_out==128.
    b_tiled: (group*n_out,) f32.

    Groups `group` consecutive spatial positions into one matmul row, so the
    kernel writes (tm, 128) blocks (unmasked vst) instead of (tm, 32/64)
    masked partial stores -- with zero in-kernel relayout.  The row-major
    flatten of the grouped output equals the flatten of the ungrouped
    (M, n_out) result, so the consumer reshape is unchanged.
    """
    m, k = cols.shape
    mg = _round_up(m, group)
    if mg != m:
        cols = jnp.pad(cols, ((0, mg - m), (0, 0)))
    xg = cols.reshape(mg // group, group * k)            # free XLA reshape
    out_g = matmul_bias_act(xg, w_bd, b_tiled, relu=True, tile_m=tile_m,
                            out_dtype=jnp.bfloat16)
    out = out_g.reshape(mg, n_out)                       # row-major ungroup
    return out[:m] if mg != m else out


def fc_head(feat, w4, b4, w5, b5, *, tile_m=1024):
    """feat: (M, 3136) bf16 -> value (M, 1) f32, fc1 + value head fused."""
    m, k = feat.shape
    kw_, n = w4.shape
    assert k == kw_
    mp, tm = _plan_m(m, tile_m)
    if mp != m:
        feat = jnp.pad(feat, ((0, mp - m), (0, 0)))

    out = pl.pallas_call(
        _fc_head_kernel,
        out_shape=jax.ShapeDtypeStruct((mp, 1), jnp.float32),
        grid=(mp // tm,),
        in_specs=[
            pl.BlockSpec((tm, k), lambda i: (i, 0)),   # streamed bf16 features
            pl.BlockSpec((k, n), lambda i: (0, 0)),    # w4 resident (bf16, ~3.2 MB)
            pl.BlockSpec((1, n), lambda i: (0, 0)),    # b4 (f32)
            pl.BlockSpec((1, n), lambda i: (0, 0)),    # w5 as a row vector (f32)
            pl.BlockSpec((1, 1), lambda i: (0, 0)),    # b5
        ],
        out_specs=pl.BlockSpec((tm, 1), lambda i: (i, 0)),
        compiler_params=pltpu.CompilerParams(
            dimension_semantics=("parallel",),
            vmem_limit_bytes=_VMEM_LIMIT_BYTES),
    )(feat, w4, b4.reshape(1, n), w5.reshape(1, n), b5.reshape(1, 1))
    return out[:m] if mp != m else out


# ----------------------------------------------------------------------------
# im2col glue (plain JAX, NHWC, bf16): feature order is (kh, kw, c).
# TODO(synk): fuse patch extraction in-kernel (strided-sublane gathers) to
# remove the column-matrix HBM round trip per conv layer.
# ----------------------------------------------------------------------------
def im2col_nhwc(x, k, s):
    b, hi, wi, c = x.shape
    ho = (hi - k) // s + 1
    wo = (wi - k) // s + 1
    patches = []
    for i in range(k):
        for j in range(k):
            patches.append(x[:, i:i + s * ho:s, j:j + s * wo:s, :])  # (B,Ho,Wo,C)
    p = jnp.stack(patches, axis=3)                  # (B, Ho, Wo, k*k, C) bf16
    return p.reshape(b * ho * wo, k * k * c), ho, wo


# ----------------------------------------------------------------------------
# Parameter construction.
# ----------------------------------------------------------------------------
def _block_diag(w, group):
    """(K, N) -> (group*K, group*N) block-diagonal (one-time, at init)."""
    k, n = w.shape
    wbd = jnp.zeros((group * k, group * n), w.dtype)
    for a in range(group):
        wbd = wbd.at[a * k:(a + 1) * k, a * n:(a + 1) * n].set(w)
    return wbd


# --- torch state_dict conversion helpers (row-order differs from torch) -----
def torch_conv_weight_to_rows(w_oihw):
    """torch Conv2d weight (Cout, Cin, kh, kw) -> our (kh*kw*Cin, Cout) rows."""
    w = jnp.asarray(w_oihw)
    return jnp.transpose(w, (2, 3, 1, 0)).reshape(-1, w.shape[0])


def torch_fc1_weight_to_rows(w_torch):
    """torch Linear(3136,512) weight (512,3136), NCHW (c,h,w) flatten ->
    our (3136, 512) rows in NHWC (h,w,c) flatten order."""
    w = jnp.asarray(w_torch).reshape(512, 64, 7, 7)
    return jnp.transpose(w, (2, 3, 1, 0)).reshape(7 * 7 * 64, 512)


def init_params(key):
    """Orthogonal init (like layer_init), biases zero.  Conv / fc1 weight rows
    use NHWC (kh,kw,c) ordering (permuted orthogonal == orthogonal); to load a
    real torch state_dict use the torch_*_to_rows helpers, then _block_diag."""
    ks = jax.random.split(key, 5)
    ortho2 = jax.nn.initializers.orthogonal(scale=math.sqrt(2.0))
    ortho1 = jax.nn.initializers.orthogonal(scale=1.0)
    w1 = ortho2(ks[0], (8 * 8 * IN_CH, 32), jnp.float32)
    w2 = ortho2(ks[1], (4 * 4 * 32, 64), jnp.float32)
    w3 = ortho2(ks[2], (3 * 3 * 64, 64), jnp.float32)
    w4 = ortho2(ks[3], (7 * 7 * 64, 512), jnp.float32)
    w5 = ortho1(ks[4], (512, 1), jnp.float32)
    return {
        # Block-diagonal bf16 conv weights: group * Cout == 128 output lanes.
        "w1": _block_diag(w1, 4).astype(jnp.bfloat16),    # (2048, 128)
        "b1": jnp.zeros((4 * 32,), jnp.float32),
        "w2": _block_diag(w2, 2).astype(jnp.bfloat16),    # (1024, 128)
        "b2": jnp.zeros((2 * 64,), jnp.float32),
        "w3": _block_diag(w3, 2).astype(jnp.bfloat16),    # (1152, 128)
        "b3": jnp.zeros((2 * 64,), jnp.float32),
        "w4": w4.astype(jnp.bfloat16),                    # (3136, 512)
        "b4": jnp.zeros((512,), jnp.float32),
        "w5": w5,                                         # value head kept f32
        "b5": jnp.zeros((1,), jnp.float32),
    }


# ----------------------------------------------------------------------------
# Forward pass
# ----------------------------------------------------------------------------
@jax.jit
def critic_forward(params, x):
    # x: (B, 8*num_agents, 84, 84) f32 NCHW (same as PyTorch).
    # Single NCHW->NHWC transpose + bf16 cast; all downstream activations,
    # im2col columns and features stay bf16 (half the HBM traffic).
    x = jnp.transpose(x, (0, 2, 3, 1)).astype(jnp.bfloat16)
    b = x.shape[0]

    cols, ho, wo = im2col_nhwc(x, 8, 4)                              # (B*400, 512)
    h = conv_matmul(cols, params["w1"], params["b1"], group=4, n_out=32)
    h = h.reshape(b, ho, wo, 32)                                     # (B,20,20,32)

    cols, ho, wo = im2col_nhwc(h, 4, 2)                              # (B*81, 512)
    h = conv_matmul(cols, params["w2"], params["b2"], group=2, n_out=64)
    h = h.reshape(b, ho, wo, 64)                                     # (B, 9, 9,64)

    cols, ho, wo = im2col_nhwc(h, 3, 1)                              # (B*49, 576)
    h = conv_matmul(cols, params["w3"], params["b3"], group=2, n_out=64)
    feat = h.reshape(b, ho * wo * 64)                                # (B, 3136) NHWC flatten

    # TODO(synk): fuse conv2+conv3+fc+head into one pallas_call per batch tile
    # (per-sample activations fit VMEM) to drop the remaining launches/round trips.
    return fc_head(feat, params["w4"], params["b4"],
                   params["w5"], params["b5"])                       # (B, 1) f32


if __name__ == "__main__":
    key = jax.random.PRNGKey(0)
    pkey, xkey = jax.random.split(key)
    params = init_params(pkey)

    B = 2
    x = jax.random.normal(xkey, (B, IN_CH, H, W), jnp.float32)

    out = jax.block_until_ready(critic_forward(params, x))
    assert out.shape == (B, 1), out.shape
    assert jnp.all(jnp.isfinite(out))
    print("KERNEL_OK")
</pallas_src>

<mosaic_0001>
module attributes {stable_mosaic.version = 11 : i64} {
  func.func @_matmul_bias_act_kernel(%arg0: i32, %arg1: memref<200x2048xbf16, #tpu.memory_space<vmem>>, %arg2: memref<2048x128xbf16, #tpu.memory_space<vmem>>, %arg3: memref<1x128xf32, #tpu.memory_space<vmem>>, %arg4: memref<200x128xbf16, #tpu.memory_space<vmem>>) attributes {dimension_semantics = [#tpu.dimension_semantics<parallel>], iteration_bounds = array<i64: 1>, scalar_prefetch = 0 : i64, scratch_operands = 0 : i64, tpu.core_type = #tpu.core_type<tc>, window_params = [{transform_indices = @transform_0, window_bounds = array<i64: 200, 2048>}, {pipeline_mode = #tpu.pipeline_mode<synchronous>, transform_indices = @transform_1, window_bounds = array<i64: 2048, 128>}, {pipeline_mode = #tpu.pipeline_mode<synchronous>, transform_indices = @transform_2, window_bounds = array<i64: 1, 128>}, {transform_indices = @transform_3, window_bounds = array<i64: 200, 128>}]} {
    %c0 = arith.constant 0 : index
    %c0_0 = arith.constant 0 : index
    %0 = vector.load %arg1[%c0, %c0_0] : memref<200x2048xbf16, #tpu.memory_space<vmem>>, vector<200x2048xbf16>
    %c0_1 = arith.constant 0 : index
    %c0_2 = arith.constant 0 : index
    %1 = vector.load %arg2[%c0_1, %c0_2] : memref<2048x128xbf16, #tpu.memory_space<vmem>>, vector<2048x128xbf16>
    %cst = arith.constant dense<0.000000e+00> : vector<200x128xf32>
    %2 = tpu.matmul %0, %1, %cst {dimension_numbers = #tpu.dot_dimension_numbers<[1], [0], [0], [1], [0, 0, 1, 1], [], []>} : vector<200x2048xbf16>, vector<2048x128xbf16>, vector<200x128xf32> -> vector<200x128xf32>
    %c0_3 = arith.constant 0 : index
    %c0_4 = arith.constant 0 : index
    %3 = vector.load %arg3[%c0_3, %c0_4] : memref<1x128xf32, #tpu.memory_space<vmem>>, vector<1x128xf32>
    %4 = vector.broadcast %3 : vector<1x128xf32> to vector<200x128xf32>
    %5 = arith.addf %2, %4 : vector<200x128xf32>
    %cst_5 = arith.constant 0.000000e+00 : f32
    %6 = vector.broadcast %cst_5 : f32 to vector<200x128xf32>
    %7 = arith.maximumf %5, %6 : vector<200x128xf32>
    %8 = arith.truncf %7 : vector<200x128xf32> to vector<200x128xbf16>
    %c0_6 = arith.constant 0 : index
    %c0_7 = arith.constant 0 : index
    %9 = vector.load %arg4[%c0_6, %c0_7] : memref<200x128xbf16, #tpu.memory_space<vmem>>, vector<200x128xbf16>
    tpu.vector_store %arg4[%c0_6, %c0_7], %8 {strides = array<i32>} : memref<200x128xbf16, #tpu.memory_space<vmem>>, vector<200x128xbf16>,
    return
  }
  func.func @transform_0(%arg0: i32) -> (i32, i32) {
    %c0_i32 = arith.constant 0 : i32
    %c0_i32_0 = arith.constant 0 : i32
    return %arg0, %c0_i32 : i32, i32
  }
  func.func @transform_1(%arg0: i32) -> (i32, i32) {
    %c0_i32 = arith.constant 0 : i32
    %c0_i32_0 = arith.constant 0 : i32
    %c0_i32_1 = arith.constant 0 : i32
    return %c0_i32, %c0_i32_0 : i32, i32
  }
  func.func @transform_2(%arg0: i32) -> (i32, i32) {
    %c0_i32 = arith.constant 0 : i32
    %c0_i32_0 = arith.constant 0 : i32
    %c0_i32_1 = arith.constant 0 : i32
    return %c0_i32, %c0_i32_0 : i32, i32
  }
  func.func @transform_3(%arg0: i32) -> (i32, i32) {
    %c0_i32 = arith.constant 0 : i32
    %c0_i32_0 = arith.constant 0 : i32
    return %arg0, %c0_i32 : i32, i32
  }
}

module attributes {stable_mosaic.version = 11 : i64} {
  func.func @_matmul_bias_act_kernel(%arg0: i32, %arg1: memref<88x1024xbf16, #tpu.memory_space<vmem>>, %arg2: memref<1024x128xbf16, #tpu.memory_space<vmem>>, %arg3: memref<1x128xf32, #tpu.memory_space<vmem>>, %arg4: memref<88x128xbf16, #tpu.memory_space<vmem>>) attributes {dimension_semantics = [#tpu.dimension_semantics<parallel>], iteration_bounds = array<i64: 1>, scalar_prefetch = 0 : i64, scratch_operands = 0 : i64, tpu.core_type = #tpu.core_type<tc>, window_params = [{transform_indices = @transform_0, window_bounds = array<i64: 88, 1024>}, {pipeline_mode = #tpu.pipeline_mode<synchronous>, transform_indices = @transform_1, window_bounds = array<i64: 1024, 128>}, {pipeline_mode = #tpu.pipeline_mode<synchronous>, transform_indices = @transform_2, window_bounds = array<i64: 1, 128>}, {transform_indices = @transform_3, window_bounds = array<i64: 88, 128>}]} {
    %c0 = arith.constant 0 : index
    %c0_0 = arith.constant 0 : index
    %0 = vector.load %arg1[%c0, %c0_0] : memref<88x1024xbf16, #tpu.memory_space<vmem>>, vector<88x1024xbf16>
    %c0_1 = arith.constant 0 : index
    %c0_2 = arith.constant 0 : index
    %1 = vector.load %arg2[%c0_1, %c0_2] : memref<1024x128xbf16, #tpu.memory_space<vmem>>, vector<1024x128xbf16>
    %cst = arith.constant dense<0.000000e+00> : vector<88x128xf32>
    %2 = tpu.matmul %0, %1, %cst {dimension_numbers = #tpu.dot_dimension_numbers<[1], [0], [0], [1], [0, 0, 1, 1], [], []>} : vector<88x1024xbf16>, vector<1024x128xbf16>, vector<88x128xf32> -> vector<88x128xf32>
    %c0_3 = arith.constant 0 : index
    %c0_4 = arith.constant 0 : index
    %3 = vector.load %arg3[%c0_3, %c0_4] : memref<1x128xf32, #tpu.memory_space<vmem>>, vector<1x128xf32>
    %4 = vector.broadcast %3 : vector<1x128xf32> to vector<88x128xf32>
    %5 = arith.addf %2, %4 : vector<88x128xf32>
    %cst_5 = arith.constant 0.000000e+00 : f32
    %6 = vector.broadcast %cst_5 : f32 to vector<88x128xf32>
    %7 = arith.maximumf %5, %6 : vector<88x128xf32>
    %8 = arith.truncf %7 : vector<88x128xf32> to vector<88x128xbf16>
    %c0_6 = arith.constant 0 : index
    %c0_7 = arith.constant 0 : index
    %9 = vector.load %arg4[%c0_6, %c0_7] : memref<88x128xbf16, #tpu.memory_space<vmem>>, vector<88x128xbf16>
    tpu.vector_store %arg4[%c0_6, %c0_7], %8 {strides = array<i32>} : memref<88x128xbf16, #tpu.memory_space<vmem>>, vector<88x128xbf16>,
    return
  }
  func.func @transform_0(%arg0: i32) -> (i32, i32) {
    %c0_i32 = arith.constant 0 : i32
    %c0_i32_0 = arith.constant 0 : i32
    return %arg0, %c0_i32 : i32, i32
  }
  func.func @transform_1(%arg0: i32) -> (i32, i32) {
    %c0_i32 = arith.constant 0 : i32
    %c0_i32_0 = arith.constant 0 : i32
    %c0_i32_1 = arith.constant 0 : i32
    return %c0_i32, %c0_i32_0 : i32, i32
  }
  func.func @transform_2(%arg0: i32) -> (i32, i32) {
    %c0_i32 = arith.constant 0 : i32
    %c0_i32_0 = arith.constant 0 : i32
    %c0_i32_1 = arith.constant 0 : i32
    return %c0_i32, %c0_i32_0 : i32, i32
  }
  func.func @transform_3(%arg0: i32) -> (i32, i32) {
    %c0_i32 = arith.constant 0 : i32
    %c0_i32_0 = arith.constant 0 : i32
    return %arg0, %c0_i32 : i32, i32
  }
}

module attributes {stable_mosaic.version = 11 : i64} {
  func.func @_matmul_bias_act_kernel(%arg0: i32, %arg1: memref<56x1152xbf16, #tpu.memory_space<vmem>>, %arg2: memref<1152x128xbf16, #tpu.memory_space<vmem>>, %arg3: memref<1x128xf32, #tpu.memory_space<vmem>>, %arg4: memref<56x128xbf16, #tpu.memory_space<vmem>>) attributes {dimension_semantics = [#tpu.dimension_semantics<parallel>], iteration_bounds = array<i64: 1>, scalar_prefetch = 0 : i64, scratch_operands = 0 : i64, tpu.core_type = #tpu.core_type<tc>, window_params = [{transform_indices = @transform_0, window_bounds = array<i64: 56, 1152>}, {pipeline_mode = #tpu.pipeline_mode<synchronous>, transform_indices = @transform_1, window_bounds = array<i64: 1152, 128>}, {pipeline_mode = #tpu.pipeline_mode<synchronous>, transform_indices = @transform_2, window_bounds = array<i64: 1, 128>}, {transform_indices = @transform_3, window_bounds = array<i64: 56, 128>}]} {
    %c0 = arith.constant 0 : index
    %c0_0 = arith.constant 0 : index
    %0 = vector.load %arg1[%c0, %c0_0] : memref<56x1152xbf16, #tpu.memory_space<vmem>>, vector<56x1152xbf16>
    %c0_1 = arith.constant 0 : index
    %c0_2 = arith.constant 0 : index
    %1 = vector.load %arg2[%c0_1, %c0_2] : memref<1152x128xbf16, #tpu.memory_space<vmem>>, vector<1152x128xbf16>
    %cst = arith.constant dense<0.000000e+00> : vector<56x128xf32>
    %2 = tpu.matmul %0, %1, %cst {dimension_numbers = #tpu.dot_dimension_numbers<[1], [0], [0], [1], [0, 0, 1, 1], [], []>} : vector<56x1152xbf16>, vector<1152x128xbf16>, vector<56x128xf32> -> vector<56x128xf32>
    %c0_3 = arith.constant 0 : index
    %c0_4 = arith.constant 0 : index
    %3 = vector.load %arg3[%c0_3, %c0_4] : memref<1x128xf32, #tpu.memory_space<vmem>>, vector<1x128xf32>
    %4 = vector.broadcast %3 : vector<1x128xf32> to vector<56x128xf32>
    %5 = arith.addf %2, %4 : vector<56x128xf32>
    %cst_5 = arith.constant 0.000000e+00 : f32
    %6 = vector.broadcast %cst_5 : f32 to vector<56x128xf32>
    %7 = arith.maximumf %5, %6 : vector<56x128xf32>
    %8 = arith.truncf %7 : vector<56x128xf32> to vector<56x128xbf16>
    %c0_6 = arith.constant 0 : index
    %c0_7 = arith.constant 0 : index
    %9 = vector.load %arg4[%c0_6, %c0_7] : memref<56x128xbf16, #tpu.memory_space<vmem>>, vector<56x128xbf16>
    tpu.vector_store %arg4[%c0_6, %c0_7], %8 {strides = array<i32>} : memref<56x128xbf16, #tpu.memory_space<vmem>>, vector<56x128xbf16>,
    return
  }
  func.func @transform_0(%arg0: i32) -> (i32, i32) {
    %c0_i32 = arith.constant 0 : i32
    %c0_i32_0 = arith.constant 0 : i32
    return %arg0, %c0_i32 : i32, i32
  }
  func.func @transform_1(%arg0: i32) -> (i32, i32) {
    %c0_i32 = arith.constant 0 : i32
    %c0_i32_0 = arith.constant 0 : i32
    %c0_i32_1 = arith.constant 0 : i32
    return %c0_i32, %c0_i32_0 : i32, i32
  }
  func.func @transform_2(%arg0: i32) -> (i32, i32) {
    %c0_i32 = arith.constant 0 : i32
    %c0_i32_0 = arith.constant 0 : i32
    %c0_i32_1 = arith.constant 0 : i32
    return %c0_i32, %c0_i32_0 : i32, i32
  }
  func.func @transform_3(%arg0: i32) -> (i32, i32) {
    %c0_i32 = arith.constant 0 : i32
    %c0_i32_0 = arith.constant 0 : i32
    return %arg0, %c0_i32 : i32, i32
  }
}

module attributes {stable_mosaic.version = 11 : i64} {
  func.func @_fc_head_kernel(%arg0: i32, %arg1: memref<8x3136xbf16, #tpu.memory_space<vmem>>, %arg2: memref<3136x512xbf16, #tpu.memory_space<vmem>>, %arg3: memref<1x512xf32, #tpu.memory_space<vmem>>, %arg4: memref<1x512xf32, #tpu.memory_space<vmem>>, %arg5: memref<1x1xf32, #tpu.memory_space<vmem>>, %arg6: memref<8x1xf32, #tpu.memory_space<vmem>>) attributes {dimension_semantics = [#tpu.dimension_semantics<parallel>], iteration_bounds = array<i64: 1>, scalar_prefetch = 0 : i64, scratch_operands = 0 : i64, tpu.core_type = #tpu.core_type<tc>, window_params = [{transform_indices = @transform_0, window_bounds = array<i64: 8, 3136>}, {pipeline_mode = #tpu.pipeline_mode<synchronous>, transform_indices = @transform_1, window_bounds = array<i64: 3136, 512>}, {pipeline_mode = #tpu.pipeline_mode<synchronous>, transform_indices = @transform_2, window_bounds = array<i64: 1, 512>}, {pipeline_mode = #tpu.pipeline_mode<synchronous>, transform_indices = @transform_3, window_bounds = array<i64: 1, 512>}, {pipeline_mode = #tpu.pipeline_mode<synchronous>, transform_indices = @transform_4, window_bounds = array<i64: 1, 1>}, {transform_indices = @transform_5, window_bounds = array<i64: 8, 1>}]} {
    %c0 = arith.constant 0 : index
    %c0_0 = arith.constant 0 : index
    %0 = vector.load %arg1[%c0, %c0_0] : memref<8x3136xbf16, #tpu.memory_space<vmem>>, vector<8x3136xbf16>
    %c0_1 = arith.constant 0 : index
    %c0_2 = arith.constant 0 : index
    %1 = vector.load %arg2[%c0_1, %c0_2] : memref<3136x512xbf16, #tpu.memory_space<vmem>>, vector<3136x512xbf16>
    %cst = arith.constant dense<0.000000e+00> : vector<8x512xf32>
    %2 = tpu.matmul %0, %1, %cst {dimension_numbers = #tpu.dot_dimension_numbers<[1], [0], [0], [1], [0, 0, 1, 1], [], []>} : vector<8x3136xbf16>, vector<3136x512xbf16>, vector<8x512xf32> -> vector<8x512xf32>
    %c0_3 = arith.constant 0 : index
    %c0_4 = arith.constant 0 : index
    %3 = vector.load %arg3[%c0_3, %c0_4] : memref<1x512xf32, #tpu.memory_space<vmem>>, vector<1x512xf32>
    %4 = vector.broadcast %3 : vector<1x512xf32> to vector<8x512xf32>
    %5 = arith.addf %2, %4 : vector<8x512xf32>
    %cst_5 = arith.constant 0.000000e+00 : f32
    %6 = vector.broadcast %cst_5 : f32 to vector<8x512xf32>
    %7 = arith.maximumf %5, %6 : vector<8x512xf32>
    %c0_6 = arith.constant 0 : index
    %c0_7 = arith.constant 0 : index
    %8 = vector.load %arg4[%c0_6, %c0_7] : memref<1x512xf32, #tpu.memory_space<vmem>>, vector<1x512xf32>
    %9 = vector.broadcast %8 : vector<1x512xf32> to vector<8x512xf32>
    %10 = arith.mulf %7, %9 : vector<8x512xf32>
    %cst_8 = arith.constant dense<0.000000e+00> : vector<8xf32>
    %11 = vector.multi_reduction <add>, %10, %cst_8 [1] : vector<8x512xf32> to vector<8xf32>
    %12 = vector.shape_cast %11 : vector<8xf32> to vector<8x1xf32>
    %c0_9 = arith.constant 0 : index
    %c0_10 = arith.constant 0 : index
    %13 = vector.load %arg5[%c0_9, %c0_10] : memref<1x1xf32, #tpu.memory_space<vmem>>, vector<1x1xf32>
    %14 = vector.broadcast %13 : vector<1x1xf32> to vector<8x1xf32>
    %15 = arith.addf %12, %14 : vector<8x1xf32>
    %c0_11 = arith.constant 0 : index
    %c0_12 = arith.constant 0 : index
    %16 = vector.load %arg6[%c0_11, %c0_12] : memref<8x1xf32, #tpu.memory_space<vmem>>, vector<8x1xf32>
    tpu.vector_store %arg6[%c0_11, %c0_12], %15 {strides = array<i32>} : memref<8x1xf32, #tpu.memory_space<vmem>>, vector<8x1xf32>,
    return
  }
  func.func @transform_0(%arg0: i32) -> (i32, i32) {
    %c0_i32 = arith.constant 0 : i32
    %c0_i32_0 = arith.constant 0 : i32
    return %arg0, %c0_i32 : i32, i32
  }
  func.func @transform_1(%arg0: i32) -> (i32, i32) {
    %c0_i32 = arith.constant 0 : i32
    %c0_i32_0 = arith.constant 0 : i32
    %c0_i32_1 = arith.constant 0 : i32
    return %c0_i32, %c0_i32_0 : i32, i32
  }
  func.func @transform_2(%arg0: i32) -> (i32, i32) {
    %c0_i32 = arith.constant 0 : i32
    %c0_i32_0 = arith.constant 0 : i32
    %c0_i32_1 = arith.constant 0 : i32
    return %c0_i32, %c0_i32_0 : i32, i32
  }
  func.func @transform_3(%arg0: i32) -> (i32, i32) {
    %c0_i32 = arith.constant 0 : i32
    %c0_i32_0 = arith.constant 0 : i32
    %c0_i32_1 = arith.constant 0 : i32
    return %c0_i32, %c0_i32_0 : i32, i32
  }
  func.func @transform_4(%arg0: i32) -> (i32, i32) {
    %c0_i32 = arith.constant 0 : i32
    %c0_i32_0 = arith.constant 0 : i32
    %c0_i32_1 = arith.constant 0 : i32
    return %c0_i32, %c0_i32_0 : i32, i32
  }
  func.func @transform_5(%arg0: i32) -> (i32, i32) {
    %c0_i32 = arith.constant 0 : i32
    %c0_i32_0 = arith.constant 0 : i32
    return %arg0, %c0_i32 : i32, i32
  }
}

</mosaic_0001>

<bundles_post_ra>
// kernel: critic_forward.4
= control target key start
LH: loop header
LB: loop body
LE: loop exit
PB: predicated region body
PF: predicated region fallthrough
CT: control target
= control target key end

     0   :  { %s6205_s1 = inlined_call_operand.vmem [shape: bf16[2048,128], index: 1, kind: input, shape index: {}]   ;;  %s6206_s0 = inlined_call_operand.vmem [shape: bf16[200,2048], index: 0, kind: input, shape index: {}]   ;;  %s6207_s2 = inlined_call_operand.vmem [shape: f32[1,128], index: 2, kind: input, shape index: {}]   ;;  %s6208_s3 = inlined_call_operand.vmem [shape: bf16[200,128], index: 3, kind: output, shape index: {}]  }
   0x1   :  { %v4715_v0 = vld [vmem:[%s6205_s1 + $0x40] sm:$0xff]   ;;  %v4719_v4 = vld [vmem:[%s6205_s1 + $0x48] sm:$0xff]   ;;  %v4723_v8 = vld [vmem:[%s6205_s1 + $0x50] sm:$0xff]  }
   0x2   :  { %v4716_v1 = vld [vmem:[%s6205_s1 + $0xc0] sm:$0xff]   ;;  %3963 = vmatprep.subr.bf16.mxu0 %v4715_v0  ;;  %v4720_v5 = vld [vmem:[%s6205_s1 + $0xc8] sm:$0xff]   ;;  %v4724_v9 = vld [vmem:[%s6205_s1 + $0xd0] sm:$0xff]  }
   0x3   :  { %v4717_v2 = vld [vmem:[%s6205_s1] sm:$0xff]   ;;  %4057 = vmatprep.subr.bf16.mxu1 %v4716_v1  ;;  %v4721_v6 = vld [vmem:[%s6205_s1 + $0x8] sm:$0xff]   ;;  %v4725_v10 = vld [vmem:[%s6205_s1 + $0x10] sm:$0xff]  }
   0x4   :  { %v4718_v3 = vld [vmem:[%s6205_s1 + $0x80] sm:$0xff]   ;;  %3964 = vmatpush3.bf16.msra.mxu0 %v4717_v2  ;;  %v4722_v7 = vld [vmem:[%s6205_s1 + $0x88] sm:$0xff]   ;;  %v4726_v11 = vld [vmem:[%s6205_s1 + $0x90] sm:$0xff]  }
   0x5   :  { %4058 = vmatpush3.bf16.msra.mxu1 %v4718_v3  ;;  %3965 = vmatprep.subr.bf16.mxu0 %v4719_v4  ;;  %v4727_v12 = vld [vmem:[%s6205_s1 + $0x58] sm:$0xff]   ;;  %v4731_v16 = vld [vmem:[%s6205_s1 + $0x60] sm:$0xff]   ;;  %v4735_v20 = vld [vmem:[%s6205_s1 + $0x68] sm:$0xff]  }
   0x6   :  { %4059 = vmatprep.subr.bf16.mxu1 %v4720_v5  ;;  %v4728_v13 = vld [vmem:[%s6205_s1 + $0xd8] sm:$0xff]   ;;  %v4732_v17 = vld [vmem:[%s6205_s1 + $0xe0] sm:$0xff]   ;;  %v4736_v21 = vld [vmem:[%s6205_s1 + $0xe8] sm:$0xff]  }
   0x7   :  { %v4729_v14 = vld [vmem:[%s6205_s1 + $0x18] sm:$0xff]   ;;  %v4733_v18 = vld [vmem:[%s6205_s1 + $0x20] sm:$0xff]   ;;  %v4737_v22 = vld [vmem:[%s6205_s1 + $0x28] sm:$0xff]  }
   0x8   :  { %3966 = vmatpush3.bf16.msra.mxu0 %v4721_v6  ;;  %v4730_v15 = vld [vmem:[%s6205_s1 + $0x98] sm:$0xff]   ;;  %v4734_v19 = vld [vmem:[%s6205_s1 + $0xa0] sm:$0xff]   ;;  %v4738_v23 = vld [vmem:[%s6205_s1 + $0xa8] sm:$0xff]  }
   0x9   :  { %4060 = vmatpush3.bf16.msra.mxu1 %v4722_v7  ;;  %3967 = vmatprep.subr.bf16.mxu0 %v4723_v8  ;;  %v4739_v24 = vld [vmem:[%s6205_s1 + $0x70] sm:$0xff]   ;;  %v4743_v28 = vld [vmem:[%s6205_s1 + $0x78] sm:$0xff]   ;;  %v15_v32 = vld [vmem:[%s6206_s0] sm:$0xff] }
   0xa   :  { %4061 = vmatprep.subr.bf16.mxu1 %v4724_v9  ;;  %v4740_v25 = vld [vmem:[%s6205_s1 + $0xf0] sm:$0xff]   ;;  %v4744_v29 = vld [vmem:[%s6205_s1 + $0xf8] sm:$0xff]   ;;  %v23_v33 = vld [vmem:[%s6206_s0 + $0x40] sm:$0xff] }
   0xb   :  { %v4741_v26 = vld [vmem:[%s6205_s1 + $0x30] sm:$0xff]   ;;  %v4745_v30 = vld [vmem:[%s6205_s1 + $0x38] sm:$0xff]   ;;  %v16_v34 = vld [vmem:[%s6206_s0 + $0x8] sm:$0xff]  ;;  %v3506_v35 = vcombine.low %v15_v32, %v23_v33  ;;  %v3507_v36 = vcombine.high %v15_v32, %v23_v33 }
   0xc   :  { %3968 = vmatpush3.bf16.msra.mxu0 %v4725_v10  ;;  %v4742_v27 = vld [vmem:[%s6205_s1 + $0xb0] sm:$0xff]   ;;  %v4746_v31 = vld [vmem:[%s6205_s1 + $0xb8] sm:$0xff]   ;;  %v24_v37 = vld [vmem:[%s6206_s0 + $0x48] sm:$0xff] }
   0xd   :  { %4062 = vmatpush3.bf16.msra.mxu1 %v4726_v11  ;;  %3969 = vmatprep.subr.bf16.mxu0 %v4727_v12  ;;  %v3508_v38 = vcombine.low %v16_v34, %v24_v37  ;;  %v3509_v39 = vcombine.high %v16_v34, %v24_v37  ;;  %v4747_v40 = vld [vmem:[%s6205_s1 + $0x140] sm:$0xff]   ;;  %v32_v47 = vld [vmem:[%s6206_s0 + $0x88] sm:$0xff]  ;;  %v4755_v2 = vld [vmem:[%s6205_s1 + $0x150] sm:$0xff]  }
   0xe   :  { %4063 = vmatprep.subr.bf16.mxu1 %v4728_v13  ;;  %2294 = vmatprep.mubr.bf16.mxu0 %v3507_v36  ;;  %v4748_v41 = vld [vmem:[%s6205_s1 + $0x100] sm:$0xff]   ;;  %v40_v48 = vld [vmem:[%s6206_s0 + $0xc8] sm:$0xff]  ;;  %v4756_v3 = vld [vmem:[%s6205_s1 + $0x110] sm:$0xff]  }
   0xf   :  { %2430 = vmatprep.mubr.bf16.mxu1 %v3509_v39  ;;  %v4749_v42 = vld [vmem:[%s6205_s1 + $0x1c0] sm:$0xff]   ;;  %v3525_v49 = vcombine.high %v32_v47, %v40_v48  ;;  %v4751_v50 = vld [vmem:[%s6205_s1 + $0x148] sm:$0xff]   ;;  %v3524_v54 = vcombine.low %v32_v47, %v40_v48  ;;  %v4757_v5 = vld [vmem:[%s6205_s1 + $0x1d0] sm:$0xff]  }
  0x10   :  { %3970 = vmatpush3.bf16.msra.mxu0 %v4729_v14  ;;  %v4750_v43 = vld [vmem:[%s6205_s1 + $0x180] sm:$0xff]   ;;  %v4752_v52 = vld [vmem:[%s6205_s1 + $0x108] sm:$0xff]   ;;  %v4758_v8 = vld [vmem:[%s6205_s1 + $0x190] sm:$0xff]  }
  0x11   :  { %4064 = vmatpush3.bf16.msra.mxu1 %v4730_v15  ;;  %3971 = vmatprep.subr.bf16.mxu0 %v4731_v16  ;;  %v31_v44 = vld [vmem:[%s6206_s0 + $0x80] sm:$0xff]  ;;  %v48_v56 = vld [vmem:[%s6206_s0 + $0x108] sm:$0xff]  ;;  %v4759_v12 = vld [vmem:[%s6205_s1 + $0x158] sm:$0xff]  }
  0x12   :  { %4065 = vmatprep.subr.bf16.mxu1 %v4732_v17  ;;  %v39_v45 = vld [vmem:[%s6206_s0 + $0xc0] sm:$0xff]  ;;  %v56_v57 = vld [vmem:[%s6206_s0 + $0x148] sm:$0xff]  ;;  %v4760_v15 = vld [vmem:[%s6205_s1 + $0x118] sm:$0xff]  }
  0x13   :  { %v3523_v46 = vcombine.high %v31_v44, %v39_v45  ;;  %v3522_v51 = vcombine.low %v31_v44, %v39_v45  ;;  %v47_v53 = vld [vmem:[%s6206_s0 + $0x100] sm:$0xff]  ;;  %v3541_v59 = vcombine.high %v48_v56, %v56_v57  ;;  %v4753_v60 = vld [vmem:[%s6205_s1 + $0x1c8] sm:$0xff]   ;;  %v3540_v6 = vcombine.low %v48_v56, %v56_v57  ;;  %v4761_v16 = vld [vmem:[%s6205_s1 + $0x1d8] sm:$0xff]  }
  0x14   :  { %3972 = vmatpush3.bf16.msra.mxu0 %v4733_v18  ;;  %v55_v55 = vld [vmem:[%s6206_s0 + $0x140] sm:$0xff]  ;;  %v4754_v61 = vld [vmem:[%s6205_s1 + $0x188] sm:$0xff]   ;;  %v4762_v17 = vld [vmem:[%s6205_s1 + $0x198] sm:$0xff]  }
  0x15   :  { %4066 = vmatpush3.bf16.msra.mxu1 %v4734_v19  ;;  %3973 = vmatprep.subr.bf16.mxu0 %v4735_v20  ;;  %v3539_v58 = vcombine.high %v47_v53, %v55_v55  ;;  %v63_v62 = vld [vmem:[%s6206_s0 + $0x180] sm:$0xff]  ;;  %v64_v0 = vld [vmem:[%s6206_s0 + $0x188] sm:$0xff]  ;;  %v3538_v4 = vcombine.low %v47_v53, %v55_v55  ;;  %v4772_v44 = vld [vmem:[%s6205_s1 + $0x130] sm:$0xff]  }
  0x16   :  { %4067 = vmatprep.subr.bf16.mxu1 %v4736_v21  ;;  %v71_v63 = vld [vmem:[%s6206_s0 + $0x1c0] sm:$0xff]  ;;  %v72_v1 = vld [vmem:[%s6206_s0 + $0x1c8] sm:$0xff]  ;;  %v4773_v47 = vld [vmem:[%s6205_s1 + $0x1f0] sm:$0xff]  }
  0x17   :  { %v3555_v7 = vcombine.high %v63_v62, %v71_v63  ;;  %v3557_v9 = vcombine.high %v64_v0, %v72_v1  ;;  %v79_v10 = vld [vmem:[%s6206_s0 + $0x200] sm:$0xff]  ;;  %v80_v13 = vld [vmem:[%s6206_s0 + $0x208] sm:$0xff]  ;;  %v3554_v18 = vcombine.low %v63_v62, %v71_v63  ;;  %v3556_v19 = vcombine.low %v64_v0, %v72_v1  ;;  %v4776_v55 = vld [vmem:[%s6205_s1 + $0x138] sm:$0xff]  }
  0x18   :  { %3974 = vmatpush3.bf16.msra.mxu0 %v4737_v22  ;;  %v87_v11 = vld [vmem:[%s6206_s0 + $0x240] sm:$0xff]  ;;  %v88_v14 = vld [vmem:[%s6206_s0 + $0x248] sm:$0xff]  ;;  %v4777_v56 = vld [vmem:[%s6205_s1 + $0x1f8] sm:$0xff]  }
  0x19   :  { %4068 = vmatpush3.bf16.msra.mxu1 %v4738_v23  ;;  %3975 = vmatprep.subr.bf16.mxu0 %v4739_v24  ;;  %v3571_v20 = vcombine.high %v79_v10, %v87_v11  ;;  %v3573_v21 = vcombine.high %v80_v13, %v88_v14  ;;  %v4763_v22 = vld [vmem:[%s6205_s1 + $0x160] sm:$0xff]   ;;  %v3572_v32 = vcombine.low %v80_v13, %v88_v14  ;;  %v4768_v34 = vld [vmem:[%s6205_s1 + $0x128] sm:$0xff]   ;;  %v4778_v57 = vld [vmem:[%s6205_s1 + $0x1b8] sm:$0xff]  }
  0x1a   :  { %4069 = vmatprep.subr.bf16.mxu1 %v4740_v25  ;;  %v4764_v23 = vld [vmem:[%s6205_s1 + $0x120] sm:$0xff]   ;;  %v4769_v36 = vld [vmem:[%s6205_s1 + $0x1e8] sm:$0xff]  }
  0x1b   :  { %v4765_v24 = vld [vmem:[%s6205_s1 + $0x1e0] sm:$0xff]   ;;  %v4770_v37 = vld [vmem:[%s6205_s1 + $0x1a8] sm:$0xff]  }
  0x1c   :  { %3976 = vmatpush3.bf16.msra.mxu0 %v4741_v26  ;;  %v95_v25 = vld [vmem:[%s6206_s0 + $0x280] sm:$0xff]  ;;  %v128_v53 = vld [vmem:[%s6206_s0 + $0x388] sm:$0xff] }
  0x1d   :  { %4070 = vmatpush3.bf16.msra.mxu1 %v4742_v27  ;;  %3977 = vmatprep.subr.bf16.mxu0 %v4743_v28  ;;  %v103_v26 = vld [vmem:[%s6206_s0 + $0x2c0] sm:$0xff]  ;;  %v96_v28 = vld [vmem:[%s6206_s0 + $0x288] sm:$0xff] }
  0x1e   :  { %4071 = vmatprep.subr.bf16.mxu1 %v4744_v29  ;;  %v4766_v27 = vld [vmem:[%s6205_s1 + $0x1a0] sm:$0xff]   ;;  %v104_v29 = vld [vmem:[%s6206_s0 + $0x2c8] sm:$0xff]  ;;  %v3587_v33 = vcombine.high %v95_v25, %v103_v26 }
  0x1f   :  { %v119_v39 = vld [vmem:[%s6206_s0 + $0x340] sm:$0xff]  ;;  %v3588_v45 = vcombine.low %v96_v28, %v104_v29 }
  0x20   :  { %3978 = vmatpush3.bf16.msra.mxu0 %v4745_v30  ;;  %v3570_v30 = vcombine.low %v79_v10, %v87_v11  ;;  %v4783_v62 = vld [vmem:[%s6205_s1 + $0x240] sm:$0xff]   ;;  %v160_v10 = vld [vmem:[%s6206_s0 + $0x488] sm:$0xff] }
  0x21   :  { %4072 = vmatpush3.bf16.msra.mxu1 %v4746_v31  ;;  %4151 = vmatprep.subr.bf16.mxu0 %v4747_v40  ;;  %v4767_v31 = vld [vmem:[%s6205_s1 + $0x168] sm:$0xff]   ;;  %v4771_v40 = vld [vmem:[%s6205_s1 + $0x170] sm:$0xff]   ;;  %v4785_v63 = vld [vmem:[%s6205_s1 + $0x2c0] sm:$0xff]  }
  0x22   :  { %4245 = vmatprep.subr.bf16.mxu1 %v4749_v42  ;;  %v120_v42 = vld [vmem:[%s6206_s0 + $0x348] sm:$0xff]  ;;  %v143_v0 = vld [vmem:[%s6206_s0 + $0x400] sm:$0xff] }
  0x23   :  { %2295 = vmatmul.mubr.bf16.vlgmr.msra.gmra.mrb[0].mxu0 %v3506_v35  ;;  %v3589_v35 = vcombine.high %v96_v28, %v104_v29  ;;  %v151_v1 = vld [vmem:[%s6206_s0 + $0x440] sm:$0xff]  ;;  %v168_v11 = vld [vmem:[%s6206_s0 + $0x4c8] sm:$0xff] }
  0x24   :  { %2431 = vmatmul.mubr.bf16.vlgmr.msra.gmra.mrb[0].mxu1 %v3508_v38  ;;  %4152 = vmatpush3.bf16.msra.mxu0 %v4748_v41  ;;  %v111_v38 = vld [vmem:[%s6206_s0 + $0x300] sm:$0xff]  ;;  %v112_v41 = vld [vmem:[%s6206_s0 + $0x308] sm:$0xff] }
  0x25   :  { %4246 = vmatpush3.bf16.msra.mxu1 %v4750_v43  ;;  %2302 = vmatprep.mubr.bf16.mxu0 %v3523_v46  ;;  %v3586_v43 = vcombine.low %v95_v25, %v103_v26  ;;  %v3603_v46 = vcombine.high %v111_v38, %v119_v39  ;;  %v3605_v48 = vcombine.high %v112_v41, %v120_v42  ;;  %v199_v25 = vld [vmem:[%s6206_s0 + $0x5c0] sm:$0xff]  ;;  %v192_v26 = vld [vmem:[%s6206_s0 + $0x588] sm:$0xff] }
  0x26   :  { %2438 = vmatprep.mubr.bf16.mxu1 %v3525_v49  ;;  %4153 = vmatprep.subr.bf16.mxu0 %v4751_v50  ;;  %v4774_v49 = vld [vmem:[%s6205_s1 + $0x1b0] sm:$0xff]   ;;  %v127_v50 = vld [vmem:[%s6206_s0 + $0x380] sm:$0xff] }
  0x27   :  { %4247 = vmatprep.subr.bf16.mxu1 %v4753_v60 }
  0x28   :  { %4154 = vmatpush3.bf16.msra.mxu0 %v4752_v52  ;;  %v4775_v52 = vld [vmem:[%s6205_s1 + $0x178] sm:$0xff]  }
  0x29   :  { %4248 = vmatpush3.bf16.msra.mxu1 %v4754_v61  ;;  %4155 = vmatprep.subr.bf16.mxu0 %v4755_v2  ;;  %v144_v2 = vld [vmem:[%s6206_s0 + $0x408] sm:$0xff] }
  0x2a   :  { %4249 = vmatprep.subr.bf16.mxu1 %v4757_v5 }
  0x2b   :  { %2303 = vmatmul.mubr.bf16.gmra.mrb[4].mxu0 %v3522_v51  ;;  %v135_v51 = vld [vmem:[%s6206_s0 + $0x3c0] sm:$0xff] }
  0x2c   :  { %2439 = vmatmul.mubr.bf16.gmra.mrb[4].mxu1 %v3524_v54  ;;  %2310 = vmatprep.mubr.bf16.mxu0 %v3539_v58  ;;  %v136_v54 = vld [vmem:[%s6206_s0 + $0x3c8] sm:$0xff]  ;;  %v3602_v58 = vcombine.low %v111_v38, %v119_v39  ;;  %v3619_v60 = vcombine.high %v127_v50, %v135_v51  ;;  %v17_v38 = vld [vmem:[%s6206_s0 + $0x10] sm:$0xff] }
  0x2d   :  { %2446 = vmatprep.mubr.bf16.mxu1 %v3541_v59  ;;  %4156 = vmatpush3.bf16.msra.mxu0 %v4756_v3  ;;  %v3604_v59 = vcombine.low %v112_v41, %v120_v42  ;;  %v3621_v61 = vcombine.high %v128_v53, %v136_v54  ;;  %v152_v3 = vld [vmem:[%s6206_s0 + $0x448] sm:$0xff]  ;;  %v3620_v5 = vcombine.low %v128_v53, %v136_v54  ;;  %v25_v39 = vld [vmem:[%s6206_s0 + $0x50] sm:$0xff]  ;;  %v26_v41 = vld [vmem:[%s6206_s0 + $0x58] sm:$0xff] }
  0x2e   :  { %4250 = vmatpush3.bf16.msra.mxu1 %v4758_v8  ;;  %4157 = vmatprep.subr.bf16.mxu0 %v4759_v12  ;;  %v159_v8 = vld [vmem:[%s6206_s0 + $0x480] sm:$0xff]  ;;  %v3634_v12 = vcombine.low %v143_v0, %v151_v1  ;;  %v3636_v13 = vcombine.low %v144_v2, %v152_v3 }
  0x2f   :  { %4251 = vmatprep.subr.bf16.mxu1 %v4761_v16  ;;  %v175_v16 = vld [vmem:[%s6206_s0 + $0x500] sm:$0xff] }
  0x30   :  { %v4786_v53 = vld [vmem:[%s6205_s1 + $0x280] sm:$0xff]  }
  0x31   :  { %4158 = vmatpush3.bf16.msra.mxu0 %v4760_v15  ;;  %v3653_v15 = vcombine.high %v160_v10, %v168_v11 }
  0x32   :  { %4252 = vmatpush3.bf16.msra.mxu1 %v4762_v17  ;;  %4159 = vmatprep.subr.bf16.mxu0 %v4763_v22  ;;  %v183_v17 = vld [vmem:[%s6206_s0 + $0x540] sm:$0xff] }
  0x33   :  { %2311 = vmatmul.mubr.bf16.gmra.mrb[8].mxu0 %v3538_v4  ;;  %4253 = vmatprep.subr.bf16.mxu1 %v4765_v24  ;;  %v3618_v4 = vcombine.low %v127_v50, %v135_v51  ;;  %v3667_v22 = vcombine.high %v175_v16, %v183_v17  ;;  %v191_v24 = vld [vmem:[%s6206_s0 + $0x580] sm:$0xff]  ;;  %v3666_v28 = vcombine.low %v175_v16, %v183_v17  ;;  %v42_v50 = vld [vmem:[%s6206_s0 + $0xd8] sm:$0xff] }
  0x34   :  { %2447 = vmatmul.mubr.bf16.gmra.mrb[8].mxu1 %v3540_v6  ;;  %2318 = vmatprep.mubr.bf16.mxu0 %v3555_v7  ;;  %v3635_v6 = vcombine.high %v143_v0, %v151_v1  ;;  %v3637_v7 = vcombine.high %v144_v2, %v152_v3  ;;  %v4791_v0 = vld [vmem:[%s6205_s1 + $0x250] sm:$0xff]   ;;  %v4799_v16 = vld [vmem:[%s6205_s1 + $0x260] sm:$0xff]  }
  0x35   :  { %2454 = vmatprep.mubr.bf16.mxu1 %v3557_v9  ;;  %4160 = vmatpush3.bf16.msra.mxu0 %v4764_v23  ;;  %v167_v9 = vld [vmem:[%s6206_s0 + $0x4c0] sm:$0xff]  ;;  %v4793_v1 = vld [vmem:[%s6205_s1 + $0x2d0] sm:$0xff]  }
  0x36   :  { %4254 = vmatpush3.bf16.msra.mxu1 %v4766_v27  ;;  %4161 = vmatprep.subr.bf16.mxu0 %v4767_v31  ;;  %v3651_v14 = vcombine.high %v159_v8, %v167_v9  ;;  %v200_v27 = vld [vmem:[%s6206_s0 + $0x5c8] sm:$0xff]  ;;  %v4801_v17 = vld [vmem:[%s6205_s1 + $0x2e0] sm:$0xff]  }
  0x37   :  { %4255 = vmatprep.subr.bf16.mxu1 %v4769_v36  ;;  %v3685_v31 = vcombine.high %v192_v26, %v200_v27 }
  0x39   :  { %4162 = vmatpush3.bf16.msra.mxu0 %v4768_v34  ;;  %v3682_v34 = vcombine.low %v191_v24, %v199_v25 }
  0x3a   :  { %4256 = vmatpush3.bf16.msra.mxu1 %v4770_v37  ;;  %4163 = vmatprep.subr.bf16.mxu0 %v4771_v40  ;;  %v18_v40 = vld [vmem:[%s6206_s0 + $0x18] sm:$0xff] }
  0x3b   :  { %2319 = vmatmul.mubr.bf16.gmra.mrb[12].mxu0 %v3554_v18  ;;  %4257 = vmatprep.subr.bf16.mxu1 %v4773_v47  ;;  %v176_v18 = vld [vmem:[%s6206_s0 + $0x508] sm:$0xff]  ;;  %v41_v47 = vld [vmem:[%s6206_s0 + $0xd0] sm:$0xff]  ;;  %v3512_v51 = vcombine.low %v18_v40, %v26_v41 }
  0x3c   :  { %2455 = vmatmul.mubr.bf16.gmra.mrb[12].mxu1 %v3556_v19  ;;  %2326 = vmatprep.mubr.bf16.mxu0 %v3571_v20  ;;  %v184_v19 = vld [vmem:[%s6206_s0 + $0x548] sm:$0xff]  ;;  %v3650_v20 = vcombine.low %v159_v8, %v167_v9  ;;  %v4795_v8 = vld [vmem:[%s6205_s1 + $0x258] sm:$0xff]  }
  0x3d   :  { %2462 = vmatprep.mubr.bf16.mxu1 %v3573_v21  ;;  %4164 = vmatpush3.bf16.msra.mxu0 %v4772_v44  ;;  %v3652_v21 = vcombine.low %v160_v10, %v168_v11  ;;  %v3669_v23 = vcombine.high %v176_v18, %v184_v19  ;;  %v3668_v29 = vcombine.low %v176_v18, %v184_v19  ;;  %v4797_v9 = vld [vmem:[%s6205_s1 + $0x2d8] sm:$0xff]   ;;  %v65_v10 = vld [vmem:[%s6206_s0 + $0x190] sm:$0xff] }
  0x3e   :  { %4258 = vmatpush3.bf16.msra.mxu1 %v4774_v49  ;;  %4165 = vmatprep.subr.bf16.mxu0 %v4775_v52  ;;  %v3511_v44 = vcombine.high %v17_v38, %v25_v39  ;;  %v3510_v49 = vcombine.low %v17_v38, %v25_v39  ;;  %v4784_v52 = vld [vmem:[%s6205_s1 + $0x200] sm:$0xff]   ;;  %v73_v11 = vld [vmem:[%s6206_s0 + $0x1d0] sm:$0xff]  ;;  %v4811_v39 = vld [vmem:[%s6205_s1 + $0x278] sm:$0xff]  }
  0x3f   :  { %4259 = vmatprep.subr.bf16.mxu1 %v4777_v56  ;;  %v4787_v56 = vld [vmem:[%s6205_s1 + $0x248] sm:$0xff]   ;;  %v4810_v38 = vld [vmem:[%s6205_s1 + $0x2b0] sm:$0xff]  }
  0x41   :  { %4166 = vmatpush3.bf16.msra.mxu0 %v4776_v55 }
  0x42   :  { %4260 = vmatpush3.bf16.msra.mxu1 %v4778_v57  ;;  %4339 = vmatprep.subr.bf16.mxu0 %v4783_v62  ;;  %v4788_v57 = vld [vmem:[%s6205_s1 + $0x208] sm:$0xff]   ;;  %v58_v62 = vld [vmem:[%s6206_s0 + $0x158] sm:$0xff] }
  0x43   :  { %2327 = vmatmul.mubr.bf16.gmra.mrb[16].mxu0 %v3570_v30  ;;  %4433 = vmatprep.subr.bf16.mxu1 %v4785_v63  ;;  %v3683_v30 = vcombine.high %v191_v24, %v199_v25  ;;  %v4790_v63 = vld [vmem:[%s6205_s1 + $0x288] sm:$0xff]  }
  0x44   :  { %2463 = vmatmul.mubr.bf16.gmra.mrb[16].mxu1 %v3572_v32  ;;  %2334 = vmatprep.mubr.bf16.mxu0 %v3587_v33  ;;  %v207_v32 = vld [vmem:[%s6206_s0 + $0x600] sm:$0xff]  ;;  %v208_v33 = vld [vmem:[%s6206_s0 + $0x608] sm:$0xff] }
  0x45   :  { %2470 = vmatprep.mubr.bf16.mxu1 %v3589_v35  ;;  %v3684_v35 = vcombine.low %v192_v26, %v200_v27  ;;  %v3699_v36 = vcombine.high %v207_v32, %v207_v32  ;;  %v3701_v37 = vcombine.high %v208_v33, %v208_v33  ;;  %v3698_v42 = vcombine.low %v207_v32, %v207_v32  ;;  %v4805_v25 = vld [vmem:[%s6205_s1 + $0x2e8] sm:$0xff]   ;;  %v81_v26 = vld [vmem:[%s6206_s0 + $0x210] sm:$0xff] }
  0x46   :  { %v89_v27 = vld [vmem:[%s6206_s0 + $0x250] sm:$0xff] }
  0x47   :  { %v4807_v32 = vld [vmem:[%s6205_s1 + $0x270] sm:$0xff]  }
  0x4b   :  { %2335 = vmatmul.mubr.bf16.gmra.mrb[20].mxu0 %v3586_v43  ;;  %v3700_v43 = vcombine.low %v208_v33, %v208_v33  ;;  %v3558_v33 = vcombine.low %v65_v10, %v73_v11 }
  0x4c   :  { %2471 = vmatmul.mubr.bf16.gmra.mrb[20].mxu1 %v3588_v45  ;;  %2342 = vmatprep.mubr.bf16.mxu0 %v3603_v46  ;;  %v3513_v45 = vcombine.high %v18_v40, %v26_v41  ;;  %v33_v46 = vld [vmem:[%s6206_s0 + $0x90] sm:$0xff]  ;;  %v4813_v41 = vld [vmem:[%s6205_s1 + $0x2f8] sm:$0xff]  }
  0x4d   :  { %2478 = vmatprep.mubr.bf16.mxu1 %v3605_v48  ;;  %v34_v48 = vld [vmem:[%s6206_s0 + $0x98] sm:$0xff]  ;;  %v3527_v54 = vcombine.high %v33_v46, %v41_v47  ;;  %v3526_v2 = vcombine.low %v33_v46, %v41_v47 }
  0x4e   :  { %v3529_v55 = vcombine.high %v34_v48, %v42_v50  ;;  %v3528_v3 = vcombine.low %v34_v48, %v42_v50  ;;  %v106_v46 = vld [vmem:[%s6206_s0 + $0x2d8] sm:$0xff]  ;;  %v4819_v48 = vld [vmem:[%s6205_s1 + $0x340] sm:$0xff]  }
  0x4f   :  { %v4814_v47 = vld [vmem:[%s6205_s1 + $0x2b8] sm:$0xff]   ;;  %v4821_v50 = vld [vmem:[%s6205_s1 + $0x3c0] sm:$0xff]  }
  0x53   :  { %2343 = vmatmul.mubr.bf16.gmra.mrb[24].mxu0 %v3602_v58  ;;  %v49_v58 = vld [vmem:[%s6206_s0 + $0x110] sm:$0xff] }
  0x54   :  { %2479 = vmatmul.mubr.bf16.gmra.mrb[24].mxu1 %v3604_v59  ;;  %2350 = vmatprep.mubr.bf16.mxu0 %v3619_v60  ;;  %v4789_v59 = vld [vmem:[%s6205_s1 + $0x2c8] sm:$0xff]   ;;  %v57_v60 = vld [vmem:[%s6206_s0 + $0x150] sm:$0xff] }
  0x55   :  { %2486 = vmatprep.mubr.bf16.mxu1 %v3621_v61  ;;  %v50_v61 = vld [vmem:[%s6206_s0 + $0x118] sm:$0xff]  ;;  %v3542_v18 = vcombine.low %v49_v58, %v57_v60 }
  0x56   :  { %v3544_v19 = vcombine.low %v50_v61, %v58_v62 }
  0x5b   :  { %2351 = vmatmul.mubr.bf16.gmra.mrb[28].mxu0 %v3618_v4  ;;  %v3543_v4 = vcombine.high %v49_v58, %v57_v60 }
  0x5c   :  { %2487 = vmatmul.mubr.bf16.gmra.mrb[28].mxu1 %v3620_v5  ;;  %2358 = vmatprep.mubr.bf16.mxu0 %v3635_v6  ;;  %v3545_v5 = vcombine.high %v50_v61, %v58_v62  ;;  %v4792_v6 = vld [vmem:[%s6205_s1 + $0x210] sm:$0xff]  }
  0x5d   :  { %2494 = vmatprep.mubr.bf16.mxu1 %v3637_v7  ;;  %v4794_v7 = vld [vmem:[%s6205_s1 + $0x290] sm:$0xff]  }
  0x5e   :  { %v129_v62 = vld [vmem:[%s6206_s0 + $0x390] sm:$0xff] }
  0x63   :  { %2359 = vmatmul.mubr.bf16.gmra.mrb[32].mxu0 %v3634_v12  ;;  %v4796_v12 = vld [vmem:[%s6205_s1 + $0x218] sm:$0xff]  }
  0x64   :  { %2495 = vmatmul.mubr.bf16.gmra.mrb[32].mxu1 %v3636_v13  ;;  %2366 = vmatprep.mubr.bf16.mxu0 %v3651_v14  ;;  %v66_v13 = vld [vmem:[%s6206_s0 + $0x198] sm:$0xff] }
  0x65   :  { %2502 = vmatprep.mubr.bf16.mxu1 %v3653_v15  ;;  %v74_v14 = vld [vmem:[%s6206_s0 + $0x1d8] sm:$0xff] }
  0x66   :  { %v4798_v15 = vld [vmem:[%s6205_s1 + $0x298] sm:$0xff]   ;;  %v3561_v24 = vcombine.high %v66_v13, %v74_v14 }
  0x6b   :  { %2367 = vmatmul.mubr.bf16.gmra.mrb[36].mxu0 %v3650_v20  ;;  %v3559_v20 = vcombine.high %v65_v10, %v73_v11 }
  0x6c   :  { %2503 = vmatmul.mubr.bf16.gmra.mrb[36].mxu1 %v3652_v21  ;;  %2374 = vmatprep.mubr.bf16.mxu0 %v3667_v22  ;;  %v4800_v21 = vld [vmem:[%s6205_s1 + $0x220] sm:$0xff]  }
  0x6d   :  { %2510 = vmatprep.mubr.bf16.mxu1 %v3669_v23  ;;  %v4802_v22 = vld [vmem:[%s6205_s1 + $0x2a0] sm:$0xff]   ;;  %v4803_v23 = vld [vmem:[%s6205_s1 + $0x268] sm:$0xff]  }
  0x73   :  { %2375 = vmatmul.mubr.bf16.gmra.mrb[40].mxu0 %v3666_v28  ;;  %v4804_v28 = vld [vmem:[%s6205_s1 + $0x228] sm:$0xff]  }
  0x74   :  { %2511 = vmatmul.mubr.bf16.gmra.mrb[40].mxu1 %v3668_v29  ;;  %2382 = vmatprep.mubr.bf16.mxu0 %v3683_v30  ;;  %v82_v29 = vld [vmem:[%s6206_s0 + $0x218] sm:$0xff] }
  0x75   :  { %2518 = vmatprep.mubr.bf16.mxu1 %v3685_v31  ;;  %v90_v30 = vld [vmem:[%s6206_s0 + $0x258] sm:$0xff]  ;;  %v4806_v31 = vld [vmem:[%s6205_s1 + $0x2a8] sm:$0xff]  }
  0x76   :  { %v3577_v40 = vcombine.high %v82_v29, %v90_v30 }
  0x7b   :  { %2383 = vmatmul.mubr.bf16.gmra.mrb[44].mxu0 %v3682_v34  ;;  %v4809_v34 = vld [vmem:[%s6205_s1 + $0x2f0] sm:$0xff]  }
  0x7c   :  { %2519 = vmatmul.mubr.bf16.gmra.mrb[44].mxu1 %v3684_v35  ;;  %2390 = vmatprep.mubr.bf16.mxu0 %v3699_v36  ;;  %v3560_v35 = vcombine.low %v66_v13, %v74_v14  ;;  %v3575_v36 = vcombine.high %v81_v26, %v89_v27  ;;  %v161_v14 = vld [vmem:[%s6206_s0 + $0x490] sm:$0xff] }
  0x7d   :  { %2526 = vmatprep.mubr.bf16.mxu1 %v3701_v37  ;;  %v4808_v37 = vld [vmem:[%s6205_s1 + $0x230] sm:$0xff]  }
  0x83   :  { %2391 = vmatmul.mubr.bf16.gmra.mrb[48].mxu0 %v3698_v42  ;;  %v97_v42 = vld [vmem:[%s6206_s0 + $0x290] sm:$0xff] }
  0x84   :  { %2527 = vmatmul.mubr.bf16.gmra.mrb[48].mxu1 %v3700_v43  ;;  %2566 = vmatprep.mubr.bf16.mxu0 %v3511_v44  ;;  %v105_v43 = vld [vmem:[%s6206_s0 + $0x2d0] sm:$0xff]  ;;  %v98_v44 = vld [vmem:[%s6206_s0 + $0x298] sm:$0xff] }
  0x85   :  { %2702 = vmatprep.mubr.bf16.mxu1 %v3513_v45  ;;  %v4812_v45 = vld [vmem:[%s6205_s1 + $0x238] sm:$0xff]   ;;  %v3590_v58 = vcombine.low %v97_v42, %v105_v43 }
  0x8b   :  { %2567 = vmatmul.mubr.bf16.vlgmr.msra.gmra.mrb[52].mxu0 %v3510_v49  ;;  %v3574_v49 = vcombine.low %v81_v26, %v89_v27 }
  0x8c   :  { %2703 = vmatmul.mubr.bf16.vlgmr.msra.gmra.mrb[52].mxu1 %v3512_v51  ;;  %4340 = vmatpush3.bf16.msra.mxu0 %v4784_v52  ;;  %v3576_v51 = vcombine.low %v82_v29, %v90_v30  ;;  %v3591_v52 = vcombine.high %v97_v42, %v105_v43  ;;  %v193_v30 = vld [vmem:[%s6206_s0 + $0x590] sm:$0xff] }
  0x8d   :  { %4434 = vmatpush3.bf16.msra.mxu1 %v4786_v53  ;;  %2574 = vmatprep.mubr.bf16.mxu0 %v3527_v54  ;;  %v3593_v53 = vcombine.high %v98_v44, %v106_v46  ;;  %v113_v54 = vld [vmem:[%s6206_s0 + $0x310] sm:$0xff] }
  0x8e   :  { %2710 = vmatprep.mubr.bf16.mxu1 %v3529_v55  ;;  %4341 = vmatprep.subr.bf16.mxu0 %v4787_v56  ;;  %v121_v55 = vld [vmem:[%s6206_s0 + $0x350] sm:$0xff]  ;;  %v114_v56 = vld [vmem:[%s6206_s0 + $0x318] sm:$0xff] }
  0x8f   :  { %4435 = vmatprep.subr.bf16.mxu1 %v4789_v59  ;;  %v3592_v59 = vcombine.low %v98_v44, %v106_v46  ;;  %v3607_v60 = vcombine.high %v113_v54, %v121_v55  ;;  %v19_v44 = vld [vmem:[%s6206_s0 + $0x20] sm:$0xff]  ;;  %v20_v46 = vld [vmem:[%s6206_s0 + $0x28] sm:$0xff] }
  0x90   :  { %4342 = vmatpush3.bf16.msra.mxu0 %v4788_v57  ;;  %v122_v57 = vld [vmem:[%s6206_s0 + $0x358] sm:$0xff] }
  0x91   :  { %4436 = vmatpush3.bf16.msra.mxu1 %v4790_v63  ;;  %4343 = vmatprep.subr.bf16.mxu0 %v4791_v0  ;;  %v3609_v61 = vcombine.high %v114_v56, %v122_v57  ;;  %v137_v63 = vld [vmem:[%s6206_s0 + $0x3d0] sm:$0xff]  ;;  %v130_v0 = vld [vmem:[%s6206_s0 + $0x398] sm:$0xff] }
  0x92   :  { %4437 = vmatprep.subr.bf16.mxu1 %v4793_v1  ;;  %v138_v1 = vld [vmem:[%s6206_s0 + $0x3d8] sm:$0xff]  ;;  %v3622_v10 = vcombine.low %v129_v62, %v137_v63 }
  0x93   :  { %2575 = vmatmul.mubr.bf16.gmra.mrb[56].mxu0 %v3526_v2  ;;  %v3606_v2 = vcombine.low %v113_v54, %v121_v55  ;;  %v3624_v11 = vcombine.low %v130_v0, %v138_v1  ;;  %v36_v55 = vld [vmem:[%s6206_s0 + $0xa8] sm:$0xff] }
  0x94   :  { %2711 = vmatmul.mubr.bf16.gmra.mrb[56].mxu1 %v3528_v3  ;;  %2582 = vmatprep.mubr.bf16.mxu0 %v3543_v4  ;;  %v3608_v3 = vcombine.low %v114_v56, %v122_v57  ;;  %v3623_v4 = vcombine.high %v129_v62, %v137_v63  ;;  %v44_v56 = vld [vmem:[%s6206_s0 + $0xe8] sm:$0xff] }
  0x95   :  { %2718 = vmatprep.mubr.bf16.mxu1 %v3545_v5  ;;  %4344 = vmatpush3.bf16.msra.mxu0 %v4792_v6  ;;  %v3625_v5 = vcombine.high %v130_v0, %v138_v1  ;;  %v145_v6 = vld [vmem:[%s6206_s0 + $0x410] sm:$0xff]  ;;  %v4823_v62 = vld [vmem:[%s6205_s1 + $0x348] sm:$0xff]   ;;  %v5515_v1 = vld [vmem:[%s6206_s0 + $0x120] sm:$0xff] }
  0x96   :  { %4438 = vmatpush3.bf16.msra.mxu1 %v4794_v7  ;;  %4345 = vmatprep.subr.bf16.mxu0 %v4795_v8  ;;  %v153_v7 = vld [vmem:[%s6206_s0 + $0x450] sm:$0xff]  ;;  %v146_v8 = vld [vmem:[%s6206_s0 + $0x418] sm:$0xff]  ;;  %v4825_v63 = vld [vmem:[%s6205_s1 + $0x3c8] sm:$0xff]  }
  0x97   :  { %4439 = vmatprep.subr.bf16.mxu1 %v4797_v9  ;;  %v154_v9 = vld [vmem:[%s6206_s0 + $0x458] sm:$0xff]  ;;  %v4824_v0 = vld [vmem:[%s6205_s1 + $0x308] sm:$0xff]  }
  0x98   :  { %v3641_v13 = vcombine.high %v146_v8, %v154_v9 }
  0x99   :  { %4346 = vmatpush3.bf16.msra.mxu0 %v4796_v12  ;;  %v3639_v12 = vcombine.high %v145_v6, %v153_v7 }
  0x9a   :  { %4440 = vmatpush3.bf16.msra.mxu1 %v4798_v15  ;;  %4347 = vmatprep.subr.bf16.mxu0 %v4799_v16  ;;  %v169_v15 = vld [vmem:[%s6206_s0 + $0x4d0] sm:$0xff]  ;;  %v162_v16 = vld [vmem:[%s6206_s0 + $0x498] sm:$0xff] }
  0x9b   :  { %2583 = vmatmul.mubr.bf16.gmra.mrb[60].mxu0 %v3542_v18  ;;  %4441 = vmatprep.subr.bf16.mxu1 %v4801_v17  ;;  %v170_v17 = vld [vmem:[%s6206_s0 + $0x4d8] sm:$0xff]  ;;  %v3638_v18 = vcombine.low %v145_v6, %v153_v7  ;;  %v3654_v26 = vcombine.low %v161_v14, %v169_v15  ;;  %v5531_v6 = vld [vmem:[%s6206_s0 + $0x128] sm:$0xff] }
  0x9c   :  { %2719 = vmatmul.mubr.bf16.gmra.mrb[60].mxu1 %v3544_v19  ;;  %2590 = vmatprep.mubr.bf16.mxu0 %v3559_v20  ;;  %v3640_v19 = vcombine.low %v146_v8, %v154_v9  ;;  %v3655_v20 = vcombine.high %v161_v14, %v169_v15  ;;  %v3656_v27 = vcombine.low %v162_v16, %v170_v17  ;;  %v5536_v7 = vld [vmem:[%s6206_s0 + $0x168] sm:$0xff]  ;;  %v4829_v8 = vld [vmem:[%s6205_s1 + $0x3d0] sm:$0xff]  }
  0x9d   :  { %2726 = vmatprep.mubr.bf16.mxu1 %v3561_v24  ;;  %4348 = vmatpush3.bf16.msra.mxu0 %v4800_v21  ;;  %v3657_v21 = vcombine.high %v162_v16, %v170_v17  ;;  %v178_v24 = vld [vmem:[%s6206_s0 + $0x518] sm:$0xff]  ;;  %v3532_v16 = vcombine.low %v36_v55, %v44_v56 }
  0x9e   :  { %4442 = vmatpush3.bf16.msra.mxu1 %v4802_v22  ;;  %4349 = vmatprep.subr.bf16.mxu0 %v4803_v23  ;;  %v177_v22 = vld [vmem:[%s6206_s0 + $0x510] sm:$0xff] }
  0x9f   :  { %4443 = vmatprep.subr.bf16.mxu1 %v4805_v25  ;;  %v185_v23 = vld [vmem:[%s6206_s0 + $0x550] sm:$0xff]  ;;  %v186_v25 = vld [vmem:[%s6206_s0 + $0x558] sm:$0xff] }
  0xa0   :  { %v3673_v29 = vcombine.high %v178_v24, %v186_v25 }
  0xa1   :  { %4350 = vmatpush3.bf16.msra.mxu0 %v4804_v28  ;;  %v3671_v28 = vcombine.high %v177_v22, %v185_v23 }
  0xa2   :  { %4444 = vmatpush3.bf16.msra.mxu1 %v4806_v31  ;;  %4351 = vmatprep.subr.bf16.mxu0 %v4807_v32  ;;  %v201_v31 = vld [vmem:[%s6206_s0 + $0x5d0] sm:$0xff]  ;;  %v194_v32 = vld [vmem:[%s6206_s0 + $0x598] sm:$0xff] }
  0xa3   :  { %2591 = vmatmul.mubr.bf16.gmra.mrb[64].mxu0 %v3558_v33  ;;  %4445 = vmatprep.subr.bf16.mxu1 %v4809_v34  ;;  %v202_v33 = vld [vmem:[%s6206_s0 + $0x5d8] sm:$0xff]  ;;  %v3670_v34 = vcombine.low %v177_v22, %v185_v23  ;;  %v4828_v22 = vld [vmem:[%s6205_s1 + $0x310] sm:$0xff]  }
  0xa4   :  { %2727 = vmatmul.mubr.bf16.gmra.mrb[64].mxu1 %v3560_v35  ;;  %2598 = vmatprep.mubr.bf16.mxu0 %v3575_v36  ;;  %v3672_v35 = vcombine.low %v178_v24, %v186_v25  ;;  %v3687_v36 = vcombine.high %v193_v30, %v201_v31 }
  0xa5   :  { %2734 = vmatprep.mubr.bf16.mxu1 %v3577_v40  ;;  %4352 = vmatpush3.bf16.msra.mxu0 %v4808_v37  ;;  %v3689_v37 = vcombine.high %v194_v32, %v202_v33  ;;  %v3686_v40 = vcombine.low %v193_v30, %v201_v31 }
  0xa6   :  { %4446 = vmatpush3.bf16.msra.mxu1 %v4810_v38  ;;  %4353 = vmatprep.subr.bf16.mxu0 %v4811_v39  ;;  %v209_v38 = vld [vmem:[%s6206_s0 + $0x610] sm:$0xff]  ;;  %v210_v39 = vld [vmem:[%s6206_s0 + $0x618] sm:$0xff] }
  0xa7   :  { %4447 = vmatprep.subr.bf16.mxu1 %v4813_v41  ;;  %v3688_v41 = vcombine.low %v194_v32, %v202_v33  ;;  %v3703_v42 = vcombine.high %v209_v38, %v209_v38  ;;  %v3705_v43 = vcombine.high %v210_v39, %v210_v39  ;;  %v5569_v32 = vld [vmem:[%s6206_s0 + $0x1a0] sm:$0xff] }
  0xa8   :  { %v5574_v33 = vld [vmem:[%s6206_s0 + $0x1e0] sm:$0xff] }
  0xa9   :  { %4354 = vmatpush3.bf16.msra.mxu0 %v4812_v45  ;;  %v27_v45 = vld [vmem:[%s6206_s0 + $0x60] sm:$0xff] }
  0xaa   :  { %4448 = vmatpush3.bf16.msra.mxu1 %v4814_v47  ;;  %4527 = vmatprep.subr.bf16.mxu0 %v4819_v48  ;;  %v28_v47 = vld [vmem:[%s6206_s0 + $0x68] sm:$0xff]  ;;  %v3702_v48 = vcombine.low %v209_v38, %v209_v38  ;;  %v3514_v54 = vcombine.low %v19_v44, %v27_v45 }
  0xab   :  { %2599 = vmatmul.mubr.bf16.gmra.mrb[68].mxu0 %v3574_v49  ;;  %4621 = vmatprep.subr.bf16.mxu1 %v4821_v50  ;;  %v3704_v49 = vcombine.low %v210_v39, %v210_v39  ;;  %v3515_v50 = vcombine.high %v19_v44, %v27_v45  ;;  %v3516_v57 = vcombine.low %v20_v46, %v28_v47  ;;  %v5589_v38 = vld [vmem:[%s6206_s0 + $0x1e8] sm:$0xff]  ;;  %v4834_v39 = vld [vmem:[%s6205_s1 + $0x398] sm:$0xff]   ;;  %v4837_v44 = vld [vmem:[%s6205_s1 + $0x3e0] sm:$0xff]  }
  0xac   :  { %2735 = vmatmul.mubr.bf16.gmra.mrb[68].mxu1 %v3576_v51  ;;  %2606 = vmatprep.mubr.bf16.mxu0 %v3591_v52  ;;  %v3517_v51 = vcombine.high %v20_v46, %v28_v47  ;;  %v35_v52 = vld [vmem:[%s6206_s0 + $0xa0] sm:$0xff] }
  0xad   :  { %2742 = vmatprep.mubr.bf16.mxu1 %v3593_v53  ;;  %v43_v53 = vld [vmem:[%s6206_s0 + $0xe0] sm:$0xff] }
  0xb3   :  { %2607 = vmatmul.mubr.bf16.gmra.mrb[72].mxu0 %v3590_v58  ;;  %v4820_v58 = vld [vmem:[%s6205_s1 + $0x300] sm:$0xff]  }
  0xb4   :  { %2743 = vmatmul.mubr.bf16.gmra.mrb[72].mxu1 %v3592_v59  ;;  %2614 = vmatprep.mubr.bf16.mxu0 %v3607_v60  ;;  %v4822_v59 = vld [vmem:[%s6205_s1 + $0x380] sm:$0xff]   ;;  %v3531_v60 = vcombine.high %v35_v52, %v43_v53 }
  0xb5   :  { %2750 = vmatprep.mubr.bf16.mxu1 %v3609_v61  ;;  %v3533_v61 = vcombine.high %v36_v55, %v44_v56 }
  0xbb   :  { %2615 = vmatmul.mubr.bf16.gmra.mrb[76].mxu0 %v3606_v2  ;;  %v5520_v2 = vld [vmem:[%s6206_s0 + $0x160] sm:$0xff] }
  0xbc   :  { %2751 = vmatmul.mubr.bf16.gmra.mrb[76].mxu1 %v3608_v3  ;;  %2622 = vmatprep.mubr.bf16.mxu0 %v3623_v4  ;;  %v4826_v3 = vld [vmem:[%s6205_s1 + $0x388] sm:$0xff]   ;;  %v4827_v4 = vld [vmem:[%s6205_s1 + $0x350] sm:$0xff]   ;;  %v3547_v17 = vcombine.high %v5515_v1, %v5520_v2 }
  0xbd   :  { %2758 = vmatprep.mubr.bf16.mxu1 %v3625_v5 }
  0xc3   :  { %2623 = vmatmul.mubr.bf16.gmra.mrb[80].mxu0 %v3622_v10  ;;  %v5544_v10 = vld [vmem:[%s6207_s2] ss:$0 sm:$0xff] }
  0xc4   :  { %2759 = vmatmul.mubr.bf16.gmra.mrb[80].mxu1 %v3624_v11  ;;  %2630 = vmatprep.mubr.bf16.mxu0 %v3639_v12  ;;  %v3530_v12 = vcombine.low %v35_v52, %v43_v53 }
  0xc5   :  { %2766 = vmatprep.mubr.bf16.mxu1 %v3641_v13 }
  0xcb   :  { %2631 = vmatmul.mubr.bf16.gmra.mrb[84].mxu0 %v3638_v18 }
  0xcc   :  { %2767 = vmatmul.mubr.bf16.gmra.mrb[84].mxu1 %v3640_v19  ;;  %2638 = vmatprep.mubr.bf16.mxu0 %v3655_v20 }
  0xcd   :  { %2774 = vmatprep.mubr.bf16.mxu1 %v3657_v21  ;;  %v3549_v21 = vcombine.high %v5531_v6, %v5536_v7 }
  0xd3   :  { %2639 = vmatmul.mubr.bf16.gmra.mrb[88].mxu0 %v3654_v26  ;;  %v4830_v26 = vld [vmem:[%s6205_s1 + $0x390] sm:$0xff]  }
  0xd4   :  { %2775 = vmatmul.mubr.bf16.gmra.mrb[88].mxu1 %v3656_v27  ;;  %2646 = vmatprep.mubr.bf16.mxu0 %v3671_v28  ;;  %v4831_v27 = vld [vmem:[%s6205_s1 + $0x358] sm:$0xff]  }
  0xd5   :  { %2782 = vmatprep.mubr.bf16.mxu1 %v3673_v29  ;;  %v4833_v29 = vld [vmem:[%s6205_s1 + $0x3d8] sm:$0xff]  }
  0xdb   :  { %2647 = vmatmul.mubr.bf16.gmra.mrb[92].mxu0 %v3670_v34  ;;  %v5579_v34 = vld [vmem:[%s6206_s0 + $0x1a8] sm:$0xff] }
  0xdc   :  { %2783 = vmatmul.mubr.bf16.gmra.mrb[92].mxu1 %v3672_v35  ;;  %2654 = vmatprep.mubr.bf16.mxu0 %v3687_v36  ;;  %v4832_v35 = vld [vmem:[%s6205_s1 + $0x318] sm:$0xff]   ;;  %v3565_v53 = vcombine.high %v5579_v34, %v5589_v38 }
  0xdd   :  { %2790 = vmatprep.mubr.bf16.mxu1 %v3689_v37 }
  0xe3   :  { %2655 = vmatmul.mubr.bf16.gmra.mrb[96].mxu0 %v3686_v40  ;;  %v4835_v40 = vld [vmem:[%s6205_s1 + $0x360] sm:$0xff]  }
  0xe4   :  { %2791 = vmatmul.mubr.bf16.gmra.mrb[96].mxu1 %v3688_v41  ;;  %2662 = vmatprep.mubr.bf16.mxu0 %v3703_v42 }
  0xe5   :  { %2798 = vmatprep.mubr.bf16.mxu1 %v3705_v43  ;;  %v3546_v43 = vcombine.low %v5515_v1, %v5520_v2  ;;  %v5632_v1 = vld [vmem:[%s6206_s0 + $0x260] sm:$0xff]  ;;  %v5637_v2 = vld [vmem:[%s6206_s0 + $0x228] sm:$0xff] }
  0xeb   :  { %2663 = vmatmul.mubr.bf16.gmra.mrb[100].mxu0 %v3702_v48  ;;  %v3548_v48 = vcombine.low %v5531_v6, %v5536_v7  ;;  %v5647_v6 = vld [vmem:[%s6206_s0 + $0x268] sm:$0xff] }
  0xec   :  { %2799 = vmatmul.mubr.bf16.gmra.mrb[100].mxu1 %v3704_v49  ;;  %2838 = vmatprep.mubr.bf16.mxu0 %v3515_v50  ;;  %v3563_v49 = vcombine.high %v5569_v32, %v5574_v33  ;;  %v4842_v7 = vld [vmem:[%s6205_s1 + $0x3a8] sm:$0xff]  }
  0xed   :  { %2974 = vmatprep.mubr.bf16.mxu1 %v3517_v51 }
  0xf3   :  { %2839 = vmatmul.mubr.bf16.vlgmr.msra.gmra.mrb[104].mxu0 %v3514_v54  ;;  %v4836_v54 = vld [vmem:[%s6205_s1 + $0x320] sm:$0xff]  }
  0xf4   :  { %2975 = vmatmul.mubr.bf16.vlgmr.msra.gmra.mrb[104].mxu1 %v3516_v57  ;;  %4528 = vmatpush3.bf16.msra.mxu0 %v4820_v58  ;;  %v4838_v58 = vld [vmem:[%s6205_s1 + $0x3a0] sm:$0xff]  }
  0xf5   :  { %4622 = vmatpush3.bf16.msra.mxu1 %v4822_v59  ;;  %2846 = vmatprep.mubr.bf16.mxu0 %v3531_v60  ;;  %v4839_v59 = vld [vmem:[%s6205_s1 + $0x368] sm:$0xff]  }
  0xf6   :  { %v3979_v5 = vpop.f32.mrb[0].mxu0  ;;  %2982 = vmatprep.mubr.bf16.mxu1 %v3533_v61  ;;  %4529 = vmatprep.subr.bf16.mxu0 %v4823_v62  ;;  %v4841_v61 = vld [vmem:[%s6205_s1 + $0x3e8] sm:$0xff]  }
  0xf7   :  { %v4073_v9 = vpop.f32.mrb[0].mxu1  ;;  %v3980_v11 = vpop.f32.mrb[1].mxu0  ;;  %4623 = vmatprep.subr.bf16.mxu1 %v4825_v63 }
  0xf8   :  { %v3981_v13 = vadd.f32 %v3980_v11, %v3979_v5  ;;  %v4074_v14 = vpop.f32.mrb[1].mxu1  ;;  %v3982_v15 = vpop.f32.mrb[2].mxu0  ;;  %4530 = vmatpush3.bf16.msra.mxu0 %v4824_v0  ;;  %v5627_v0 = vld [vmem:[%s6206_s0 + $0x220] sm:$0xff] }
  0xf9   :  { %v4075_v18 = vadd.f32 %v4074_v14, %v4073_v9  ;;  %v4076_v19 = vpop.f32.mrb[2].mxu1  ;;  %v3983_v20 = vpop.f32.mrb[3].mxu0  ;;  %4624 = vmatpush3.bf16.msra.mxu1 %v4826_v3  ;;  %4531 = vmatprep.subr.bf16.mxu0 %v4827_v4  ;;  %v4840_v3 = vld [vmem:[%s6205_s1 + $0x328] sm:$0xff]  }
  0xfa   :  { %v2297_v23 = vadd.f32 %v3981_v13, %v5544_v10  ;;  %v3984_v24 = vadd.f32 %v3983_v20, %v3982_v15  ;;  %v4077_v25 = vpop.f32.mrb[3].mxu1  ;;  %4625 = vmatprep.subr.bf16.mxu1 %v4829_v8  ;;  %v4843_v8 = vld [vmem:[%s6205_s1 + $0x370] sm:$0xff]  }
  0xfb   :  { %v4078_v28 = vadd.f32 %v4077_v25, %v4076_v19  ;;  %2847 = vmatmul.mubr.bf16.gmra.mrb[108].mxu0 %v3530_v12  ;;  %v3562_v12 = vcombine.low %v5569_v32, %v5574_v33  ;;  %v4845_v13 = vld [vmem:[%s6205_s1 + $0x3f0] sm:$0xff]  }
  0xfc   :  { %v5563_v30 = vadd.f32 %v4075_v18, %v2297_v23  ;;  %v2300_v31 = vadd.f32 %v3984_v24, %v5544_v10  ;;  %2983 = vmatmul.mubr.bf16.gmra.mrb[108].mxu1 %v3532_v16  ;;  %2854 = vmatprep.mubr.bf16.mxu0 %v3547_v17  ;;  %v3564_v17 = vcombine.low %v5579_v34, %v5589_v38  ;;  %v4844_v23 = vld [vmem:[%s6205_s1 + $0x330] sm:$0xff]   ;;  %v99_v34 = vld [vmem:[%s6206_s0 + $0x2a0] sm:$0xff] }
  0xfd   :  { %2990 = vmatprep.mubr.bf16.mxu1 %v3549_v21  ;;  %4532 = vmatpush3.bf16.msra.mxu0 %v4828_v22  ;;  %v3579_v18 = vcombine.high %v5627_v0, %v5632_v1  ;;  %v3581_v22 = vcombine.high %v5637_v2, %v5647_v6 }
  0xfe   :  { %v5584_v36 = vadd.f32 %v4078_v28, %v2300_v31  ;;  %v3985_v37 = vpop.f32.mrb[4].mxu0  ;;  %4626 = vmatpush3.bf16.msra.mxu1 %v4830_v26  ;;  %4533 = vmatprep.subr.bf16.mxu0 %v4831_v27  ;;  %v4846_v27 = vld [vmem:[%s6205_s1 + $0x3b0] sm:$0xff]   ;;  %v4847_v28 = vld [vmem:[%s6205_s1 + $0x378] sm:$0xff]  }
  0xff   :  { %v4079_v41 = vpop.f32.mrb[4].mxu1  ;;  %v3986_v42 = vpop.f32.mrb[5].mxu0  ;;  %4627 = vmatprep.subr.bf16.mxu1 %v4833_v29  ;;  %v4849_v31 = vld [vmem:[%s6205_s1 + $0x3f8] sm:$0xff]  }
 0x100   :  { %v3987_v45 = vadd.f32 %v3986_v42, %v3985_v37  ;;  %v4080_v46 = vpop.f32.mrb[5].mxu1  ;;  %v3988_v47 = vpop.f32.mrb[6].mxu0  ;;  %v4848_v37 = vld [vmem:[%s6205_s1 + $0x338] sm:$0xff]  }
 0x101   :  { %v4081_v50 = vadd.f32 %v4080_v46, %v4079_v41  ;;  %v4082_v51 = vpop.f32.mrb[6].mxu1  ;;  %v3989_v52 = vpop.f32.mrb[7].mxu0  ;;  %4534 = vmatpush3.bf16.msra.mxu0 %v4832_v35  ;;  %v107_v35 = vld [vmem:[%s6206_s0 + $0x2e0] sm:$0xff]  ;;  %v108_v41 = vld [vmem:[%s6206_s0 + $0x2e8] sm:$0xff]  ;;  %v4850_v42 = vld [vmem:[%s6205_s1 + $0x3b8] sm:$0xff]  }
 0x102   :  { %v2305_v55 = vadd.f32 %v3987_v45, %v5544_v10  ;;  %v3990_v56 = vadd.f32 %v3989_v52, %v3988_v47  ;;  %v4083_v57 = vpop.f32.mrb[7].mxu1  ;;  %4628 = vmatpush3.bf16.msra.mxu1 %v4834_v39  ;;  %4535 = vmatprep.subr.bf16.mxu0 %v4835_v40  ;;  %v100_v40 = vld [vmem:[%s6206_s0 + $0x2a8] sm:$0xff]  ;;  %v3578_v45 = vcombine.low %v5627_v0, %v5632_v1 }
 0x103   :  { %v4084_v60 = vadd.f32 %v4083_v57, %v4082_v51  ;;  %2855 = vmatmul.mubr.bf16.gmra.mrb[112].mxu0 %v3546_v43  ;;  %4629 = vmatprep.subr.bf16.mxu1 %v4837_v44 }
 0x104   :  { %v5621_v62 = vadd.f32 %v4081_v50, %v2305_v55  ;;  %v2308_v63 = vadd.f32 %v3990_v56, %v5544_v10  ;;  %2991 = vmatmul.mubr.bf16.gmra.mrb[112].mxu1 %v3548_v48  ;;  %2862 = vmatprep.mubr.bf16.mxu0 %v3563_v49  ;;  %v3580_v49 = vcombine.low %v5637_v2, %v5647_v6  ;;  %v116_v2 = vld [vmem:[%s6206_s0 + $0x328] sm:$0xff] }
 0x105   :  { %2998 = vmatprep.mubr.bf16.mxu1 %v3565_v53  ;;  %4536 = vmatpush3.bf16.msra.mxu0 %v4836_v54  ;;  %v3595_v50 = vcombine.high %v99_v34, %v107_v35  ;;  %v3597_v54 = vcombine.high %v100_v40, %v108_v41 }
 0x106   :  { %v5642_v4 = vadd.f32 %v4084_v60, %v2308_v63  ;;  %v3991_v5 = vpop.f32.mrb[8].mxu0  ;;  %4630 = vmatpush3.bf16.msra.mxu1 %v4838_v58  ;;  %4537 = vmatprep.subr.bf16.mxu0 %v4839_v59  ;;  %v123_v63 = vld [vmem:[%s6206_s0 + $0x360] sm:$0xff] }
 0x107   :  { %v4085_v9 = vpop.f32.mrb[8].mxu1  ;;  %v3992_v11 = vpop.f32.mrb[9].mxu0  ;;  %4631 = vmatprep.subr.bf16.mxu1 %v4841_v61  ;;  %v115_v61 = vld [vmem:[%s6206_s0 + $0x320] sm:$0xff] }
 0x108   :  { %v3993_v14 = vadd.f32 %v3992_v11, %v3991_v5  ;;  %v4086_v15 = vpop.f32.mrb[9].mxu1  ;;  %v3994_v16 = vpop.f32.mrb[10].mxu0 }
 0x109   :  { %v4087_v19 = vadd.f32 %v4086_v15, %v4085_v9  ;;  %v4088_v20 = vpop.f32.mrb[10].mxu1  ;;  %v3995_v21 = vpop.f32.mrb[11].mxu0  ;;  %4538 = vmatpush3.bf16.msra.mxu0 %v4840_v3  ;;  %v124_v3 = vld [vmem:[%s6206_s0 + $0x368] sm:$0xff] }
 0x10a   :  { %v2313_v24 = vadd.f32 %v3993_v14, %v5544_v10  ;;  %v3996_v25 = vadd.f32 %v3995_v21, %v3994_v16  ;;  %v4089_v26 = vpop.f32.mrb[11].mxu1  ;;  %4632 = vmatpush3.bf16.msra.mxu1 %v4842_v7  ;;  %4539 = vmatprep.subr.bf16.mxu0 %v4843_v8  ;;  %v3594_v7 = vcombine.low %v99_v34, %v107_v35 }
 0x10b   :  { %v4090_v29 = vadd.f32 %v4089_v26, %v4088_v20  ;;  %2863 = vmatmul.mubr.bf16.gmra.mrb[116].mxu0 %v3562_v12  ;;  %4633 = vmatprep.subr.bf16.mxu1 %v4845_v13  ;;  %v3596_v12 = vcombine.low %v100_v40, %v108_v41  ;;  %v3611_v13 = vcombine.high %v115_v61, %v123_v63 }
 0x10c   :  { %v5679_v32 = vadd.f32 %v4087_v19, %v2313_v24  ;;  %v2316_v33 = vadd.f32 %v3996_v25, %v5544_v10  ;;  %2999 = vmatmul.mubr.bf16.gmra.mrb[116].mxu1 %v3564_v17  ;;  %2870 = vmatprep.mubr.bf16.mxu0 %v3579_v18  ;;  %v3613_v17 = vcombine.high %v116_v2, %v124_v3  ;;  %v131_v24 = vld [vmem:[%s6206_s0 + $0x3a0] sm:$0xff] }
 0x10d   :  { %3006 = vmatprep.mubr.bf16.mxu1 %v3581_v22  ;;  %4540 = vmatpush3.bf16.msra.mxu0 %v4844_v23  ;;  %v139_v25 = vld [vmem:[%s6206_s0 + $0x3e0] sm:$0xff]  ;;  %v3610_v34 = vcombine.low %v115_v61, %v123_v63  ;;  %v3612_v40 = vcombine.low %v116_v2, %v124_v3 }
 0x10e   :  { %v5691_v38 = vadd.f32 %v4090_v29, %v2316_v33  ;;  %v3997_v39 = vpop.f32.mrb[12].mxu0  ;;  %4634 = vmatpush3.bf16.msra.mxu1 %v4846_v27  ;;  %4541 = vmatprep.subr.bf16.mxu0 %v4847_v28  ;;  %v132_v28 = vld [vmem:[%s6206_s0 + $0x3a8] sm:$0xff]  ;;  %v3627_v41 = vcombine.high %v131_v24, %v139_v25  ;;  %v3626_v61 = vcombine.low %v131_v24, %v139_v25 }
 0x10f   :  { %v4091_v43 = vpop.f32.mrb[12].mxu1  ;;  %v3998_v44 = vpop.f32.mrb[13].mxu0  ;;  %4635 = vmatprep.subr.bf16.mxu1 %v4849_v31  ;;  %v140_v29 = vld [vmem:[%s6206_s0 + $0x3e8] sm:$0xff] }
 0x110   :  { %v3999_v46 = vadd.f32 %v3998_v44, %v3997_v39  ;;  %v4092_v47 = vpop.f32.mrb[13].mxu1  ;;  %v4000_v48 = vpop.f32.mrb[14].mxu0  ;;  %v3628_v3 = vcombine.low %v132_v28, %v140_v29 }
 0x111   :  { %v4093_v51 = vadd.f32 %v4092_v47, %v4091_v43  ;;  %v4094_v52 = vpop.f32.mrb[14].mxu1  ;;  %v4001_v53 = vpop.f32.mrb[15].mxu0  ;;  %4542 = vmatpush3.bf16.msra.mxu0 %v4848_v37 }
 0x112   :  { %v2321_v55 = vadd.f32 %v3999_v46, %v5544_v10  ;;  %v4002_v56 = vadd.f32 %v4001_v53, %v4000_v48  ;;  %v4095_v57 = vpop.f32.mrb[15].mxu1  ;;  %4636 = vmatpush3.bf16.msra.mxu1 %v4850_v42  ;;  %v155_v53 = vld [vmem:[%s6206_s0 + $0x460] sm:$0xff] }
 0x113   :  { %v4096_v58 = vadd.f32 %v4095_v57, %v4094_v52  ;;  %2871 = vmatmul.mubr.bf16.gmra.mrb[120].mxu0 %v3578_v45  ;;  %v3629_v45 = vcombine.high %v132_v28, %v140_v29  ;;  %v147_v52 = vld [vmem:[%s6206_s0 + $0x420] sm:$0xff]  ;;  %v156_v57 = vld [vmem:[%s6206_s0 + $0x468] sm:$0xff] }
 0x114   :  { %v5707_v59 = vadd.f32 %v4093_v51, %v2321_v55  ;;  %v2324_v60 = vadd.f32 %v4002_v56, %v5544_v10  ;;  %3007 = vmatmul.mubr.bf16.gmra.mrb[120].mxu1 %v3580_v49  ;;  %2878 = vmatprep.mubr.bf16.mxu0 %v3595_v50  ;;  %v148_v56 = vld [vmem:[%s6206_s0 + $0x428] sm:$0xff] }
 0x115   :  { %3014 = vmatprep.mubr.bf16.mxu1 %v3597_v54 }
 0x116   :  { %v5716_v0 = vadd.f32 %v4096_v58, %v2324_v60  ;;  %v4003_v1 = vpop.f32.mrb[16].mxu0 }
 0x117   :  { %v4097_v5 = vpop.f32.mrb[16].mxu1  ;;  %v4004_v6 = vpop.f32.mrb[17].mxu0 }
 0x118   :  { %v4005_v8 = vadd.f32 %v4004_v6, %v4003_v1  ;;  %v4098_v9 = vpop.f32.mrb[17].mxu1  ;;  %v4006_v11 = vpop.f32.mrb[18].mxu0 }
 0x119   :  { %v4099_v14 = vadd.f32 %v4098_v9, %v4097_v5  ;;  %v4100_v15 = vpop.f32.mrb[18].mxu1  ;;  %v4007_v16 = vpop.f32.mrb[19].mxu0  ;;  %v3643_v5 = vcombine.high %v147_v52, %v155_v53  ;;  %v3645_v9 = vcombine.high %v148_v56, %v156_v57 }
 0x11a   :  { %v2329_v18 = vadd.f32 %v4005_v8, %v5544_v10  ;;  %v4008_v19 = vadd.f32 %v4007_v16, %v4006_v11  ;;  %v4101_v20 = vpop.f32.mrb[19].mxu1 }
 0x11b   :  { %v4102_v21 = vadd.f32 %v4101_v20, %v4100_v15  ;;  %2879 = vmatmul.mubr.bf16.gmra.mrb[124].mxu0 %v3594_v7 }
 0x11c   :  { %v5725_v22 = vadd.f32 %v4099_v14, %v2329_v18  ;;  %v2332_v23 = vadd.f32 %v4008_v19, %v5544_v10  ;;  %3015 = vmatmul.mubr.bf16.gmra.mrb[124].mxu1 %v3596_v12  ;;  %2886 = vmatprep.mubr.bf16.mxu0 %v3611_v13  ;;  %v171_v18 = vld [vmem:[%s6206_s0 + $0x4e0] sm:$0xff] }
 0x11d   :  { %3022 = vmatprep.mubr.bf16.mxu1 %v3613_v17  ;;  %v163_v17 = vld [vmem:[%s6206_s0 + $0x4a0] sm:$0xff] }
 0x11e   :  { %v5734_v26 = vadd.f32 %v4102_v21, %v2332_v23  ;;  %v4009_v27 = vpop.f32.mrb[20].mxu0  ;;  %v164_v21 = vld [vmem:[%s6206_s0 + $0x4a8] sm:$0xff] }
 0x11f   :  { %v4103_v31 = vpop.f32.mrb[20].mxu1  ;;  %v4010_v33 = vpop.f32.mrb[21].mxu0  ;;  %v172_v23 = vld [vmem:[%s6206_s0 + $0x4e8] sm:$0xff] }
 0x120   :  { %v4011_v35 = vadd.f32 %v4010_v33, %v4009_v27  ;;  %v4104_v37 = vpop.f32.mrb[21].mxu1  ;;  %v4012_v39 = vpop.f32.mrb[22].mxu0  ;;  %v3642_v27 = vcombine.low %v147_v52, %v155_v53  ;;  %v3644_v33 = vcombine.low %v148_v56, %v156_v57  ;;  %v180_v52 = vld [vmem:[%s6206_s0 + $0x528] sm:$0xff]  ;;  %v3658_v57 = vcombine.low %v163_v17, %v171_v18 }
 0x121   :  { %v4105_v42 = vadd.f32 %v4104_v37, %v4103_v31  ;;  %v4106_v43 = vpop.f32.mrb[22].mxu1  ;;  %v4013_v44 = vpop.f32.mrb[23].mxu0  ;;  %v188_v53 = vld [vmem:[%s6206_s0 + $0x568] sm:$0xff] }
 0x122   :  { %v2337_v46 = vadd.f32 %v4011_v35, %v5544_v10  ;;  %v4014_v47 = vadd.f32 %v4013_v44, %v4012_v39  ;;  %v4107_v48 = vpop.f32.mrb[23].mxu1 }
 0x123   :  { %v4108_v49 = vadd.f32 %v4107_v48, %v4106_v43  ;;  %2887 = vmatmul.mubr.bf16.gmra.mrb[128].mxu0 %v3610_v34  ;;  %v3659_v34 = vcombine.high %v163_v17, %v171_v18  ;;  %v187_v48 = vld [vmem:[%s6206_s0 + $0x560] sm:$0xff] }
 0x124   :  { %v5743_v50 = vadd.f32 %v4105_v42, %v2337_v46  ;;  %v2340_v51 = vadd.f32 %v4014_v47, %v5544_v10  ;;  %3023 = vmatmul.mubr.bf16.gmra.mrb[128].mxu1 %v3612_v40  ;;  %2894 = vmatprep.mubr.bf16.mxu0 %v3627_v41  ;;  %v3661_v40 = vcombine.high %v164_v21, %v172_v23  ;;  %v179_v47 = vld [vmem:[%s6206_s0 + $0x520] sm:$0xff] }
 0x125   :  { %3030 = vmatprep.mubr.bf16.mxu1 %v3629_v45 }
 0x126   :  { %v5752_v54 = vadd.f32 %v4108_v49, %v2340_v51  ;;  %v4015_v55 = vpop.f32.mrb[24].mxu0 }
 0x127   :  { %v4109_v58 = vpop.f32.mrb[24].mxu1  ;;  %v4016_v60 = vpop.f32.mrb[25].mxu0 }
 0x128   :  { %v4017_v63 = vadd.f32 %v4016_v60, %v4015_v55  ;;  %v4110_v1 = vpop.f32.mrb[25].mxu1  ;;  %v4018_v2 = vpop.f32.mrb[26].mxu0 }
 0x129   :  { %v4111_v6 = vadd.f32 %v4110_v1, %v4109_v58  ;;  %v4112_v7 = vpop.f32.mrb[26].mxu1  ;;  %v4019_v8 = vpop.f32.mrb[27].mxu0  ;;  %v3675_v1 = vcombine.high %v179_v47, %v187_v48 }
 0x12a   :  { %v2345_v11 = vadd.f32 %v4017_v63, %v5544_v10  ;;  %v4020_v12 = vadd.f32 %v4019_v8, %v4018_v2  ;;  %v4113_v13 = vpop.f32.mrb[27].mxu1  ;;  %v3660_v63 = vcombine.low %v164_v21, %v172_v23  ;;  %v204_v21 = vld [vmem:[%s6206_s0 + $0x5e8] sm:$0xff] }
 0x12b   :  { %v4114_v14 = vadd.f32 %v4113_v13, %v4112_v7  ;;  %2895 = vmatmul.mubr.bf16.gmra.mrb[132].mxu0 %v3626_v61 }
 0x12c   :  { %v5761_v15 = vadd.f32 %v4111_v6, %v2345_v11  ;;  %v2348_v16 = vadd.f32 %v4020_v12, %v5544_v10  ;;  %3031 = vmatmul.mubr.bf16.gmra.mrb[132].mxu1 %v3628_v3  ;;  %2902 = vmatprep.mubr.bf16.mxu0 %v3643_v5  ;;  %v3677_v6 = vcombine.high %v180_v52, %v188_v53 }
 0x12d   :  { %3038 = vmatprep.mubr.bf16.mxu1 %v3645_v9 }
 0x12e   :  { %v5770_v19 = vadd.f32 %v4114_v14, %v2348_v16  ;;  %v4021_v20 = vpop.f32.mrb[28].mxu0  ;;  %v195_v14 = vld [vmem:[%s6206_s0 + $0x5a0] sm:$0xff] }
 0x12f   :  { %v4115_v24 = vpop.f32.mrb[28].mxu1  ;;  %v4022_v25 = vpop.f32.mrb[29].mxu0  ;;  %v203_v16 = vld [vmem:[%s6206_s0 + $0x5e0] sm:$0xff] }
 0x130   :  { %v4023_v28 = vadd.f32 %v4022_v25, %v4021_v20  ;;  %v4116_v29 = vpop.f32.mrb[29].mxu1  ;;  %v4024_v31 = vpop.f32.mrb[30].mxu0  ;;  %v196_v20 = vld [vmem:[%s6206_s0 + $0x5a8] sm:$0xff]  ;;  %v3674_v25 = vcombine.low %v179_v47, %v187_v48  ;;  %v211_v47 = vld [vmem:[%s6206_s0 + $0x620] sm:$0xff] }
 0x131   :  { %v4117_v35 = vadd.f32 %v4116_v29, %v4115_v24  ;;  %v4118_v37 = vpop.f32.mrb[30].mxu1  ;;  %v4025_v39 = vpop.f32.mrb[31].mxu0 }
 0x132   :  { %v2353_v41 = vadd.f32 %v4023_v28, %v5544_v10  ;;  %v4026_v42 = vadd.f32 %v4025_v39, %v4024_v31  ;;  %v4119_v43 = vpop.f32.mrb[31].mxu1  ;;  %v3676_v31 = vcombine.low %v180_v52, %v188_v53  ;;  %v3693_v39 = vcombine.high %v196_v20, %v204_v21  ;;  %v212_v52 = vld [vmem:[%s6206_s0 + $0x628] sm:$0xff] }
 0x133   :  { %v4120_v44 = vadd.f32 %v4119_v43, %v4118_v37  ;;  %2903 = vmatmul.mubr.bf16.gmra.mrb[136].mxu0 %v3642_v27 }
 0x134   :  { %v5779_v45 = vadd.f32 %v4117_v35, %v2353_v41  ;;  %v2356_v46 = vadd.f32 %v4026_v42, %v5544_v10  ;;  %3039 = vmatmul.mubr.bf16.gmra.mrb[136].mxu1 %v3644_v33  ;;  %2910 = vmatprep.mubr.bf16.mxu0 %v3659_v34  ;;  %v3691_v33 = vcombine.high %v195_v14, %v203_v16 }
 0x135   :  { %3046 = vmatprep.mubr.bf16.mxu1 %v3661_v40 }
 0x136   :  { %v5788_v49 = vadd.f32 %v4120_v44, %v2356_v46  ;;  %v4027_v51 = vpop.f32.mrb[32].mxu0 }
 0x137   :  { %v4121_v55 = vpop.f32.mrb[32].mxu1  ;;  %v4028_v56 = vpop.f32.mrb[33].mxu0 }
 0x138   :  { %v4029_v58 = vadd.f32 %v4028_v56, %v4027_v51  ;;  %v4122_v60 = vpop.f32.mrb[33].mxu1  ;;  %v4030_v61 = vpop.f32.mrb[34].mxu0  ;;  %v3690_v56 = vcombine.low %v195_v14, %v203_v16  ;;  %v21_v14 = vld [vmem:[%s6206_s0 + $0x30] sm:$0xff] }
 0x139   :  { %v4123_v2 = vadd.f32 %v4122_v60, %v4121_v55  ;;  %v4124_v3 = vpop.f32.mrb[34].mxu1  ;;  %v4031_v5 = vpop.f32.mrb[35].mxu0  ;;  %v29_v16 = vld [vmem:[%s6206_s0 + $0x70] sm:$0xff] }
 0x13a   :  { %v2361_v7 = vadd.f32 %v4029_v58, %v5544_v10  ;;  %v4032_v8 = vadd.f32 %v4031_v5, %v4030_v61  ;;  %v4125_v9 = vpop.f32.mrb[35].mxu1  ;;  %v3692_v61 = vcombine.low %v196_v20, %v204_v21  ;;  %v3709_v5 = vcombine.high %v212_v52, %v212_v52  ;;  %v22_v21 = vld [vmem:[%s6206_s0 + $0x38] sm:$0xff] }
 0x13b   :  { %v4126_v11 = vadd.f32 %v4125_v9, %v4124_v3  ;;  %2911 = vmatmul.mubr.bf16.gmra.mrb[140].mxu0 %v3658_v57 }
 0x13c   :  { %v5797_v12 = vadd.f32 %v4123_v2, %v2361_v7  ;;  %v2364_v13 = vadd.f32 %v4032_v8, %v5544_v10  ;;  %3047 = vmatmul.mubr.bf16.gmra.mrb[140].mxu1 %v3660_v63  ;;  %2918 = vmatprep.mubr.bf16.mxu0 %v3675_v1  ;;  %v3707_v63 = vcombine.high %v211_v47, %v211_v47 }
 0x13d   :  { %3054 = vmatprep.mubr.bf16.mxu1 %v3677_v6 }
 0x13e   :  { %v5806_v17 = vadd.f32 %v4126_v11, %v2364_v13  ;;  %v4033_v18 = vpop.f32.mrb[36].mxu0 }
 0x13f   :  { %v4127_v23 = vpop.f32.mrb[36].mxu1  ;;  %v4034_v24 = vpop.f32.mrb[37].mxu0 }
 0x140   :  { %v4035_v27 = vadd.f32 %v4034_v24, %v4033_v18  ;;  %v4128_v28 = vpop.f32.mrb[37].mxu1  ;;  %v4036_v29 = vpop.f32.mrb[38].mxu0 }
 0x141   :  { %v4129_v34 = vadd.f32 %v4128_v28, %v4127_v23  ;;  %v4130_v35 = vpop.f32.mrb[38].mxu1  ;;  %v4037_v37 = vpop.f32.mrb[39].mxu0  ;;  %v30_v23 = vld [vmem:[%s6206_s0 + $0x78] sm:$0xff] }
 0x142   :  { %v2369_v40 = vadd.f32 %v4035_v27, %v5544_v10  ;;  %v4038_v41 = vadd.f32 %v4037_v37, %v4036_v29  ;;  %v4131_v42 = vpop.f32.mrb[39].mxu1  ;;  %v3706_v27 = vcombine.low %v211_v47, %v211_v47  ;;  %v37_v47 = vld [vmem:[%s6206_s0 + $0xb0] sm:$0xff] }
 0x143   :  { %v4132_v43 = vadd.f32 %v4131_v42, %v4130_v35  ;;  %2919 = vmatmul.mubr.bf16.gmra.mrb[144].mxu0 %v3674_v25 }
 0x144   :  { %v5815_v44 = vadd.f32 %v4129_v34, %v2369_v40  ;;  %v2372_v46 = vadd.f32 %v4038_v41, %v5544_v10  ;;  %3055 = vmatmul.mubr.bf16.gmra.mrb[144].mxu1 %v3676_v31  ;;  %2926 = vmatprep.mubr.bf16.mxu0 %v3691_v33  ;;  %v3708_v33 = vcombine.low %v212_v52, %v212_v52  ;;  %v45_v52 = vld [vmem:[%s6206_s0 + $0xf0] sm:$0xff] }
 0x145   :  { %3062 = vmatprep.mubr.bf16.mxu1 %v3693_v39  ;;  %v3519_v34 = vcombine.high %v21_v14, %v29_v16  ;;  %v3521_v40 = vcombine.high %v22_v21, %v30_v23 }
 0x146   :  { %v5821_v48 = vadd.f32 %v4132_v43, %v2372_v46  ;;  %v4039_v51 = vpop.f32.mrb[40].mxu0 }
 0x147   :  { %v4133_v53 = vpop.f32.mrb[40].mxu1  ;;  %v4040_v55 = vpop.f32.mrb[41].mxu0 }
 0x148   :  { %v4041_v57 = vadd.f32 %v4040_v55, %v4039_v51  ;;  %v4134_v58 = vpop.f32.mrb[41].mxu1  ;;  %v4042_v60 = vpop.f32.mrb[42].mxu0 }
 0x149   :  { %v4135_v1 = vadd.f32 %v4134_v58, %v4133_v53  ;;  %v4136_v2 = vpop.f32.mrb[42].mxu1  ;;  %v4043_v3 = vpop.f32.mrb[43].mxu0  ;;  %v46_v58 = vld [vmem:[%s6206_s0 + $0xf8] sm:$0xff] }
 0x14a   :  { %v2377_v6 = vadd.f32 %v4041_v57, %v5544_v10  ;;  %v4044_v7 = vadd.f32 %v4043_v3, %v4042_v60  ;;  %v4137_v8 = vpop.f32.mrb[43].mxu1  ;;  %v38_v57 = vld [vmem:[%s6206_s0 + $0xb8] sm:$0xff] }
 0x14b   :  { %v4138_v9 = vadd.f32 %v4137_v8, %v4136_v2  ;;  %2927 = vmatmul.mubr.bf16.gmra.mrb[148].mxu0 %v3690_v56 }
 0x14c   :  { %v5827_v11 = vadd.f32 %v4135_v1, %v2377_v6  ;;  %v2380_v13 = vadd.f32 %v4044_v7, %v5544_v10  ;;  %3063 = vmatmul.mubr.bf16.gmra.mrb[148].mxu1 %v3692_v61  ;;  %2934 = vmatprep.mubr.bf16.mxu0 %v3707_v63  ;;  %v3518_v63 = vcombine.low %v21_v14, %v29_v16  ;;  %v53_v14 = vld [vmem:[%s6206_s0 + $0x130] sm:$0xff] }
 0x14d   :  { %3070 = vmatprep.mubr.bf16.mxu1 %v3709_v5  ;;  %v3520_v5 = vcombine.low %v22_v21, %v30_v23  ;;  %v3535_v6 = vcombine.high %v37_v47, %v45_v52  ;;  %v61_v16 = vld [vmem:[%s6206_s0 + $0x170] sm:$0xff]  ;;  %v62_v23 = vld [vmem:[%s6206_s0 + $0x178] sm:$0xff] }
 0x14e   :  { %v5836_v18 = vadd.f32 %v4138_v9, %v2380_v13  ;;  %v4045_v20 = vpop.f32.mrb[44].mxu0  ;;  %v3537_v13 = vcombine.high %v38_v57, %v46_v58 }
 0x14f   :  { %v4139_v24 = vpop.f32.mrb[44].mxu1  ;;  %v4046_v25 = vpop.f32.mrb[45].mxu0 }
 0x150   :  { %v4047_v28 = vadd.f32 %v4046_v25, %v4045_v20  ;;  %v4140_v29 = vpop.f32.mrb[45].mxu1  ;;  %v4048_v31 = vpop.f32.mrb[46].mxu0 }
 0x151   :  { %v4141_v35 = vadd.f32 %v4140_v29, %v4139_v24  ;;  %v4142_v37 = vpop.f32.mrb[46].mxu1  ;;  %v4049_v39 = vpop.f32.mrb[47].mxu0  ;;  %v3534_v29 = vcombine.low %v37_v47, %v45_v52  ;;  %v69_v47 = vld [vmem:[%s6206_s0 + $0x1b0] sm:$0xff] }
 0x152   :  { %v2385_v41 = vadd.f32 %v4047_v28, %v5544_v10  ;;  %v4050_v42 = vadd.f32 %v4049_v39, %v4048_v31  ;;  %v4143_v43 = vpop.f32.mrb[47].mxu1  ;;  %v77_v52 = vld [vmem:[%s6206_s0 + $0x1f0] sm:$0xff] }
 0x153   :  { %v4144_v46 = vadd.f32 %v4143_v43, %v4142_v37  ;;  %2935 = vmatmul.mubr.bf16.gmra.mrb[152].mxu0 %v3706_v27  ;;  %v3551_v37 = vcombine.high %v53_v14, %v61_v16 }
 0x154   :  { %v5845_v51 = vadd.f32 %v4141_v35, %v2385_v41  ;;  %v2388_v53 = vadd.f32 %v4050_v42, %v5544_v10  ;;  %3071 = vmatmul.mubr.bf16.gmra.mrb[152].mxu1 %v3708_v33  ;;  %3110 = vmatprep.mubr.bf16.mxu0 %v3519_v34  ;;  %v3536_v35 = vcombine.low %v38_v57, %v46_v58  ;;  %v70_v58 = vld [vmem:[%s6206_s0 + $0x1b8] sm:$0xff] }
 0x155   :  { %3246 = vmatprep.mubr.bf16.mxu1 %v3521_v40 }
 0x156   :  { %v5854_v55 = vadd.f32 %v4144_v46, %v2388_v53  ;;  %v4051_v56 = vpop.f32.mrb[48].mxu0 }
 0x157   :  { %v4145_v60 = vpop.f32.mrb[48].mxu1  ;;  %v4052_v61 = vpop.f32.mrb[49].mxu0 }
 0x158   :  { %v4053_v1 = vadd.f32 %v4052_v61, %v4051_v56  ;;  %v4146_v2 = vpop.f32.mrb[49].mxu1  ;;  %v4054_v3 = vpop.f32.mrb[50].mxu0 }
 0x159   :  { %v4147_v7 = vadd.f32 %v4146_v2, %v4145_v60  ;;  %v4148_v8 = vpop.f32.mrb[50].mxu1  ;;  %v4055_v9 = vpop.f32.mrb[51].mxu0  ;;  %v3550_v2 = vcombine.low %v53_v14, %v61_v16  ;;  %v85_v14 = vld [vmem:[%s6206_s0 + $0x230] sm:$0xff] }
 0x15a   :  { %v2393_v20 = vadd.f32 %v4053_v1, %v5544_v10  ;;  %v4149_v24 = vpop.f32.mrb[51].mxu1  ;;  %v54_v10 = vld [vmem:[%s6206_s0 + $0x138] sm:$0xff]  ;;  %v3567_v8 = vcombine.high %v69_v47, %v77_v52  ;;  %v93_v16 = vld [vmem:[%s6206_s0 + $0x270] sm:$0xff] }
 0x15b   :  { %3111 = vmatmul.mubr.bf16.vlgmr.msra.gmra.mrb[156].mxu0 %v3518_v63  ;;  %v3553_v42 = vcombine.high %v54_v10, %v62_v23 }
 0x15c   :  { %v5863_v25 = vadd.f32 %v4147_v7, %v2393_v20  ;;  %3247 = vmatmul.mubr.bf16.vlgmr.msra.gmra.mrb[156].mxu1 %v3520_v5  ;;  %3118 = vmatprep.mubr.bf16.mxu0 %v3535_v6  ;;  %v3552_v7 = vcombine.low %v54_v10, %v62_v23  ;;  %v86_v23 = vld [vmem:[%s6206_s0 + $0x238] sm:$0xff] }
 0x15d   :  { %3254 = vmatprep.mubr.bf16.mxu1 %v3537_v13 }
 0x15e   :  { %v4167_v21 = vpop.f32.mrb[52].mxu0 }
 0x15f   :  { %v4261_v27 = vpop.f32.mrb[52].mxu1  ;;  %v4168_v28 = vpop.f32.mrb[53].mxu0 }
 0x160   :  { %v4169_v31 = vadd.f32 %v4168_v28, %v4167_v21  ;;  %v4262_v33 = vpop.f32.mrb[53].mxu1  ;;  %v4170_v34 = vpop.f32.mrb[54].mxu0 }
 0x161   :  { %v4263_v39 = vadd.f32 %v4262_v33, %v4261_v27  ;;  %v4264_v40 = vpop.f32.mrb[54].mxu1  ;;  %v4171_v41 = vpop.f32.mrb[55].mxu0 }
 0x162   :  { %v2569_v43 = vadd.f32 %v4169_v31, %v5563_v30  ;;  %v4172_v46 = vadd.f32 %v4171_v41, %v4170_v34  ;;  %v4265_v53 = vpop.f32.mrb[55].mxu1 }
 0x163   :  { %v4266_v56 = vadd.f32 %v4265_v53, %v4264_v40  ;;  %3119 = vmatmul.mubr.bf16.gmra.mrb[160].mxu0 %v3534_v29 }
 0x164   :  { %v5878_v60 = vadd.f32 %v4263_v39, %v2569_v43  ;;  %v2572_v61 = vadd.f32 %v4172_v46, %v5584_v36  ;;  %3255 = vmatmul.mubr.bf16.gmra.mrb[160].mxu1 %v3536_v35  ;;  %3126 = vmatprep.mubr.bf16.mxu0 %v3551_v37  ;;  %v78_v36 = vld [vmem:[%s6206_s0 + $0x1f8] sm:$0xff]  ;;  %v3566_v37 = vcombine.low %v69_v47, %v77_v52  ;;  %v101_v47 = vld [vmem:[%s6206_s0 + $0x2b0] sm:$0xff] }
 0x165   :  { %3262 = vmatprep.mubr.bf16.mxu1 %v3553_v42  ;;  %v3569_v24 = vcombine.high %v70_v58, %v78_v36  ;;  %v3568_v42 = vcombine.low %v70_v58, %v78_v36  ;;  %v3583_v43 = vcombine.high %v85_v14, %v93_v16  ;;  %v109_v52 = vld [vmem:[%s6206_s0 + $0x2f0] sm:$0xff]  ;;  %v102_v36 = vld [vmem:[%s6206_s0 + $0x2b8] sm:$0xff] }
 0x166   :  { %v5887_v30 = vadd.f32 %v4266_v56, %v2572_v61  ;;  %v4173_v57 = vpop.f32.mrb[56].mxu0 }
 0x167   :  { %v4267_v63 = vpop.f32.mrb[56].mxu1  ;;  %v4174_v1 = vpop.f32.mrb[57].mxu0 }
 0x168   :  { %v4175_v3 = vadd.f32 %v4174_v1, %v4173_v57  ;;  %v4268_v5 = vpop.f32.mrb[57].mxu1  ;;  %v4176_v6 = vpop.f32.mrb[58].mxu0 }
 0x169   :  { %v4269_v9 = vadd.f32 %v4268_v5, %v4267_v63  ;;  %v4270_v13 = vpop.f32.mrb[58].mxu1  ;;  %v4177_v20 = vpop.f32.mrb[59].mxu0 }
 0x16a   :  { %v2577_v21 = vadd.f32 %v4175_v3, %v5621_v62  ;;  %v4178_v27 = vadd.f32 %v4177_v20, %v4176_v6  ;;  %v4271_v28 = vpop.f32.mrb[59].mxu1 }
 0x16b   :  { %v4272_v29 = vadd.f32 %v4271_v28, %v4270_v13  ;;  %3127 = vmatmul.mubr.bf16.gmra.mrb[164].mxu0 %v3550_v2 }
 0x16c   :  { %v5896_v31 = vadd.f32 %v4269_v9, %v2577_v21  ;;  %v2580_v33 = vadd.f32 %v4178_v27, %v5642_v4  ;;  %3263 = vmatmul.mubr.bf16.gmra.mrb[164].mxu1 %v3552_v7  ;;  %3134 = vmatprep.mubr.bf16.mxu0 %v3567_v8  ;;  %v94_v4 = vld [vmem:[%s6206_s0 + $0x278] sm:$0xff]  ;;  %v3582_v8 = vcombine.low %v85_v14, %v93_v16  ;;  %v117_v14 = vld [vmem:[%s6206_s0 + $0x330] sm:$0xff] }
 0x16d   :  { %3270 = vmatprep.mubr.bf16.mxu1 %v3569_v24  ;;  %v3585_v61 = vcombine.high %v86_v23, %v94_v4  ;;  %v3584_v24 = vcombine.low %v86_v23, %v94_v4  ;;  %v3599_v21 = vcombine.high %v101_v47, %v109_v52  ;;  %v125_v16 = vld [vmem:[%s6206_s0 + $0x370] sm:$0xff]  ;;  %v118_v4 = vld [vmem:[%s6206_s0 + $0x338] sm:$0xff] }
 0x16e   :  { %v5905_v62 = vadd.f32 %v4272_v29, %v2580_v33  ;;  %v4179_v10 = vpop.f32.mrb[60].mxu0 }
 0x16f   :  { %v4273_v34 = vpop.f32.mrb[60].mxu1  ;;  %v4180_v35 = vpop.f32.mrb[61].mxu0 }
 0x170   :  { %v4181_v39 = vadd.f32 %v4180_v35, %v4179_v10  ;;  %v4274_v40 = vpop.f32.mrb[61].mxu1  ;;  %v4182_v41 = vpop.f32.mrb[62].mxu0 }
 0x171   :  { %v4275_v46 = vadd.f32 %v4274_v40, %v4273_v34  ;;  %v4276_v53 = vpop.f32.mrb[62].mxu1  ;;  %v4183_v56 = vpop.f32.mrb[63].mxu0 }
 0x172   :  { %v2585_v57 = vadd.f32 %v4181_v39, %v5679_v32  ;;  %v4184_v63 = vadd.f32 %v4183_v56, %v4182_v41  ;;  %v4277_v1 = vpop.f32.mrb[63].mxu1 }
 0x173   :  { %v4278_v2 = vadd.f32 %v4277_v1, %v4276_v53  ;;  %3135 = vmatmul.mubr.bf16.gmra.mrb[168].mxu0 %v3566_v37 }
 0x174   :  { %v5914_v3 = vadd.f32 %v4275_v46, %v2585_v57  ;;  %v2588_v5 = vadd.f32 %v4184_v63, %v5691_v38  ;;  %3271 = vmatmul.mubr.bf16.gmra.mrb[168].mxu1 %v3568_v42  ;;  %3142 = vmatprep.mubr.bf16.mxu0 %v3583_v43  ;;  %v110_v38 = vld [vmem:[%s6206_s0 + $0x2f8] sm:$0xff]  ;;  %v3598_v43 = vcombine.low %v101_v47, %v109_v52  ;;  %v133_v47 = vld [vmem:[%s6206_s0 + $0x3b0] sm:$0xff] }
 0x175   :  { %3278 = vmatprep.mubr.bf16.mxu1 %v3585_v61  ;;  %v3601_v33 = vcombine.high %v102_v36, %v110_v38  ;;  %v3600_v61 = vcombine.low %v102_v36, %v110_v38  ;;  %v3615_v57 = vcombine.high %v117_v14, %v125_v16  ;;  %v141_v52 = vld [vmem:[%s6206_s0 + $0x3f0] sm:$0xff]  ;;  %v134_v38 = vld [vmem:[%s6206_s0 + $0x3b8] sm:$0xff] }
 0x176   :  { %v5923_v32 = vadd.f32 %v4278_v2, %v2588_v5  ;;  %v4185_v58 = vpop.f32.mrb[64].mxu0 }
 0x177   :  { %v4279_v6 = vpop.f32.mrb[64].mxu1  ;;  %v4186_v7 = vpop.f32.mrb[65].mxu0 }
 0x178   :  { %v4187_v9 = vadd.f32 %v4186_v7, %v4185_v58  ;;  %v4280_v13 = vpop.f32.mrb[65].mxu1  ;;  %v4188_v20 = vpop.f32.mrb[66].mxu0 }
 0x179   :  { %v4281_v27 = vadd.f32 %v4280_v13, %v4279_v6  ;;  %v4282_v28 = vpop.f32.mrb[66].mxu1  ;;  %v4189_v29 = vpop.f32.mrb[67].mxu0 }
 0x17a   :  { %v2593_v10 = vadd.f32 %v4187_v9, %v5707_v59  ;;  %v4190_v34 = vadd.f32 %v4189_v29, %v4188_v20  ;;  %v4283_v35 = vpop.f32.mrb[67].mxu1 }
 0x17b   :  { %v4284_v37 = vadd.f32 %v4283_v35, %v4282_v28  ;;  %3143 = vmatmul.mubr.bf16.gmra.mrb[172].mxu0 %v3582_v8 }
 0x17c   :  { %v5932_v39 = vadd.f32 %v4281_v27, %v2593_v10  ;;  %v2596_v40 = vadd.f32 %v4190_v34, %v5716_v0  ;;  %3279 = vmatmul.mubr.bf16.gmra.mrb[172].mxu1 %v3584_v24  ;;  %3150 = vmatprep.mubr.bf16.mxu0 %v3599_v21  ;;  %v126_v0 = vld [vmem:[%s6206_s0 + $0x378] sm:$0xff]  ;;  %v3614_v21 = vcombine.low %v117_v14, %v125_v16  ;;  %v149_v14 = vld [vmem:[%s6206_s0 + $0x430] sm:$0xff] }
 0x17d   :  { %3286 = vmatprep.mubr.bf16.mxu1 %v3601_v33  ;;  %v3617_v5 = vcombine.high %v118_v4, %v126_v0  ;;  %v3616_v33 = vcombine.low %v118_v4, %v126_v0  ;;  %v3631_v10 = vcombine.high %v133_v47, %v141_v52  ;;  %v157_v16 = vld [vmem:[%s6206_s0 + $0x470] sm:$0xff]  ;;  %v150_v0 = vld [vmem:[%s6206_s0 + $0x438] sm:$0xff] }
 0x17e   :  { %v5941_v59 = vadd.f32 %v4284_v37, %v2596_v40  ;;  %v4191_v23 = vpop.f32.mrb[68].mxu0 }
 0x17f   :  { %v4285_v41 = vpop.f32.mrb[68].mxu1  ;;  %v4192_v42 = vpop.f32.mrb[69].mxu0 }
 0x180   :  { %v4193_v46 = vadd.f32 %v4192_v42, %v4191_v23  ;;  %v4286_v53 = vpop.f32.mrb[69].mxu1  ;;  %v4194_v56 = vpop.f32.mrb[70].mxu0 }
 0x181   :  { %v4287_v63 = vadd.f32 %v4286_v53, %v4285_v41  ;;  %v4288_v1 = vpop.f32.mrb[70].mxu1  ;;  %v4195_v2 = vpop.f32.mrb[71].mxu0 }
 0x182   :  { %v2601_v58 = vadd.f32 %v4193_v46, %v5725_v22  ;;  %v4196_v6 = vadd.f32 %v4195_v2, %v4194_v56  ;;  %v4289_v7 = vpop.f32.mrb[71].mxu1 }
 0x183   :  { %v4290_v8 = vadd.f32 %v4289_v7, %v4288_v1  ;;  %3151 = vmatmul.mubr.bf16.gmra.mrb[176].mxu0 %v3598_v43 }
 0x184   :  { %v5950_v9 = vadd.f32 %v4287_v63, %v2601_v58  ;;  %v2604_v13 = vadd.f32 %v4196_v6, %v5734_v26  ;;  %3287 = vmatmul.mubr.bf16.gmra.mrb[176].mxu1 %v3600_v61  ;;  %3158 = vmatprep.mubr.bf16.mxu0 %v3615_v57  ;;  %v142_v26 = vld [vmem:[%s6206_s0 + $0x3f8] sm:$0xff]  ;;  %v3630_v57 = vcombine.low %v133_v47, %v141_v52  ;;  %v165_v47 = vld [vmem:[%s6206_s0 + $0x4b0] sm:$0xff] }
 0x185   :  { %3294 = vmatprep.mubr.bf16.mxu1 %v3617_v5  ;;  %v3633_v40 = vcombine.high %v134_v38, %v142_v26  ;;  %v3632_v5 = vcombine.low %v134_v38, %v142_v26  ;;  %v3647_v58 = vcombine.high %v149_v14, %v157_v16  ;;  %v173_v52 = vld [vmem:[%s6206_s0 + $0x4f0] sm:$0xff]  ;;  %v166_v26 = vld [vmem:[%s6206_s0 + $0x4b8] sm:$0xff] }
 0x186   :  { %v5959_v22 = vadd.f32 %v4290_v8, %v2604_v13  ;;  %v4197_v36 = vpop.f32.mrb[72].mxu0 }
 0x187   :  { %v4291_v20 = vpop.f32.mrb[72].mxu1  ;;  %v4198_v24 = vpop.f32.mrb[73].mxu0 }
 0x188   :  { %v4199_v27 = vadd.f32 %v4198_v24, %v4197_v36  ;;  %v4292_v28 = vpop.f32.mrb[73].mxu1  ;;  %v4200_v29 = vpop.f32.mrb[74].mxu0 }
 0x189   :  { %v4293_v34 = vadd.f32 %v4292_v28, %v4291_v20  ;;  %v4294_v35 = vpop.f32.mrb[74].mxu1  ;;  %v4201_v37 = vpop.f32.mrb[75].mxu0 }
 0x18a   :  { %v2609_v23 = vadd.f32 %v4199_v27, %v5743_v50  ;;  %v4202_v41 = vadd.f32 %v4201_v37, %v4200_v29  ;;  %v4295_v42 = vpop.f32.mrb[75].mxu1 }
 0x18b   :  { %v4296_v43 = vadd.f32 %v4295_v42, %v4294_v35  ;;  %3159 = vmatmul.mubr.bf16.gmra.mrb[180].mxu0 %v3614_v21 }
 0x18c   :  { %v5968_v46 = vadd.f32 %v4293_v34, %v2609_v23  ;;  %v2612_v53 = vadd.f32 %v4202_v41, %v5752_v54  ;;  %3295 = vmatmul.mubr.bf16.gmra.mrb[180].mxu1 %v3616_v33  ;;  %3166 = vmatprep.mubr.bf16.mxu0 %v3631_v10  ;;  %v158_v54 = vld [vmem:[%s6206_s0 + $0x478] sm:$0xff]  ;;  %v3646_v10 = vcombine.low %v149_v14, %v157_v16  ;;  %v181_v14 = vld [vmem:[%s6206_s0 + $0x530] sm:$0xff] }
 0x18d   :  { %3302 = vmatprep.mubr.bf16.mxu1 %v3633_v40  ;;  %v3649_v13 = vcombine.high %v150_v0, %v158_v54  ;;  %v3648_v40 = vcombine.low %v150_v0, %v158_v54  ;;  %v3663_v23 = vcombine.high %v165_v47, %v173_v52  ;;  %v189_v16 = vld [vmem:[%s6206_s0 + $0x570] sm:$0xff]  ;;  %v182_v54 = vld [vmem:[%s6206_s0 + $0x538] sm:$0xff] }
 0x18e   :  { %v5977_v50 = vadd.f32 %v4296_v43, %v2612_v53  ;;  %v4203_v4 = vpop.f32.mrb[76].mxu0 }
 0x18f   :  { %v4297_v56 = vpop.f32.mrb[76].mxu1  ;;  %v4204_v61 = vpop.f32.mrb[77].mxu0 }
 0x190   :  { %v4205_v63 = vadd.f32 %v4204_v61, %v4203_v4  ;;  %v4298_v1 = vpop.f32.mrb[77].mxu1  ;;  %v4206_v2 = vpop.f32.mrb[78].mxu0 }
 0x191   :  { %v4299_v6 = vadd.f32 %v4298_v1, %v4297_v56  ;;  %v4300_v7 = vpop.f32.mrb[78].mxu1  ;;  %v4207_v8 = vpop.f32.mrb[79].mxu0 }
 0x192   :  { %v2617_v36 = vadd.f32 %v4205_v63, %v5761_v15  ;;  %v4208_v20 = vadd.f32 %v4207_v8, %v4206_v2  ;;  %v4301_v24 = vpop.f32.mrb[79].mxu1 }
 0x193   :  { %v4302_v21 = vadd.f32 %v4301_v24, %v4300_v7  ;;  %3167 = vmatmul.mubr.bf16.gmra.mrb[184].mxu0 %v3630_v57 }
 0x194   :  { %v5986_v27 = vadd.f32 %v4299_v6, %v2617_v36  ;;  %v2620_v28 = vadd.f32 %v4208_v20, %v5770_v19  ;;  %3303 = vmatmul.mubr.bf16.gmra.mrb[184].mxu1 %v3632_v5  ;;  %3174 = vmatprep.mubr.bf16.mxu0 %v3647_v58  ;;  %v174_v19 = vld [vmem:[%s6206_s0 + $0x4f8] sm:$0xff]  ;;  %v3662_v58 = vcombine.low %v165_v47, %v173_v52  ;;  %v197_v47 = vld [vmem:[%s6206_s0 + $0x5b0] sm:$0xff] }
 0x195   :  { %3310 = vmatprep.mubr.bf16.mxu1 %v3649_v13  ;;  %v3665_v53 = vcombine.high %v166_v26, %v174_v19  ;;  %v3664_v13 = vcombine.low %v166_v26, %v174_v19  ;;  %v3679_v36 = vcombine.high %v181_v14, %v189_v16  ;;  %v205_v52 = vld [vmem:[%s6206_s0 + $0x5f0] sm:$0xff]  ;;  %v198_v19 = vld [vmem:[%s6206_s0 + $0x5b8] sm:$0xff] }
 0x196   :  { %v5995_v15 = vadd.f32 %v4302_v21, %v2620_v28  ;;  %v4209_v38 = vpop.f32.mrb[80].mxu0 }
 0x197   :  { %v4303_v29 = vpop.f32.mrb[80].mxu1  ;;  %v4210_v33 = vpop.f32.mrb[81].mxu0 }
 0x198   :  { %v4211_v34 = vadd.f32 %v4210_v33, %v4209_v38  ;;  %v4304_v35 = vpop.f32.mrb[81].mxu1  ;;  %v4212_v37 = vpop.f32.mrb[82].mxu0 }
 0x199   :  { %v4305_v41 = vadd.f32 %v4304_v35, %v4303_v29  ;;  %v4306_v42 = vpop.f32.mrb[82].mxu1  ;;  %v4213_v43 = vpop.f32.mrb[83].mxu0 }
 0x19a   :  { %v2625_v4 = vadd.f32 %v4211_v34, %v5779_v45  ;;  %v4214_v56 = vadd.f32 %v4213_v43, %v4212_v37  ;;  %v4307_v61 = vpop.f32.mrb[83].mxu1 }
 0x19b   :  { %v4308_v57 = vadd.f32 %v4307_v61, %v4306_v42  ;;  %3175 = vmatmul.mubr.bf16.gmra.mrb[188].mxu0 %v3646_v10 }
 0x19c   :  { %v6004_v63 = vadd.f32 %v4305_v41, %v2625_v4  ;;  %v2628_v1 = vadd.f32 %v4214_v56, %v5788_v49  ;;  %3311 = vmatmul.mubr.bf16.gmra.mrb[188].mxu1 %v3648_v40  ;;  %3182 = vmatprep.mubr.bf16.mxu0 %v3663_v23  ;;  %v190_v49 = vld [vmem:[%s6206_s0 + $0x578] sm:$0xff]  ;;  %v3678_v23 = vcombine.low %v181_v14, %v189_v16  ;;  %v213_v14 = vld [vmem:[%s6206_s0 + $0x630] sm:$0xff] }
 0x19d   :  { %3318 = vmatprep.mubr.bf16.mxu1 %v3665_v53  ;;  %v3681_v28 = vcombine.high %v182_v54, %v190_v49  ;;  %v3680_v53 = vcombine.low %v182_v54, %v190_v49  ;;  %v3695_v4 = vcombine.high %v197_v47, %v205_v52 }
 0x19e   :  { %v6013_v45 = vadd.f32 %v4308_v57, %v2628_v1  ;;  %v4215_v0 = vpop.f32.mrb[84].mxu0 }
 0x19f   :  { %v4309_v2 = vpop.f32.mrb[84].mxu1  ;;  %v4216_v5 = vpop.f32.mrb[85].mxu0 }
 0x1a0   :  { %v4217_v6 = vadd.f32 %v4216_v5, %v4215_v0  ;;  %v4310_v7 = vpop.f32.mrb[85].mxu1  ;;  %v4218_v8 = vpop.f32.mrb[86].mxu0 }
 0x1a1   :  { %v4311_v20 = vadd.f32 %v4310_v7, %v4309_v2  ;;  %v4312_v24 = vpop.f32.mrb[86].mxu1  ;;  %v4219_v21 = vpop.f32.mrb[87].mxu0 }
 0x1a2   :  { %v2633_v38 = vadd.f32 %v4217_v6, %v5797_v12  ;;  %v4220_v29 = vadd.f32 %v4219_v21, %v4218_v8  ;;  %v4313_v33 = vpop.f32.mrb[87].mxu1  ;;  %v3711_v21 = vcombine.high %v213_v14, %v213_v14 }
 0x1a3   :  { %v4314_v10 = vadd.f32 %v4313_v33, %v4312_v24  ;;  %3183 = vmatmul.mubr.bf16.gmra.mrb[192].mxu0 %v3662_v58 }
 0x1a4   :  { %v6022_v34 = vadd.f32 %v4311_v20, %v2633_v38  ;;  %v2636_v35 = vadd.f32 %v4220_v29, %v5806_v17  ;;  %3319 = vmatmul.mubr.bf16.gmra.mrb[192].mxu1 %v3664_v13  ;;  %3190 = vmatprep.mubr.bf16.mxu0 %v3679_v36  ;;  %v206_v17 = vld [vmem:[%s6206_s0 + $0x5f8] sm:$0xff]  ;;  %v3694_v13 = vcombine.low %v197_v47, %v205_v52 }
 0x1a5   :  { %3326 = vmatprep.mubr.bf16.mxu1 %v3681_v28  ;;  %v3697_v1 = vcombine.high %v198_v19, %v206_v17  ;;  %v3696_v24 = vcombine.low %v198_v19, %v206_v17 }
 0x1a6   :  { %v6031_v12 = vadd.f32 %v4314_v10, %v2636_v35  ;;  %v4221_v26 = vpop.f32.mrb[88].mxu0 }
 0x1a7   :  { %v4315_v37 = vpop.f32.mrb[88].mxu1  ;;  %v4222_v40 = vpop.f32.mrb[89].mxu0 }
 0x1a8   :  { %v4223_v41 = vadd.f32 %v4222_v40, %v4221_v26  ;;  %v4316_v42 = vpop.f32.mrb[89].mxu1  ;;  %v4224_v43 = vpop.f32.mrb[90].mxu0 }
 0x1a9   :  { %v4317_v56 = vadd.f32 %v4316_v42, %v4315_v37  ;;  %v4318_v61 = vpop.f32.mrb[90].mxu1  ;;  %v4225_v57 = vpop.f32.mrb[91].mxu0 }
 0x1aa   :  { %v2641_v0 = vadd.f32 %v4223_v41, %v5815_v44  ;;  %v4226_v2 = vadd.f32 %v4225_v57, %v4224_v43  ;;  %v4319_v5 = vpop.f32.mrb[91].mxu1  ;;  %v214_v44 = vld [vmem:[%s6206_s0 + $0x638] sm:$0xff]  ;;  %v3710_v41 = vcombine.low %v213_v14, %v213_v14 }
 0x1ab   :  { %v4320_v58 = vadd.f32 %v4319_v5, %v4318_v61  ;;  %3191 = vmatmul.mubr.bf16.gmra.mrb[196].mxu0 %v3678_v23  ;;  %v3713_v33 = vcombine.high %v214_v44, %v214_v44 }
 0x1ac   :  { %v6040_v6 = vadd.f32 %v4317_v56, %v2641_v0  ;;  %v2644_v7 = vadd.f32 %v4226_v2, %v5821_v48  ;;  %3327 = vmatmul.mubr.bf16.gmra.mrb[196].mxu1 %v3680_v53  ;;  %3198 = vmatprep.mubr.bf16.mxu0 %v3695_v4  ;;  %v3712_v53 = vcombine.low %v214_v44, %v214_v44 }
 0x1ad   :  { %3334 = vmatprep.mubr.bf16.mxu1 %v3697_v1 }
 0x1ae   :  { %v6046_v16 = vadd.f32 %v4320_v58, %v2644_v7  ;;  %v4227_v54 = vpop.f32.mrb[92].mxu0 }
 0x1af   :  { %v4321_v49 = vpop.f32.mrb[92].mxu1  ;;  %v4228_v8 = vpop.f32.mrb[93].mxu0 }
 0x1b0   :  { %v4229_v36 = vadd.f32 %v4228_v8, %v4227_v54  ;;  %v4322_v20 = vpop.f32.mrb[93].mxu1  ;;  %v4230_v48 = vpop.f32.mrb[94].mxu0 }
 0x1b1   :  { %v4323_v28 = vadd.f32 %v4322_v20, %v4321_v49  ;;  %v4324_v38 = vpop.f32.mrb[94].mxu1  ;;  %v4231_v29 = vpop.f32.mrb[95].mxu0 }
 0x1b2   :  { %v2649_v10 = vadd.f32 %v4229_v36, %v5827_v11  ;;  %v4232_v35 = vadd.f32 %v4231_v29, %v4230_v48  ;;  %v4325_v26 = vpop.f32.mrb[95].mxu1 }
 0x1b3   :  { %v4326_v37 = vadd.f32 %v4325_v26, %v4324_v38  ;;  %3199 = vmatmul.mubr.bf16.gmra.mrb[200].mxu0 %v3694_v13 }
 0x1b4   :  { %v6052_v40 = vadd.f32 %v4323_v28, %v2649_v10  ;;  %v2652_v23 = vadd.f32 %v4232_v35, %v5836_v18  ;;  %3335 = vmatmul.mubr.bf16.gmra.mrb[200].mxu1 %v3696_v24  ;;  %3206 = vmatprep.mubr.bf16.mxu0 %v3711_v21 }
 0x1b5   :  { %3342 = vmatprep.mubr.bf16.mxu1 %v3713_v33 }
 0x1b6   :  { %v6055_v47 = vadd.f32 %v4326_v37, %v2652_v23  ;;  %v4233_v52 = vpop.f32.mrb[96].mxu0 }
 0x1b7   :  { %v4327_v19 = vpop.f32.mrb[96].mxu1  ;;  %v4234_v17 = vpop.f32.mrb[97].mxu0 }
 0x1b8   :  { %v4235_v42 = vadd.f32 %v4234_v17, %v4233_v52  ;;  %v4328_v43 = vpop.f32.mrb[97].mxu1  ;;  %v4236_v11 = vpop.f32.mrb[98].mxu0 }
 0x1b9   :  { %v4329_v4 = vadd.f32 %v4328_v43, %v4327_v19  ;;  %v4330_v56 = vpop.f32.mrb[98].mxu1  ;;  %v4237_v61 = vpop.f32.mrb[99].mxu0 }
 0x1ba   :  { %v2657_v57 = vadd.f32 %v4235_v42, %v5845_v51  ;;  %v4238_v1 = vadd.f32 %v4237_v61, %v4236_v11  ;;  %v4331_v18 = vpop.f32.mrb[99].mxu1 }
 0x1bb   :  { %v4332_v0 = vadd.f32 %v4331_v18, %v4330_v56  ;;  %3207 = vmatmul.mubr.bf16.gmra.mrb[204].mxu0 %v3710_v41 }
 0x1bc   :  { %v6058_v2 = vadd.f32 %v4329_v4, %v2657_v57  ;;  %v2660_v5 = vadd.f32 %v4238_v1, %v5854_v55  ;;  %3343 = vmatmul.mubr.bf16.gmra.mrb[204].mxu1 %v3712_v53 }
 0x1be   :  { %v6061_v58 = vadd.f32 %v4332_v0, %v2660_v5  ;;  %v4239_v7 = vpop.f32.mrb[100].mxu0 }
 0x1bf   :  { %v4333_v14 = vpop.f32.mrb[100].mxu1  ;;  %v4240_v54 = vpop.f32.mrb[101].mxu0 }
 0x1c0   :  { %v4241_v44 = vadd.f32 %v4240_v54, %v4239_v7  ;;  %v4334_v49 = vpop.f32.mrb[101].mxu1  ;;  %v4242_v8 = vpop.f32.mrb[102].mxu0 }
 0x1c1   :  { %v4335_v13 = vadd.f32 %v4334_v49, %v4333_v14  ;;  %v4336_v36 = vpop.f32.mrb[102].mxu1  ;;  %v4243_v51 = vpop.f32.mrb[103].mxu0 }
 0x1c2   :  { %v2665_v20 = vadd.f32 %v4241_v44, %v5863_v25  ;;  %v4337_v48 = vpop.f32.mrb[103].mxu1 }
 0x1c4   :  { %v6064_v24 = vadd.f32 %v4335_v13, %v2665_v20 }
 0x1c6   :  { %v4355_v21 = vpop.f32.mrb[104].mxu0 }
 0x1c7   :  { %v4449_v28 = vpop.f32.mrb[104].mxu1  ;;  %v4356_v55 = vpop.f32.mrb[105].mxu0 }
 0x1c8   :  { %v4357_v38 = vadd.f32 %v4356_v55, %v4355_v21  ;;  %v4450_v29 = vpop.f32.mrb[105].mxu1  ;;  %v4358_v33 = vpop.f32.mrb[106].mxu0 }
 0x1c9   :  { %v4451_v10 = vadd.f32 %v4450_v29, %v4449_v28  ;;  %v4452_v35 = vpop.f32.mrb[106].mxu1  ;;  %v4359_v26 = vpop.f32.mrb[107].mxu0 }
 0x1ca   :  { %v2841_v37 = vadd.f32 %v4357_v38, %v5878_v60  ;;  %v4360_v23 = vadd.f32 %v4359_v26, %v4358_v33  ;;  %v4453_v52 = vpop.f32.mrb[107].mxu1 }
 0x1cb   :  { %v4454_v19 = vadd.f32 %v4453_v52, %v4452_v35 }
 0x1cc   :  { %v6067_v17 = vadd.f32 %v4451_v10, %v2841_v37  ;;  %v2844_v25 = vadd.f32 %v4360_v23, %v5887_v30 }
 0x1ce   :  { %v6070_v41 = vadd.f32 %v4454_v19, %v2844_v25  ;;  %v4361_v42 = vpop.f32.mrb[108].mxu0 }
 0x1cf   :  { %v4455_v43 = vpop.f32.mrb[108].mxu1  ;;  %v4362_v11 = vpop.f32.mrb[109].mxu0 }
 0x1d0   :  { %v4363_v53 = vadd.f32 %v4362_v11, %v4361_v42  ;;  %v4456_v4 = vpop.f32.mrb[109].mxu1  ;;  %v4364_v56 = vpop.f32.mrb[110].mxu0 }
 0x1d1   :  { %v4457_v61 = vadd.f32 %v4456_v4, %v4455_v43  ;;  %v4458_v57 = vpop.f32.mrb[110].mxu1  ;;  %v4365_v1 = vpop.f32.mrb[111].mxu0 }
 0x1d2   :  { %v2849_v60 = vadd.f32 %v4363_v53, %v5896_v31  ;;  %v4366_v18 = vadd.f32 %v4365_v1, %v4364_v56  ;;  %v4459_v0 = vpop.f32.mrb[111].mxu1 }
 0x1d3   :  { %v4460_v5 = vadd.f32 %v4459_v0, %v4458_v57 }
 0x1d4   :  { %v6073_v7 = vadd.f32 %v4457_v61, %v2849_v60  ;;  %v2852_v30 = vadd.f32 %v4366_v18, %v5905_v62 }
 0x1d6   :  { %v6076_v14 = vadd.f32 %v4460_v5, %v2852_v30  ;;  %v4367_v54 = vpop.f32.mrb[112].mxu0 }
 0x1d7   :  { %v4461_v44 = vpop.f32.mrb[112].mxu1  ;;  %v4368_v49 = vpop.f32.mrb[113].mxu0 }
 0x1d8   :  { %v4369_v8 = vadd.f32 %v4368_v49, %v4367_v54  ;;  %v4462_v13 = vpop.f32.mrb[113].mxu1  ;;  %v4370_v36 = vpop.f32.mrb[114].mxu0 }
 0x1d9   :  { %v4463_v51 = vadd.f32 %v4462_v13, %v4461_v44  ;;  %v4464_v20 = vpop.f32.mrb[114].mxu1  ;;  %v4371_v48 = vpop.f32.mrb[115].mxu0 }
 0x1da   :  { %v2857_v31 = vadd.f32 %v4369_v8, %v5914_v3  ;;  %v4372_v21 = vadd.f32 %v4371_v48, %v4370_v36  ;;  %v4465_v28 = vpop.f32.mrb[115].mxu1 }
 0x1db   :  { %v4466_v55 = vadd.f32 %v4465_v28, %v4464_v20 }
 0x1dc   :  { %v6079_v38 = vadd.f32 %v4463_v51, %v2857_v31  ;;  %v2860_v62 = vadd.f32 %v4372_v21, %v5923_v32 }
 0x1de   :  { %v6082_v29 = vadd.f32 %v4466_v55, %v2860_v62  ;;  %v4373_v33 = vpop.f32.mrb[116].mxu0 }
 0x1df   :  { %v4467_v10 = vpop.f32.mrb[116].mxu1  ;;  %v4374_v35 = vpop.f32.mrb[117].mxu0 }
 0x1e0   :  { %v4375_v26 = vadd.f32 %v4374_v35, %v4373_v33  ;;  %v4468_v37 = vpop.f32.mrb[117].mxu1  ;;  %v4376_v23 = vpop.f32.mrb[118].mxu0 }
 0x1e1   :  { %v4469_v52 = vadd.f32 %v4468_v37, %v4467_v10  ;;  %v4470_v19 = vpop.f32.mrb[118].mxu1  ;;  %v4377_v25 = vpop.f32.mrb[119].mxu0 }
 0x1e2   :  { %v2865_v3 = vadd.f32 %v4375_v26, %v5932_v39  ;;  %v4378_v42 = vadd.f32 %v4377_v25, %v4376_v23  ;;  %v4471_v43 = vpop.f32.mrb[119].mxu1 }
 0x1e3   :  { %v4472_v11 = vadd.f32 %v4471_v43, %v4470_v19 }
 0x1e4   :  { %v6085_v53 = vadd.f32 %v4469_v52, %v2865_v3  ;;  %v2868_v32 = vadd.f32 %v4378_v42, %v5941_v59 }
 0x1e6   :  { %v6088_v4 = vadd.f32 %v4472_v11, %v2868_v32  ;;  %v4379_v56 = vpop.f32.mrb[120].mxu0 }
 0x1e7   :  { %v4473_v61 = vpop.f32.mrb[120].mxu1  ;;  %v4380_v57 = vpop.f32.mrb[121].mxu0 }
 0x1e8   :  { %v4381_v1 = vadd.f32 %v4380_v57, %v4379_v56  ;;  %v4474_v60 = vpop.f32.mrb[121].mxu1  ;;  %v4382_v18 = vpop.f32.mrb[122].mxu0 }
 0x1e9   :  { %v4475_v0 = vadd.f32 %v4474_v60, %v4473_v61  ;;  %v4476_v5 = vpop.f32.mrb[122].mxu1  ;;  %v4383_v30 = vpop.f32.mrb[123].mxu0 }
 0x1ea   :  { %v2873_v39 = vadd.f32 %v4381_v1, %v5950_v9  ;;  %v4384_v54 = vadd.f32 %v4383_v30, %v4382_v18  ;;  %v4477_v44 = vpop.f32.mrb[123].mxu1 }
 0x1eb   :  { %v4478_v49 = vadd.f32 %v4477_v44, %v4476_v5 }
 0x1ec   :  { %v6091_v8 = vadd.f32 %v4475_v0, %v2873_v39  ;;  %v2876_v59 = vadd.f32 %v4384_v54, %v5959_v22 }
 0x1ee   :  { %v6094_v13 = vadd.f32 %v4478_v49, %v2876_v59  ;;  %v4385_v36 = vpop.f32.mrb[124].mxu0 }
 0x1ef   :  { %v4479_v51 = vpop.f32.mrb[124].mxu1  ;;  %v4386_v20 = vpop.f32.mrb[125].mxu0 }
 0x1f0   :  { %v4387_v48 = vadd.f32 %v4386_v20, %v4385_v36  ;;  %v4480_v31 = vpop.f32.mrb[125].mxu1  ;;  %v4388_v21 = vpop.f32.mrb[126].mxu0 }
 0x1f1   :  { %v4481_v28 = vadd.f32 %v4480_v31, %v4479_v51  ;;  %v4482_v55 = vpop.f32.mrb[126].mxu1  ;;  %v4389_v62 = vpop.f32.mrb[127].mxu0 }
 0x1f2   :  { %v2881_v9 = vadd.f32 %v4387_v48, %v5968_v46  ;;  %v4390_v33 = vadd.f32 %v4389_v62, %v4388_v21  ;;  %v4483_v10 = vpop.f32.mrb[127].mxu1 }
 0x1f3   :  { %v4484_v35 = vadd.f32 %v4483_v10, %v4482_v55 }
 0x1f4   :  { %v6097_v26 = vadd.f32 %v4481_v28, %v2881_v9  ;;  %v2884_v22 = vadd.f32 %v4390_v33, %v5977_v50 }
 0x1f6   :  { %v6100_v37 = vadd.f32 %v4484_v35, %v2884_v22  ;;  %v4391_v23 = vpop.f32.mrb[128].mxu0 }
 0x1f7   :  { %v4485_v52 = vpop.f32.mrb[128].mxu1  ;;  %v4392_v19 = vpop.f32.mrb[129].mxu0 }
 0x1f8   :  { %v4393_v25 = vadd.f32 %v4392_v19, %v4391_v23  ;;  %v4486_v3 = vpop.f32.mrb[129].mxu1  ;;  %v4394_v42 = vpop.f32.mrb[130].mxu0 }
 0x1f9   :  { %v4487_v43 = vadd.f32 %v4486_v3, %v4485_v52  ;;  %v4488_v11 = vpop.f32.mrb[130].mxu1  ;;  %v4395_v32 = vpop.f32.mrb[131].mxu0 }
 0x1fa   :  { %v2889_v46 = vadd.f32 %v4393_v25, %v5986_v27  ;;  %v4396_v56 = vadd.f32 %v4395_v32, %v4394_v42  ;;  %v4489_v61 = vpop.f32.mrb[131].mxu1 }
 0x1fb   :  { %v4490_v57 = vadd.f32 %v4489_v61, %v4488_v11 }
 0x1fc   :  { %v6103_v1 = vadd.f32 %v4487_v43, %v2889_v46  ;;  %v2892_v50 = vadd.f32 %v4396_v56, %v5995_v15 }
 0x1fe   :  { %v6106_v60 = vadd.f32 %v4490_v57, %v2892_v50  ;;  %v4397_v18 = vpop.f32.mrb[132].mxu0 }
 0x1ff   :  { %v4491_v0 = vpop.f32.mrb[132].mxu1  ;;  %v4398_v5 = vpop.f32.mrb[133].mxu0 }
 0x200   :  { %v4399_v30 = vadd.f32 %v4398_v5, %v4397_v18  ;;  %v4492_v39 = vpop.f32.mrb[133].mxu1  ;;  %v4400_v54 = vpop.f32.mrb[134].mxu0 }
 0x201   :  { %v4493_v44 = vadd.f32 %v4492_v39, %v4491_v0  ;;  %v4494_v49 = vpop.f32.mrb[134].mxu1  ;;  %v4401_v59 = vpop.f32.mrb[135].mxu0 }
 0x202   :  { %v2897_v27 = vadd.f32 %v4399_v30, %v6004_v63  ;;  %v4402_v36 = vadd.f32 %v4401_v59, %v4400_v54  ;;  %v4495_v51 = vpop.f32.mrb[135].mxu1 }
 0x203   :  { %v4496_v20 = vadd.f32 %v4495_v51, %v4494_v49 }
 0x204   :  { %v6109_v48 = vadd.f32 %v4493_v44, %v2897_v27  ;;  %v2900_v15 = vadd.f32 %v4402_v36, %v6013_v45 }
 0x206   :  { %v6112_v31 = vadd.f32 %v4496_v20, %v2900_v15  ;;  %v4403_v21 = vpop.f32.mrb[136].mxu0 }
 0x207   :  { %v4497_v28 = vpop.f32.mrb[136].mxu1  ;;  %v4404_v55 = vpop.f32.mrb[137].mxu0 }
 0x208   :  { %v4405_v62 = vadd.f32 %v4404_v55, %v4403_v21  ;;  %v4498_v9 = vpop.f32.mrb[137].mxu1  ;;  %v4406_v33 = vpop.f32.mrb[138].mxu0 }
 0x209   :  { %v4499_v10 = vadd.f32 %v4498_v9, %v4497_v28  ;;  %v4500_v35 = vpop.f32.mrb[138].mxu1  ;;  %v4407_v22 = vpop.f32.mrb[139].mxu0 }
 0x20a   :  { %v2905_v63 = vadd.f32 %v4405_v62, %v6022_v34  ;;  %v4408_v23 = vadd.f32 %v4407_v22, %v4406_v33  ;;  %v4501_v52 = vpop.f32.mrb[139].mxu1 }
 0x20b   :  { %v4502_v19 = vadd.f32 %v4501_v52, %v4500_v35 }
 0x20c   :  { %v6115_v25 = vadd.f32 %v4499_v10, %v2905_v63  ;;  %v2908_v45 = vadd.f32 %v4408_v23, %v6031_v12 }
 0x20e   :  { %v6118_v3 = vadd.f32 %v4502_v19, %v2908_v45  ;;  %v4409_v42 = vpop.f32.mrb[140].mxu0 }
 0x20f   :  { %v4503_v43 = vpop.f32.mrb[140].mxu1  ;;  %v4410_v11 = vpop.f32.mrb[141].mxu0 }
 0x210   :  { %v4411_v32 = vadd.f32 %v4410_v11, %v4409_v42  ;;  %v4504_v46 = vpop.f32.mrb[141].mxu1  ;;  %v4412_v56 = vpop.f32.mrb[142].mxu0 }
 0x211   :  { %v4505_v61 = vadd.f32 %v4504_v46, %v4503_v43  ;;  %v4506_v57 = vpop.f32.mrb[142].mxu1  ;;  %v4413_v50 = vpop.f32.mrb[143].mxu0 }
 0x212   :  { %v2913_v34 = vadd.f32 %v4411_v32, %v6040_v6  ;;  %v4414_v18 = vadd.f32 %v4413_v50, %v4412_v56  ;;  %v4507_v0 = vpop.f32.mrb[143].mxu1 }
 0x213   :  { %v4508_v5 = vadd.f32 %v4507_v0, %v4506_v57 }
 0x214   :  { %v6121_v30 = vadd.f32 %v4505_v61, %v2913_v34  ;;  %v2916_v12 = vadd.f32 %v4414_v18, %v6046_v16 }
 0x216   :  { %v6124_v39 = vadd.f32 %v4508_v5, %v2916_v12  ;;  %v4415_v54 = vpop.f32.mrb[144].mxu0 }
 0x217   :  { %v4509_v44 = vpop.f32.mrb[144].mxu1  ;;  %v4416_v49 = vpop.f32.mrb[145].mxu0 }
 0x218   :  { %v4417_v59 = vadd.f32 %v4416_v49, %v4415_v54  ;;  %v4510_v27 = vpop.f32.mrb[145].mxu1  ;;  %v4418_v36 = vpop.f32.mrb[146].mxu0 }
 0x219   :  { %v4511_v51 = vadd.f32 %v4510_v27, %v4509_v44  ;;  %v4512_v20 = vpop.f32.mrb[146].mxu1  ;;  %v4419_v15 = vpop.f32.mrb[147].mxu0 }
 0x21a   :  { %v2921_v6 = vadd.f32 %v4417_v59, %v6052_v40  ;;  %v4420_v21 = vadd.f32 %v4419_v15, %v4418_v36  ;;  %v4513_v28 = vpop.f32.mrb[147].mxu1 }
 0x21b   :  { %v4514_v55 = vadd.f32 %v4513_v28, %v4512_v20 }
 0x21c   :  { %v6127_v62 = vadd.f32 %v4511_v51, %v2921_v6  ;;  %v2924_v16 = vadd.f32 %v4420_v21, %v6055_v47 }
 0x21e   :  { %v6130_v9 = vadd.f32 %v4514_v55, %v2924_v16  ;;  %v4421_v33 = vpop.f32.mrb[148].mxu0 }
 0x21f   :  { %v4515_v10 = vpop.f32.mrb[148].mxu1  ;;  %v4422_v35 = vpop.f32.mrb[149].mxu0 }
 0x220   :  { %v4423_v22 = vadd.f32 %v4422_v35, %v4421_v33  ;;  %v4516_v63 = vpop.f32.mrb[149].mxu1  ;;  %v4424_v23 = vpop.f32.mrb[150].mxu0 }
 0x221   :  { %v4517_v52 = vadd.f32 %v4516_v63, %v4515_v10  ;;  %v4518_v19 = vpop.f32.mrb[150].mxu1  ;;  %v4425_v45 = vpop.f32.mrb[151].mxu0 }
 0x222   :  { %v2929_v40 = vadd.f32 %v4423_v22, %v6058_v2  ;;  %v4426_v42 = vadd.f32 %v4425_v45, %v4424_v23  ;;  %v4519_v43 = vpop.f32.mrb[151].mxu1 }
 0x223   :  { %v4520_v11 = vadd.f32 %v4519_v43, %v4518_v19 }
 0x224   :  { %v6133_v32 = vadd.f32 %v4517_v52, %v2929_v40  ;;  %v2932_v47 = vadd.f32 %v4426_v42, %v6061_v58 }
 0x226   :  { %v6136_v46 = vadd.f32 %v4520_v11, %v2932_v47  ;;  %v4427_v56 = vpop.f32.mrb[152].mxu0 }
 0x227   :  { %v4521_v61 = vpop.f32.mrb[152].mxu1  ;;  %v4428_v57 = vpop.f32.mrb[153].mxu0 }
 0x228   :  { %v4429_v50 = vadd.f32 %v4428_v57, %v4427_v56  ;;  %v4522_v34 = vpop.f32.mrb[153].mxu1  ;;  %v4430_v18 = vpop.f32.mrb[154].mxu0 }
 0x229   :  { %v4523_v0 = vadd.f32 %v4522_v34, %v4521_v61  ;;  %v4524_v5 = vpop.f32.mrb[154].mxu1  ;;  %v4431_v12 = vpop.f32.mrb[155].mxu0 }
 0x22a   :  { %v2937_v2 = vadd.f32 %v4429_v50, %v6064_v24  ;;  %v4525_v54 = vpop.f32.mrb[155].mxu1 }
 0x22c   :  { %v6139_v44 = vadd.f32 %v4523_v0, %v2937_v2 }
 0x22e   :  { %v4543_v49 = vpop.f32.mrb[156].mxu0 }
 0x22f   :  { %v4637_v59 = vpop.f32.mrb[156].mxu1  ;;  %v4544_v27 = vpop.f32.mrb[157].mxu0 }
 0x230   :  { %v4545_v58 = vadd.f32 %v4544_v27, %v4543_v49  ;;  %v4638_v36 = vpop.f32.mrb[157].mxu1  ;;  %v4546_v51 = vpop.f32.mrb[158].mxu0 }
 0x231   :  { %v4639_v20 = vadd.f32 %v4638_v36, %v4637_v59  ;;  %v4640_v15 = vpop.f32.mrb[158].mxu1  ;;  %v4547_v6 = vpop.f32.mrb[159].mxu0 }
 0x232   :  { %v3113_v21 = vadd.f32 %v4545_v58, %v6067_v17  ;;  %v4548_v28 = vadd.f32 %v4547_v6, %v4546_v51  ;;  %v4641_v55 = vpop.f32.mrb[159].mxu1 }
 0x233   :  { %v4642_v16 = vadd.f32 %v4641_v55, %v4640_v15 }
 0x234   :  { %v3249_v33 = vadd.f32 %v4639_v20, %v3113_v21  ;;  %v3116_v24 = vadd.f32 %v4548_v28, %v6070_v41 }
 0x236   :  { %v3252_v10 = vadd.f32 %v4642_v16, %v3116_v24  ;;  %v4549_v35 = vpop.f32.mrb[160].mxu0  ;;  %v3350_v23 = vmax.f32 %v3249_v33, 0.0 }
 0x237   :  { %v4643_v22 = vpop.f32.mrb[160].mxu1  ;;  %v4550_v63 = vpop.f32.mrb[161].mxu0 }
 0x238   :  { %v3351_v52 = vmax.f32 %v3252_v10, 0.0  ;;  %v4551_v19 = vadd.f32 %v4550_v63, %v4549_v35  ;;  %v4644_v45 = vpop.f32.mrb[161].mxu1  ;;  %v4552_v40 = vpop.f32.mrb[162].mxu0 }
 0x239   :  { %v4645_v42 = vadd.f32 %v4644_v45, %v4643_v22  ;;  %v4646_v43 = vpop.f32.mrb[162].mxu1  ;;  %v4553_v11 = vpop.f32.mrb[163].mxu0 }
 0x23a   :  { %v3895_v47 = vpack.c.bf16 %v3351_v52, %v3350_v23  ;;  %v3121_v17 = vadd.f32 %v4551_v19, %v6073_v7  ;;  %v4554_v56 = vadd.f32 %v4553_v11, %v4552_v40  ;;  %v4647_v61 = vpop.f32.mrb[163].mxu1 }
 0x23b   :  { %v4648_v57 = vadd.f32 %v4647_v61, %v4646_v43 }
 0x23c   :  { %3896 = vst [vmem:[%s6208_s3] sm:$0xff] %v3895_v47   ;;  %v3257_v41 = vadd.f32 %v4645_v42, %v3121_v17  ;;  %v3124_v50 = vadd.f32 %v4554_v56, %v6076_v14 }
 0x23e   :  { %v3260_v34 = vadd.f32 %v4648_v57, %v3124_v50  ;;  %v4555_v18 = vpop.f32.mrb[164].mxu0  ;;  %v3352_v12 = vmax.f32 %v3257_v41, 0.0 }
 0x23f   :  { %v4649_v0 = vpop.f32.mrb[164].mxu1  ;;  %v4556_v5 = vpop.f32.mrb[165].mxu0 }
 0x240   :  { %v3353_v2 = vmax.f32 %v3260_v34, 0.0  ;;  %v4557_v54 = vadd.f32 %v4556_v5, %v4555_v18  ;;  %v4650_v49 = vpop.f32.mrb[165].mxu1  ;;  %v4558_v59 = vpop.f32.mrb[166].mxu0 }
 0x241   :  { %v4651_v7 = vadd.f32 %v4650_v49, %v4649_v0  ;;  %v4652_v27 = vpop.f32.mrb[166].mxu1  ;;  %v4559_v58 = vpop.f32.mrb[167].mxu0 }
 0x242   :  { %v3900_v36 = vpack.c.bf16 %v3353_v2, %v3352_v12  ;;  %v3129_v51 = vadd.f32 %v4557_v54, %v6079_v38  ;;  %v4560_v20 = vadd.f32 %v4559_v58, %v4558_v59  ;;  %v4653_v15 = vpop.f32.mrb[167].mxu1 }
 0x243   :  { %v4654_v6 = vadd.f32 %v4653_v15, %v4652_v27 }
 0x244   :  { %3952 = vst [vmem:[%s6208_s3 + $0x8] sm:$0xff] %v3900_v36   ;;  %v3265_v14 = vadd.f32 %v4651_v7, %v3129_v51  ;;  %v3132_v21 = vadd.f32 %v4560_v20, %v6082_v29 }
 0x246   :  { %v3268_v28 = vadd.f32 %v4654_v6, %v3132_v21  ;;  %v4561_v55 = vpop.f32.mrb[168].mxu0  ;;  %v3354_v24 = vmax.f32 %v3265_v14, 0.0 }
 0x247   :  { %v4655_v16 = vpop.f32.mrb[168].mxu1  ;;  %v4562_v33 = vpop.f32.mrb[169].mxu0 }
 0x248   :  { %v3355_v10 = vmax.f32 %v3268_v28, 0.0  ;;  %v4563_v35 = vadd.f32 %v4562_v33, %v4561_v55  ;;  %v4656_v22 = vpop.f32.mrb[169].mxu1  ;;  %v4564_v63 = vpop.f32.mrb[170].mxu0 }
 0x249   :  { %v4657_v38 = vadd.f32 %v4656_v22, %v4655_v16  ;;  %v4658_v23 = vpop.f32.mrb[170].mxu1  ;;  %v4565_v52 = vpop.f32.mrb[171].mxu0 }
 0x24a   :  { %v3905_v19 = vpack.c.bf16 %v3355_v10, %v3354_v24  ;;  %v3137_v45 = vadd.f32 %v4563_v35, %v6085_v53  ;;  %v4566_v40 = vadd.f32 %v4565_v52, %v4564_v63  ;;  %v4659_v42 = vpop.f32.mrb[171].mxu1 }
 0x24b   :  { %v4660_v43 = vadd.f32 %v4659_v42, %v4658_v23 }
 0x24c   :  { %3953 = vst [vmem:[%s6208_s3 + $0x10] sm:$0xff] %v3905_v19   ;;  %v3273_v29 = vadd.f32 %v4657_v38, %v3137_v45  ;;  %v3140_v11 = vadd.f32 %v4566_v40, %v6088_v4 }
 0x24e   :  { %v3276_v47 = vadd.f32 %v4660_v43, %v3140_v11  ;;  %v4567_v17 = vpop.f32.mrb[172].mxu0  ;;  %v3356_v57 = vmax.f32 %v3273_v29, 0.0 }
 0x24f   :  { %v4661_v56 = vpop.f32.mrb[172].mxu1  ;;  %v4568_v61 = vpop.f32.mrb[173].mxu0 }
 0x250   :  { %v3357_v41 = vmax.f32 %v3276_v47, 0.0  ;;  %v4569_v50 = vadd.f32 %v4568_v61, %v4567_v17  ;;  %v4662_v34 = vpop.f32.mrb[173].mxu1  ;;  %v4570_v18 = vpop.f32.mrb[174].mxu0 }
 0x251   :  { %v4663_v53 = vadd.f32 %v4662_v34, %v4661_v56  ;;  %v4664_v0 = vpop.f32.mrb[174].mxu1  ;;  %v4571_v5 = vpop.f32.mrb[175].mxu0 }
 0x252   :  { %v3910_v12 = vpack.c.bf16 %v3357_v41, %v3356_v57  ;;  %v3145_v2 = vadd.f32 %v4569_v50, %v6091_v8  ;;  %v4572_v54 = vadd.f32 %v4571_v5, %v4570_v18  ;;  %v4665_v49 = vpop.f32.mrb[175].mxu1 }
 0x253   :  { %v4666_v59 = vadd.f32 %v4665_v49, %v4664_v0 }
 0x254   :  { %3954 = vst [vmem:[%s6208_s3 + $0x18] sm:$0xff] %v3910_v12   ;;  %v3281_v4 = vadd.f32 %v4663_v53, %v3145_v2  ;;  %v3148_v7 = vadd.f32 %v4572_v54, %v6094_v13 }
 0x256   :  { %v3284_v27 = vadd.f32 %v4666_v59, %v3148_v7  ;;  %v4573_v58 = vpop.f32.mrb[176].mxu0  ;;  %v3358_v20 = vmax.f32 %v3281_v4, 0.0 }
 0x257   :  { %v4667_v36 = vpop.f32.mrb[176].mxu1  ;;  %v4574_v51 = vpop.f32.mrb[177].mxu0 }
 0x258   :  { %v3359_v15 = vmax.f32 %v3284_v27, 0.0  ;;  %v4575_v6 = vadd.f32 %v4574_v51, %v4573_v58  ;;  %v4668_v14 = vpop.f32.mrb[177].mxu1  ;;  %v4576_v21 = vpop.f32.mrb[178].mxu0 }
 0x259   :  { %v4669_v8 = vadd.f32 %v4668_v14, %v4667_v36  ;;  %v4670_v28 = vpop.f32.mrb[178].mxu1  ;;  %v4577_v55 = vpop.f32.mrb[179].mxu0 }
 0x25a   :  { %v3915_v16 = vpack.c.bf16 %v3359_v15, %v3358_v20  ;;  %v3153_v33 = vadd.f32 %v4575_v6, %v6097_v26  ;;  %v4578_v24 = vadd.f32 %v4577_v55, %v4576_v21  ;;  %v4671_v10 = vpop.f32.mrb[179].mxu1 }
 0x25b   :  { %v4672_v35 = vadd.f32 %v4671_v10, %v4670_v28 }
 0x25c   :  { %3955 = vst [vmem:[%s6208_s3 + $0x20] sm:$0xff] %v3915_v16   ;;  %v3289_v13 = vadd.f32 %v4669_v8, %v3153_v33  ;;  %v3156_v22 = vadd.f32 %v4578_v24, %v6100_v37 }
 0x25e   :  { %v3292_v63 = vadd.f32 %v4672_v35, %v3156_v22  ;;  %v4579_v38 = vpop.f32.mrb[180].mxu0  ;;  %v3360_v19 = vmax.f32 %v3289_v13, 0.0 }
 0x25f   :  { %v4673_v23 = vpop.f32.mrb[180].mxu1  ;;  %v4580_v52 = vpop.f32.mrb[181].mxu0 }
 0x260   :  { %v3361_v45 = vmax.f32 %v3292_v63, 0.0  ;;  %v4581_v40 = vadd.f32 %v4580_v52, %v4579_v38  ;;  %v4674_v42 = vpop.f32.mrb[181].mxu1  ;;  %v4582_v43 = vpop.f32.mrb[182].mxu0 }
 0x261   :  { %v4675_v26 = vadd.f32 %v4674_v42, %v4673_v23  ;;  %v4676_v29 = vpop.f32.mrb[182].mxu1  ;;  %v4583_v11 = vpop.f32.mrb[183].mxu0 }
 0x262   :  { %v3920_v47 = vpack.c.bf16 %v3361_v45, %v3360_v19  ;;  %v3161_v17 = vadd.f32 %v4581_v40, %v6103_v1  ;;  %v4584_v56 = vadd.f32 %v4583_v11, %v4582_v43  ;;  %v4677_v61 = vpop.f32.mrb[183].mxu1 }
 0x263   :  { %v4678_v57 = vadd.f32 %v4677_v61, %v4676_v29 }
 0x264   :  { %3956 = vst [vmem:[%s6208_s3 + $0x28] sm:$0xff] %v3920_v47   ;;  %v3297_v37 = vadd.f32 %v4675_v26, %v3161_v17  ;;  %v3164_v41 = vadd.f32 %v4584_v56, %v6106_v60 }
 0x266   :  { %v3300_v50 = vadd.f32 %v4678_v57, %v3164_v41  ;;  %v4585_v34 = vpop.f32.mrb[184].mxu0  ;;  %v3362_v0 = vmax.f32 %v3297_v37, 0.0 }
 0x267   :  { %v4679_v18 = vpop.f32.mrb[184].mxu1  ;;  %v4586_v53 = vpop.f32.mrb[185].mxu0 }
 0x268   :  { %v3363_v5 = vmax.f32 %v3300_v50, 0.0  ;;  %v4587_v12 = vadd.f32 %v4586_v53, %v4585_v34  ;;  %v4680_v2 = vpop.f32.mrb[185].mxu1  ;;  %v4588_v54 = vpop.f32.mrb[186].mxu0 }
 0x269   :  { %v4681_v1 = vadd.f32 %v4680_v2, %v4679_v18  ;;  %v4682_v49 = vpop.f32.mrb[186].mxu1  ;;  %v4589_v59 = vpop.f32.mrb[187].mxu0 }
 0x26a   :  { %v3925_v4 = vpack.c.bf16 %v3363_v5, %v3362_v0  ;;  %v3169_v7 = vadd.f32 %v4587_v12, %v6109_v48  ;;  %v4590_v27 = vadd.f32 %v4589_v59, %v4588_v54  ;;  %v4683_v58 = vpop.f32.mrb[187].mxu1 }
 0x26b   :  { %v4684_v36 = vadd.f32 %v4683_v58, %v4682_v49 }
 0x26c   :  { %3957 = vst [vmem:[%s6208_s3 + $0x30] sm:$0xff] %v3925_v4   ;;  %v3305_v60 = vadd.f32 %v4681_v1, %v3169_v7  ;;  %v3172_v51 = vadd.f32 %v4590_v27, %v6112_v31 }
 0x26e   :  { %v3308_v20 = vadd.f32 %v4684_v36, %v3172_v51  ;;  %v4591_v15 = vpop.f32.mrb[188].mxu0  ;;  %v3364_v21 = vmax.f32 %v3305_v60, 0.0 }
 0x26f   :  { %v4685_v6 = vpop.f32.mrb[188].mxu1  ;;  %v4592_v14 = vpop.f32.mrb[189].mxu0 }
 0x270   :  { %v3365_v8 = vmax.f32 %v3308_v20, 0.0  ;;  %v4593_v28 = vadd.f32 %v4592_v14, %v4591_v15  ;;  %v4686_v55 = vpop.f32.mrb[189].mxu1  ;;  %v4594_v16 = vpop.f32.mrb[190].mxu0 }
 0x271   :  { %v4687_v48 = vadd.f32 %v4686_v55, %v4685_v6  ;;  %v4688_v33 = vpop.f32.mrb[190].mxu1  ;;  %v4595_v24 = vpop.f32.mrb[191].mxu0 }
 0x272   :  { %v3930_v10 = vpack.c.bf16 %v3365_v8, %v3364_v21  ;;  %v3177_v35 = vadd.f32 %v4593_v28, %v6115_v25  ;;  %v4596_v13 = vadd.f32 %v4595_v24, %v4594_v16  ;;  %v4689_v22 = vpop.f32.mrb[191].mxu1 }
 0x273   :  { %v4690_v63 = vadd.f32 %v4689_v22, %v4688_v33 }
 0x274   :  { %3958 = vst [vmem:[%s6208_s3 + $0x38] sm:$0xff] %v3930_v10   ;;  %v3313_v31 = vadd.f32 %v4687_v48, %v3177_v35  ;;  %v3180_v38 = vadd.f32 %v4596_v13, %v6118_v3 }
 0x276   :  { %v3316_v23 = vadd.f32 %v4690_v63, %v3180_v38  ;;  %v4597_v52 = vpop.f32.mrb[192].mxu0  ;;  %v3366_v40 = vmax.f32 %v3313_v31, 0.0 }
 0x277   :  { %v4691_v19 = vpop.f32.mrb[192].mxu1  ;;  %v4598_v45 = vpop.f32.mrb[193].mxu0 }
 0x278   :  { %v3367_v42 = vmax.f32 %v3316_v23, 0.0  ;;  %v4599_v43 = vadd.f32 %v4598_v45, %v4597_v52  ;;  %v4692_v26 = vpop.f32.mrb[193].mxu1  ;;  %v4600_v29 = vpop.f32.mrb[194].mxu0 }
 0x279   :  { %v4693_v25 = vadd.f32 %v4692_v26, %v4691_v19  ;;  %v4694_v11 = vpop.f32.mrb[194].mxu1  ;;  %v4601_v47 = vpop.f32.mrb[195].mxu0 }
 0x27a   :  { %v3935_v17 = vpack.c.bf16 %v3367_v42, %v3366_v40  ;;  %v3185_v56 = vadd.f32 %v4599_v43, %v6121_v30  ;;  %v4602_v61 = vadd.f32 %v4601_v47, %v4600_v29  ;;  %v4695_v57 = vpop.f32.mrb[195].mxu1 }
 0x27b   :  { %v4696_v37 = vadd.f32 %v4695_v57, %v4694_v11 }
 0x27c   :  { %3959 = vst [vmem:[%s6208_s3 + $0x40] sm:$0xff] %v3935_v17   ;;  %v3321_v3 = vadd.f32 %v4693_v25, %v3185_v56  ;;  %v3188_v41 = vadd.f32 %v4602_v61, %v6124_v39 }
 0x27e   :  { %v3324_v50 = vadd.f32 %v4696_v37, %v3188_v41  ;;  %v4603_v34 = vpop.f32.mrb[196].mxu0  ;;  %v3368_v0 = vmax.f32 %v3321_v3, 0.0 }
 0x27f   :  { %v4697_v18 = vpop.f32.mrb[196].mxu1  ;;  %v4604_v53 = vpop.f32.mrb[197].mxu0 }
 0x280   :  { %v3369_v5 = vmax.f32 %v3324_v50, 0.0  ;;  %v4605_v12 = vadd.f32 %v4604_v53, %v4603_v34  ;;  %v4698_v2 = vpop.f32.mrb[197].mxu1  ;;  %v4606_v54 = vpop.f32.mrb[198].mxu0 }
 0x281   :  { %v4699_v30 = vadd.f32 %v4698_v2, %v4697_v18  ;;  %v4700_v1 = vpop.f32.mrb[198].mxu1  ;;  %v4607_v49 = vpop.f32.mrb[199].mxu0 }
 0x282   :  { %v3940_v59 = vpack.c.bf16 %v3369_v5, %v3368_v0  ;;  %v3193_v4 = vadd.f32 %v4605_v12, %v6127_v62  ;;  %v4608_v7 = vadd.f32 %v4607_v49, %v4606_v54  ;;  %v4701_v27 = vpop.f32.mrb[199].mxu1 }
 0x283   :  { %v4702_v58 = vadd.f32 %v4701_v27, %v4700_v1 }
 0x284   :  { %3960 = vst [vmem:[%s6208_s3 + $0x48] sm:$0xff] %v3940_v59   ;;  %v3329_v39 = vadd.f32 %v4699_v30, %v3193_v4  ;;  %v3196_v36 = vadd.f32 %v4608_v7, %v6130_v9 }
 0x286   :  { %v3332_v60 = vadd.f32 %v4702_v58, %v3196_v36  ;;  %v4609_v51 = vpop.f32.mrb[200].mxu0  ;;  %v3370_v6 = vmax.f32 %v3329_v39, 0.0 }
 0x287   :  { %v4703_v20 = vpop.f32.mrb[200].mxu1  ;;  %v4610_v15 = vpop.f32.mrb[201].mxu0 }
 0x288   :  { %v3371_v14 = vmax.f32 %v3332_v60, 0.0  ;;  %v4611_v21 = vadd.f32 %v4610_v15, %v4609_v51  ;;  %v4704_v8 = vpop.f32.mrb[201].mxu1  ;;  %v4612_v28 = vpop.f32.mrb[202].mxu0 }
 0x289   :  { %v4705_v62 = vadd.f32 %v4704_v8, %v4703_v20  ;;  %v4706_v55 = vpop.f32.mrb[202].mxu1  ;;  %v4613_v16 = vpop.f32.mrb[203].mxu0 }
 0x28a   :  { %v3945_v48 = vpack.c.bf16 %v3371_v14, %v3370_v6  ;;  %v3201_v33 = vadd.f32 %v4611_v21, %v6133_v32  ;;  %v4614_v24 = vadd.f32 %v4613_v16, %v4612_v28  ;;  %v4707_v10 = vpop.f32.mrb[203].mxu1 }
 0x28b   :  { %v4708_v35 = vadd.f32 %v4707_v10, %v4706_v55 }
 0x28c   :  { %3961 = vst [vmem:[%s6208_s3 + $0x50] sm:$0xff] %v3945_v48   ;;  %v3337_v9 = vadd.f32 %v4705_v62, %v3201_v33  ;;  %v3204_v13 = vadd.f32 %v4614_v24, %v6136_v46 }
 0x28e   :  { %v3340_v22 = vadd.f32 %v4708_v35, %v3204_v13  ;;  %v4615_v63 = vpop.f32.mrb[204].mxu0  ;;  %v3372_v23 = vmax.f32 %v3337_v9, 0.0 }
 0x28f   :  { %v4709_v31 = vpop.f32.mrb[204].mxu1  ;;  %v4616_v38 = vpop.f32.mrb[205].mxu0 }
 0x290   :  { %v3373_v52 = vmax.f32 %v3340_v22, 0.0  ;;  %v4617_v19 = vadd.f32 %v4616_v38, %v4615_v63  ;;  %v4710_v45 = vpop.f32.mrb[205].mxu1  ;;  %v4618_v40 = vpop.f32.mrb[206].mxu0 }
 0x291   :  { %v4711_v32 = vadd.f32 %v4710_v45, %v4709_v31  ;;  %v4712_v42 = vpop.f32.mrb[206].mxu1  ;;  %v4619_v43 = vpop.f32.mrb[207].mxu0 }
 0x292   :  { %v3950_v26 = vpack.c.bf16 %v3373_v52, %v3372_v23  ;;  %v3209_v29 = vadd.f32 %v4617_v19, %v6139_v44  ;;  %v4713_v25 = vpop.f32.mrb[207].mxu1 }
 0x294   :  { %3962 = vst [vmem:[%s6208_s3 + $0x58] sm:$0xff] %v3950_v26   ;;  %v3345_v46 = vadd.f32 %v4711_v32, %v3209_v29 }
 0x296   :  { %v3374_v11 = vmax.f32 %v3345_v46, 0.0 }
 0x298   :  { %v3891_v47 = vpack.c.bf16 %v3374_v11, %v3374_v11 }
 0x29a   :  { %3500 = vst [vmem:[%s6208_s3 + $0x60] sm:$0xf] %v3891_v47 }

// kernel: critic_forward.5
= control target key start
LH: loop header
LB: loop body
LE: loop exit
PB: predicated region body
PF: predicated region fallthrough
CT: control target
= control target key end

     0   :  { %s2052_s1 = inlined_call_operand.vmem [shape: bf16[1024,128], index: 1, kind: input, shape index: {}]   ;;  %s2053_s0 = inlined_call_operand.vmem [shape: bf16[88,1024], index: 0, kind: input, shape index: {}]   ;;  %s2054_s2 = inlined_call_operand.vmem [shape: f32[1,128], index: 2, kind: input, shape index: {}]   ;;  %s2055_s3 = inlined_call_operand.vmem [shape: bf16[88,128], index: 3, kind: output, shape index: {}]  }
   0x1   :  { %v1569_v0 = vld [vmem:[%s2052_s1 + $0x40] sm:$0xff]   ;;  %v1573_v4 = vld [vmem:[%s2052_s1 + $0x48] sm:$0xff]   ;;  %v1577_v8 = vld [vmem:[%s2052_s1 + $0x50] sm:$0xff]  }
   0x2   :  { %v1570_v1 = vld [vmem:[%s2052_s1 + $0xc0] sm:$0xff]   ;;  %1361 = vmatprep.subr.bf16.mxu0 %v1569_v0  ;;  %v1574_v5 = vld [vmem:[%s2052_s1 + $0xc8] sm:$0xff]   ;;  %v1578_v9 = vld [vmem:[%s2052_s1 + $0xd0] sm:$0xff]  }
   0x3   :  { %v1571_v2 = vld [vmem:[%s2052_s1] sm:$0xff]   ;;  %1413 = vmatprep.subr.bf16.mxu1 %v1570_v1  ;;  %v1575_v6 = vld [vmem:[%s2052_s1 + $0x8] sm:$0xff]   ;;  %v1579_v10 = vld [vmem:[%s2052_s1 + $0x10] sm:$0xff]  }
   0x4   :  { %v1572_v3 = vld [vmem:[%s2052_s1 + $0x80] sm:$0xff]   ;;  %1362 = vmatpush3.bf16.msra.mxu0 %v1571_v2  ;;  %v1576_v7 = vld [vmem:[%s2052_s1 + $0x88] sm:$0xff]   ;;  %v1580_v11 = vld [vmem:[%s2052_s1 + $0x90] sm:$0xff]  }
   0x5   :  { %1414 = vmatpush3.bf16.msra.mxu1 %v1572_v3  ;;  %1363 = vmatprep.subr.bf16.mxu0 %v1573_v4  ;;  %v1581_v12 = vld [vmem:[%s2052_s1 + $0x58] sm:$0xff]   ;;  %v1585_v16 = vld [vmem:[%s2052_s1 + $0x60] sm:$0xff]   ;;  %v1589_v20 = vld [vmem:[%s2052_s1 + $0x68] sm:$0xff]  }
   0x6   :  { %1415 = vmatprep.subr.bf16.mxu1 %v1574_v5  ;;  %v1582_v13 = vld [vmem:[%s2052_s1 + $0xd8] sm:$0xff]   ;;  %v1586_v17 = vld [vmem:[%s2052_s1 + $0xe0] sm:$0xff]   ;;  %v1590_v21 = vld [vmem:[%s2052_s1 + $0xe8] sm:$0xff]  }
   0x7   :  { %v1583_v14 = vld [vmem:[%s2052_s1 + $0x18] sm:$0xff]   ;;  %v1587_v18 = vld [vmem:[%s2052_s1 + $0x20] sm:$0xff]   ;;  %v1591_v22 = vld [vmem:[%s2052_s1 + $0x28] sm:$0xff]  }
   0x8   :  { %1364 = vmatpush3.bf16.msra.mxu0 %v1575_v6  ;;  %v1584_v15 = vld [vmem:[%s2052_s1 + $0x98] sm:$0xff]   ;;  %v1588_v19 = vld [vmem:[%s2052_s1 + $0xa0] sm:$0xff]   ;;  %v1592_v23 = vld [vmem:[%s2052_s1 + $0xa8] sm:$0xff]  }
   0x9   :  { %1416 = vmatpush3.bf16.msra.mxu1 %v1576_v7  ;;  %1365 = vmatprep.subr.bf16.mxu0 %v1577_v8  ;;  %v1593_v24 = vld [vmem:[%s2052_s1 + $0x70] sm:$0xff]   ;;  %v1597_v28 = vld [vmem:[%s2052_s1 + $0x78] sm:$0xff]   ;;  %v15_v32 = vld [vmem:[%s2053_s0] sm:$0xff] }
   0xa   :  { %1417 = vmatprep.subr.bf16.mxu1 %v1578_v9  ;;  %v1594_v25 = vld [vmem:[%s2052_s1 + $0xf0] sm:$0xff]   ;;  %v1598_v29 = vld [vmem:[%s2052_s1 + $0xf8] sm:$0xff]   ;;  %v19_v33 = vld [vmem:[%s2053_s0 + $0x20] sm:$0xff] }
   0xb   :  { %v1595_v26 = vld [vmem:[%s2052_s1 + $0x30] sm:$0xff]   ;;  %v1599_v30 = vld [vmem:[%s2052_s1 + $0x38] sm:$0xff]   ;;  %v16_v34 = vld [vmem:[%s2053_s0 + $0x8] sm:$0xff]  ;;  %v1198_v35 = vcombine.low %v15_v32, %v19_v33  ;;  %v1199_v36 = vcombine.high %v15_v32, %v19_v33 }
   0xc   :  { %1366 = vmatpush3.bf16.msra.mxu0 %v1579_v10  ;;  %v1596_v27 = vld [vmem:[%s2052_s1 + $0xb0] sm:$0xff]   ;;  %v1600_v31 = vld [vmem:[%s2052_s1 + $0xb8] sm:$0xff]   ;;  %v20_v37 = vld [vmem:[%s2053_s0 + $0x28] sm:$0xff] }
   0xd   :  { %1418 = vmatpush3.bf16.msra.mxu1 %v1580_v11  ;;  %1367 = vmatprep.subr.bf16.mxu0 %v1581_v12  ;;  %v1200_v38 = vcombine.low %v16_v34, %v20_v37  ;;  %v1201_v39 = vcombine.high %v16_v34, %v20_v37  ;;  %v1601_v40 = vld [vmem:[%s2052_s1 + $0x140] sm:$0xff]   ;;  %v1605_v44 = vld [vmem:[%s2052_s1 + $0x148] sm:$0xff]   ;;  %v1609_v56 = vld [vmem:[%s2052_s1 + $0x150] sm:$0xff]  }
   0xe   :  { %1419 = vmatprep.subr.bf16.mxu1 %v1582_v13  ;;  %838 = vmatprep.mubr.bf16.mxu0 %v1199_v36  ;;  %v1602_v41 = vld [vmem:[%s2052_s1 + $0x100] sm:$0xff]   ;;  %v24_v48 = vld [vmem:[%s2053_s0 + $0x48] sm:$0xff]  ;;  %v1610_v57 = vld [vmem:[%s2052_s1 + $0x110] sm:$0xff]  }
   0xf   :  { %918 = vmatprep.mubr.bf16.mxu1 %v1201_v39  ;;  %v1603_v42 = vld [vmem:[%s2052_s1 + $0x1c0] sm:$0xff]   ;;  %v28_v49 = vld [vmem:[%s2053_s0 + $0x68] sm:$0xff]  ;;  %v1611_v58 = vld [vmem:[%s2052_s1 + $0x1d0] sm:$0xff]  }
  0x10   :  { %1368 = vmatpush3.bf16.msra.mxu0 %v1583_v14  ;;  %v1604_v43 = vld [vmem:[%s2052_s1 + $0x180] sm:$0xff]   ;;  %v1209_v50 = vcombine.high %v24_v48, %v28_v49  ;;  %v1606_v51 = vld [vmem:[%s2052_s1 + $0x108] sm:$0xff]   ;;  %v1208_v53 = vcombine.low %v24_v48, %v28_v49  ;;  %v1612_v1 = vld [vmem:[%s2052_s1 + $0x190] sm:$0xff]  }
  0x11   :  { %1420 = vmatpush3.bf16.msra.mxu1 %v1584_v15  ;;  %1369 = vmatprep.subr.bf16.mxu0 %v1585_v16  ;;  %v23_v45 = vld [vmem:[%s2053_s0 + $0x40] sm:$0xff]  ;;  %v1607_v54 = vld [vmem:[%s2052_s1 + $0x1c8] sm:$0xff]   ;;  %v1613_v3 = vld [vmem:[%s2052_s1 + $0x158] sm:$0xff]  }
  0x12   :  { %1421 = vmatprep.subr.bf16.mxu1 %v1586_v17  ;;  %v27_v46 = vld [vmem:[%s2053_s0 + $0x60] sm:$0xff]  ;;  %v1608_v55 = vld [vmem:[%s2052_s1 + $0x188] sm:$0xff]   ;;  %v1614_v5 = vld [vmem:[%s2052_s1 + $0x118] sm:$0xff]  }
  0x13   :  { %v1207_v47 = vcombine.high %v23_v45, %v27_v46  ;;  %v1206_v52 = vcombine.low %v23_v45, %v27_v46  ;;  %v31_v59 = vld [vmem:[%s2053_s0 + $0x80] sm:$0xff]  ;;  %v32_v61 = vld [vmem:[%s2053_s0 + $0x88] sm:$0xff]  ;;  %v1615_v6 = vld [vmem:[%s2052_s1 + $0x1d8] sm:$0xff]  }
  0x14   :  { %1370 = vmatpush3.bf16.msra.mxu0 %v1587_v18  ;;  %v35_v60 = vld [vmem:[%s2053_s0 + $0xa0] sm:$0xff]  ;;  %v36_v62 = vld [vmem:[%s2053_s0 + $0xa8] sm:$0xff]  ;;  %v1616_v7 = vld [vmem:[%s2052_s1 + $0x198] sm:$0xff]  }
  0x15   :  { %1422 = vmatpush3.bf16.msra.mxu1 %v1588_v19  ;;  %1371 = vmatprep.subr.bf16.mxu0 %v1589_v20  ;;  %v1215_v63 = vcombine.high %v31_v59, %v35_v60  ;;  %v1217_v0 = vcombine.high %v32_v61, %v36_v62  ;;  %v1214_v2 = vcombine.low %v31_v59, %v35_v60  ;;  %v39_v8 = vld [vmem:[%s2053_s0 + $0xc0] sm:$0xff]  ;;  %v40_v10 = vld [vmem:[%s2053_s0 + $0xc8] sm:$0xff]  ;;  %v1626_v32 = vld [vmem:[%s2052_s1 + $0x130] sm:$0xff]  }
  0x16   :  { %1423 = vmatprep.subr.bf16.mxu1 %v1590_v21  ;;  %v1216_v4 = vcombine.low %v32_v61, %v36_v62  ;;  %v43_v9 = vld [vmem:[%s2053_s0 + $0xe0] sm:$0xff]  ;;  %v44_v12 = vld [vmem:[%s2053_s0 + $0xe8] sm:$0xff]  ;;  %v1627_v34 = vld [vmem:[%s2052_s1 + $0x1f0] sm:$0xff]  }
  0x17   :  { %v1223_v11 = vcombine.high %v39_v8, %v43_v9  ;;  %v1225_v13 = vcombine.high %v40_v10, %v44_v12  ;;  %v1617_v14 = vld [vmem:[%s2052_s1 + $0x160] sm:$0xff]   ;;  %v1222_v16 = vcombine.low %v39_v8, %v43_v9  ;;  %v1224_v18 = vcombine.low %v40_v10, %v44_v12  ;;  %v1621_v20 = vld [vmem:[%s2052_s1 + $0x168] sm:$0xff]   ;;  %v1630_v39 = vld [vmem:[%s2052_s1 + $0x1b0] sm:$0xff]  }
  0x18   :  { %1372 = vmatpush3.bf16.msra.mxu0 %v1591_v22  ;;  %v1618_v15 = vld [vmem:[%s2052_s1 + $0x120] sm:$0xff]   ;;  %v56_v37 = vld [vmem:[%s2053_s0 + $0x148] sm:$0xff]  ;;  %v21_v45 = vld [vmem:[%s2053_s0 + $0x30] sm:$0xff] }
  0x19   :  { %1424 = vmatpush3.bf16.msra.mxu1 %v1592_v23  ;;  %1373 = vmatprep.subr.bf16.mxu0 %v1593_v24  ;;  %v1619_v17 = vld [vmem:[%s2052_s1 + $0x1e0] sm:$0xff]   ;;  %v48_v24 = vld [vmem:[%s2053_s0 + $0x108] sm:$0xff]  ;;  %v22_v48 = vld [vmem:[%s2053_s0 + $0x38] sm:$0xff]  ;;  %v1240_v49 = vcombine.low %v56_v37, %v56_v37 }
  0x1a   :  { %1425 = vmatprep.subr.bf16.mxu1 %v1594_v25  ;;  %v1620_v19 = vld [vmem:[%s2052_s1 + $0x1a0] sm:$0xff]   ;;  %v52_v25 = vld [vmem:[%s2053_s0 + $0x128] sm:$0xff]  ;;  %v33_v60 = vld [vmem:[%s2053_s0 + $0x90] sm:$0xff] }
  0x1b   :  { %v47_v21 = vld [vmem:[%s2053_s0 + $0x100] sm:$0xff]  ;;  %v1232_v33 = vcombine.low %v48_v24, %v52_v25  ;;  %v37_v61 = vld [vmem:[%s2053_s0 + $0xb0] sm:$0xff]  ;;  %v34_v62 = vld [vmem:[%s2053_s0 + $0x98] sm:$0xff] }
  0x1c   :  { %1374 = vmatpush3.bf16.msra.mxu0 %v1595_v26  ;;  %v51_v22 = vld [vmem:[%s2053_s0 + $0x120] sm:$0xff]  ;;  %v1233_v26 = vcombine.high %v48_v24, %v52_v25  ;;  %v1218_v8 = vcombine.low %v33_v60, %v37_v61  ;;  %v49_v12 = vld [vmem:[%s2053_s0 + $0x110] sm:$0xff] }
  0x1d   :  { %1426 = vmatpush3.bf16.msra.mxu1 %v1596_v27  ;;  %1375 = vmatprep.subr.bf16.mxu0 %v1597_v28  ;;  %v1231_v23 = vcombine.high %v47_v21, %v51_v22  ;;  %v1622_v27 = vld [vmem:[%s2052_s1 + $0x128] sm:$0xff]  }
  0x1e   :  { %1427 = vmatprep.subr.bf16.mxu1 %v1598_v29  ;;  %v1623_v28 = vld [vmem:[%s2052_s1 + $0x1e8] sm:$0xff]  }
  0x1f   :  { %v1624_v29 = vld [vmem:[%s2052_s1 + $0x1a8] sm:$0xff]  }
  0x20   :  { %1376 = vmatpush3.bf16.msra.mxu0 %v1599_v30  ;;  %v1625_v30 = vld [vmem:[%s2052_s1 + $0x170] sm:$0xff]  }
  0x21   :  { %1428 = vmatpush3.bf16.msra.mxu1 %v1600_v31  ;;  %1465 = vmatprep.subr.bf16.mxu0 %v1601_v40  ;;  %v1230_v31 = vcombine.low %v47_v21, %v51_v22  ;;  %v1633_v40 = vld [vmem:[%s2052_s1 + $0x178] sm:$0xff]  }
  0x22   :  { %1517 = vmatprep.subr.bf16.mxu1 %v1603_v42  ;;  %v1635_v42 = vld [vmem:[%s2052_s1 + $0x1f8] sm:$0xff]  }
  0x23   :  { %839 = vmatmul.mubr.bf16.vlgmr.msra.gmra.mrb[0].mxu0 %v1198_v35  ;;  %v55_v35 = vld [vmem:[%s2053_s0 + $0x140] sm:$0xff]  ;;  %v58_v21 = vld [vmem:[%s2053_s0 + $0x158] sm:$0xff] }
  0x24   :  { %919 = vmatmul.mubr.bf16.vlgmr.msra.gmra.mrb[0].mxu1 %v1200_v38  ;;  %1466 = vmatpush3.bf16.msra.mxu0 %v1602_v41  ;;  %v1239_v36 = vcombine.high %v55_v35, %v55_v35  ;;  %v1241_v38 = vcombine.high %v56_v37, %v56_v37  ;;  %v1634_v41 = vld [vmem:[%s2052_s1 + $0x138] sm:$0xff]   ;;  %v1238_v46 = vcombine.low %v55_v35, %v55_v35 }
  0x25   :  { %1518 = vmatpush3.bf16.msra.mxu1 %v1604_v43  ;;  %1467 = vmatprep.subr.bf16.mxu0 %v1605_v44  ;;  %v1636_v43 = vld [vmem:[%s2052_s1 + $0x1b8] sm:$0xff]   ;;  %v17_v44 = vld [vmem:[%s2053_s0 + $0x10] sm:$0xff]  ;;  %v1245_v25 = vcombine.high %v58_v21, %v58_v21 }
  0x26   :  { %846 = vmatprep.mubr.bf16.mxu0 %v1207_v47  ;;  %926 = vmatprep.mubr.bf16.mxu1 %v1209_v50  ;;  %v18_v47 = vld [vmem:[%s2053_s0 + $0x18] sm:$0xff]  ;;  %v1203_v50 = vcombine.high %v17_v44, %v21_v45 }
  0x27   :  { %1519 = vmatprep.subr.bf16.mxu1 %v1607_v54  ;;  %v26_v54 = vld [vmem:[%s2053_s0 + $0x58] sm:$0xff] }
  0x28   :  { %1468 = vmatpush3.bf16.msra.mxu0 %v1606_v51  ;;  %v1205_v51 = vcombine.high %v18_v47, %v22_v48 }
  0x29   :  { %1520 = vmatpush3.bf16.msra.mxu1 %v1608_v55  ;;  %1469 = vmatprep.subr.bf16.mxu0 %v1609_v56  ;;  %v30_v55 = vld [vmem:[%s2053_s0 + $0x78] sm:$0xff]  ;;  %v1202_v56 = vcombine.low %v17_v44, %v21_v45 }
  0x2a   :  { %1521 = vmatprep.subr.bf16.mxu1 %v1611_v58  ;;  %v1213_v59 = vcombine.high %v26_v54, %v30_v55 }
  0x2b   :  { %847 = vmatmul.mubr.bf16.gmra.mrb[4].mxu0 %v1206_v52  ;;  %v25_v52 = vld [vmem:[%s2053_s0 + $0x50] sm:$0xff] }
  0x2c   :  { %927 = vmatmul.mubr.bf16.gmra.mrb[4].mxu1 %v1208_v53  ;;  %1470 = vmatpush3.bf16.msra.mxu0 %v1610_v57  ;;  %v29_v53 = vld [vmem:[%s2053_s0 + $0x70] sm:$0xff]  ;;  %v1204_v57 = vcombine.low %v18_v47, %v22_v48 }
  0x2d   :  { %854 = vmatprep.mubr.bf16.mxu0 %v1215_v63  ;;  %934 = vmatprep.mubr.bf16.mxu1 %v1217_v0  ;;  %v1211_v58 = vcombine.high %v25_v52, %v29_v53  ;;  %v38_v63 = vld [vmem:[%s2053_s0 + $0xb8] sm:$0xff]  ;;  %v1210_v0 = vcombine.low %v25_v52, %v29_v53 }
  0x2e   :  { %1522 = vmatpush3.bf16.msra.mxu1 %v1612_v1  ;;  %1471 = vmatprep.subr.bf16.mxu0 %v1613_v3  ;;  %v1212_v1 = vcombine.low %v26_v54, %v30_v55  ;;  %v1221_v3 = vcombine.high %v34_v62, %v38_v63  ;;  %v1220_v9 = vcombine.low %v34_v62, %v38_v63 }
  0x2f   :  { %1523 = vmatprep.subr.bf16.mxu1 %v1615_v6  ;;  %v42_v6 = vld [vmem:[%s2053_s0 + $0xd8] sm:$0xff] }
  0x30   :  { %1472 = vmatpush3.bf16.msra.mxu0 %v1614_v5  ;;  %v45_v5 = vld [vmem:[%s2053_s0 + $0xf0] sm:$0xff] }
  0x31   :  { %1473 = vmatprep.subr.bf16.mxu0 %v1617_v14  ;;  %v50_v14 = vld [vmem:[%s2053_s0 + $0x118] sm:$0xff] }
  0x32   :  { %1524 = vmatpush3.bf16.msra.mxu1 %v1616_v7  ;;  %v46_v7 = vld [vmem:[%s2053_s0 + $0xf8] sm:$0xff] }
  0x33   :  { %855 = vmatmul.mubr.bf16.gmra.mrb[8].mxu0 %v1214_v2  ;;  %1525 = vmatprep.subr.bf16.mxu1 %v1619_v17  ;;  %v1219_v2 = vcombine.high %v33_v60, %v37_v61  ;;  %v1228_v17 = vcombine.low %v42_v6, %v46_v7 }
  0x34   :  { %935 = vmatmul.mubr.bf16.gmra.mrb[8].mxu1 %v1216_v4  ;;  %862 = vmatprep.mubr.bf16.mxu0 %v1223_v11  ;;  %v41_v4 = vld [vmem:[%s2053_s0 + $0xd0] sm:$0xff]  ;;  %v1229_v11 = vcombine.high %v42_v6, %v46_v7 }
  0x35   :  { %942 = vmatprep.mubr.bf16.mxu1 %v1225_v13  ;;  %1474 = vmatpush3.bf16.msra.mxu0 %v1618_v15  ;;  %v1227_v10 = vcombine.high %v41_v4, %v45_v5  ;;  %v53_v13 = vld [vmem:[%s2053_s0 + $0x130] sm:$0xff]  ;;  %v54_v15 = vld [vmem:[%s2053_s0 + $0x138] sm:$0xff] }
  0x36   :  { %1526 = vmatpush3.bf16.msra.mxu1 %v1620_v19  ;;  %1475 = vmatprep.subr.bf16.mxu0 %v1621_v20  ;;  %v1237_v19 = vcombine.high %v50_v14, %v54_v15  ;;  %v57_v20 = vld [vmem:[%s2053_s0 + $0x150] sm:$0xff]  ;;  %v1234_v22 = vcombine.low %v49_v12, %v53_v13 }
  0x37   :  { %1527 = vmatprep.subr.bf16.mxu1 %v1623_v28  ;;  %v1243_v24 = vcombine.high %v57_v20, %v57_v20 }
  0x39   :  { %1476 = vmatpush3.bf16.msra.mxu0 %v1622_v27  ;;  %v1244_v27 = vcombine.low %v58_v21, %v58_v21 }
  0x3a   :  { %1528 = vmatpush3.bf16.msra.mxu1 %v1624_v29  ;;  %1477 = vmatprep.subr.bf16.mxu0 %v1625_v30  ;;  %v1988_v30 = vld [vmem:[%s2054_s2] ss:$0 sm:$0xff] }
  0x3b   :  { %863 = vmatmul.mubr.bf16.gmra.mrb[12].mxu0 %v1222_v16  ;;  %1529 = vmatprep.subr.bf16.mxu1 %v1627_v34  ;;  %v1226_v16 = vcombine.low %v41_v4, %v45_v5 }
  0x3c   :  { %943 = vmatmul.mubr.bf16.gmra.mrb[12].mxu1 %v1224_v18  ;;  %870 = vmatprep.mubr.bf16.mxu0 %v1231_v23  ;;  %v1235_v18 = vcombine.high %v49_v12, %v53_v13  ;;  %v1236_v23 = vcombine.low %v50_v14, %v54_v15 }
  0x3d   :  { %950 = vmatprep.mubr.bf16.mxu1 %v1233_v26  ;;  %1478 = vmatpush3.bf16.msra.mxu0 %v1626_v32  ;;  %v1242_v26 = vcombine.low %v57_v20, %v57_v20 }
  0x3e   :  { %1530 = vmatpush3.bf16.msra.mxu1 %v1630_v39  ;;  %1479 = vmatprep.subr.bf16.mxu0 %v1633_v40 }
  0x3f   :  { %1531 = vmatprep.subr.bf16.mxu1 %v1635_v42 }
  0x41   :  { %1480 = vmatpush3.bf16.msra.mxu0 %v1634_v41 }
  0x42   :  { %1532 = vmatpush3.bf16.msra.mxu1 %v1636_v43 }
  0x43   :  { %871 = vmatmul.mubr.bf16.gmra.mrb[16].mxu0 %v1230_v31 }
  0x44   :  { %951 = vmatmul.mubr.bf16.gmra.mrb[16].mxu1 %v1232_v33  ;;  %878 = vmatprep.mubr.bf16.mxu0 %v1239_v36 }
  0x45   :  { %958 = vmatprep.mubr.bf16.mxu1 %v1241_v38 }
  0x4b   :  { %879 = vmatmul.mubr.bf16.gmra.mrb[20].mxu0 %v1238_v46 }
  0x4c   :  { %959 = vmatmul.mubr.bf16.gmra.mrb[20].mxu1 %v1240_v49  ;;  %998 = vmatprep.mubr.bf16.mxu0 %v1203_v50 }
  0x4d   :  { %1078 = vmatprep.mubr.bf16.mxu1 %v1205_v51 }
  0x53   :  { %999 = vmatmul.mubr.bf16.vlgmr.msra.gmra.mrb[24].mxu0 %v1202_v56 }
  0x54   :  { %1079 = vmatmul.mubr.bf16.vlgmr.msra.gmra.mrb[24].mxu1 %v1204_v57  ;;  %1006 = vmatprep.mubr.bf16.mxu0 %v1211_v58 }
  0x55   :  { %1086 = vmatprep.mubr.bf16.mxu1 %v1213_v59 }
  0x5b   :  { %1007 = vmatmul.mubr.bf16.gmra.mrb[28].mxu0 %v1210_v0 }
  0x5c   :  { %1087 = vmatmul.mubr.bf16.gmra.mrb[28].mxu1 %v1212_v1  ;;  %1014 = vmatprep.mubr.bf16.mxu0 %v1219_v2 }
  0x5d   :  { %1094 = vmatprep.mubr.bf16.mxu1 %v1221_v3 }
  0x63   :  { %1015 = vmatmul.mubr.bf16.gmra.mrb[32].mxu0 %v1218_v8 }
  0x64   :  { %1095 = vmatmul.mubr.bf16.gmra.mrb[32].mxu1 %v1220_v9  ;;  %1022 = vmatprep.mubr.bf16.mxu0 %v1227_v10 }
  0x65   :  { %1102 = vmatprep.mubr.bf16.mxu1 %v1229_v11 }
  0x6b   :  { %1023 = vmatmul.mubr.bf16.gmra.mrb[36].mxu0 %v1226_v16 }
  0x6c   :  { %1103 = vmatmul.mubr.bf16.gmra.mrb[36].mxu1 %v1228_v17  ;;  %1030 = vmatprep.mubr.bf16.mxu0 %v1235_v18 }
  0x6d   :  { %1110 = vmatprep.mubr.bf16.mxu1 %v1237_v19 }
  0x73   :  { %1031 = vmatmul.mubr.bf16.gmra.mrb[40].mxu0 %v1234_v22 }
  0x74   :  { %1111 = vmatmul.mubr.bf16.gmra.mrb[40].mxu1 %v1236_v23  ;;  %1038 = vmatprep.mubr.bf16.mxu0 %v1243_v24 }
  0x75   :  { %1118 = vmatprep.mubr.bf16.mxu1 %v1245_v25 }
  0x7b   :  { %1039 = vmatmul.mubr.bf16.gmra.mrb[44].mxu0 %v1242_v26 }
  0x7c   :  { %1119 = vmatmul.mubr.bf16.gmra.mrb[44].mxu1 %v1244_v27 }
  0xf6   :  { %v1377_v28 = vpop.f32.mrb[0].mxu0 }
  0xf7   :  { %v1429_v29 = vpop.f32.mrb[0].mxu1  ;;  %v1378_v31 = vpop.f32.mrb[1].mxu0 }
  0xf8   :  { %v1379_v32 = vadd.f32 %v1378_v31, %v1377_v28  ;;  %v1430_v33 = vpop.f32.mrb[1].mxu1  ;;  %v1380_v34 = vpop.f32.mrb[2].mxu0 }
  0xf9   :  { %v1431_v35 = vadd.f32 %v1430_v33, %v1429_v29  ;;  %v1432_v36 = vpop.f32.mrb[2].mxu1  ;;  %v1381_v37 = vpop.f32.mrb[3].mxu0 }
  0xfa   :  { %v841_v38 = vadd.f32 %v1379_v32, %v1988_v30  ;;  %v1382_v39 = vadd.f32 %v1381_v37, %v1380_v34  ;;  %v1433_v40 = vpop.f32.mrb[3].mxu1 }
  0xfb   :  { %v1434_v41 = vadd.f32 %v1433_v40, %v1432_v36 }
  0xfc   :  { %v1991_v42 = vadd.f32 %v1431_v35, %v841_v38  ;;  %v844_v43 = vadd.f32 %v1382_v39, %v1988_v30 }
  0xfe   :  { %v1994_v44 = vadd.f32 %v1434_v41, %v844_v43  ;;  %v1383_v45 = vpop.f32.mrb[4].mxu0 }
  0xff   :  { %v1435_v46 = vpop.f32.mrb[4].mxu1  ;;  %v1384_v47 = vpop.f32.mrb[5].mxu0 }
 0x100   :  { %v1385_v48 = vadd.f32 %v1384_v47, %v1383_v45  ;;  %v1436_v49 = vpop.f32.mrb[5].mxu1  ;;  %v1386_v50 = vpop.f32.mrb[6].mxu0 }
 0x101   :  { %v1437_v51 = vadd.f32 %v1436_v49, %v1435_v46  ;;  %v1438_v52 = vpop.f32.mrb[6].mxu1  ;;  %v1387_v53 = vpop.f32.mrb[7].mxu0 }
 0x102   :  { %v849_v54 = vadd.f32 %v1385_v48, %v1988_v30  ;;  %v1388_v55 = vadd.f32 %v1387_v53, %v1386_v50  ;;  %v1439_v56 = vpop.f32.mrb[7].mxu1 }
 0x103   :  { %v1440_v57 = vadd.f32 %v1439_v56, %v1438_v52 }
 0x104   :  { %v1997_v58 = vadd.f32 %v1437_v51, %v849_v54  ;;  %v852_v59 = vadd.f32 %v1388_v55, %v1988_v30 }
 0x106   :  { %v2000_v60 = vadd.f32 %v1440_v57, %v852_v59  ;;  %v1389_v61 = vpop.f32.mrb[8].mxu0 }
 0x107   :  { %v1441_v62 = vpop.f32.mrb[8].mxu1  ;;  %v1390_v63 = vpop.f32.mrb[9].mxu0 }
 0x108   :  { %v1391_v0 = vadd.f32 %v1390_v63, %v1389_v61  ;;  %v1442_v1 = vpop.f32.mrb[9].mxu1  ;;  %v1392_v2 = vpop.f32.mrb[10].mxu0 }
 0x109   :  { %v1443_v3 = vadd.f32 %v1442_v1, %v1441_v62  ;;  %v1444_v4 = vpop.f32.mrb[10].mxu1  ;;  %v1393_v5 = vpop.f32.mrb[11].mxu0 }
 0x10a   :  { %v857_v6 = vadd.f32 %v1391_v0, %v1988_v30  ;;  %v1394_v7 = vadd.f32 %v1393_v5, %v1392_v2  ;;  %v1445_v8 = vpop.f32.mrb[11].mxu1 }
 0x10b   :  { %v1446_v9 = vadd.f32 %v1445_v8, %v1444_v4 }
 0x10c   :  { %v2003_v10 = vadd.f32 %v1443_v3, %v857_v6  ;;  %v860_v11 = vadd.f32 %v1394_v7, %v1988_v30 }
 0x10e   :  { %v2006_v12 = vadd.f32 %v1446_v9, %v860_v11  ;;  %v1395_v13 = vpop.f32.mrb[12].mxu0 }
 0x10f   :  { %v1447_v14 = vpop.f32.mrb[12].mxu1  ;;  %v1396_v15 = vpop.f32.mrb[13].mxu0 }
 0x110   :  { %v1397_v16 = vadd.f32 %v1396_v15, %v1395_v13  ;;  %v1448_v17 = vpop.f32.mrb[13].mxu1  ;;  %v1398_v18 = vpop.f32.mrb[14].mxu0 }
 0x111   :  { %v1449_v19 = vadd.f32 %v1448_v17, %v1447_v14  ;;  %v1450_v20 = vpop.f32.mrb[14].mxu1  ;;  %v1399_v21 = vpop.f32.mrb[15].mxu0 }
 0x112   :  { %v865_v22 = vadd.f32 %v1397_v16, %v1988_v30  ;;  %v1400_v23 = vadd.f32 %v1399_v21, %v1398_v18  ;;  %v1451_v24 = vpop.f32.mrb[15].mxu1 }
 0x113   :  { %v1452_v25 = vadd.f32 %v1451_v24, %v1450_v20 }
 0x114   :  { %v2009_v26 = vadd.f32 %v1449_v19, %v865_v22  ;;  %v868_v27 = vadd.f32 %v1400_v23, %v1988_v30 }
 0x116   :  { %v2012_v28 = vadd.f32 %v1452_v25, %v868_v27  ;;  %v1401_v29 = vpop.f32.mrb[16].mxu0 }
 0x117   :  { %v1453_v31 = vpop.f32.mrb[16].mxu1  ;;  %v1402_v32 = vpop.f32.mrb[17].mxu0 }
 0x118   :  { %v1403_v33 = vadd.f32 %v1402_v32, %v1401_v29  ;;  %v1454_v34 = vpop.f32.mrb[17].mxu1  ;;  %v1404_v35 = vpop.f32.mrb[18].mxu0 }
 0x119   :  { %v1455_v36 = vadd.f32 %v1454_v34, %v1453_v31  ;;  %v1456_v37 = vpop.f32.mrb[18].mxu1  ;;  %v1405_v38 = vpop.f32.mrb[19].mxu0 }
 0x11a   :  { %v873_v39 = vadd.f32 %v1403_v33, %v1988_v30  ;;  %v1406_v40 = vadd.f32 %v1405_v38, %v1404_v35  ;;  %v1457_v41 = vpop.f32.mrb[19].mxu1 }
 0x11b   :  { %v1458_v43 = vadd.f32 %v1457_v41, %v1456_v37 }
 0x11c   :  { %v2015_v45 = vadd.f32 %v1455_v36, %v873_v39  ;;  %v876_v46 = vadd.f32 %v1406_v40, %v1988_v30 }
 0x11e   :  { %v2018_v47 = vadd.f32 %v1458_v43, %v876_v46  ;;  %v1407_v48 = vpop.f32.mrb[20].mxu0 }
 0x11f   :  { %v1459_v49 = vpop.f32.mrb[20].mxu1  ;;  %v1408_v50 = vpop.f32.mrb[21].mxu0 }
 0x120   :  { %v1409_v51 = vadd.f32 %v1408_v50, %v1407_v48  ;;  %v1460_v52 = vpop.f32.mrb[21].mxu1  ;;  %v1410_v53 = vpop.f32.mrb[22].mxu0 }
 0x121   :  { %v1461_v54 = vadd.f32 %v1460_v52, %v1459_v49  ;;  %v1462_v55 = vpop.f32.mrb[22].mxu1  ;;  %v1411_v56 = vpop.f32.mrb[23].mxu0 }
 0x122   :  { %v881_v57 = vadd.f32 %v1409_v51, %v1988_v30  ;;  %v1463_v59 = vpop.f32.mrb[23].mxu1 }
 0x124   :  { %v2021_v61 = vadd.f32 %v1461_v54, %v881_v57 }
 0x126   :  { %v1481_v62 = vpop.f32.mrb[24].mxu0 }
 0x127   :  { %v1533_v63 = vpop.f32.mrb[24].mxu1  ;;  %v1482_v0 = vpop.f32.mrb[25].mxu0 }
 0x128   :  { %v1483_v1 = vadd.f32 %v1482_v0, %v1481_v62  ;;  %v1534_v2 = vpop.f32.mrb[25].mxu1  ;;  %v1484_v3 = vpop.f32.mrb[26].mxu0 }
 0x129   :  { %v1535_v4 = vadd.f32 %v1534_v2, %v1533_v63  ;;  %v1536_v5 = vpop.f32.mrb[26].mxu1  ;;  %v1485_v6 = vpop.f32.mrb[27].mxu0 }
 0x12a   :  { %v1001_v7 = vadd.f32 %v1483_v1, %v1991_v42  ;;  %v1486_v8 = vadd.f32 %v1485_v6, %v1484_v3  ;;  %v1537_v9 = vpop.f32.mrb[27].mxu1 }
 0x12b   :  { %v1538_v11 = vadd.f32 %v1537_v9, %v1536_v5 }
 0x12c   :  { %v1081_v13 = vadd.f32 %v1535_v4, %v1001_v7  ;;  %v1004_v30 = vadd.f32 %v1486_v8, %v1994_v44 }
 0x12e   :  { %v1084_v14 = vadd.f32 %v1538_v11, %v1004_v30  ;;  %v1487_v15 = vpop.f32.mrb[28].mxu0  ;;  %v1126_v18 = vmax.f32 %v1081_v13, 0.0 }
 0x12f   :  { %v1539_v16 = vpop.f32.mrb[28].mxu1  ;;  %v1488_v17 = vpop.f32.mrb[29].mxu0 }
 0x130   :  { %v1127_v19 = vmax.f32 %v1084_v14, 0.0  ;;  %v1489_v20 = vadd.f32 %v1488_v17, %v1487_v15  ;;  %v1540_v21 = vpop.f32.mrb[29].mxu1  ;;  %v1490_v22 = vpop.f32.mrb[30].mxu0 }
 0x131   :  { %v1541_v23 = vadd.f32 %v1540_v21, %v1539_v16  ;;  %v1542_v24 = vpop.f32.mrb[30].mxu1  ;;  %v1491_v25 = vpop.f32.mrb[31].mxu0 }
 0x132   :  { %v1335_v27 = vpack.c.bf16 %v1127_v19, %v1126_v18  ;;  %v1009_v42 = vadd.f32 %v1489_v20, %v1997_v58  ;;  %v1492_v29 = vadd.f32 %v1491_v25, %v1490_v22  ;;  %v1543_v31 = vpop.f32.mrb[31].mxu1 }
 0x133   :  { %v1544_v32 = vadd.f32 %v1543_v31, %v1542_v24 }
 0x134   :  { %1336 = vst [vmem:[%s2055_s3] sm:$0xff] %v1335_v27   ;;  %v1089_v44 = vadd.f32 %v1541_v23, %v1009_v42  ;;  %v1012_v33 = vadd.f32 %v1492_v29, %v2000_v60 }
 0x136   :  { %v1092_v34 = vadd.f32 %v1544_v32, %v1012_v33  ;;  %v1493_v35 = vpop.f32.mrb[32].mxu0  ;;  %v1128_v38 = vmax.f32 %v1089_v44, 0.0 }
 0x137   :  { %v1545_v36 = vpop.f32.mrb[32].mxu1  ;;  %v1494_v37 = vpop.f32.mrb[33].mxu0 }
 0x138   :  { %v1129_v39 = vmax.f32 %v1092_v34, 0.0  ;;  %v1495_v40 = vadd.f32 %v1494_v37, %v1493_v35  ;;  %v1546_v41 = vpop.f32.mrb[33].mxu1  ;;  %v1496_v43 = vpop.f32.mrb[34].mxu0 }
 0x139   :  { %v1547_v58 = vadd.f32 %v1546_v41, %v1545_v36  ;;  %v1548_v46 = vpop.f32.mrb[34].mxu1  ;;  %v1497_v48 = vpop.f32.mrb[35].mxu0 }
 0x13a   :  { %v1340_v49 = vpack.c.bf16 %v1129_v39, %v1128_v38  ;;  %v1017_v50 = vadd.f32 %v1495_v40, %v2003_v10  ;;  %v1498_v51 = vadd.f32 %v1497_v48, %v1496_v43  ;;  %v1549_v52 = vpop.f32.mrb[35].mxu1 }
 0x13b   :  { %v1550_v53 = vadd.f32 %v1549_v52, %v1548_v46 }
 0x13c   :  { %1357 = vst [vmem:[%s2055_s3 + $0x8] sm:$0xff] %v1340_v49   ;;  %v1097_v60 = vadd.f32 %v1547_v58, %v1017_v50  ;;  %v1020_v54 = vadd.f32 %v1498_v51, %v2006_v12 }
 0x13e   :  { %v1100_v55 = vadd.f32 %v1550_v53, %v1020_v54  ;;  %v1499_v56 = vpop.f32.mrb[36].mxu0  ;;  %v1130_v62 = vmax.f32 %v1097_v60, 0.0 }
 0x13f   :  { %v1551_v57 = vpop.f32.mrb[36].mxu1  ;;  %v1500_v59 = vpop.f32.mrb[37].mxu0 }
 0x140   :  { %v1131_v63 = vmax.f32 %v1100_v55, 0.0  ;;  %v1501_v0 = vadd.f32 %v1500_v59, %v1499_v56  ;;  %v1552_v1 = vpop.f32.mrb[37].mxu1  ;;  %v1502_v2 = vpop.f32.mrb[38].mxu0 }
 0x141   :  { %v1553_v10 = vadd.f32 %v1552_v1, %v1551_v57  ;;  %v1554_v3 = vpop.f32.mrb[38].mxu1  ;;  %v1503_v4 = vpop.f32.mrb[39].mxu0 }
 0x142   :  { %v1345_v5 = vpack.c.bf16 %v1131_v63, %v1130_v62  ;;  %v1025_v6 = vadd.f32 %v1501_v0, %v2009_v26  ;;  %v1504_v7 = vadd.f32 %v1503_v4, %v1502_v2  ;;  %v1555_v8 = vpop.f32.mrb[39].mxu1 }
 0x143   :  { %v1556_v9 = vadd.f32 %v1555_v8, %v1554_v3 }
 0x144   :  { %1358 = vst [vmem:[%s2055_s3 + $0x10] sm:$0xff] %v1345_v5   ;;  %v1105_v12 = vadd.f32 %v1553_v10, %v1025_v6  ;;  %v1028_v11 = vadd.f32 %v1504_v7, %v2012_v28 }
 0x146   :  { %v1108_v13 = vadd.f32 %v1556_v9, %v1028_v11  ;;  %v1505_v30 = vpop.f32.mrb[40].mxu0  ;;  %v1132_v16 = vmax.f32 %v1105_v12, 0.0 }
 0x147   :  { %v1557_v14 = vpop.f32.mrb[40].mxu1  ;;  %v1506_v15 = vpop.f32.mrb[41].mxu0 }
 0x148   :  { %v1133_v17 = vmax.f32 %v1108_v13, 0.0  ;;  %v1507_v18 = vadd.f32 %v1506_v15, %v1505_v30  ;;  %v1558_v19 = vpop.f32.mrb[41].mxu1  ;;  %v1508_v20 = vpop.f32.mrb[42].mxu0 }
 0x149   :  { %v1559_v26 = vadd.f32 %v1558_v19, %v1557_v14  ;;  %v1560_v21 = vpop.f32.mrb[42].mxu1  ;;  %v1509_v22 = vpop.f32.mrb[43].mxu0 }
 0x14a   :  { %v1350_v23 = vpack.c.bf16 %v1133_v17, %v1132_v16  ;;  %v1033_v24 = vadd.f32 %v1507_v18, %v2015_v45  ;;  %v1510_v25 = vadd.f32 %v1509_v22, %v1508_v20  ;;  %v1561_v27 = vpop.f32.mrb[43].mxu1 }
 0x14b   :  { %v1562_v42 = vadd.f32 %v1561_v27, %v1560_v21 }
 0x14c   :  { %1359 = vst [vmem:[%s2055_s3 + $0x18] sm:$0xff] %v1350_v23   ;;  %v1113_v28 = vadd.f32 %v1559_v26, %v1033_v24  ;;  %v1036_v29 = vadd.f32 %v1510_v25, %v2018_v47 }
 0x14e   :  { %v1116_v31 = vadd.f32 %v1562_v42, %v1036_v29  ;;  %v1511_v32 = vpop.f32.mrb[44].mxu0  ;;  %v1134_v34 = vmax.f32 %v1113_v28, 0.0 }
 0x14f   :  { %v1563_v44 = vpop.f32.mrb[44].mxu1  ;;  %v1512_v33 = vpop.f32.mrb[45].mxu0 }
 0x150   :  { %v1135_v35 = vmax.f32 %v1116_v31, 0.0  ;;  %v1513_v36 = vadd.f32 %v1512_v33, %v1511_v32  ;;  %v1564_v37 = vpop.f32.mrb[45].mxu1  ;;  %v1514_v38 = vpop.f32.mrb[46].mxu0 }
 0x151   :  { %v1565_v45 = vadd.f32 %v1564_v37, %v1563_v44  ;;  %v1566_v39 = vpop.f32.mrb[46].mxu1  ;;  %v1515_v40 = vpop.f32.mrb[47].mxu0 }
 0x152   :  { %v1355_v41 = vpack.c.bf16 %v1135_v35, %v1134_v34  ;;  %v1041_v43 = vadd.f32 %v1513_v36, %v2021_v61  ;;  %v1567_v58 = vpop.f32.mrb[47].mxu1 }
 0x154   :  { %1360 = vst [vmem:[%s2055_s3 + $0x20] sm:$0xff] %v1355_v41   ;;  %v1121_v47 = vadd.f32 %v1565_v45, %v1041_v43 }
 0x156   :  { %v1136_v46 = vmax.f32 %v1121_v47, 0.0 }
 0x158   :  { %v1331_v48 = vpack.c.bf16 %v1136_v46, %v1136_v46 }
 0x15a   :  { %1192 = vst [vmem:[%s2055_s3 + $0x28] sm:$0xf] %v1331_v48 }

// kernel: critic_forward.6
= control target key start
LH: loop header
LB: loop body
LE: loop exit
PB: predicated region body
PF: predicated region fallthrough
CT: control target
= control target key end

     0   :  { %s1989_s1 = inlined_call_operand.vmem [shape: bf16[1152,128], index: 1, kind: input, shape index: {}]   ;;  %s1990_s0 = inlined_call_operand.vmem [shape: bf16[56,1152], index: 0, kind: input, shape index: {}]   ;;  %s1991_s2 = inlined_call_operand.vmem [shape: f32[1,128], index: 2, kind: input, shape index: {}]   ;;  %s1992_s3 = inlined_call_operand.vmem [shape: bf16[56,128], index: 3, kind: output, shape index: {}]  }
   0x1   :  { %v1522_v0 = vld [vmem:[%s1989_s1 + $0x40] sm:$0xff]   ;;  %v1526_v4 = vld [vmem:[%s1989_s1 + $0x48] sm:$0xff]   ;;  %v1530_v8 = vld [vmem:[%s1989_s1 + $0x50] sm:$0xff]  }
   0x2   :  { %v1523_v1 = vld [vmem:[%s1989_s1 + $0xc0] sm:$0xff]   ;;  %1310 = vmatprep.subr.bf16.mxu0 %v1522_v0  ;;  %v1527_v5 = vld [vmem:[%s1989_s1 + $0xc8] sm:$0xff]   ;;  %v1531_v9 = vld [vmem:[%s1989_s1 + $0xd0] sm:$0xff]  }
   0x3   :  { %v1524_v2 = vld [vmem:[%s1989_s1] sm:$0xff]   ;;  %1350 = vmatprep.subr.bf16.mxu1 %v1523_v1  ;;  %v1528_v6 = vld [vmem:[%s1989_s1 + $0x8] sm:$0xff]   ;;  %v1532_v10 = vld [vmem:[%s1989_s1 + $0x10] sm:$0xff]  }
   0x4   :  { %v1525_v3 = vld [vmem:[%s1989_s1 + $0x80] sm:$0xff]   ;;  %1311 = vmatpush3.bf16.msra.mxu0 %v1524_v2  ;;  %v1529_v7 = vld [vmem:[%s1989_s1 + $0x88] sm:$0xff]   ;;  %v1533_v11 = vld [vmem:[%s1989_s1 + $0x90] sm:$0xff]  }
   0x5   :  { %1351 = vmatpush3.bf16.msra.mxu1 %v1525_v3  ;;  %1312 = vmatprep.subr.bf16.mxu0 %v1526_v4  ;;  %v1534_v12 = vld [vmem:[%s1989_s1 + $0x58] sm:$0xff]   ;;  %v1538_v16 = vld [vmem:[%s1989_s1 + $0x60] sm:$0xff]   ;;  %v1542_v20 = vld [vmem:[%s1989_s1 + $0x68] sm:$0xff]  }
   0x6   :  { %1352 = vmatprep.subr.bf16.mxu1 %v1527_v5  ;;  %v1535_v13 = vld [vmem:[%s1989_s1 + $0xd8] sm:$0xff]   ;;  %v1539_v17 = vld [vmem:[%s1989_s1 + $0xe0] sm:$0xff]   ;;  %v1543_v21 = vld [vmem:[%s1989_s1 + $0xe8] sm:$0xff]  }
   0x7   :  { %v1536_v14 = vld [vmem:[%s1989_s1 + $0x18] sm:$0xff]   ;;  %v1540_v18 = vld [vmem:[%s1989_s1 + $0x20] sm:$0xff]   ;;  %v1544_v22 = vld [vmem:[%s1989_s1 + $0x28] sm:$0xff]  }
   0x8   :  { %1313 = vmatpush3.bf16.msra.mxu0 %v1528_v6  ;;  %v1537_v15 = vld [vmem:[%s1989_s1 + $0x98] sm:$0xff]   ;;  %v1541_v19 = vld [vmem:[%s1989_s1 + $0xa0] sm:$0xff]   ;;  %v1545_v23 = vld [vmem:[%s1989_s1 + $0xa8] sm:$0xff]  }
   0x9   :  { %1353 = vmatpush3.bf16.msra.mxu1 %v1529_v7  ;;  %1314 = vmatprep.subr.bf16.mxu0 %v1530_v8  ;;  %v1546_v24 = vld [vmem:[%s1989_s1 + $0x70] sm:$0xff]   ;;  %v1550_v28 = vld [vmem:[%s1989_s1 + $0x78] sm:$0xff]   ;;  %v1554_v32 = vld [vmem:[%s1990_s0] ss:$36 sps:$4 sm:$0xff]  }
   0xa   :  { %1354 = vmatprep.subr.bf16.mxu1 %v1531_v9  ;;  %v1547_v25 = vld [vmem:[%s1989_s1 + $0xf0] sm:$0xff]   ;;  %v1551_v29 = vld [vmem:[%s1989_s1 + $0xf8] sm:$0xff]   ;;  %v1556_v33 = vld [vmem:[%s1990_s0 + $0x4] ss:$36 sps:$4 sm:$0xff]  }
   0xb   :  { %v1548_v26 = vld [vmem:[%s1989_s1 + $0x30] sm:$0xff]   ;;  %v1552_v30 = vld [vmem:[%s1989_s1 + $0x38] sm:$0xff]   ;;  %v1557_v34 = vld [vmem:[%s1990_s0 + $0x8] ss:$36 sps:$4 sm:$0xff]   ;;  %835 = vmatprep.mubr.bf16.mxu0 %v1556_v33 }
   0xc   :  { %1315 = vmatpush3.bf16.msra.mxu0 %v1532_v10  ;;  %v1549_v27 = vld [vmem:[%s1989_s1 + $0xb0] sm:$0xff]   ;;  %v1553_v31 = vld [vmem:[%s1989_s1 + $0xb8] sm:$0xff]   ;;  %v1560_v36 = vld [vmem:[%s1989_s1 + $0x140] sm:$0xff]  }
   0xd   :  { %1355 = vmatpush3.bf16.msra.mxu1 %v1533_v11  ;;  %1316 = vmatprep.subr.bf16.mxu0 %v1534_v12  ;;  %v1559_v35 = vld [vmem:[%s1990_s0 + $0xc] ss:$36 sps:$4 sm:$0xff]   ;;  %v1561_v37 = vld [vmem:[%s1989_s1 + $0x1c0] sm:$0xff]   ;;  %v1570_v45 = vld [vmem:[%s1990_s0 + $0x54] ss:$36 sps:$4 sm:$0xff]  }
   0xe   :  { %1356 = vmatprep.subr.bf16.mxu1 %v1535_v13  ;;  %899 = vmatprep.mubr.bf16.mxu1 %v1559_v35  ;;  %v1562_v38 = vld [vmem:[%s1989_s1 + $0x100] sm:$0xff]   ;;  %v1564_v40 = vld [vmem:[%s1989_s1 + $0x148] sm:$0xff]   ;;  %v1573_v47 = vld [vmem:[%s1990_s0 + $0x50] ss:$36 sps:$4 sm:$0xff]  }
   0xf   :  { %v1563_v39 = vld [vmem:[%s1989_s1 + $0x180] sm:$0xff]   ;;  %v1565_v41 = vld [vmem:[%s1989_s1 + $0x1c8] sm:$0xff]   ;;  %v1574_v48 = vld [vmem:[%s1989_s1 + $0x150] sm:$0xff]  }
  0x10   :  { %1317 = vmatpush3.bf16.msra.mxu0 %v1536_v14  ;;  %v1566_v42 = vld [vmem:[%s1989_s1 + $0x108] sm:$0xff]   ;;  %v1575_v49 = vld [vmem:[%s1989_s1 + $0x1d0] sm:$0xff]   ;;  %v1578_v52 = vld [vmem:[%s1989_s1 + $0x158] sm:$0xff]  }
  0x11   :  { %1357 = vmatpush3.bf16.msra.mxu1 %v1537_v15  ;;  %1318 = vmatprep.subr.bf16.mxu0 %v1538_v16  ;;  %v1567_v43 = vld [vmem:[%s1989_s1 + $0x188] sm:$0xff]   ;;  %v1576_v50 = vld [vmem:[%s1989_s1 + $0x110] sm:$0xff]   ;;  %v1579_v53 = vld [vmem:[%s1989_s1 + $0x1d8] sm:$0xff]  }
  0x12   :  { %1358 = vmatprep.subr.bf16.mxu1 %v1539_v17  ;;  %v1568_v44 = vld [vmem:[%s1990_s0 + $0x4c] ss:$36 sps:$4 sm:$0xff]   ;;  %v1580_v54 = vld [vmem:[%s1989_s1 + $0x118] sm:$0xff]   ;;  %v1588_v60 = vld [vmem:[%s1989_s1 + $0x160] sm:$0xff]  }
  0x13   :  { %v1572_v46 = vld [vmem:[%s1990_s0 + $0x48] ss:$36 sps:$4 sm:$0xff]   ;;  %v1577_v51 = vld [vmem:[%s1989_s1 + $0x190] sm:$0xff]   ;;  %v1581_v55 = vld [vmem:[%s1989_s1 + $0x198] sm:$0xff]  }
  0x14   :  { %1319 = vmatpush3.bf16.msra.mxu0 %v1540_v18  ;;  %v1582_v56 = vld [vmem:[%s1990_s0 + $0x94] ss:$36 sps:$4 sm:$0xff]   ;;  %v1584_v57 = vld [vmem:[%s1990_s0 + $0x9c] ss:$36 sps:$4 sm:$0xff]   ;;  %v1592_v0 = vld [vmem:[%s1989_s1 + $0x168] sm:$0xff]  }
  0x15   :  { %1359 = vmatpush3.bf16.msra.mxu1 %v1541_v19  ;;  %1320 = vmatprep.subr.bf16.mxu0 %v1542_v20  ;;  %v1586_v58 = vld [vmem:[%s1990_s0 + $0x90] ss:$36 sps:$4 sm:$0xff]   ;;  %v1587_v59 = vld [vmem:[%s1990_s0 + $0x98] ss:$36 sps:$4 sm:$0xff]   ;;  %v1589_v61 = vld [vmem:[%s1989_s1 + $0x1e0] sm:$0xff]  }
  0x16   :  { %1360 = vmatprep.subr.bf16.mxu1 %v1543_v21  ;;  %v1590_v62 = vld [vmem:[%s1989_s1 + $0x120] sm:$0xff]   ;;  %v1593_v1 = vld [vmem:[%s1989_s1 + $0x1e8] sm:$0xff]   ;;  %v45_v4 = vld [vmem:[%s1990_s0 + $0xd8] sm:$0xff] }
  0x17   :  { %v1591_v63 = vld [vmem:[%s1989_s1 + $0x1a0] sm:$0xff]   ;;  %v1594_v2 = vld [vmem:[%s1989_s1 + $0x128] sm:$0xff]   ;;  %v1199_v6 = vcombine.high %v45_v4, %v45_v4  ;;  %v1198_v8 = vcombine.low %v45_v4, %v45_v4  ;;  %v1600_v10 = vld [vmem:[%s1989_s1 + $0x170] sm:$0xff]  }
  0x18   :  { %1321 = vmatpush3.bf16.msra.mxu0 %v1544_v22  ;;  %v1595_v3 = vld [vmem:[%s1989_s1 + $0x1a8] sm:$0xff]   ;;  %v46_v5 = vld [vmem:[%s1990_s0 + $0xe0] sm:$0xff]  ;;  %v1601_v11 = vld [vmem:[%s1989_s1 + $0x1f0] sm:$0xff]  }
  0x19   :  { %1361 = vmatpush3.bf16.msra.mxu1 %v1545_v23  ;;  %1322 = vmatprep.subr.bf16.mxu0 %v1546_v24  ;;  %v1201_v7 = vcombine.high %v46_v5, %v46_v5  ;;  %v1200_v9 = vcombine.low %v46_v5, %v46_v5  ;;  %v1602_v12 = vld [vmem:[%s1989_s1 + $0x130] sm:$0xff]   ;;  %v1604_v14 = vld [vmem:[%s1989_s1 + $0x178] sm:$0xff]   ;;  %v1614_v22 = vld [vmem:[%s1989_s1 + $0x200] sm:$0xff]  }
  0x1a   :  { %1362 = vmatprep.subr.bf16.mxu1 %v1547_v25  ;;  %v1603_v13 = vld [vmem:[%s1989_s1 + $0x1b0] sm:$0xff]   ;;  %v1605_v15 = vld [vmem:[%s1989_s1 + $0x1f8] sm:$0xff]   ;;  %v1615_v23 = vld [vmem:[%s1989_s1 + $0x208] sm:$0xff]  }
  0x1b   :  { %v1606_v16 = vld [vmem:[%s1989_s1 + $0x138] sm:$0xff]   ;;  %v1608_v18 = vld [vmem:[%s1990_s0 + $0x10] ss:$36 sps:$4 sm:$0xff]   ;;  %v1618_v25 = vld [vmem:[%s1990_s0 + $0x64] ss:$36 sps:$4 sm:$0xff]  }
  0x1c   :  { %1323 = vmatpush3.bf16.msra.mxu0 %v1548_v26  ;;  %v1607_v17 = vld [vmem:[%s1989_s1 + $0x1b8] sm:$0xff]   ;;  %v47_v33 = vld [vmem:[%s1990_s0 + $0xe8] sm:$0xff]  ;;  %v1628_v35 = vld [vmem:[%s1990_s0 + $0xa0] ss:$36 sps:$4 sm:$0xff]  }
  0x1d   :  { %1363 = vmatpush3.bf16.msra.mxu1 %v1549_v27  ;;  %1324 = vmatprep.subr.bf16.mxu0 %v1550_v28  ;;  %v1610_v19 = vld [vmem:[%s1990_s0 + $0x14] ss:$36 sps:$4 sm:$0xff]   ;;  %v1613_v21 = vld [vmem:[%s1990_s0 + $0x1c] ss:$36 sps:$4 sm:$0xff]  }
  0x1e   :  { %1364 = vmatprep.subr.bf16.mxu1 %v1551_v29  ;;  %v1611_v20 = vld [vmem:[%s1990_s0 + $0x18] ss:$36 sps:$4 sm:$0xff]   ;;  %v1622_v27 = vld [vmem:[%s1989_s1 + $0x210] sm:$0xff]   ;;  %v1621_v28 = vld [vmem:[%s1990_s0 + $0x60] ss:$36 sps:$4 sm:$0xff]  }
  0x1f   :  { %v1616_v24 = vld [vmem:[%s1990_s0 + $0x5c] ss:$36 sps:$4 sm:$0xff]   ;;  %v1624_v29 = vld [vmem:[%s1990_s0 + $0xa4] ss:$36 sps:$4 sm:$0xff]  }
  0x20   :  { %1325 = vmatpush3.bf16.msra.mxu0 %v1552_v30  ;;  %v1620_v26 = vld [vmem:[%s1990_s0 + $0x58] ss:$36 sps:$4 sm:$0xff]   ;;  %v1626_v30 = vld [vmem:[%s1990_s0 + $0xac] ss:$36 sps:$4 sm:$0xff]  }
  0x21   :  { %1365 = vmatpush3.bf16.msra.mxu1 %v1553_v31  ;;  %1390 = vmatprep.subr.bf16.mxu0 %v1560_v36  ;;  %v1623_v31 = vld [vmem:[%s1989_s1 + $0x218] sm:$0xff]   ;;  %v1629_v36 = vld [vmem:[%s1990_s0 + $0xa8] ss:$36 sps:$4 sm:$0xff]  }
  0x22   :  { %1430 = vmatprep.subr.bf16.mxu1 %v1561_v37  ;;  %v1203_v37 = vcombine.high %v47_v33, %v47_v33 }
  0x23   :  { %836 = vmatmul.mubr.bf16.vlgmr.msra.gmra.mrb[0].mxu0 %v1554_v32  ;;  %v1630_v32 = vld [vmem:[%s1989_s1 + $0x220] sm:$0xff]  }
  0x24   :  { %900 = vmatmul.mubr.bf16.vlgmr.msra.gmra.mrb[0].mxu1 %v1557_v34  ;;  %1391 = vmatpush3.bf16.msra.mxu0 %v1562_v38  ;;  %v48_v34 = vld [vmem:[%s1990_s0 + $0xf0] sm:$0xff] }
  0x25   :  { %1431 = vmatpush3.bf16.msra.mxu1 %v1563_v39  ;;  %1392 = vmatprep.subr.bf16.mxu0 %v1564_v40  ;;  %v1205_v38 = vcombine.high %v48_v34, %v48_v34  ;;  %v1631_v39 = vld [vmem:[%s1989_s1 + $0x228] sm:$0xff]   ;;  %v1636_v40 = vld [vmem:[%s1989_s1 + $0x230] sm:$0xff]  }
  0x26   :  { %1432 = vmatprep.subr.bf16.mxu1 %v1565_v41  ;;  %843 = vmatprep.mubr.bf16.mxu0 %v1568_v44  ;;  %v1202_v41 = vcombine.low %v47_v33, %v47_v33  ;;  %v1639_v44 = vld [vmem:[%s1990_s0 + $0xb0] ss:$36 sps:$4 sm:$0xff]  }
  0x27   :  { %907 = vmatprep.mubr.bf16.mxu1 %v1570_v45  ;;  %v1637_v45 = vld [vmem:[%s1989_s1 + $0x238] sm:$0xff]  }
  0x28   :  { %1393 = vmatpush3.bf16.msra.mxu0 %v1566_v42  ;;  %v1204_v42 = vcombine.low %v48_v34, %v48_v34 }
  0x29   :  { %1433 = vmatpush3.bf16.msra.mxu1 %v1567_v43  ;;  %1394 = vmatprep.subr.bf16.mxu0 %v1574_v48  ;;  %v1638_v43 = vld [vmem:[%s1990_s0 + $0x20] ss:$36 sps:$4 sm:$0xff]  }
  0x2a   :  { %1434 = vmatprep.subr.bf16.mxu1 %v1575_v49 }
  0x2b   :  { %844 = vmatmul.mubr.bf16.gmra.mrb[4].mxu0 %v1572_v46  ;;  %v1640_v46 = vld [vmem:[%s1990_s0 + $0x68] ss:$36 sps:$4 sm:$0xff]  }
  0x2c   :  { %908 = vmatmul.mubr.bf16.gmra.mrb[4].mxu1 %v1573_v47  ;;  %1395 = vmatpush3.bf16.msra.mxu0 %v1576_v50  ;;  %v1641_v47 = vld [vmem:[%s1990_s0 + $0xf8] ss:$0 sps:$4 sm:$0xff]   ;;  %v1170_v50 = vld [vmem:[%s1991_s2] ss:$0 sm:$0xff] }
  0x2d   :  { %1435 = vmatpush3.bf16.msra.mxu1 %v1577_v51  ;;  %1396 = vmatprep.subr.bf16.mxu0 %v1578_v52 }
  0x2e   :  { %1436 = vmatprep.subr.bf16.mxu1 %v1579_v53  ;;  %851 = vmatprep.mubr.bf16.mxu0 %v1582_v56 }
  0x2f   :  { %915 = vmatprep.mubr.bf16.mxu1 %v1584_v57 }
  0x30   :  { %1397 = vmatpush3.bf16.msra.mxu0 %v1580_v54 }
  0x31   :  { %1437 = vmatpush3.bf16.msra.mxu1 %v1581_v55  ;;  %1398 = vmatprep.subr.bf16.mxu0 %v1588_v60 }
  0x32   :  { %1438 = vmatprep.subr.bf16.mxu1 %v1589_v61 }
  0x33   :  { %852 = vmatmul.mubr.bf16.gmra.mrb[8].mxu0 %v1586_v58 }
  0x34   :  { %916 = vmatmul.mubr.bf16.gmra.mrb[8].mxu1 %v1587_v59  ;;  %1399 = vmatpush3.bf16.msra.mxu0 %v1590_v62 }
  0x35   :  { %1439 = vmatpush3.bf16.msra.mxu1 %v1591_v63  ;;  %1400 = vmatprep.subr.bf16.mxu0 %v1592_v0 }
  0x36   :  { %1440 = vmatprep.subr.bf16.mxu1 %v1593_v1  ;;  %859 = vmatprep.mubr.bf16.mxu0 %v1199_v6 }
  0x37   :  { %923 = vmatprep.mubr.bf16.mxu1 %v1201_v7 }
  0x38   :  { %1401 = vmatpush3.bf16.msra.mxu0 %v1594_v2 }
  0x39   :  { %1441 = vmatpush3.bf16.msra.mxu1 %v1595_v3  ;;  %1402 = vmatprep.subr.bf16.mxu0 %v1600_v10 }
  0x3a   :  { %1442 = vmatprep.subr.bf16.mxu1 %v1601_v11 }
  0x3b   :  { %860 = vmatmul.mubr.bf16.gmra.mrb[12].mxu0 %v1198_v8 }
  0x3c   :  { %924 = vmatmul.mubr.bf16.gmra.mrb[12].mxu1 %v1200_v9  ;;  %1403 = vmatpush3.bf16.msra.mxu0 %v1602_v12 }
  0x3d   :  { %1443 = vmatpush3.bf16.msra.mxu1 %v1603_v13  ;;  %1404 = vmatprep.subr.bf16.mxu0 %v1604_v14 }
  0x3e   :  { %1444 = vmatprep.subr.bf16.mxu1 %v1605_v15  ;;  %963 = vmatprep.mubr.bf16.mxu0 %v1610_v19 }
  0x3f   :  { %1027 = vmatprep.mubr.bf16.mxu1 %v1613_v21 }
  0x40   :  { %1405 = vmatpush3.bf16.msra.mxu0 %v1606_v16 }
  0x41   :  { %1445 = vmatpush3.bf16.msra.mxu1 %v1607_v17  ;;  %1482 = vmatprep.subr.bf16.mxu0 %v1614_v22 }
  0x42   :  { %1506 = vmatprep.subr.bf16.mxu1 %v1614_v22 }
  0x43   :  { %964 = vmatmul.mubr.bf16.vlgmr.msra.gmra.mrb[16].mxu0 %v1608_v18 }
  0x44   :  { %1028 = vmatmul.mubr.bf16.vlgmr.msra.gmra.mrb[16].mxu1 %v1611_v20  ;;  %1483 = vmatpush3.bf16.msra.mxu0 %v1614_v22 }
  0x45   :  { %1514 = vmatpush3.bf16.msra.mxu1 %v1614_v22  ;;  %1484 = vmatprep.subr.bf16.mxu0 %v1615_v23 }
  0x46   :  { %1507 = vmatprep.subr.bf16.mxu1 %v1615_v23  ;;  %971 = vmatprep.mubr.bf16.mxu0 %v1616_v24 }
  0x47   :  { %1035 = vmatprep.mubr.bf16.mxu1 %v1618_v25 }
  0x48   :  { %1485 = vmatpush3.bf16.msra.mxu0 %v1615_v23 }
  0x49   :  { %1515 = vmatpush3.bf16.msra.mxu1 %v1615_v23  ;;  %1486 = vmatprep.subr.bf16.mxu0 %v1622_v27 }
  0x4a   :  { %1508 = vmatprep.subr.bf16.mxu1 %v1622_v27 }
  0x4b   :  { %972 = vmatmul.mubr.bf16.gmra.mrb[20].mxu0 %v1620_v26 }
  0x4c   :  { %1036 = vmatmul.mubr.bf16.gmra.mrb[20].mxu1 %v1621_v28  ;;  %979 = vmatprep.mubr.bf16.mxu0 %v1624_v29 }
  0x4d   :  { %1487 = vmatpush3.bf16.msra.mxu0 %v1622_v27  ;;  %1043 = vmatprep.mubr.bf16.mxu1 %v1626_v30 }
  0x4e   :  { %1516 = vmatpush3.bf16.msra.mxu1 %v1622_v27  ;;  %1488 = vmatprep.subr.bf16.mxu0 %v1623_v31 }
  0x4f   :  { %1509 = vmatprep.subr.bf16.mxu1 %v1623_v31 }
  0x51   :  { %1489 = vmatpush3.bf16.msra.mxu0 %v1623_v31 }
  0x52   :  { %1517 = vmatpush3.bf16.msra.mxu1 %v1623_v31  ;;  %1490 = vmatprep.subr.bf16.mxu0 %v1630_v32 }
  0x53   :  { %980 = vmatmul.mubr.bf16.gmra.mrb[24].mxu0 %v1628_v35  ;;  %1510 = vmatprep.subr.bf16.mxu1 %v1630_v32 }
  0x54   :  { %1044 = vmatmul.mubr.bf16.gmra.mrb[24].mxu1 %v1629_v36  ;;  %987 = vmatprep.mubr.bf16.mxu0 %v1203_v37 }
  0x55   :  { %1491 = vmatpush3.bf16.msra.mxu0 %v1630_v32  ;;  %1051 = vmatprep.mubr.bf16.mxu1 %v1205_v38 }
  0x56   :  { %1518 = vmatpush3.bf16.msra.mxu1 %v1630_v32  ;;  %1492 = vmatprep.subr.bf16.mxu0 %v1631_v39 }
  0x57   :  { %1511 = vmatprep.subr.bf16.mxu1 %v1631_v39 }
  0x59   :  { %1493 = vmatpush3.bf16.msra.mxu0 %v1631_v39 }
  0x5a   :  { %1519 = vmatpush3.bf16.msra.mxu1 %v1631_v39  ;;  %1494 = vmatprep.subr.bf16.mxu0 %v1636_v40 }
  0x5b   :  { %988 = vmatmul.mubr.bf16.gmra.mrb[28].mxu0 %v1202_v41  ;;  %1512 = vmatprep.subr.bf16.mxu1 %v1636_v40 }
  0x5c   :  { %1052 = vmatmul.mubr.bf16.gmra.mrb[28].mxu1 %v1204_v42  ;;  %1498 = vmatprep.mubr.bf16.mxu0 %v1638_v43 }
  0x5d   :  { %1495 = vmatpush3.bf16.msra.mxu0 %v1636_v40  ;;  %1502 = vmatprep.mubr.bf16.mxu1 %v1639_v44 }
  0x5e   :  { %1520 = vmatpush3.bf16.msra.mxu1 %v1636_v40  ;;  %1496 = vmatprep.subr.bf16.mxu0 %v1637_v45 }
  0x5f   :  { %1513 = vmatprep.subr.bf16.mxu1 %v1637_v45 }
  0x61   :  { %1497 = vmatpush3.bf16.msra.mxu0 %v1637_v45 }
  0x62   :  { %1521 = vmatpush3.bf16.msra.mxu1 %v1637_v45 }
  0x64   :  { %1499 = vmatmul.mubr.bf16.vlgmr.msra.gmra.mrb[32].mxu0 %v1640_v46 }
  0x65   :  { %1503 = vmatmul.mubr.bf16.vlgmr.msra.gmra.mrb[32].mxu1 %v1641_v47 }
  0xf6   :  { %v1326_v48 = vpop.f32.mrb[0].mxu0 }
  0xf7   :  { %v1366_v49 = vpop.f32.mrb[0].mxu1  ;;  %v1327_v51 = vpop.f32.mrb[1].mxu0 }
  0xf8   :  { %v1328_v52 = vadd.f32 %v1327_v51, %v1326_v48  ;;  %v1367_v53 = vpop.f32.mrb[1].mxu1  ;;  %v1329_v54 = vpop.f32.mrb[2].mxu0 }
  0xf9   :  { %v1368_v55 = vadd.f32 %v1367_v53, %v1366_v49  ;;  %v1369_v56 = vpop.f32.mrb[2].mxu1  ;;  %v1330_v57 = vpop.f32.mrb[3].mxu0 }
  0xfa   :  { %v838_v58 = vadd.f32 %v1328_v52, %v1170_v50  ;;  %v1331_v59 = vadd.f32 %v1330_v57, %v1329_v54  ;;  %v1370_v60 = vpop.f32.mrb[3].mxu1 }
  0xfb   :  { %v1371_v61 = vadd.f32 %v1370_v60, %v1369_v56 }
  0xfc   :  { %v902_v62 = vadd.f32 %v1368_v55, %v838_v58  ;;  %v841_v63 = vadd.f32 %v1331_v59, %v1170_v50 }
  0xfe   :  { %v905_v0 = vadd.f32 %v1371_v61, %v841_v63  ;;  %v1332_v1 = vpop.f32.mrb[4].mxu0 }
  0xff   :  { %v1372_v2 = vpop.f32.mrb[4].mxu1  ;;  %v1333_v3 = vpop.f32.mrb[5].mxu0 }
 0x100   :  { %v1334_v4 = vadd.f32 %v1333_v3, %v1332_v1  ;;  %v1373_v5 = vpop.f32.mrb[5].mxu1  ;;  %v1335_v6 = vpop.f32.mrb[6].mxu0 }
 0x101   :  { %v1374_v7 = vadd.f32 %v1373_v5, %v1372_v2  ;;  %v1375_v8 = vpop.f32.mrb[6].mxu1  ;;  %v1336_v9 = vpop.f32.mrb[7].mxu0 }
 0x102   :  { %v846_v10 = vadd.f32 %v1334_v4, %v1170_v50  ;;  %v1337_v11 = vadd.f32 %v1336_v9, %v1335_v6  ;;  %v1376_v12 = vpop.f32.mrb[7].mxu1 }
 0x103   :  { %v1377_v13 = vadd.f32 %v1376_v12, %v1375_v8 }
 0x104   :  { %v910_v14 = vadd.f32 %v1374_v7, %v846_v10  ;;  %v849_v15 = vadd.f32 %v1337_v11, %v1170_v50 }
 0x106   :  { %v913_v16 = vadd.f32 %v1377_v13, %v849_v15  ;;  %v1338_v17 = vpop.f32.mrb[8].mxu0 }
 0x107   :  { %v1378_v18 = vpop.f32.mrb[8].mxu1  ;;  %v1339_v19 = vpop.f32.mrb[9].mxu0 }
 0x108   :  { %v1340_v20 = vadd.f32 %v1339_v19, %v1338_v17  ;;  %v1379_v21 = vpop.f32.mrb[9].mxu1  ;;  %v1341_v22 = vpop.f32.mrb[10].mxu0 }
 0x109   :  { %v1380_v23 = vadd.f32 %v1379_v21, %v1378_v18  ;;  %v1381_v24 = vpop.f32.mrb[10].mxu1  ;;  %v1342_v25 = vpop.f32.mrb[11].mxu0 }
 0x10a   :  { %v854_v26 = vadd.f32 %v1340_v20, %v1170_v50  ;;  %v1343_v27 = vadd.f32 %v1342_v25, %v1341_v22  ;;  %v1382_v28 = vpop.f32.mrb[11].mxu1 }
 0x10b   :  { %v1383_v29 = vadd.f32 %v1382_v28, %v1381_v24 }
 0x10c   :  { %v918_v30 = vadd.f32 %v1380_v23, %v854_v26  ;;  %v857_v31 = vadd.f32 %v1343_v27, %v1170_v50 }
 0x10e   :  { %v921_v32 = vadd.f32 %v1383_v29, %v857_v31  ;;  %v1344_v33 = vpop.f32.mrb[12].mxu0 }
 0x10f   :  { %v1384_v34 = vpop.f32.mrb[12].mxu1  ;;  %v1345_v35 = vpop.f32.mrb[13].mxu0 }
 0x110   :  { %v1385_v36 = vpop.f32.mrb[13].mxu1  ;;  %v1346_v37 = vadd.f32 %v1345_v35, %v1344_v33  ;;  %v1347_v39 = vpop.f32.mrb[14].mxu0 }
 0x111   :  { %v1386_v38 = vadd.f32 %v1385_v36, %v1384_v34  ;;  %v1387_v40 = vpop.f32.mrb[14].mxu1  ;;  %v1348_v41 = vpop.f32.mrb[15].mxu0 }
 0x112   :  { %v1388_v42 = vpop.f32.mrb[15].mxu1  ;;  %v862_v43 = vadd.f32 %v1346_v37, %v1170_v50 }
 0x114   :  { %v926_v44 = vadd.f32 %v1386_v38, %v862_v43 }
 0x116   :  { %v1406_v45 = vpop.f32.mrb[16].mxu0 }
 0x117   :  { %v1446_v46 = vpop.f32.mrb[16].mxu1  ;;  %v1407_v47 = vpop.f32.mrb[17].mxu0 }
 0x118   :  { %v1408_v48 = vadd.f32 %v1407_v47, %v1406_v45  ;;  %v1447_v49 = vpop.f32.mrb[17].mxu1  ;;  %v1409_v51 = vpop.f32.mrb[18].mxu0 }
 0x119   :  { %v1448_v52 = vadd.f32 %v1447_v49, %v1446_v46  ;;  %v1449_v53 = vpop.f32.mrb[18].mxu1  ;;  %v1410_v54 = vpop.f32.mrb[19].mxu0 }
 0x11a   :  { %v966_v55 = vadd.f32 %v1408_v48, %v902_v62  ;;  %v1411_v56 = vadd.f32 %v1410_v54, %v1409_v51  ;;  %v1450_v57 = vpop.f32.mrb[19].mxu1 }
 0x11b   :  { %v1451_v58 = vadd.f32 %v1450_v57, %v1449_v53 }
 0x11c   :  { %v969_v59 = vadd.f32 %v1411_v56, %v905_v0  ;;  %v1030_v60 = vadd.f32 %v1448_v52, %v966_v55 }
 0x11e   :  { %v1412_v61 = vpop.f32.mrb[20].mxu0  ;;  %v1033_v63 = vadd.f32 %v1451_v58, %v969_v59 }
 0x11f   :  { %v1452_v1 = vpop.f32.mrb[20].mxu1  ;;  %v1413_v50 = vpop.f32.mrb[21].mxu0 }
 0x120   :  { %v1414_v2 = vadd.f32 %v1413_v50, %v1412_v61  ;;  %v1453_v3 = vpop.f32.mrb[21].mxu1  ;;  %v1415_v4 = vpop.f32.mrb[22].mxu0 }
 0x121   :  { %v1454_v5 = vadd.f32 %v1453_v3, %v1452_v1  ;;  %v1455_v6 = vpop.f32.mrb[22].mxu1  ;;  %v1416_v7 = vpop.f32.mrb[23].mxu0 }
 0x122   :  { %v974_v8 = vadd.f32 %v1414_v2, %v910_v14  ;;  %v1417_v9 = vadd.f32 %v1416_v7, %v1415_v4  ;;  %v1456_v10 = vpop.f32.mrb[23].mxu1 }
 0x123   :  { %v1457_v11 = vadd.f32 %v1456_v10, %v1455_v6 }
 0x124   :  { %v977_v62 = vadd.f32 %v1417_v9, %v913_v16  ;;  %v1038_v12 = vadd.f32 %v1454_v5, %v974_v8 }
 0x126   :  { %v1418_v13 = vpop.f32.mrb[24].mxu0  ;;  %v1041_v15 = vadd.f32 %v1457_v11, %v977_v62 }
 0x127   :  { %v1458_v0 = vpop.f32.mrb[24].mxu1  ;;  %v1419_v17 = vpop.f32.mrb[25].mxu0 }
 0x128   :  { %v1420_v18 = vadd.f32 %v1419_v17, %v1418_v13  ;;  %v1459_v19 = vpop.f32.mrb[25].mxu1  ;;  %v1421_v20 = vpop.f32.mrb[26].mxu0 }
 0x129   :  { %v1460_v21 = vadd.f32 %v1459_v19, %v1458_v0  ;;  %v1461_v22 = vpop.f32.mrb[26].mxu1  ;;  %v1422_v23 = vpop.f32.mrb[27].mxu0 }
 0x12a   :  { %v982_v24 = vadd.f32 %v1420_v18, %v918_v30  ;;  %v1423_v25 = vadd.f32 %v1422_v23, %v1421_v20  ;;  %v1462_v26 = vpop.f32.mrb[27].mxu1 }
 0x12b   :  { %v1463_v27 = vadd.f32 %v1462_v26, %v1461_v22 }
 0x12c   :  { %v985_v14 = vadd.f32 %v1423_v25, %v921_v32  ;;  %v1046_v28 = vadd.f32 %v1460_v21, %v982_v24 }
 0x12e   :  { %v1424_v29 = vpop.f32.mrb[28].mxu0  ;;  %v1049_v31 = vadd.f32 %v1463_v27, %v985_v14 }
 0x12f   :  { %v1464_v16 = vpop.f32.mrb[28].mxu1  ;;  %v1425_v33 = vpop.f32.mrb[29].mxu0 }
 0x130   :  { %v1426_v34 = vadd.f32 %v1425_v33, %v1424_v29  ;;  %v1465_v35 = vpop.f32.mrb[29].mxu1  ;;  %v1427_v36 = vpop.f32.mrb[30].mxu0 }
 0x131   :  { %v1466_v37 = vadd.f32 %v1465_v35, %v1464_v16  ;;  %v1467_v38 = vpop.f32.mrb[30].mxu1  ;;  %v1428_v39 = vpop.f32.mrb[31].mxu0 }
 0x132   :  { %v990_v40 = vadd.f32 %v1426_v34, %v926_v44  ;;  %v1468_v41 = vpop.f32.mrb[31].mxu1 }
 0x134   :  { %v1054_v42 = vadd.f32 %v1466_v37, %v990_v40 }
 0x137   :  { %v1500_v43 = vpop.f32.mrb[32].mxu0 }
 0x138   :  { %v1102_v30 = vadd.f32 %v1500_v43, %v1038_v12  ;;  %v1504_v45 = vpop.f32.mrb[32].mxu1  ;;  %v1093_v46 = vpop.f32.mrb[33].mxu0 }
 0x139   :  { %v1118_v47 = vadd.f32 %v1504_v45, %v1054_v42  ;;  %v1094_v32 = vadd.f32 %v1093_v46, %v1030_v60  ;;  %v1109_v48 = vpop.f32.mrb[33].mxu1  ;;  %v1501_v49 = vpop.f32.mrb[34].mxu0 }
 0x13a   :  { %v1110_v51 = vadd.f32 %v1109_v48, %v1046_v28  ;;  %v1105_v52 = vadd.f32 %v1501_v49, %v1041_v15  ;;  %v1505_v53 = vpop.f32.mrb[34].mxu1  ;;  %v1096_v54 = vpop.f32.mrb[35].mxu0  ;;  %v1125_v58 = vmax.f32 %v1102_v30, 0.0 }
 0x13b   :  { %v1129_v55 = vmax.f32 %v1118_v47, 0.0  ;;  %v1097_v56 = vadd.f32 %v1096_v54, %v1033_v63  ;;  %v1112_v57 = vpop.f32.mrb[35].mxu1  ;;  %v1123_v1 = vmax.f32 %v1094_v32, 0.0 }
 0x13c   :  { %v1126_v59 = vmax.f32 %v1105_v52, 0.0  ;;  %v1113_v44 = vadd.f32 %v1112_v57, %v1049_v31  ;;  %v1127_v2 = vmax.f32 %v1110_v51, 0.0 }
 0x13d   :  { %v1292_v61 = vpack.c.bf16 %v1129_v55, %v1129_v55  ;;  %v1124_v50 = vmax.f32 %v1097_v56, 0.0 }
 0x13e   :  { %v1301_v3 = vpack.c.bf16 %v1126_v59, %v1125_v58  ;;  %v1128_v4 = vmax.f32 %v1113_v44, 0.0 }
 0x13f   :  { %1165 = vst [vmem:[%s1992_s3 + $0x18] sm:$0xf] %v1292_v61  ;;  %v1296_v60 = vpack.c.bf16 %v1124_v50, %v1123_v1 }
 0x140   :  { %1308 = vst [vmem:[%s1992_s3 + $0x8] sm:$0xff] %v1301_v3   ;;  %v1306_v63 = vpack.c.bf16 %v1128_v4, %v1127_v2 }
 0x141   :  { %1297 = vst [vmem:[%s1992_s3] sm:$0xff] %v1296_v60  }
 0x142   :  { %1309 = vst [vmem:[%s1992_s3 + $0x10] sm:$0xff] %v1306_v63  }

// kernel: critic_forward.7
= control target key start
LH: loop header
LB: loop body
LE: loop exit
PB: predicated region body
PF: predicated region fallthrough
CT: control target
= control target key end

     0   :  { %vm4849_vm0 = vcmask 523264   ;;  %vm5962_vm1 = vcmask 7168   ;;  %s10582_s1 = inlined_call_operand.vmem [shape: bf16[3136,512], index: 1, kind: input, shape index: {}]   ;;  %s10583_s0 = inlined_call_operand.vmem [shape: bf16[8,3136], index: 0, kind: input, shape index: {}]   ;;  %s10584_s4 = inlined_call_operand.<no memory space> [shape: f32[1,1], index: 4, kind: input, shape index: {}]   ;;  %s10585_s2 = inlined_call_operand.vmem [shape: f32[1,512], index: 2, kind: input, shape index: {}]   ;;  %s10586_s3 = inlined_call_operand.vmem [shape: f32[1,512], index: 3, kind: input, shape index: {}]   ;;  %s10587_s5 = inlined_call_operand.vmem [shape: f32[8,1], index: 5, kind: output, shape index: {}]  }
   0x1   :  { %v6881_v0 = vld [vmem:[%s10582_s1 + $0x4] ss:$16 sps:$4 sm:$0xff]   ;;  %v6883_v1 = vld [vmem:[%s10582_s1 + $0xc] ss:$16 sps:$4 sm:$0xff]   ;;  %v6885_v2 = vld [vmem:[%s10582_s1] ss:$16 sps:$4 sm:$0xff]  }
   0x2   :  { %4853 = vmatprep.subr.bf16.mxu0 %v6881_v0  ;;  %v6886_v3 = vld [vmem:[%s10582_s1 + $0x8] ss:$16 sps:$4 sm:$0xff]   ;;  %5386 = vmatprep.subr.bf16.mxu1 %v6883_v1  ;;  %v6887_v4 = vld [vmem:[%s10582_s1 + $0x24] ss:$16 sps:$4 sm:$0xff]   ;;  %v6889_v5 = vld [vmem:[%s10582_s1 + $0x2c] ss:$16 sps:$4 sm:$0xff]  }
   0x3   :  { %4854 = vmatpush1.bf16.msra.mxu0 %v6885_v2  ;;  %5387 = vmatpush1.bf16.msra.mxu1 %v6886_v3  ;;  %v6891_v6 = vld [vmem:[%s10582_s1 + $0x20] ss:$16 sps:$4 sm:$0xff]   ;;  %v6892_v7 = vld [vmem:[%s10582_s1 + $0x28] ss:$16 sps:$4 sm:$0xff]   ;;  %v6893_v8 = vld [vmem:[%s10582_s1 + $0x44] ss:$16 sps:$4 sm:$0xff]  }
   0x4   :  { %4855 = vmatprep.subr.bf16.mxu0 %v6887_v4  ;;  %5388 = vmatprep.subr.bf16.mxu1 %v6889_v5  ;;  %v6895_v9 = vld [vmem:[%s10582_s1 + $0x4c] ss:$16 sps:$4 sm:$0xff]   ;;  %v6897_v10 = vld [vmem:[%s10582_s1 + $0x40] ss:$16 sps:$4 sm:$0xff]   ;;  %v6898_v11 = vld [vmem:[%s10582_s1 + $0x48] ss:$16 sps:$4 sm:$0xff]  }
   0x5   :  { %v6899_v12 = vld [vmem:[%s10582_s1 + $0x64] ss:$16 sps:$4 sm:$0xff]   ;;  %v6901_v13 = vld [vmem:[%s10582_s1 + $0x6c] ss:$16 sps:$4 sm:$0xff]   ;;  %v6903_v14 = vld [vmem:[%s10582_s1 + $0x60] ss:$16 sps:$4 sm:$0xff]  }
   0x6   :  { %v6904_v15 = vld [vmem:[%s10582_s1 + $0x68] ss:$16 sps:$4 sm:$0xff]   ;;  %v6905_v16 = vld [vmem:[%s10582_s1 + $0x84] ss:$16 sps:$4 sm:$0xff]   ;;  %v6907_v17 = vld [vmem:[%s10582_s1 + $0x8c] ss:$16 sps:$4 sm:$0xff]  }
   0x7   :  { %4856 = vmatpush1.bf16.msra.mxu0 %v6891_v6  ;;  %5389 = vmatpush1.bf16.msra.mxu1 %v6892_v7  ;;  %v6909_v18 = vld [vmem:[%s10582_s1 + $0x80] ss:$16 sps:$4 sm:$0xff]   ;;  %v6910_v19 = vld [vmem:[%s10582_s1 + $0x88] ss:$16 sps:$4 sm:$0xff]   ;;  %v6911_v20 = vld [vmem:[%s10582_s1 + $0xa4] ss:$16 sps:$4 sm:$0xff]  }
   0x8   :  { %4857 = vmatprep.subr.bf16.mxu0 %v6893_v8  ;;  %5390 = vmatprep.subr.bf16.mxu1 %v6895_v9  ;;  %v6913_v21 = vld [vmem:[%s10582_s1 + $0xac] ss:$16 sps:$4 sm:$0xff]   ;;  %v6915_v22 = vld [vmem:[%s10582_s1 + $0xa0] ss:$16 sps:$4 sm:$0xff]   ;;  %v6916_v23 = vld [vmem:[%s10582_s1 + $0xa8] ss:$16 sps:$4 sm:$0xff]  }
   0x9   :  { %v6917_v24 = vld [vmem:[%s10582_s1 + $0xc4] ss:$16 sps:$4 sm:$0xff]   ;;  %v6919_v25 = vld [vmem:[%s10582_s1 + $0xcc] ss:$16 sps:$4 sm:$0xff]   ;;  %v6921_v26 = vld [vmem:[%s10582_s1 + $0xc0] ss:$16 sps:$4 sm:$0xff]  }
   0xa   :  { %v6922_v27 = vld [vmem:[%s10582_s1 + $0xc8] ss:$16 sps:$4 sm:$0xff]   ;;  %v6923_v28 = vld [vmem:[%s10582_s1 + $0xe4] ss:$16 sps:$4 sm:$0xff]   ;;  %v6925_v29 = vld [vmem:[%s10582_s1 + $0xec] ss:$16 sps:$4 sm:$0xff]  }
   0xb   :  { %4858 = vmatpush1.bf16.msra.mxu0 %v6897_v10  ;;  %5391 = vmatpush1.bf16.msra.mxu1 %v6898_v11  ;;  %v6927_v30 = vld [vmem:[%s10582_s1 + $0xe0] ss:$16 sps:$4 sm:$0xff]   ;;  %v6928_v31 = vld [vmem:[%s10582_s1 + $0xe8] ss:$16 sps:$4 sm:$0xff]   ;;  %v6929_v32 = vld [vmem:[%s10582_s1 + $0x104] ss:$16 sps:$4 sm:$0xff]  }
   0xc   :  { %4859 = vmatprep.subr.bf16.mxu0 %v6899_v12  ;;  %5392 = vmatprep.subr.bf16.mxu1 %v6901_v13  ;;  %v6931_v33 = vld [vmem:[%s10582_s1 + $0x10c] ss:$16 sps:$4 sm:$0xff]   ;;  %v6933_v34 = vld [vmem:[%s10582_s1 + $0x100] ss:$16 sps:$4 sm:$0xff]   ;;  %v6934_v35 = vld [vmem:[%s10582_s1 + $0x108] ss:$16 sps:$4 sm:$0xff]  }
   0xd   :  { %v6935_v36 = vld [vmem:[%s10582_s1 + $0x124] ss:$16 sps:$4 sm:$0xff]   ;;  %v6937_v37 = vld [vmem:[%s10582_s1 + $0x12c] ss:$16 sps:$4 sm:$0xff]   ;;  %v6939_v38 = vld [vmem:[%s10582_s1 + $0x120] ss:$16 sps:$4 sm:$0xff]  }
   0xe   :  { %v6940_v39 = vld [vmem:[%s10582_s1 + $0x128] ss:$16 sps:$4 sm:$0xff]   ;;  %v6941_v40 = vld [vmem:[%s10582_s1 + $0x144] ss:$16 sps:$4 sm:$0xff]   ;;  %v6943_v41 = vld [vmem:[%s10582_s1 + $0x14c] ss:$16 sps:$4 sm:$0xff]  }
   0xf   :  { %4860 = vmatpush1.bf16.msra.mxu0 %v6903_v14  ;;  %5393 = vmatpush1.bf16.msra.mxu1 %v6904_v15  ;;  %v6945_v42 = vld [vmem:[%s10582_s1 + $0x140] ss:$16 sps:$4 sm:$0xff]   ;;  %v6946_v43 = vld [vmem:[%s10582_s1 + $0x148] ss:$16 sps:$4 sm:$0xff]   ;;  %v6947_v44 = vld [vmem:[%s10582_s1 + $0x164] ss:$16 sps:$4 sm:$0xff]  }
  0x10   :  { %4861 = vmatprep.subr.bf16.mxu0 %v6905_v16  ;;  %5394 = vmatprep.subr.bf16.mxu1 %v6907_v17  ;;  %v6949_v45 = vld [vmem:[%s10582_s1 + $0x16c] ss:$16 sps:$4 sm:$0xff]   ;;  %v23_v46 = vld [vmem:[%s10583_s0] sm:$0xff]  ;;  %v6952_v49 = vld [vmem:[%s10582_s1 + $0x168] ss:$16 sps:$4 sm:$0xff]  }
  0x11   :  { %v6951_v47 = vld [vmem:[%s10582_s1 + $0x160] ss:$16 sps:$4 sm:$0xff]   ;;  %v5969_v48 = vcombine.high %v23_v46, %v23_v46  ;;  %v6953_v50 = vld [vmem:[%s10582_s1 + $0x184] ss:$16 sps:$4 sm:$0xff]   ;;  %v6955_v51 = vld [vmem:[%s10582_s1 + $0x18c] ss:$16 sps:$4 sm:$0xff]   ;;  %v5968_v4 = vcombine.low %v23_v46, %v23_v46 }
  0x12   :  { %v6957_v52 = vld [vmem:[%s10582_s1 + $0x180] ss:$16 sps:$4 sm:$0xff]   ;;  %v6958_v53 = vld [vmem:[%s10582_s1 + $0x188] ss:$16 sps:$4 sm:$0xff]   ;;  %v6959_v54 = vld [vmem:[%s10582_s1 + $0x1a4] ss:$16 sps:$4 sm:$0xff]  }
  0x13   :  { %4862 = vmatpush1.bf16.msra.mxu0 %v6909_v18  ;;  %5395 = vmatpush1.bf16.msra.mxu1 %v6910_v19  ;;  %v6961_v55 = vld [vmem:[%s10582_s1 + $0x1ac] ss:$16 sps:$4 sm:$0xff]   ;;  %v6963_v56 = vld [vmem:[%s10582_s1 + $0x1a0] ss:$16 sps:$4 sm:$0xff]   ;;  %v6964_v57 = vld [vmem:[%s10582_s1 + $0x1a8] ss:$16 sps:$4 sm:$0xff]  }
  0x14   :  { %4863 = vmatprep.subr.bf16.mxu0 %v6911_v20  ;;  %5396 = vmatprep.subr.bf16.mxu1 %v6913_v21  ;;  %v6965_v58 = vld [vmem:[%s10582_s1 + $0x1c4] ss:$16 sps:$4 sm:$0xff]   ;;  %v6967_v59 = vld [vmem:[%s10582_s1 + $0x1cc] ss:$16 sps:$4 sm:$0xff]   ;;  %v6969_v60 = vld [vmem:[%s10582_s1 + $0x1c0] ss:$16 sps:$4 sm:$0xff]  }
  0x15   :  { %4885 = vmatprep.mubr.bf16.mxu0 %v5969_v48  ;;  %5418 = vmatprep.mubr.bf16.mxu1 %v5969_v48  ;;  %v6970_v61 = vld [vmem:[%s10582_s1 + $0x1c8] ss:$16 sps:$4 sm:$0xff]   ;;  %v6971_v62 = vld [vmem:[%s10582_s1 + $0x1e4] ss:$16 sps:$4 sm:$0xff]   ;;  %v6973_v63 = vld [vmem:[%s10582_s1 + $0x1ec] ss:$16 sps:$4 sm:$0xff]  }
  0x16   :  { %v6975_v0 = vld [vmem:[%s10582_s1 + $0x1e0] ss:$16 sps:$4 sm:$0xff]   ;;  %v6976_v1 = vld [vmem:[%s10582_s1 + $0x1e8] ss:$16 sps:$4 sm:$0xff]   ;;  %v6981_v2 = vld [vmem:[%s10582_s1 + $0x204] ss:$16 sps:$4 sm:$0xff]  }
  0x17   :  { %4864 = vmatpush1.bf16.msra.mxu0 %v6915_v22  ;;  %5397 = vmatpush1.bf16.msra.mxu1 %v6916_v23  ;;  %v6984_v3 = vld [vmem:[%s10582_s1 + $0x20c] ss:$16 sps:$4 sm:$0xff]   ;;  %v6979_v5 = vld [vmem:[%s10582_s1 + $0x200] ss:$16 sps:$4 sm:$0xff]   ;;  %v6982_v6 = vld [vmem:[%s10582_s1 + $0x208] ss:$16 sps:$4 sm:$0xff]  }
  0x18   :  { %4865 = vmatprep.subr.bf16.mxu0 %v6917_v24  ;;  %5398 = vmatprep.subr.bf16.mxu1 %v6919_v25  ;;  %v6987_v7 = vld [vmem:[%s10582_s1 + $0x224] ss:$16 sps:$4 sm:$0xff]   ;;  %v6990_v8 = vld [vmem:[%s10582_s1 + $0x22c] ss:$16 sps:$4 sm:$0xff]   ;;  %v6985_v9 = vld [vmem:[%s10582_s1 + $0x220] ss:$16 sps:$4 sm:$0xff]  }
  0x19   :  { %v6988_v10 = vld [vmem:[%s10582_s1 + $0x228] ss:$16 sps:$4 sm:$0xff]   ;;  %v6993_v11 = vld [vmem:[%s10582_s1 + $0x244] ss:$16 sps:$4 sm:$0xff]   ;;  %v6996_v12 = vld [vmem:[%s10582_s1 + $0x24c] ss:$16 sps:$4 sm:$0xff]  }
  0x1a   :  { %v6991_v13 = vld [vmem:[%s10582_s1 + $0x240] ss:$16 sps:$4 sm:$0xff]   ;;  %v6994_v14 = vld [vmem:[%s10582_s1 + $0x248] ss:$16 sps:$4 sm:$0xff]   ;;  %v6999_v15 = vld [vmem:[%s10582_s1 + $0x264] ss:$16 sps:$4 sm:$0xff]  }
  0x1b   :  { %4866 = vmatpush1.bf16.msra.mxu0 %v6921_v26  ;;  %5399 = vmatpush1.bf16.msra.mxu1 %v6922_v27  ;;  %v7002_v16 = vld [vmem:[%s10582_s1 + $0x26c] ss:$16 sps:$4 sm:$0xff]   ;;  %v6997_v17 = vld [vmem:[%s10582_s1 + $0x260] ss:$16 sps:$4 sm:$0xff]   ;;  %v7000_v18 = vld [vmem:[%s10582_s1 + $0x268] ss:$16 sps:$4 sm:$0xff]  }
  0x1c   :  { %4867 = vmatprep.subr.bf16.mxu0 %v6923_v28  ;;  %5400 = vmatprep.subr.bf16.mxu1 %v6925_v29  ;;  %v7005_v19 = vld [vmem:[%s10582_s1 + $0x284] ss:$16 sps:$4 sm:$0xff]   ;;  %v7008_v20 = vld [vmem:[%s10582_s1 + $0x28c] ss:$16 sps:$4 sm:$0xff]   ;;  %v7003_v21 = vld [vmem:[%s10582_s1 + $0x280] ss:$16 sps:$4 sm:$0xff]  }
  0x1d   :  { %v7006_v22 = vld [vmem:[%s10582_s1 + $0x288] ss:$16 sps:$4 sm:$0xff]   ;;  %v7011_v23 = vld [vmem:[%s10582_s1 + $0x2a4] ss:$16 sps:$4 sm:$0xff]   ;;  %v7014_v24 = vld [vmem:[%s10582_s1 + $0x2ac] ss:$16 sps:$4 sm:$0xff]  }
  0x1e   :  { %v7009_v25 = vld [vmem:[%s10582_s1 + $0x2a0] ss:$16 sps:$4 sm:$0xff]   ;;  %v7012_v26 = vld [vmem:[%s10582_s1 + $0x2a8] ss:$16 sps:$4 sm:$0xff]   ;;  %v7017_v27 = vld [vmem:[%s10582_s1 + $0x2c4] ss:$16 sps:$4 sm:$0xff]  }
  0x1f   :  { %4868 = vmatpush1.bf16.msra.mxu0 %v6927_v30  ;;  %5401 = vmatpush1.bf16.msra.mxu1 %v6928_v31  ;;  %v7020_v28 = vld [vmem:[%s10582_s1 + $0x2cc] ss:$16 sps:$4 sm:$0xff]   ;;  %v7015_v31 = vld [vmem:[%s10582_s1 + $0x2c0] ss:$16 sps:$4 sm:$0xff]   ;;  %v7042_v48 = vld [vmem:[%s10582_s1 + $0x348] ss:$16 sps:$4 sm:$0xff]  }
  0x20   :  { %4869 = vmatprep.subr.bf16.mxu0 %v6929_v32  ;;  %5402 = vmatprep.subr.bf16.mxu1 %v6931_v33  ;;  %v8389_v29 = vld [vmem:[%s10583_s0 + $0x8] sm:$0xff]  ;;  %v7023_v33 = vld [vmem:[%s10582_s1 + $0x2e4] ss:$16 sps:$4 sm:$0xff]  }
  0x21   :  { %v5971_v30 = vcombine.high %v8389_v29, %v8389_v29  ;;  %v7018_v32 = vld [vmem:[%s10582_s1 + $0x2c8] ss:$16 sps:$4 sm:$0xff]   ;;  %v7044_v46 = vld [vmem:[%s10582_s1 + $0x34c] ss:$16 sps:$4 sm:$0xff]  }
  0x23   :  { %4870 = vmatpush1.bf16.msra.mxu0 %v6933_v34  ;;  %5403 = vmatpush1.bf16.msra.mxu1 %v6934_v35  ;;  %v7026_v34 = vld [vmem:[%s10582_s1 + $0x2ec] ss:$16 sps:$4 sm:$0xff]   ;;  %v7021_v35 = vld [vmem:[%s10582_s1 + $0x2e0] ss:$16 sps:$4 sm:$0xff]  }
  0x24   :  { %4871 = vmatprep.subr.bf16.mxu0 %v6935_v36  ;;  %5404 = vmatprep.subr.bf16.mxu1 %v6937_v37  ;;  %v7024_v36 = vld [vmem:[%s10582_s1 + $0x2e8] ss:$16 sps:$4 sm:$0xff]   ;;  %v7029_v37 = vld [vmem:[%s10582_s1 + $0x304] ss:$16 sps:$4 sm:$0xff]  }
  0x27   :  { %4872 = vmatpush1.bf16.msra.mxu0 %v6939_v38  ;;  %5405 = vmatpush1.bf16.msra.mxu1 %v6940_v39  ;;  %v7032_v38 = vld [vmem:[%s10582_s1 + $0x30c] ss:$16 sps:$4 sm:$0xff]   ;;  %v7027_v39 = vld [vmem:[%s10582_s1 + $0x300] ss:$16 sps:$4 sm:$0xff]  }
  0x28   :  { %4873 = vmatprep.subr.bf16.mxu0 %v6941_v40  ;;  %5406 = vmatprep.subr.bf16.mxu1 %v6943_v41  ;;  %v7030_v40 = vld [vmem:[%s10582_s1 + $0x308] ss:$16 sps:$4 sm:$0xff]   ;;  %v7035_v41 = vld [vmem:[%s10582_s1 + $0x324] ss:$16 sps:$4 sm:$0xff]  }
  0x2b   :  { %4874 = vmatpush1.bf16.msra.mxu0 %v6945_v42  ;;  %5407 = vmatpush1.bf16.msra.mxu1 %v6946_v43  ;;  %v7038_v42 = vld [vmem:[%s10582_s1 + $0x32c] ss:$16 sps:$4 sm:$0xff]   ;;  %v7033_v43 = vld [vmem:[%s10582_s1 + $0x320] ss:$16 sps:$4 sm:$0xff]  }
  0x2c   :  { %4875 = vmatprep.subr.bf16.mxu0 %v6947_v44  ;;  %5408 = vmatprep.subr.bf16.mxu1 %v6949_v45  ;;  %v7036_v44 = vld [vmem:[%s10582_s1 + $0x328] ss:$16 sps:$4 sm:$0xff]   ;;  %v7041_v45 = vld [vmem:[%s10582_s1 + $0x344] ss:$16 sps:$4 sm:$0xff]  }
  0x2f   :  { %4876 = vmatpush1.bf16.msra.mxu0 %v6951_v47  ;;  %5409 = vmatpush1.bf16.msra.mxu1 %v6952_v49  ;;  %v7039_v47 = vld [vmem:[%s10582_s1 + $0x340] ss:$16 sps:$4 sm:$0xff]   ;;  %v7047_v49 = vld [vmem:[%s10582_s1 + $0x364] ss:$16 sps:$4 sm:$0xff]  }
  0x30   :  { %4877 = vmatprep.subr.bf16.mxu0 %v6953_v50  ;;  %5410 = vmatprep.subr.bf16.mxu1 %v6955_v51  ;;  %v7050_v50 = vld [vmem:[%s10582_s1 + $0x36c] ss:$16 sps:$4 sm:$0xff]   ;;  %v7045_v51 = vld [vmem:[%s10582_s1 + $0x360] ss:$16 sps:$4 sm:$0xff]  }
  0x33   :  { %4878 = vmatpush1.bf16.msra.mxu0 %v6957_v52  ;;  %5411 = vmatpush1.bf16.msra.mxu1 %v6958_v53  ;;  %v7048_v52 = vld [vmem:[%s10582_s1 + $0x368] ss:$16 sps:$4 sm:$0xff]   ;;  %v7053_v53 = vld [vmem:[%s10582_s1 + $0x384] ss:$16 sps:$4 sm:$0xff]  }
  0x34   :  { %4879 = vmatprep.subr.bf16.mxu0 %v6959_v54  ;;  %5412 = vmatprep.subr.bf16.mxu1 %v6961_v55  ;;  %v7056_v54 = vld [vmem:[%s10582_s1 + $0x38c] ss:$16 sps:$4 sm:$0xff]   ;;  %v7051_v55 = vld [vmem:[%s10582_s1 + $0x380] ss:$16 sps:$4 sm:$0xff]  }
  0x37   :  { %4880 = vmatpush1.bf16.msra.mxu0 %v6963_v56  ;;  %5413 = vmatpush1.bf16.msra.mxu1 %v6964_v57  ;;  %v7054_v56 = vld [vmem:[%s10582_s1 + $0x388] ss:$16 sps:$4 sm:$0xff]   ;;  %v7059_v57 = vld [vmem:[%s10582_s1 + $0x3a4] ss:$16 sps:$4 sm:$0xff]  }
  0x38   :  { %4881 = vmatprep.subr.bf16.mxu0 %v6965_v58  ;;  %5414 = vmatprep.subr.bf16.mxu1 %v6967_v59  ;;  %v7062_v58 = vld [vmem:[%s10582_s1 + $0x3ac] ss:$16 sps:$4 sm:$0xff]   ;;  %v7057_v59 = vld [vmem:[%s10582_s1 + $0x3a0] ss:$16 sps:$4 sm:$0xff]  }
  0x3b   :  { %4882 = vmatpush1.bf16.msra.mxu0 %v6969_v60  ;;  %5415 = vmatpush1.bf16.msra.mxu1 %v6970_v61  ;;  %v7060_v60 = vld [vmem:[%s10582_s1 + $0x3a8] ss:$16 sps:$4 sm:$0xff]   ;;  %v7065_v61 = vld [vmem:[%s10582_s1 + $0x3c4] ss:$16 sps:$4 sm:$0xff]  }
  0x3c   :  { %4883 = vmatprep.subr.bf16.mxu0 %v6971_v62  ;;  %5416 = vmatprep.subr.bf16.mxu1 %v6973_v63  ;;  %v7068_v62 = vld [vmem:[%s10582_s1 + $0x3cc] ss:$16 sps:$4 sm:$0xff]   ;;  %v7063_v63 = vld [vmem:[%s10582_s1 + $0x3c0] ss:$16 sps:$4 sm:$0xff]  }
  0x3f   :  { %4884 = vmatpush1.bf16.msra.mxu0 %v6975_v0  ;;  %5417 = vmatpush1.bf16.msra.mxu1 %v6976_v1  ;;  %v7066_v0 = vld [vmem:[%s10582_s1 + $0x3c8] ss:$16 sps:$4 sm:$0xff]   ;;  %v7071_v1 = vld [vmem:[%s10582_s1 + $0x3e4] ss:$16 sps:$4 sm:$0xff]  }
  0x40   :  { %4894 = vmatprep.subr.bf16.mxu0 %v6981_v2  ;;  %5427 = vmatprep.subr.bf16.mxu1 %v6984_v3  ;;  %v7074_v2 = vld [vmem:[%s10582_s1 + $0x3ec] ss:$16 sps:$4 sm:$0xff]   ;;  %v7069_v3 = vld [vmem:[%s10582_s1 + $0x3e0] ss:$16 sps:$4 sm:$0xff]  }
  0x42   :  { %4886 = vmatmul.mubr.bf16.vlgmr.msra.gmra.mrb[0].mxu0 %v5968_v4  ;;  %5419 = vmatmul.mubr.bf16.vlgmr.msra.gmra.mrb[0].mxu1 %v5968_v4  ;;  %v7072_v4 = vld [vmem:[%s10582_s1 + $0x3e8] ss:$16 sps:$4 sm:$0xff]  }
  0x43   :  { %4895 = vmatpush1.bf16.msra.mxu0 %v6979_v5  ;;  %5428 = vmatpush1.bf16.msra.mxu1 %v6982_v6  ;;  %v7079_v5 = vld [vmem:[%s10582_s1 + $0x404] ss:$16 sps:$4 sm:$0xff]   ;;  %v7082_v6 = vld [vmem:[%s10582_s1 + $0x40c] ss:$16 sps:$4 sm:$0xff]  }
  0x44   :  { %4896 = vmatprep.subr.bf16.mxu0 %v6987_v7  ;;  %5429 = vmatprep.subr.bf16.mxu1 %v6990_v8  ;;  %v5970_v7 = vcombine.low %v8389_v29, %v8389_v29  ;;  %v7077_v8 = vld [vmem:[%s10582_s1 + $0x400] ss:$16 sps:$4 sm:$0xff]   ;;  %v7112_v29 = vld [vmem:[%s10582_s1 + $0x4ac] ss:$16 sps:$4 sm:$0xff]  }
  0x45   :  { %4926 = vmatprep.mubr.bf16.mxu0 %v5971_v30  ;;  %5459 = vmatprep.mubr.bf16.mxu1 %v5971_v30  ;;  %v7107_v30 = vld [vmem:[%s10582_s1 + $0x4a0] ss:$16 sps:$4 sm:$0xff]  }
  0x47   :  { %4897 = vmatpush1.bf16.msra.mxu0 %v6985_v9  ;;  %5430 = vmatpush1.bf16.msra.mxu1 %v6988_v10  ;;  %v7080_v9 = vld [vmem:[%s10582_s1 + $0x408] ss:$16 sps:$4 sm:$0xff]   ;;  %v7085_v10 = vld [vmem:[%s10582_s1 + $0x424] ss:$16 sps:$4 sm:$0xff]  }
  0x48   :  { %4898 = vmatprep.subr.bf16.mxu0 %v6993_v11  ;;  %5431 = vmatprep.subr.bf16.mxu1 %v6996_v12  ;;  %v8527_v11 = vld [vmem:[%s10583_s0 + $0x10] sm:$0xff]  ;;  %v7088_v12 = vld [vmem:[%s10582_s1 + $0x42c] ss:$16 sps:$4 sm:$0xff]  }
  0x4b   :  { %4899 = vmatpush1.bf16.msra.mxu0 %v6991_v13  ;;  %5432 = vmatpush1.bf16.msra.mxu1 %v6994_v14  ;;  %v5973_v13 = vcombine.high %v8527_v11, %v8527_v11  ;;  %v7083_v14 = vld [vmem:[%s10582_s1 + $0x420] ss:$16 sps:$4 sm:$0xff]  }
  0x4c   :  { %4900 = vmatprep.subr.bf16.mxu0 %v6999_v15  ;;  %5433 = vmatprep.subr.bf16.mxu1 %v7002_v16  ;;  %v7086_v15 = vld [vmem:[%s10582_s1 + $0x428] ss:$16 sps:$4 sm:$0xff]   ;;  %v7091_v16 = vld [vmem:[%s10582_s1 + $0x444] ss:$16 sps:$4 sm:$0xff]  }
  0x4f   :  { %4901 = vmatpush1.bf16.msra.mxu0 %v6997_v17  ;;  %5434 = vmatpush1.bf16.msra.mxu1 %v7000_v18  ;;  %v7094_v17 = vld [vmem:[%s10582_s1 + $0x44c] ss:$16 sps:$4 sm:$0xff]   ;;  %v7089_v18 = vld [vmem:[%s10582_s1 + $0x440] ss:$16 sps:$4 sm:$0xff]  }
  0x50   :  { %4902 = vmatprep.subr.bf16.mxu0 %v7005_v19  ;;  %5435 = vmatprep.subr.bf16.mxu1 %v7008_v20  ;;  %v7092_v19 = vld [vmem:[%s10582_s1 + $0x448] ss:$16 sps:$4 sm:$0xff]   ;;  %v7097_v20 = vld [vmem:[%s10582_s1 + $0x464] ss:$16 sps:$4 sm:$0xff]  }
  0x53   :  { %4903 = vmatpush1.bf16.msra.mxu0 %v7003_v21  ;;  %5436 = vmatpush1.bf16.msra.mxu1 %v7006_v22  ;;  %v7100_v21 = vld [vmem:[%s10582_s1 + $0x46c] ss:$16 sps:$4 sm:$0xff]   ;;  %v7095_v22 = vld [vmem:[%s10582_s1 + $0x460] ss:$16 sps:$4 sm:$0xff]  }
  0x54   :  { %4904 = vmatprep.subr.bf16.mxu0 %v7011_v23  ;;  %5437 = vmatprep.subr.bf16.mxu1 %v7014_v24  ;;  %v7098_v23 = vld [vmem:[%s10582_s1 + $0x468] ss:$16 sps:$4 sm:$0xff]   ;;  %v7103_v24 = vld [vmem:[%s10582_s1 + $0x484] ss:$16 sps:$4 sm:$0xff]  }
  0x57   :  { %4905 = vmatpush1.bf16.msra.mxu0 %v7009_v25  ;;  %5438 = vmatpush1.bf16.msra.mxu1 %v7012_v26  ;;  %v7106_v25 = vld [vmem:[%s10582_s1 + $0x48c] ss:$16 sps:$4 sm:$0xff]   ;;  %v7101_v26 = vld [vmem:[%s10582_s1 + $0x480] ss:$16 sps:$4 sm:$0xff]  }
  0x58   :  { %4906 = vmatprep.subr.bf16.mxu0 %v7017_v27  ;;  %5439 = vmatprep.subr.bf16.mxu1 %v7020_v28  ;;  %v7104_v27 = vld [vmem:[%s10582_s1 + $0x488] ss:$16 sps:$4 sm:$0xff]   ;;  %v7109_v28 = vld [vmem:[%s10582_s1 + $0x4a4] ss:$16 sps:$4 sm:$0xff]  }
  0x5b   :  { %4907 = vmatpush1.bf16.msra.mxu0 %v7015_v31  ;;  %5440 = vmatpush1.bf16.msra.mxu1 %v7018_v32  ;;  %v7110_v31 = vld [vmem:[%s10582_s1 + $0x4a8] ss:$16 sps:$4 sm:$0xff]   ;;  %v7115_v32 = vld [vmem:[%s10582_s1 + $0x4c4] ss:$16 sps:$4 sm:$0xff]  }
  0x5c   :  { %4908 = vmatprep.subr.bf16.mxu0 %v7023_v33  ;;  %5441 = vmatprep.subr.bf16.mxu1 %v7026_v34  ;;  %v7118_v33 = vld [vmem:[%s10582_s1 + $0x4cc] ss:$16 sps:$4 sm:$0xff]   ;;  %v7113_v34 = vld [vmem:[%s10582_s1 + $0x4c0] ss:$16 sps:$4 sm:$0xff]  }
  0x5f   :  { %4909 = vmatpush1.bf16.msra.mxu0 %v7021_v35  ;;  %5442 = vmatpush1.bf16.msra.mxu1 %v7024_v36  ;;  %v7116_v35 = vld [vmem:[%s10582_s1 + $0x4c8] ss:$16 sps:$4 sm:$0xff]   ;;  %v7121_v36 = vld [vmem:[%s10582_s1 + $0x4e4] ss:$16 sps:$4 sm:$0xff]  }
  0x60   :  { %4910 = vmatprep.subr.bf16.mxu0 %v7029_v37  ;;  %5443 = vmatprep.subr.bf16.mxu1 %v7032_v38  ;;  %v7124_v37 = vld [vmem:[%s10582_s1 + $0x4ec] ss:$16 sps:$4 sm:$0xff]   ;;  %v7119_v38 = vld [vmem:[%s10582_s1 + $0x4e0] ss:$16 sps:$4 sm:$0xff]  }
  0x63   :  { %4911 = vmatpush1.bf16.msra.mxu0 %v7027_v39  ;;  %5444 = vmatpush1.bf16.msra.mxu1 %v7030_v40  ;;  %v7122_v39 = vld [vmem:[%s10582_s1 + $0x4e8] ss:$16 sps:$4 sm:$0xff]   ;;  %v7127_v40 = vld [vmem:[%s10582_s1 + $0x504] ss:$16 sps:$4 sm:$0xff]  }
  0x64   :  { %4912 = vmatprep.subr.bf16.mxu0 %v7035_v41  ;;  %5445 = vmatprep.subr.bf16.mxu1 %v7038_v42  ;;  %v7130_v41 = vld [vmem:[%s10582_s1 + $0x50c] ss:$16 sps:$4 sm:$0xff]   ;;  %v7125_v42 = vld [vmem:[%s10582_s1 + $0x500] ss:$16 sps:$4 sm:$0xff]  }
  0x67   :  { %4913 = vmatpush1.bf16.msra.mxu0 %v7033_v43  ;;  %5446 = vmatpush1.bf16.msra.mxu1 %v7036_v44  ;;  %v7128_v43 = vld [vmem:[%s10582_s1 + $0x508] ss:$16 sps:$4 sm:$0xff]   ;;  %v7133_v44 = vld [vmem:[%s10582_s1 + $0x524] ss:$16 sps:$4 sm:$0xff]  }
  0x68   :  { %4914 = vmatprep.subr.bf16.mxu0 %v7041_v45  ;;  %5447 = vmatprep.subr.bf16.mxu1 %v7044_v46  ;;  %v7136_v45 = vld [vmem:[%s10582_s1 + $0x52c] ss:$16 sps:$4 sm:$0xff]   ;;  %v7131_v46 = vld [vmem:[%s10582_s1 + $0x520] ss:$16 sps:$4 sm:$0xff]  }
  0x6b   :  { %4915 = vmatpush1.bf16.msra.mxu0 %v7039_v47  ;;  %5448 = vmatpush1.bf16.msra.mxu1 %v7042_v48  ;;  %v7134_v47 = vld [vmem:[%s10582_s1 + $0x528] ss:$16 sps:$4 sm:$0xff]   ;;  %v7139_v48 = vld [vmem:[%s10582_s1 + $0x544] ss:$16 sps:$4 sm:$0xff]  }
  0x6c   :  { %4916 = vmatprep.subr.bf16.mxu0 %v7047_v49  ;;  %5449 = vmatprep.subr.bf16.mxu1 %v7050_v50  ;;  %v7142_v49 = vld [vmem:[%s10582_s1 + $0x54c] ss:$16 sps:$4 sm:$0xff]   ;;  %v7137_v50 = vld [vmem:[%s10582_s1 + $0x540] ss:$16 sps:$4 sm:$0xff]  }
  0x6f   :  { %4917 = vmatpush1.bf16.msra.mxu0 %v7045_v51  ;;  %5450 = vmatpush1.bf16.msra.mxu1 %v7048_v52  ;;  %v7140_v51 = vld [vmem:[%s10582_s1 + $0x548] ss:$16 sps:$4 sm:$0xff]   ;;  %v7145_v52 = vld [vmem:[%s10582_s1 + $0x564] ss:$16 sps:$4 sm:$0xff]  }
  0x70   :  { %4918 = vmatprep.subr.bf16.mxu0 %v7053_v53  ;;  %5451 = vmatprep.subr.bf16.mxu1 %v7056_v54  ;;  %v7148_v53 = vld [vmem:[%s10582_s1 + $0x56c] ss:$16 sps:$4 sm:$0xff]   ;;  %v7143_v54 = vld [vmem:[%s10582_s1 + $0x560] ss:$16 sps:$4 sm:$0xff]  }
  0x73   :  { %4919 = vmatpush1.bf16.msra.mxu0 %v7051_v55  ;;  %5452 = vmatpush1.bf16.msra.mxu1 %v7054_v56  ;;  %v7146_v55 = vld [vmem:[%s10582_s1 + $0x568] ss:$16 sps:$4 sm:$0xff]   ;;  %v7151_v56 = vld [vmem:[%s10582_s1 + $0x584] ss:$16 sps:$4 sm:$0xff]  }
  0x74   :  { %4920 = vmatprep.subr.bf16.mxu0 %v7059_v57  ;;  %5453 = vmatprep.subr.bf16.mxu1 %v7062_v58  ;;  %v7154_v57 = vld [vmem:[%s10582_s1 + $0x58c] ss:$16 sps:$4 sm:$0xff]   ;;  %v7149_v58 = vld [vmem:[%s10582_s1 + $0x580] ss:$16 sps:$4 sm:$0xff]  }
  0x77   :  { %4921 = vmatpush1.bf16.msra.mxu0 %v7057_v59  ;;  %5454 = vmatpush1.bf16.msra.mxu1 %v7060_v60  ;;  %v7152_v59 = vld [vmem:[%s10582_s1 + $0x588] ss:$16 sps:$4 sm:$0xff]   ;;  %v7157_v60 = vld [vmem:[%s10582_s1 + $0x5a4] ss:$16 sps:$4 sm:$0xff]  }
  0x78   :  { %4922 = vmatprep.subr.bf16.mxu0 %v7065_v61  ;;  %5455 = vmatprep.subr.bf16.mxu1 %v7068_v62  ;;  %v7160_v61 = vld [vmem:[%s10582_s1 + $0x5ac] ss:$16 sps:$4 sm:$0xff]   ;;  %v7155_v62 = vld [vmem:[%s10582_s1 + $0x5a0] ss:$16 sps:$4 sm:$0xff]  }
  0x7b   :  { %4923 = vmatpush1.bf16.msra.mxu0 %v7063_v63  ;;  %5456 = vmatpush1.bf16.msra.mxu1 %v7066_v0  ;;  %v7158_v63 = vld [vmem:[%s10582_s1 + $0x5a8] ss:$16 sps:$4 sm:$0xff]   ;;  %v7163_v0 = vld [vmem:[%s10582_s1 + $0x5c4] ss:$16 sps:$4 sm:$0xff]  }
  0x7c   :  { %4924 = vmatprep.subr.bf16.mxu0 %v7071_v1  ;;  %5457 = vmatprep.subr.bf16.mxu1 %v7074_v2  ;;  %v7166_v1 = vld [vmem:[%s10582_s1 + $0x5cc] ss:$16 sps:$4 sm:$0xff]   ;;  %v7161_v2 = vld [vmem:[%s10582_s1 + $0x5c0] ss:$16 sps:$4 sm:$0xff]  }
  0x7f   :  { %4925 = vmatpush1.bf16.msra.mxu0 %v7069_v3  ;;  %5458 = vmatpush1.bf16.msra.mxu1 %v7072_v4  ;;  %v7164_v3 = vld [vmem:[%s10582_s1 + $0x5c8] ss:$16 sps:$4 sm:$0xff]   ;;  %v7169_v4 = vld [vmem:[%s10582_s1 + $0x5e4] ss:$16 sps:$4 sm:$0xff]  }
  0x80   :  { %4935 = vmatprep.subr.bf16.mxu0 %v7079_v5  ;;  %5468 = vmatprep.subr.bf16.mxu1 %v7082_v6  ;;  %v7172_v5 = vld [vmem:[%s10582_s1 + $0x5ec] ss:$16 sps:$4 sm:$0xff]   ;;  %v7167_v6 = vld [vmem:[%s10582_s1 + $0x5e0] ss:$16 sps:$4 sm:$0xff]  }
  0x82   :  { %4927 = vmatmul.mubr.bf16.vlgmr.msra.gmra.mrb[0].mxu0 %v5970_v7  ;;  %5460 = vmatmul.mubr.bf16.vlgmr.msra.gmra.mrb[0].mxu1 %v5970_v7  ;;  %v7170_v7 = vld [vmem:[%s10582_s1 + $0x5e8] ss:$16 sps:$4 sm:$0xff]  }
  0x83   :  { %4936 = vmatpush1.bf16.msra.mxu0 %v7077_v8  ;;  %5469 = vmatpush1.bf16.msra.mxu1 %v7080_v9  ;;  %v7177_v8 = vld [vmem:[%s10582_s1 + $0x604] ss:$16 sps:$4 sm:$0xff]   ;;  %v7180_v9 = vld [vmem:[%s10582_s1 + $0x60c] ss:$16 sps:$4 sm:$0xff]  }
  0x84   :  { %4937 = vmatprep.subr.bf16.mxu0 %v7085_v10  ;;  %5470 = vmatprep.subr.bf16.mxu1 %v7088_v12  ;;  %v7175_v10 = vld [vmem:[%s10582_s1 + $0x600] ss:$16 sps:$4 sm:$0xff]   ;;  %v5972_v12 = vcombine.low %v8527_v11, %v8527_v11  ;;  %v7186_v11 = vld [vmem:[%s10582_s1 + $0x62c] ss:$16 sps:$4 sm:$0xff]  }
  0x85   :  { %4967 = vmatprep.mubr.bf16.mxu0 %v5973_v13  ;;  %5500 = vmatprep.mubr.bf16.mxu1 %v5973_v13  ;;  %v7178_v13 = vld [vmem:[%s10582_s1 + $0x608] ss:$16 sps:$4 sm:$0xff]  }
  0x87   :  { %4938 = vmatpush1.bf16.msra.mxu0 %v7083_v14  ;;  %5471 = vmatpush1.bf16.msra.mxu1 %v7086_v15  ;;  %v8725_v14 = vld [vmem:[%s10583_s0 + $0x18] sm:$0xff]  ;;  %v7183_v15 = vld [vmem:[%s10582_s1 + $0x624] ss:$16 sps:$4 sm:$0xff]  }
  0x88   :  { %4939 = vmatprep.subr.bf16.mxu0 %v7091_v16  ;;  %5472 = vmatprep.subr.bf16.mxu1 %v7094_v17  ;;  %v5975_v16 = vcombine.high %v8725_v14, %v8725_v14  ;;  %v7181_v17 = vld [vmem:[%s10582_s1 + $0x620] ss:$16 sps:$4 sm:$0xff]  }
  0x8b   :  { %4940 = vmatpush1.bf16.msra.mxu0 %v7089_v18  ;;  %5473 = vmatpush1.bf16.msra.mxu1 %v7092_v19  ;;  %v7184_v18 = vld [vmem:[%s10582_s1 + $0x628] ss:$16 sps:$4 sm:$0xff]   ;;  %v7189_v19 = vld [vmem:[%s10582_s1 + $0x644] ss:$16 sps:$4 sm:$0xff]  }
  0x8c   :  { %4941 = vmatprep.subr.bf16.mxu0 %v7097_v20  ;;  %5474 = vmatprep.subr.bf16.mxu1 %v7100_v21  ;;  %v7192_v20 = vld [vmem:[%s10582_s1 + $0x64c] ss:$16 sps:$4 sm:$0xff]   ;;  %v7187_v21 = vld [vmem:[%s10582_s1 + $0x640] ss:$16 sps:$4 sm:$0xff]  }
  0x8f   :  { %4942 = vmatpush1.bf16.msra.mxu0 %v7095_v22  ;;  %5475 = vmatpush1.bf16.msra.mxu1 %v7098_v23  ;;  %v7190_v22 = vld [vmem:[%s10582_s1 + $0x648] ss:$16 sps:$4 sm:$0xff]   ;;  %v7195_v23 = vld [vmem:[%s10582_s1 + $0x664] ss:$16 sps:$4 sm:$0xff]  }
  0x90   :  { %4943 = vmatprep.subr.bf16.mxu0 %v7103_v24  ;;  %5476 = vmatprep.subr.bf16.mxu1 %v7106_v25  ;;  %v7198_v24 = vld [vmem:[%s10582_s1 + $0x66c] ss:$16 sps:$4 sm:$0xff]   ;;  %v7193_v25 = vld [vmem:[%s10582_s1 + $0x660] ss:$16 sps:$4 sm:$0xff]  }
  0x93   :  { %4944 = vmatpush1.bf16.msra.mxu0 %v7101_v26  ;;  %5477 = vmatpush1.bf16.msra.mxu1 %v7104_v27  ;;  %v7196_v26 = vld [vmem:[%s10582_s1 + $0x668] ss:$16 sps:$4 sm:$0xff]   ;;  %v7201_v27 = vld [vmem:[%s10582_s1 + $0x684] ss:$16 sps:$4 sm:$0xff]  }
  0x94   :  { %4945 = vmatprep.subr.bf16.mxu0 %v7109_v28  ;;  %5478 = vmatprep.subr.bf16.mxu1 %v7112_v29  ;;  %v7204_v28 = vld [vmem:[%s10582_s1 + $0x68c] ss:$16 sps:$4 sm:$0xff]   ;;  %v7199_v29 = vld [vmem:[%s10582_s1 + $0x680] ss:$16 sps:$4 sm:$0xff]  }
  0x97   :  { %4946 = vmatpush1.bf16.msra.mxu0 %v7107_v30  ;;  %5479 = vmatpush1.bf16.msra.mxu1 %v7110_v31  ;;  %v7202_v30 = vld [vmem:[%s10582_s1 + $0x688] ss:$16 sps:$4 sm:$0xff]   ;;  %v7207_v31 = vld [vmem:[%s10582_s1 + $0x6a4] ss:$16 sps:$4 sm:$0xff]  }
  0x98   :  { %4947 = vmatprep.subr.bf16.mxu0 %v7115_v32  ;;  %5480 = vmatprep.subr.bf16.mxu1 %v7118_v33  ;;  %v7210_v32 = vld [vmem:[%s10582_s1 + $0x6ac] ss:$16 sps:$4 sm:$0xff]   ;;  %v7205_v33 = vld [vmem:[%s10582_s1 + $0x6a0] ss:$16 sps:$4 sm:$0xff]  }
  0x9b   :  { %4948 = vmatpush1.bf16.msra.mxu0 %v7113_v34  ;;  %5481 = vmatpush1.bf16.msra.mxu1 %v7116_v35  ;;  %v7208_v34 = vld [vmem:[%s10582_s1 + $0x6a8] ss:$16 sps:$4 sm:$0xff]   ;;  %v7213_v35 = vld [vmem:[%s10582_s1 + $0x6c4] ss:$16 sps:$4 sm:$0xff]  }
  0x9c   :  { %4949 = vmatprep.subr.bf16.mxu0 %v7121_v36  ;;  %5482 = vmatprep.subr.bf16.mxu1 %v7124_v37  ;;  %v7216_v36 = vld [vmem:[%s10582_s1 + $0x6cc] ss:$16 sps:$4 sm:$0xff]   ;;  %v7211_v37 = vld [vmem:[%s10582_s1 + $0x6c0] ss:$16 sps:$4 sm:$0xff]  }
  0x9f   :  { %4950 = vmatpush1.bf16.msra.mxu0 %v7119_v38  ;;  %5483 = vmatpush1.bf16.msra.mxu1 %v7122_v39  ;;  %v7214_v38 = vld [vmem:[%s10582_s1 + $0x6c8] ss:$16 sps:$4 sm:$0xff]   ;;  %v7219_v39 = vld [vmem:[%s10582_s1 + $0x6e4] ss:$16 sps:$4 sm:$0xff]  }
  0xa0   :  { %4951 = vmatprep.subr.bf16.mxu0 %v7127_v40  ;;  %5484 = vmatprep.subr.bf16.mxu1 %v7130_v41  ;;  %v7222_v40 = vld [vmem:[%s10582_s1 + $0x6ec] ss:$16 sps:$4 sm:$0xff]   ;;  %v7217_v41 = vld [vmem:[%s10582_s1 + $0x6e0] ss:$16 sps:$4 sm:$0xff]  }
  0xa3   :  { %4952 = vmatpush1.bf16.msra.mxu0 %v7125_v42  ;;  %5485 = vmatpush1.bf16.msra.mxu1 %v7128_v43  ;;  %v7220_v42 = vld [vmem:[%s10582_s1 + $0x6e8] ss:$16 sps:$4 sm:$0xff]   ;;  %v7225_v43 = vld [vmem:[%s10582_s1 + $0x704] ss:$16 sps:$4 sm:$0xff]  }
  0xa4   :  { %4953 = vmatprep.subr.bf16.mxu0 %v7133_v44  ;;  %5486 = vmatprep.subr.bf16.mxu1 %v7136_v45  ;;  %v7228_v44 = vld [vmem:[%s10582_s1 + $0x70c] ss:$16 sps:$4 sm:$0xff]   ;;  %v7223_v45 = vld [vmem:[%s10582_s1 + $0x700] ss:$16 sps:$4 sm:$0xff]  }
  0xa7   :  { %4954 = vmatpush1.bf16.msra.mxu0 %v7131_v46  ;;  %5487 = vmatpush1.bf16.msra.mxu1 %v7134_v47  ;;  %v7226_v46 = vld [vmem:[%s10582_s1 + $0x708] ss:$16 sps:$4 sm:$0xff]   ;;  %v7231_v47 = vld [vmem:[%s10582_s1 + $0x724] ss:$16 sps:$4 sm:$0xff]  }
  0xa8   :  { %4955 = vmatprep.subr.bf16.mxu0 %v7139_v48  ;;  %5488 = vmatprep.subr.bf16.mxu1 %v7142_v49  ;;  %v7234_v48 = vld [vmem:[%s10582_s1 + $0x72c] ss:$16 sps:$4 sm:$0xff]   ;;  %v7229_v49 = vld [vmem:[%s10582_s1 + $0x720] ss:$16 sps:$4 sm:$0xff]  }
  0xab   :  { %4956 = vmatpush1.bf16.msra.mxu0 %v7137_v50  ;;  %5489 = vmatpush1.bf16.msra.mxu1 %v7140_v51  ;;  %v7232_v50 = vld [vmem:[%s10582_s1 + $0x728] ss:$16 sps:$4 sm:$0xff]   ;;  %v7237_v51 = vld [vmem:[%s10582_s1 + $0x744] ss:$16 sps:$4 sm:$0xff]  }
  0xac   :  { %4957 = vmatprep.subr.bf16.mxu0 %v7145_v52  ;;  %5490 = vmatprep.subr.bf16.mxu1 %v7148_v53  ;;  %v7240_v52 = vld [vmem:[%s10582_s1 + $0x74c] ss:$16 sps:$4 sm:$0xff]   ;;  %v7235_v53 = vld [vmem:[%s10582_s1 + $0x740] ss:$16 sps:$4 sm:$0xff]  }
  0xaf   :  { %4958 = vmatpush1.bf16.msra.mxu0 %v7143_v54  ;;  %5491 = vmatpush1.bf16.msra.mxu1 %v7146_v55  ;;  %v7238_v54 = vld [vmem:[%s10582_s1 + $0x748] ss:$16 sps:$4 sm:$0xff]   ;;  %v7243_v55 = vld [vmem:[%s10582_s1 + $0x764] ss:$16 sps:$4 sm:$0xff]  }
  0xb0   :  { %4959 = vmatprep.subr.bf16.mxu0 %v7151_v56  ;;  %5492 = vmatprep.subr.bf16.mxu1 %v7154_v57  ;;  %v7246_v56 = vld [vmem:[%s10582_s1 + $0x76c] ss:$16 sps:$4 sm:$0xff]   ;;  %v7241_v57 = vld [vmem:[%s10582_s1 + $0x760] ss:$16 sps:$4 sm:$0xff]  }
  0xb3   :  { %4960 = vmatpush1.bf16.msra.mxu0 %v7149_v58  ;;  %5493 = vmatpush1.bf16.msra.mxu1 %v7152_v59  ;;  %v7244_v58 = vld [vmem:[%s10582_s1 + $0x768] ss:$16 sps:$4 sm:$0xff]   ;;  %v7249_v59 = vld [vmem:[%s10582_s1 + $0x784] ss:$16 sps:$4 sm:$0xff]  }
  0xb4   :  { %4961 = vmatprep.subr.bf16.mxu0 %v7157_v60  ;;  %5494 = vmatprep.subr.bf16.mxu1 %v7160_v61  ;;  %v7252_v60 = vld [vmem:[%s10582_s1 + $0x78c] ss:$16 sps:$4 sm:$0xff]   ;;  %v7247_v61 = vld [vmem:[%s10582_s1 + $0x780] ss:$16 sps:$4 sm:$0xff]  }
  0xb7   :  { %4962 = vmatpush1.bf16.msra.mxu0 %v7155_v62  ;;  %5495 = vmatpush1.bf16.msra.mxu1 %v7158_v63  ;;  %v7250_v62 = vld [vmem:[%s10582_s1 + $0x788] ss:$16 sps:$4 sm:$0xff]   ;;  %v7255_v63 = vld [vmem:[%s10582_s1 + $0x7a4] ss:$16 sps:$4 sm:$0xff]  }
  0xb8   :  { %4963 = vmatprep.subr.bf16.mxu0 %v7163_v0  ;;  %5496 = vmatprep.subr.bf16.mxu1 %v7166_v1  ;;  %v7258_v0 = vld [vmem:[%s10582_s1 + $0x7ac] ss:$16 sps:$4 sm:$0xff]   ;;  %v7253_v1 = vld [vmem:[%s10582_s1 + $0x7a0] ss:$16 sps:$4 sm:$0xff]  }
  0xbb   :  { %4964 = vmatpush1.bf16.msra.mxu0 %v7161_v2  ;;  %5497 = vmatpush1.bf16.msra.mxu1 %v7164_v3  ;;  %v7256_v2 = vld [vmem:[%s10582_s1 + $0x7a8] ss:$16 sps:$4 sm:$0xff]   ;;  %v7261_v3 = vld [vmem:[%s10582_s1 + $0x7c4] ss:$16 sps:$4 sm:$0xff]  }
  0xbc   :  { %4965 = vmatprep.subr.bf16.mxu0 %v7169_v4  ;;  %5498 = vmatprep.subr.bf16.mxu1 %v7172_v5  ;;  %v7264_v4 = vld [vmem:[%s10582_s1 + $0x7cc] ss:$16 sps:$4 sm:$0xff]   ;;  %v7259_v5 = vld [vmem:[%s10582_s1 + $0x7c0] ss:$16 sps:$4 sm:$0xff]  }
  0xbf   :  { %4966 = vmatpush1.bf16.msra.mxu0 %v7167_v6  ;;  %5499 = vmatpush1.bf16.msra.mxu1 %v7170_v7  ;;  %v7262_v6 = vld [vmem:[%s10582_s1 + $0x7c8] ss:$16 sps:$4 sm:$0xff]   ;;  %v7267_v7 = vld [vmem:[%s10582_s1 + $0x7e4] ss:$16 sps:$4 sm:$0xff]  }
  0xc0   :  { %4976 = vmatprep.subr.bf16.mxu0 %v7177_v8  ;;  %5509 = vmatprep.subr.bf16.mxu1 %v7180_v9  ;;  %v7270_v8 = vld [vmem:[%s10582_s1 + $0x7ec] ss:$16 sps:$4 sm:$0xff]   ;;  %v7265_v9 = vld [vmem:[%s10582_s1 + $0x7e0] ss:$16 sps:$4 sm:$0xff]  }
  0xc2   :  { %4968 = vmatmul.mubr.bf16.vlgmr.msra.gmra.mrb[0].mxu0 %v5972_v12  ;;  %5501 = vmatmul.mubr.bf16.vlgmr.msra.gmra.mrb[0].mxu1 %v5972_v12  ;;  %v7275_v12 = vld [vmem:[%s10582_s1 + $0x804] ss:$16 sps:$4 sm:$0xff]  }
  0xc3   :  { %4977 = vmatpush1.bf16.msra.mxu0 %v7175_v10  ;;  %5510 = vmatpush1.bf16.msra.mxu1 %v7178_v13  ;;  %v7268_v10 = vld [vmem:[%s10582_s1 + $0x7e8] ss:$16 sps:$4 sm:$0xff]   ;;  %v7278_v13 = vld [vmem:[%s10582_s1 + $0x80c] ss:$16 sps:$4 sm:$0xff]  }
  0xc4   :  { %4978 = vmatprep.subr.bf16.mxu0 %v7183_v15  ;;  %5511 = vmatprep.subr.bf16.mxu1 %v7186_v11  ;;  %v7273_v15 = vld [vmem:[%s10582_s1 + $0x800] ss:$16 sps:$4 sm:$0xff]   ;;  %v5974_v11 = vcombine.low %v8725_v14, %v8725_v14  ;;  %v7284_v14 = vld [vmem:[%s10582_s1 + $0x82c] ss:$16 sps:$4 sm:$0xff]  }
  0xc5   :  { %5008 = vmatprep.mubr.bf16.mxu0 %v5975_v16  ;;  %5541 = vmatprep.mubr.bf16.mxu1 %v5975_v16  ;;  %v8923_v16 = vld [vmem:[%s10583_s0 + $0x20] sm:$0xff] }
  0xc7   :  { %4979 = vmatpush1.bf16.msra.mxu0 %v7181_v17  ;;  %5512 = vmatpush1.bf16.msra.mxu1 %v7184_v18  ;;  %v7276_v17 = vld [vmem:[%s10582_s1 + $0x808] ss:$16 sps:$4 sm:$0xff]   ;;  %v7281_v18 = vld [vmem:[%s10582_s1 + $0x824] ss:$16 sps:$4 sm:$0xff]  }
  0xc8   :  { %4980 = vmatprep.subr.bf16.mxu0 %v7189_v19  ;;  %5513 = vmatprep.subr.bf16.mxu1 %v7192_v20  ;;  %v5977_v19 = vcombine.high %v8923_v16, %v8923_v16  ;;  %v7279_v20 = vld [vmem:[%s10582_s1 + $0x820] ss:$16 sps:$4 sm:$0xff]  }
  0xcb   :  { %4981 = vmatpush1.bf16.msra.mxu0 %v7187_v21  ;;  %5514 = vmatpush1.bf16.msra.mxu1 %v7190_v22  ;;  %v7282_v21 = vld [vmem:[%s10582_s1 + $0x828] ss:$16 sps:$4 sm:$0xff]   ;;  %v7287_v22 = vld [vmem:[%s10582_s1 + $0x844] ss:$16 sps:$4 sm:$0xff]  }
  0xcc   :  { %4982 = vmatprep.subr.bf16.mxu0 %v7195_v23  ;;  %5515 = vmatprep.subr.bf16.mxu1 %v7198_v24  ;;  %v7290_v23 = vld [vmem:[%s10582_s1 + $0x84c] ss:$16 sps:$4 sm:$0xff]   ;;  %v7285_v24 = vld [vmem:[%s10582_s1 + $0x840] ss:$16 sps:$4 sm:$0xff]  }
  0xcf   :  { %4983 = vmatpush1.bf16.msra.mxu0 %v7193_v25  ;;  %5516 = vmatpush1.bf16.msra.mxu1 %v7196_v26  ;;  %v7288_v25 = vld [vmem:[%s10582_s1 + $0x848] ss:$16 sps:$4 sm:$0xff]   ;;  %v7293_v26 = vld [vmem:[%s10582_s1 + $0x864] ss:$16 sps:$4 sm:$0xff]  }
  0xd0   :  { %4984 = vmatprep.subr.bf16.mxu0 %v7201_v27  ;;  %5517 = vmatprep.subr.bf16.mxu1 %v7204_v28  ;;  %v7296_v27 = vld [vmem:[%s10582_s1 + $0x86c] ss:$16 sps:$4 sm:$0xff]   ;;  %v7291_v28 = vld [vmem:[%s10582_s1 + $0x860] ss:$16 sps:$4 sm:$0xff]  }
  0xd3   :  { %4985 = vmatpush1.bf16.msra.mxu0 %v7199_v29  ;;  %5518 = vmatpush1.bf16.msra.mxu1 %v7202_v30  ;;  %v7294_v29 = vld [vmem:[%s10582_s1 + $0x868] ss:$16 sps:$4 sm:$0xff]   ;;  %v7299_v30 = vld [vmem:[%s10582_s1 + $0x884] ss:$16 sps:$4 sm:$0xff]  }
  0xd4   :  { %4986 = vmatprep.subr.bf16.mxu0 %v7207_v31  ;;  %5519 = vmatprep.subr.bf16.mxu1 %v7210_v32  ;;  %v7302_v31 = vld [vmem:[%s10582_s1 + $0x88c] ss:$16 sps:$4 sm:$0xff]   ;;  %v7297_v32 = vld [vmem:[%s10582_s1 + $0x880] ss:$16 sps:$4 sm:$0xff]  }
  0xd7   :  { %4987 = vmatpush1.bf16.msra.mxu0 %v7205_v33  ;;  %5520 = vmatpush1.bf16.msra.mxu1 %v7208_v34  ;;  %v7300_v33 = vld [vmem:[%s10582_s1 + $0x888] ss:$16 sps:$4 sm:$0xff]   ;;  %v7305_v34 = vld [vmem:[%s10582_s1 + $0x8a4] ss:$16 sps:$4 sm:$0xff]  }
  0xd8   :  { %4988 = vmatprep.subr.bf16.mxu0 %v7213_v35  ;;  %5521 = vmatprep.subr.bf16.mxu1 %v7216_v36  ;;  %v7308_v35 = vld [vmem:[%s10582_s1 + $0x8ac] ss:$16 sps:$4 sm:$0xff]   ;;  %v7303_v36 = vld [vmem:[%s10582_s1 + $0x8a0] ss:$16 sps:$4 sm:$0xff]  }
  0xdb   :  { %4989 = vmatpush1.bf16.msra.mxu0 %v7211_v37  ;;  %5522 = vmatpush1.bf16.msra.mxu1 %v7214_v38  ;;  %v7306_v37 = vld [vmem:[%s10582_s1 + $0x8a8] ss:$16 sps:$4 sm:$0xff]   ;;  %v7311_v38 = vld [vmem:[%s10582_s1 + $0x8c4] ss:$16 sps:$4 sm:$0xff]  }
  0xdc   :  { %4990 = vmatprep.subr.bf16.mxu0 %v7219_v39  ;;  %5523 = vmatprep.subr.bf16.mxu1 %v7222_v40  ;;  %v7314_v39 = vld [vmem:[%s10582_s1 + $0x8cc] ss:$16 sps:$4 sm:$0xff]   ;;  %v7309_v40 = vld [vmem:[%s10582_s1 + $0x8c0] ss:$16 sps:$4 sm:$0xff]  }
  0xdf   :  { %4991 = vmatpush1.bf16.msra.mxu0 %v7217_v41  ;;  %5524 = vmatpush1.bf16.msra.mxu1 %v7220_v42  ;;  %v7312_v41 = vld [vmem:[%s10582_s1 + $0x8c8] ss:$16 sps:$4 sm:$0xff]   ;;  %v7317_v42 = vld [vmem:[%s10582_s1 + $0x8e4] ss:$16 sps:$4 sm:$0xff]  }
  0xe0   :  { %4992 = vmatprep.subr.bf16.mxu0 %v7225_v43  ;;  %5525 = vmatprep.subr.bf16.mxu1 %v7228_v44  ;;  %v7320_v43 = vld [vmem:[%s10582_s1 + $0x8ec] ss:$16 sps:$4 sm:$0xff]   ;;  %v7315_v44 = vld [vmem:[%s10582_s1 + $0x8e0] ss:$16 sps:$4 sm:$0xff]  }
  0xe3   :  { %4993 = vmatpush1.bf16.msra.mxu0 %v7223_v45  ;;  %5526 = vmatpush1.bf16.msra.mxu1 %v7226_v46  ;;  %v7318_v45 = vld [vmem:[%s10582_s1 + $0x8e8] ss:$16 sps:$4 sm:$0xff]   ;;  %v7323_v46 = vld [vmem:[%s10582_s1 + $0x904] ss:$16 sps:$4 sm:$0xff]  }
  0xe4   :  { %4994 = vmatprep.subr.bf16.mxu0 %v7231_v47  ;;  %5527 = vmatprep.subr.bf16.mxu1 %v7234_v48  ;;  %v7326_v47 = vld [vmem:[%s10582_s1 + $0x90c] ss:$16 sps:$4 sm:$0xff]   ;;  %v7321_v48 = vld [vmem:[%s10582_s1 + $0x900] ss:$16 sps:$4 sm:$0xff]  }
  0xe7   :  { %4995 = vmatpush1.bf16.msra.mxu0 %v7229_v49  ;;  %5528 = vmatpush1.bf16.msra.mxu1 %v7232_v50  ;;  %v7324_v49 = vld [vmem:[%s10582_s1 + $0x908] ss:$16 sps:$4 sm:$0xff]   ;;  %v7329_v50 = vld [vmem:[%s10582_s1 + $0x924] ss:$16 sps:$4 sm:$0xff]  }
  0xe8   :  { %4996 = vmatprep.subr.bf16.mxu0 %v7237_v51  ;;  %5529 = vmatprep.subr.bf16.mxu1 %v7240_v52  ;;  %v7332_v51 = vld [vmem:[%s10582_s1 + $0x92c] ss:$16 sps:$4 sm:$0xff]   ;;  %v7327_v52 = vld [vmem:[%s10582_s1 + $0x920] ss:$16 sps:$4 sm:$0xff]  }
  0xeb   :  { %4997 = vmatpush1.bf16.msra.mxu0 %v7235_v53  ;;  %5530 = vmatpush1.bf16.msra.mxu1 %v7238_v54  ;;  %v7330_v53 = vld [vmem:[%s10582_s1 + $0x928] ss:$16 sps:$4 sm:$0xff]   ;;  %v7335_v54 = vld [vmem:[%s10582_s1 + $0x944] ss:$16 sps:$4 sm:$0xff]  }
  0xec   :  { %4998 = vmatprep.subr.bf16.mxu0 %v7243_v55  ;;  %5531 = vmatprep.subr.bf16.mxu1 %v7246_v56  ;;  %v7338_v55 = vld [vmem:[%s10582_s1 + $0x94c] ss:$16 sps:$4 sm:$0xff]   ;;  %v7333_v56 = vld [vmem:[%s10582_s1 + $0x940] ss:$16 sps:$4 sm:$0xff]  }
  0xef   :  { %4999 = vmatpush1.bf16.msra.mxu0 %v7241_v57  ;;  %5532 = vmatpush1.bf16.msra.mxu1 %v7244_v58  ;;  %v7336_v57 = vld [vmem:[%s10582_s1 + $0x948] ss:$16 sps:$4 sm:$0xff]   ;;  %v7341_v58 = vld [vmem:[%s10582_s1 + $0x964] ss:$16 sps:$4 sm:$0xff]  }
  0xf0   :  { %5000 = vmatprep.subr.bf16.mxu0 %v7249_v59  ;;  %5533 = vmatprep.subr.bf16.mxu1 %v7252_v60  ;;  %v7344_v59 = vld [vmem:[%s10582_s1 + $0x96c] ss:$16 sps:$4 sm:$0xff]   ;;  %v7339_v60 = vld [vmem:[%s10582_s1 + $0x960] ss:$16 sps:$4 sm:$0xff]  }
  0xf3   :  { %5001 = vmatpush1.bf16.msra.mxu0 %v7247_v61  ;;  %5534 = vmatpush1.bf16.msra.mxu1 %v7250_v62  ;;  %v7342_v61 = vld [vmem:[%s10582_s1 + $0x968] ss:$16 sps:$4 sm:$0xff]   ;;  %v7347_v62 = vld [vmem:[%s10582_s1 + $0x984] ss:$16 sps:$4 sm:$0xff]  }
  0xf4   :  { %5002 = vmatprep.subr.bf16.mxu0 %v7255_v63  ;;  %5535 = vmatprep.subr.bf16.mxu1 %v7258_v0  ;;  %v7350_v63 = vld [vmem:[%s10582_s1 + $0x98c] ss:$16 sps:$4 sm:$0xff]   ;;  %v7345_v0 = vld [vmem:[%s10582_s1 + $0x980] ss:$16 sps:$4 sm:$0xff]  }
  0xf7   :  { %5003 = vmatpush1.bf16.msra.mxu0 %v7253_v1  ;;  %5536 = vmatpush1.bf16.msra.mxu1 %v7256_v2  ;;  %v7348_v1 = vld [vmem:[%s10582_s1 + $0x988] ss:$16 sps:$4 sm:$0xff]   ;;  %v7353_v2 = vld [vmem:[%s10582_s1 + $0x9a4] ss:$16 sps:$4 sm:$0xff]  }
  0xf8   :  { %5004 = vmatprep.subr.bf16.mxu0 %v7261_v3  ;;  %5537 = vmatprep.subr.bf16.mxu1 %v7264_v4  ;;  %v7356_v3 = vld [vmem:[%s10582_s1 + $0x9ac] ss:$16 sps:$4 sm:$0xff]   ;;  %v7351_v4 = vld [vmem:[%s10582_s1 + $0x9a0] ss:$16 sps:$4 sm:$0xff]  }
  0xfb   :  { %5005 = vmatpush1.bf16.msra.mxu0 %v7259_v5  ;;  %5538 = vmatpush1.bf16.msra.mxu1 %v7262_v6  ;;  %v7354_v5 = vld [vmem:[%s10582_s1 + $0x9a8] ss:$16 sps:$4 sm:$0xff]   ;;  %v7359_v6 = vld [vmem:[%s10582_s1 + $0x9c4] ss:$16 sps:$4 sm:$0xff]  }
  0xfc   :  { %5006 = vmatprep.subr.bf16.mxu0 %v7267_v7  ;;  %5539 = vmatprep.subr.bf16.mxu1 %v7270_v8  ;;  %v7362_v7 = vld [vmem:[%s10582_s1 + $0x9cc] ss:$16 sps:$4 sm:$0xff]   ;;  %v7357_v8 = vld [vmem:[%s10582_s1 + $0x9c0] ss:$16 sps:$4 sm:$0xff]  }
  0xff   :  { %5007 = vmatpush1.bf16.msra.mxu0 %v7265_v9  ;;  %5540 = vmatpush1.bf16.msra.mxu1 %v7268_v10  ;;  %v7360_v9 = vld [vmem:[%s10582_s1 + $0x9c8] ss:$16 sps:$4 sm:$0xff]   ;;  %v7365_v10 = vld [vmem:[%s10582_s1 + $0x9e4] ss:$16 sps:$4 sm:$0xff]  }
 0x100   :  { %5017 = vmatprep.subr.bf16.mxu0 %v7275_v12  ;;  %5550 = vmatprep.subr.bf16.mxu1 %v7278_v13  ;;  %v7368_v12 = vld [vmem:[%s10582_s1 + $0x9ec] ss:$16 sps:$4 sm:$0xff]   ;;  %v7363_v13 = vld [vmem:[%s10582_s1 + $0x9e0] ss:$16 sps:$4 sm:$0xff]  }
 0x102   :  { %5009 = vmatmul.mubr.bf16.vlgmr.msra.gmra.mrb[0].mxu0 %v5974_v11  ;;  %5542 = vmatmul.mubr.bf16.vlgmr.msra.gmra.mrb[0].mxu1 %v5974_v11  ;;  %v7373_v11 = vld [vmem:[%s10582_s1 + $0xa04] ss:$16 sps:$4 sm:$0xff]  }
 0x103   :  { %5018 = vmatpush1.bf16.msra.mxu0 %v7273_v15  ;;  %5551 = vmatpush1.bf16.msra.mxu1 %v7276_v17  ;;  %v7366_v15 = vld [vmem:[%s10582_s1 + $0x9e8] ss:$16 sps:$4 sm:$0xff]   ;;  %v7376_v17 = vld [vmem:[%s10582_s1 + $0xa0c] ss:$16 sps:$4 sm:$0xff]  }
 0x104   :  { %5019 = vmatprep.subr.bf16.mxu0 %v7281_v18  ;;  %5552 = vmatprep.subr.bf16.mxu1 %v7284_v14  ;;  %v9119_v18 = vld [vmem:[%s10583_s0 + $0x28] sm:$0xff]  ;;  %v5976_v14 = vcombine.low %v8923_v16, %v8923_v16 }
 0x105   :  { %5049 = vmatprep.mubr.bf16.mxu0 %v5977_v19  ;;  %5582 = vmatprep.mubr.bf16.mxu1 %v5977_v19  ;;  %v7371_v19 = vld [vmem:[%s10582_s1 + $0xa00] ss:$16 sps:$4 sm:$0xff]   ;;  %v7382_v16 = vld [vmem:[%s10582_s1 + $0xa2c] ss:$16 sps:$4 sm:$0xff]  }
 0x107   :  { %5020 = vmatpush1.bf16.msra.mxu0 %v7279_v20  ;;  %5553 = vmatpush1.bf16.msra.mxu1 %v7282_v21  ;;  %v7374_v20 = vld [vmem:[%s10582_s1 + $0xa08] ss:$16 sps:$4 sm:$0xff]   ;;  %v7379_v21 = vld [vmem:[%s10582_s1 + $0xa24] ss:$16 sps:$4 sm:$0xff]  }
 0x108   :  { %5021 = vmatprep.subr.bf16.mxu0 %v7287_v22  ;;  %5554 = vmatprep.subr.bf16.mxu1 %v7290_v23  ;;  %v5979_v22 = vcombine.high %v9119_v18, %v9119_v18  ;;  %v7377_v23 = vld [vmem:[%s10582_s1 + $0xa20] ss:$16 sps:$4 sm:$0xff]  }
 0x10b   :  { %5022 = vmatpush1.bf16.msra.mxu0 %v7285_v24  ;;  %5555 = vmatpush1.bf16.msra.mxu1 %v7288_v25  ;;  %v7380_v24 = vld [vmem:[%s10582_s1 + $0xa28] ss:$16 sps:$4 sm:$0xff]   ;;  %v7385_v25 = vld [vmem:[%s10582_s1 + $0xa44] ss:$16 sps:$4 sm:$0xff]  }
 0x10c   :  { %5023 = vmatprep.subr.bf16.mxu0 %v7293_v26  ;;  %5556 = vmatprep.subr.bf16.mxu1 %v7296_v27  ;;  %v7388_v26 = vld [vmem:[%s10582_s1 + $0xa4c] ss:$16 sps:$4 sm:$0xff]   ;;  %v7383_v27 = vld [vmem:[%s10582_s1 + $0xa40] ss:$16 sps:$4 sm:$0xff]  }
 0x10f   :  { %5024 = vmatpush1.bf16.msra.mxu0 %v7291_v28  ;;  %5557 = vmatpush1.bf16.msra.mxu1 %v7294_v29  ;;  %v7386_v28 = vld [vmem:[%s10582_s1 + $0xa48] ss:$16 sps:$4 sm:$0xff]   ;;  %v7391_v29 = vld [vmem:[%s10582_s1 + $0xa64] ss:$16 sps:$4 sm:$0xff]  }
 0x110   :  { %5025 = vmatprep.subr.bf16.mxu0 %v7299_v30  ;;  %5558 = vmatprep.subr.bf16.mxu1 %v7302_v31  ;;  %v7394_v30 = vld [vmem:[%s10582_s1 + $0xa6c] ss:$16 sps:$4 sm:$0xff]   ;;  %v7389_v31 = vld [vmem:[%s10582_s1 + $0xa60] ss:$16 sps:$4 sm:$0xff]  }
 0x113   :  { %5026 = vmatpush1.bf16.msra.mxu0 %v7297_v32  ;;  %5559 = vmatpush1.bf16.msra.mxu1 %v7300_v33  ;;  %v7392_v32 = vld [vmem:[%s10582_s1 + $0xa68] ss:$16 sps:$4 sm:$0xff]   ;;  %v7397_v33 = vld [vmem:[%s10582_s1 + $0xa84] ss:$16 sps:$4 sm:$0xff]  }
 0x114   :  { %5027 = vmatprep.subr.bf16.mxu0 %v7305_v34  ;;  %5560 = vmatprep.subr.bf16.mxu1 %v7308_v35  ;;  %v7400_v34 = vld [vmem:[%s10582_s1 + $0xa8c] ss:$16 sps:$4 sm:$0xff]   ;;  %v7395_v35 = vld [vmem:[%s10582_s1 + $0xa80] ss:$16 sps:$4 sm:$0xff]  }
 0x117   :  { %5028 = vmatpush1.bf16.msra.mxu0 %v7303_v36  ;;  %5561 = vmatpush1.bf16.msra.mxu1 %v7306_v37  ;;  %v7398_v36 = vld [vmem:[%s10582_s1 + $0xa88] ss:$16 sps:$4 sm:$0xff]   ;;  %v7403_v37 = vld [vmem:[%s10582_s1 + $0xaa4] ss:$16 sps:$4 sm:$0xff]  }
 0x118   :  { %5029 = vmatprep.subr.bf16.mxu0 %v7311_v38  ;;  %5562 = vmatprep.subr.bf16.mxu1 %v7314_v39  ;;  %v7406_v38 = vld [vmem:[%s10582_s1 + $0xaac] ss:$16 sps:$4 sm:$0xff]   ;;  %v7401_v39 = vld [vmem:[%s10582_s1 + $0xaa0] ss:$16 sps:$4 sm:$0xff]  }
 0x11b   :  { %5030 = vmatpush1.bf16.msra.mxu0 %v7309_v40  ;;  %5563 = vmatpush1.bf16.msra.mxu1 %v7312_v41  ;;  %v7404_v40 = vld [vmem:[%s10582_s1 + $0xaa8] ss:$16 sps:$4 sm:$0xff]   ;;  %v7409_v41 = vld [vmem:[%s10582_s1 + $0xac4] ss:$16 sps:$4 sm:$0xff]  }
 0x11c   :  { %5031 = vmatprep.subr.bf16.mxu0 %v7317_v42  ;;  %5564 = vmatprep.subr.bf16.mxu1 %v7320_v43  ;;  %v7412_v42 = vld [vmem:[%s10582_s1 + $0xacc] ss:$16 sps:$4 sm:$0xff]   ;;  %v7407_v43 = vld [vmem:[%s10582_s1 + $0xac0] ss:$16 sps:$4 sm:$0xff]  }
 0x11f   :  { %5032 = vmatpush1.bf16.msra.mxu0 %v7315_v44  ;;  %5565 = vmatpush1.bf16.msra.mxu1 %v7318_v45  ;;  %v7410_v44 = vld [vmem:[%s10582_s1 + $0xac8] ss:$16 sps:$4 sm:$0xff]   ;;  %v7415_v45 = vld [vmem:[%s10582_s1 + $0xae4] ss:$16 sps:$4 sm:$0xff]  }
 0x120   :  { %5033 = vmatprep.subr.bf16.mxu0 %v7323_v46  ;;  %5566 = vmatprep.subr.bf16.mxu1 %v7326_v47  ;;  %v7418_v46 = vld [vmem:[%s10582_s1 + $0xaec] ss:$16 sps:$4 sm:$0xff]   ;;  %v7413_v47 = vld [vmem:[%s10582_s1 + $0xae0] ss:$16 sps:$4 sm:$0xff]  }
 0x123   :  { %5034 = vmatpush1.bf16.msra.mxu0 %v7321_v48  ;;  %5567 = vmatpush1.bf16.msra.mxu1 %v7324_v49  ;;  %v7416_v48 = vld [vmem:[%s10582_s1 + $0xae8] ss:$16 sps:$4 sm:$0xff]   ;;  %v7421_v49 = vld [vmem:[%s10582_s1 + $0xb04] ss:$16 sps:$4 sm:$0xff]  }
 0x124   :  { %5035 = vmatprep.subr.bf16.mxu0 %v7329_v50  ;;  %5568 = vmatprep.subr.bf16.mxu1 %v7332_v51  ;;  %v7424_v50 = vld [vmem:[%s10582_s1 + $0xb0c] ss:$16 sps:$4 sm:$0xff]   ;;  %v7419_v51 = vld [vmem:[%s10582_s1 + $0xb00] ss:$16 sps:$4 sm:$0xff]  }
 0x127   :  { %5036 = vmatpush1.bf16.msra.mxu0 %v7327_v52  ;;  %5569 = vmatpush1.bf16.msra.mxu1 %v7330_v53  ;;  %v7422_v52 = vld [vmem:[%s10582_s1 + $0xb08] ss:$16 sps:$4 sm:$0xff]   ;;  %v7427_v53 = vld [vmem:[%s10582_s1 + $0xb24] ss:$16 sps:$4 sm:$0xff]  }
 0x128   :  { %5037 = vmatprep.subr.bf16.mxu0 %v7335_v54  ;;  %5570 = vmatprep.subr.bf16.mxu1 %v7338_v55  ;;  %v7430_v54 = vld [vmem:[%s10582_s1 + $0xb2c] ss:$16 sps:$4 sm:$0xff]   ;;  %v7425_v55 = vld [vmem:[%s10582_s1 + $0xb20] ss:$16 sps:$4 sm:$0xff]  }
 0x12b   :  { %5038 = vmatpush1.bf16.msra.mxu0 %v7333_v56  ;;  %5571 = vmatpush1.bf16.msra.mxu1 %v7336_v57  ;;  %v7428_v56 = vld [vmem:[%s10582_s1 + $0xb28] ss:$16 sps:$4 sm:$0xff]   ;;  %v7433_v57 = vld [vmem:[%s10582_s1 + $0xb44] ss:$16 sps:$4 sm:$0xff]  }
 0x12c   :  { %5039 = vmatprep.subr.bf16.mxu0 %v7341_v58  ;;  %5572 = vmatprep.subr.bf16.mxu1 %v7344_v59  ;;  %v7436_v58 = vld [vmem:[%s10582_s1 + $0xb4c] ss:$16 sps:$4 sm:$0xff]   ;;  %v7431_v59 = vld [vmem:[%s10582_s1 + $0xb40] ss:$16 sps:$4 sm:$0xff]  }
 0x12f   :  { %5040 = vmatpush1.bf16.msra.mxu0 %v7339_v60  ;;  %5573 = vmatpush1.bf16.msra.mxu1 %v7342_v61  ;;  %v7434_v60 = vld [vmem:[%s10582_s1 + $0xb48] ss:$16 sps:$4 sm:$0xff]   ;;  %v7439_v61 = vld [vmem:[%s10582_s1 + $0xb64] ss:$16 sps:$4 sm:$0xff]  }
 0x130   :  { %5041 = vmatprep.subr.bf16.mxu0 %v7347_v62  ;;  %5574 = vmatprep.subr.bf16.mxu1 %v7350_v63  ;;  %v7442_v62 = vld [vmem:[%s10582_s1 + $0xb6c] ss:$16 sps:$4 sm:$0xff]   ;;  %v7437_v63 = vld [vmem:[%s10582_s1 + $0xb60] ss:$16 sps:$4 sm:$0xff]  }
 0x133   :  { %5042 = vmatpush1.bf16.msra.mxu0 %v7345_v0  ;;  %5575 = vmatpush1.bf16.msra.mxu1 %v7348_v1  ;;  %v7440_v0 = vld [vmem:[%s10582_s1 + $0xb68] ss:$16 sps:$4 sm:$0xff]   ;;  %v7445_v1 = vld [vmem:[%s10582_s1 + $0xb84] ss:$16 sps:$4 sm:$0xff]  }
 0x134   :  { %5043 = vmatprep.subr.bf16.mxu0 %v7353_v2  ;;  %5576 = vmatprep.subr.bf16.mxu1 %v7356_v3  ;;  %v7448_v2 = vld [vmem:[%s10582_s1 + $0xb8c] ss:$16 sps:$4 sm:$0xff]   ;;  %v7443_v3 = vld [vmem:[%s10582_s1 + $0xb80] ss:$16 sps:$4 sm:$0xff]  }
 0x137   :  { %5044 = vmatpush1.bf16.msra.mxu0 %v7351_v4  ;;  %5577 = vmatpush1.bf16.msra.mxu1 %v7354_v5  ;;  %v7446_v4 = vld [vmem:[%s10582_s1 + $0xb88] ss:$16 sps:$4 sm:$0xff]   ;;  %v7451_v5 = vld [vmem:[%s10582_s1 + $0xba4] ss:$16 sps:$4 sm:$0xff]  }
 0x138   :  { %5045 = vmatprep.subr.bf16.mxu0 %v7359_v6  ;;  %5578 = vmatprep.subr.bf16.mxu1 %v7362_v7  ;;  %v7454_v6 = vld [vmem:[%s10582_s1 + $0xbac] ss:$16 sps:$4 sm:$0xff]   ;;  %v7449_v7 = vld [vmem:[%s10582_s1 + $0xba0] ss:$16 sps:$4 sm:$0xff]  }
 0x13b   :  { %5046 = vmatpush1.bf16.msra.mxu0 %v7357_v8  ;;  %5579 = vmatpush1.bf16.msra.mxu1 %v7360_v9  ;;  %v7452_v8 = vld [vmem:[%s10582_s1 + $0xba8] ss:$16 sps:$4 sm:$0xff]   ;;  %v7457_v9 = vld [vmem:[%s10582_s1 + $0xbc4] ss:$16 sps:$4 sm:$0xff]  }
 0x13c   :  { %5047 = vmatprep.subr.bf16.mxu0 %v7365_v10  ;;  %5580 = vmatprep.subr.bf16.mxu1 %v7368_v12  ;;  %v7460_v10 = vld [vmem:[%s10582_s1 + $0xbcc] ss:$16 sps:$4 sm:$0xff]   ;;  %v7455_v12 = vld [vmem:[%s10582_s1 + $0xbc0] ss:$16 sps:$4 sm:$0xff]  }
 0x13f   :  { %5048 = vmatpush1.bf16.msra.mxu0 %v7363_v13  ;;  %5581 = vmatpush1.bf16.msra.mxu1 %v7366_v15  ;;  %v7458_v13 = vld [vmem:[%s10582_s1 + $0xbc8] ss:$16 sps:$4 sm:$0xff]   ;;  %v7463_v15 = vld [vmem:[%s10582_s1 + $0xbe4] ss:$16 sps:$4 sm:$0xff]  }
 0x140   :  { %5058 = vmatprep.subr.bf16.mxu0 %v7373_v11  ;;  %5591 = vmatprep.subr.bf16.mxu1 %v7376_v17  ;;  %v7466_v11 = vld [vmem:[%s10582_s1 + $0xbec] ss:$16 sps:$4 sm:$0xff]   ;;  %v7461_v17 = vld [vmem:[%s10582_s1 + $0xbe0] ss:$16 sps:$4 sm:$0xff]  }
 0x142   :  { %5050 = vmatmul.mubr.bf16.vlgmr.msra.gmra.mrb[0].mxu0 %v5976_v14  ;;  %5583 = vmatmul.mubr.bf16.vlgmr.msra.gmra.mrb[0].mxu1 %v5976_v14  ;;  %v7464_v14 = vld [vmem:[%s10582_s1 + $0xbe8] ss:$16 sps:$4 sm:$0xff]  }
 0x143   :  { %5059 = vmatpush1.bf16.msra.mxu0 %v7371_v19  ;;  %5592 = vmatpush1.bf16.msra.mxu1 %v7374_v20  ;;  %v7471_v19 = vld [vmem:[%s10582_s1 + $0xc04] ss:$16 sps:$4 sm:$0xff]   ;;  %v7474_v20 = vld [vmem:[%s10582_s1 + $0xc0c] ss:$16 sps:$4 sm:$0xff]  }
 0x144   :  { %5060 = vmatprep.subr.bf16.mxu0 %v7379_v21  ;;  %5593 = vmatprep.subr.bf16.mxu1 %v7382_v16  ;;  %v9320_v21 = vld [vmem:[%s10583_s0 + $0x30] sm:$0xff]  ;;  %v5978_v16 = vcombine.low %v9119_v18, %v9119_v18  ;;  %v7480_v18 = vld [vmem:[%s10582_s1 + $0xc2c] ss:$16 sps:$4 sm:$0xff]  }
 0x145   :  { %5090 = vmatprep.mubr.bf16.mxu0 %v5979_v22  ;;  %5623 = vmatprep.mubr.bf16.mxu1 %v5979_v22  ;;  %v7469_v22 = vld [vmem:[%s10582_s1 + $0xc00] ss:$16 sps:$4 sm:$0xff]  }
 0x147   :  { %5061 = vmatpush1.bf16.msra.mxu0 %v7377_v23  ;;  %5594 = vmatpush1.bf16.msra.mxu1 %v7380_v24  ;;  %v7472_v23 = vld [vmem:[%s10582_s1 + $0xc08] ss:$16 sps:$4 sm:$0xff]   ;;  %v7477_v24 = vld [vmem:[%s10582_s1 + $0xc24] ss:$16 sps:$4 sm:$0xff]  }
 0x148   :  { %5062 = vmatprep.subr.bf16.mxu0 %v7385_v25  ;;  %5595 = vmatprep.subr.bf16.mxu1 %v7388_v26  ;;  %v5981_v25 = vcombine.high %v9320_v21, %v9320_v21  ;;  %v7475_v26 = vld [vmem:[%s10582_s1 + $0xc20] ss:$16 sps:$4 sm:$0xff]  }
 0x14b   :  { %5063 = vmatpush1.bf16.msra.mxu0 %v7383_v27  ;;  %5596 = vmatpush1.bf16.msra.mxu1 %v7386_v28  ;;  %v7478_v27 = vld [vmem:[%s10582_s1 + $0xc28] ss:$16 sps:$4 sm:$0xff]   ;;  %v7483_v28 = vld [vmem:[%s10582_s1 + $0xc44] ss:$16 sps:$4 sm:$0xff]  }
 0x14c   :  { %5064 = vmatprep.subr.bf16.mxu0 %v7391_v29  ;;  %5597 = vmatprep.subr.bf16.mxu1 %v7394_v30  ;;  %v7486_v29 = vld [vmem:[%s10582_s1 + $0xc4c] ss:$16 sps:$4 sm:$0xff]   ;;  %v7481_v30 = vld [vmem:[%s10582_s1 + $0xc40] ss:$16 sps:$4 sm:$0xff]  }
 0x14f   :  { %5065 = vmatpush1.bf16.msra.mxu0 %v7389_v31  ;;  %5598 = vmatpush1.bf16.msra.mxu1 %v7392_v32  ;;  %v7484_v31 = vld [vmem:[%s10582_s1 + $0xc48] ss:$16 sps:$4 sm:$0xff]   ;;  %v7489_v32 = vld [vmem:[%s10582_s1 + $0xc64] ss:$16 sps:$4 sm:$0xff]  }
 0x150   :  { %5066 = vmatprep.subr.bf16.mxu0 %v7397_v33  ;;  %5599 = vmatprep.subr.bf16.mxu1 %v7400_v34  ;;  %v7492_v33 = vld [vmem:[%s10582_s1 + $0xc6c] ss:$16 sps:$4 sm:$0xff]   ;;  %v7487_v34 = vld [vmem:[%s10582_s1 + $0xc60] ss:$16 sps:$4 sm:$0xff]  }
 0x153   :  { %5067 = vmatpush1.bf16.msra.mxu0 %v7395_v35  ;;  %5600 = vmatpush1.bf16.msra.mxu1 %v7398_v36  ;;  %v7490_v35 = vld [vmem:[%s10582_s1 + $0xc68] ss:$16 sps:$4 sm:$0xff]   ;;  %v7495_v36 = vld [vmem:[%s10582_s1 + $0xc84] ss:$16 sps:$4 sm:$0xff]  }
 0x154   :  { %5068 = vmatprep.subr.bf16.mxu0 %v7403_v37  ;;  %5601 = vmatprep.subr.bf16.mxu1 %v7406_v38  ;;  %v7498_v37 = vld [vmem:[%s10582_s1 + $0xc8c] ss:$16 sps:$4 sm:$0xff]   ;;  %v7493_v38 = vld [vmem:[%s10582_s1 + $0xc80] ss:$16 sps:$4 sm:$0xff]  }
 0x157   :  { %5069 = vmatpush1.bf16.msra.mxu0 %v7401_v39  ;;  %5602 = vmatpush1.bf16.msra.mxu1 %v7404_v40  ;;  %v7496_v39 = vld [vmem:[%s10582_s1 + $0xc88] ss:$16 sps:$4 sm:$0xff]   ;;  %v7501_v40 = vld [vmem:[%s10582_s1 + $0xca4] ss:$16 sps:$4 sm:$0xff]  }
 0x158   :  { %5070 = vmatprep.subr.bf16.mxu0 %v7409_v41  ;;  %5603 = vmatprep.subr.bf16.mxu1 %v7412_v42  ;;  %v7504_v41 = vld [vmem:[%s10582_s1 + $0xcac] ss:$16 sps:$4 sm:$0xff]   ;;  %v7499_v42 = vld [vmem:[%s10582_s1 + $0xca0] ss:$16 sps:$4 sm:$0xff]  }
 0x15b   :  { %5071 = vmatpush1.bf16.msra.mxu0 %v7407_v43  ;;  %5604 = vmatpush1.bf16.msra.mxu1 %v7410_v44  ;;  %v7502_v43 = vld [vmem:[%s10582_s1 + $0xca8] ss:$16 sps:$4 sm:$0xff]   ;;  %v7507_v44 = vld [vmem:[%s10582_s1 + $0xcc4] ss:$16 sps:$4 sm:$0xff]  }
 0x15c   :  { %5072 = vmatprep.subr.bf16.mxu0 %v7415_v45  ;;  %5605 = vmatprep.subr.bf16.mxu1 %v7418_v46  ;;  %v7510_v45 = vld [vmem:[%s10582_s1 + $0xccc] ss:$16 sps:$4 sm:$0xff]   ;;  %v7505_v46 = vld [vmem:[%s10582_s1 + $0xcc0] ss:$16 sps:$4 sm:$0xff]  }
 0x15f   :  { %5073 = vmatpush1.bf16.msra.mxu0 %v7413_v47  ;;  %5606 = vmatpush1.bf16.msra.mxu1 %v7416_v48  ;;  %v7508_v47 = vld [vmem:[%s10582_s1 + $0xcc8] ss:$16 sps:$4 sm:$0xff]   ;;  %v7513_v48 = vld [vmem:[%s10582_s1 + $0xce4] ss:$16 sps:$4 sm:$0xff]  }
 0x160   :  { %5074 = vmatprep.subr.bf16.mxu0 %v7421_v49  ;;  %5607 = vmatprep.subr.bf16.mxu1 %v7424_v50  ;;  %v7516_v49 = vld [vmem:[%s10582_s1 + $0xcec] ss:$16 sps:$4 sm:$0xff]   ;;  %v7511_v50 = vld [vmem:[%s10582_s1 + $0xce0] ss:$16 sps:$4 sm:$0xff]  }
 0x163   :  { %5075 = vmatpush1.bf16.msra.mxu0 %v7419_v51  ;;  %5608 = vmatpush1.bf16.msra.mxu1 %v7422_v52  ;;  %v7514_v51 = vld [vmem:[%s10582_s1 + $0xce8] ss:$16 sps:$4 sm:$0xff]   ;;  %v7519_v52 = vld [vmem:[%s10582_s1 + $0xd04] ss:$16 sps:$4 sm:$0xff]  }
 0x164   :  { %5076 = vmatprep.subr.bf16.mxu0 %v7427_v53  ;;  %5609 = vmatprep.subr.bf16.mxu1 %v7430_v54  ;;  %v7522_v53 = vld [vmem:[%s10582_s1 + $0xd0c] ss:$16 sps:$4 sm:$0xff]   ;;  %v7517_v54 = vld [vmem:[%s10582_s1 + $0xd00] ss:$16 sps:$4 sm:$0xff]  }
 0x167   :  { %5077 = vmatpush1.bf16.msra.mxu0 %v7425_v55  ;;  %5610 = vmatpush1.bf16.msra.mxu1 %v7428_v56  ;;  %v7520_v55 = vld [vmem:[%s10582_s1 + $0xd08] ss:$16 sps:$4 sm:$0xff]   ;;  %v7525_v56 = vld [vmem:[%s10582_s1 + $0xd24] ss:$16 sps:$4 sm:$0xff]  }
 0x168   :  { %5078 = vmatprep.subr.bf16.mxu0 %v7433_v57  ;;  %5611 = vmatprep.subr.bf16.mxu1 %v7436_v58  ;;  %v7528_v57 = vld [vmem:[%s10582_s1 + $0xd2c] ss:$16 sps:$4 sm:$0xff]   ;;  %v7523_v58 = vld [vmem:[%s10582_s1 + $0xd20] ss:$16 sps:$4 sm:$0xff]  }
 0x16b   :  { %5079 = vmatpush1.bf16.msra.mxu0 %v7431_v59  ;;  %5612 = vmatpush1.bf16.msra.mxu1 %v7434_v60  ;;  %v7526_v59 = vld [vmem:[%s10582_s1 + $0xd28] ss:$16 sps:$4 sm:$0xff]   ;;  %v7531_v60 = vld [vmem:[%s10582_s1 + $0xd44] ss:$16 sps:$4 sm:$0xff]  }
 0x16c   :  { %5080 = vmatprep.subr.bf16.mxu0 %v7439_v61  ;;  %5613 = vmatprep.subr.bf16.mxu1 %v7442_v62  ;;  %v7534_v61 = vld [vmem:[%s10582_s1 + $0xd4c] ss:$16 sps:$4 sm:$0xff]   ;;  %v7529_v62 = vld [vmem:[%s10582_s1 + $0xd40] ss:$16 sps:$4 sm:$0xff]  }
 0x16f   :  { %5081 = vmatpush1.bf16.msra.mxu0 %v7437_v63  ;;  %5614 = vmatpush1.bf16.msra.mxu1 %v7440_v0  ;;  %v7532_v63 = vld [vmem:[%s10582_s1 + $0xd48] ss:$16 sps:$4 sm:$0xff]   ;;  %v7537_v0 = vld [vmem:[%s10582_s1 + $0xd64] ss:$16 sps:$4 sm:$0xff]  }
 0x170   :  { %5082 = vmatprep.subr.bf16.mxu0 %v7445_v1  ;;  %5615 = vmatprep.subr.bf16.mxu1 %v7448_v2  ;;  %v7540_v1 = vld [vmem:[%s10582_s1 + $0xd6c] ss:$16 sps:$4 sm:$0xff]   ;;  %v7535_v2 = vld [vmem:[%s10582_s1 + $0xd60] ss:$16 sps:$4 sm:$0xff]  }
 0x173   :  { %5083 = vmatpush1.bf16.msra.mxu0 %v7443_v3  ;;  %5616 = vmatpush1.bf16.msra.mxu1 %v7446_v4  ;;  %v7538_v3 = vld [vmem:[%s10582_s1 + $0xd68] ss:$16 sps:$4 sm:$0xff]   ;;  %v7543_v4 = vld [vmem:[%s10582_s1 + $0xd84] ss:$16 sps:$4 sm:$0xff]  }
 0x174   :  { %5084 = vmatprep.subr.bf16.mxu0 %v7451_v5  ;;  %5617 = vmatprep.subr.bf16.mxu1 %v7454_v6  ;;  %v7546_v5 = vld [vmem:[%s10582_s1 + $0xd8c] ss:$16 sps:$4 sm:$0xff]   ;;  %v7541_v6 = vld [vmem:[%s10582_s1 + $0xd80] ss:$16 sps:$4 sm:$0xff]  }
 0x177   :  { %5085 = vmatpush1.bf16.msra.mxu0 %v7449_v7  ;;  %5618 = vmatpush1.bf16.msra.mxu1 %v7452_v8  ;;  %v7544_v7 = vld [vmem:[%s10582_s1 + $0xd88] ss:$16 sps:$4 sm:$0xff]   ;;  %v7549_v8 = vld [vmem:[%s10582_s1 + $0xda4] ss:$16 sps:$4 sm:$0xff]  }
 0x178   :  { %5086 = vmatprep.subr.bf16.mxu0 %v7457_v9  ;;  %5619 = vmatprep.subr.bf16.mxu1 %v7460_v10  ;;  %v7552_v9 = vld [vmem:[%s10582_s1 + $0xdac] ss:$16 sps:$4 sm:$0xff]   ;;  %v7547_v10 = vld [vmem:[%s10582_s1 + $0xda0] ss:$16 sps:$4 sm:$0xff]  }
 0x17b   :  { %5087 = vmatpush1.bf16.msra.mxu0 %v7455_v12  ;;  %5620 = vmatpush1.bf16.msra.mxu1 %v7458_v13  ;;  %v7550_v12 = vld [vmem:[%s10582_s1 + $0xda8] ss:$16 sps:$4 sm:$0xff]   ;;  %v7555_v13 = vld [vmem:[%s10582_s1 + $0xdc4] ss:$16 sps:$4 sm:$0xff]  }
 0x17c   :  { %5088 = vmatprep.subr.bf16.mxu0 %v7463_v15  ;;  %5621 = vmatprep.subr.bf16.mxu1 %v7466_v11  ;;  %v7558_v15 = vld [vmem:[%s10582_s1 + $0xdcc] ss:$16 sps:$4 sm:$0xff]   ;;  %v7553_v11 = vld [vmem:[%s10582_s1 + $0xdc0] ss:$16 sps:$4 sm:$0xff]  }
 0x17f   :  { %5089 = vmatpush1.bf16.msra.mxu0 %v7461_v17  ;;  %5622 = vmatpush1.bf16.msra.mxu1 %v7464_v14  ;;  %v7556_v17 = vld [vmem:[%s10582_s1 + $0xdc8] ss:$16 sps:$4 sm:$0xff]   ;;  %v7561_v14 = vld [vmem:[%s10582_s1 + $0xde4] ss:$16 sps:$4 sm:$0xff]  }
 0x180   :  { %5099 = vmatprep.subr.bf16.mxu0 %v7471_v19  ;;  %5632 = vmatprep.subr.bf16.mxu1 %v7474_v20  ;;  %v7564_v19 = vld [vmem:[%s10582_s1 + $0xdec] ss:$16 sps:$4 sm:$0xff]   ;;  %v7559_v20 = vld [vmem:[%s10582_s1 + $0xde0] ss:$16 sps:$4 sm:$0xff]  }
 0x182   :  { %5091 = vmatmul.mubr.bf16.vlgmr.msra.gmra.mrb[0].mxu0 %v5978_v16  ;;  %5624 = vmatmul.mubr.bf16.vlgmr.msra.gmra.mrb[0].mxu1 %v5978_v16  ;;  %v7562_v16 = vld [vmem:[%s10582_s1 + $0xde8] ss:$16 sps:$4 sm:$0xff]  }
 0x183   :  { %5100 = vmatpush1.bf16.msra.mxu0 %v7469_v22  ;;  %5633 = vmatpush1.bf16.msra.mxu1 %v7472_v23  ;;  %v7569_v22 = vld [vmem:[%s10582_s1 + $0xe04] ss:$16 sps:$4 sm:$0xff]   ;;  %v7572_v23 = vld [vmem:[%s10582_s1 + $0xe0c] ss:$16 sps:$4 sm:$0xff]  }
 0x184   :  { %5101 = vmatprep.subr.bf16.mxu0 %v7477_v24  ;;  %5634 = vmatprep.subr.bf16.mxu1 %v7480_v18  ;;  %v9521_v24 = vld [vmem:[%s10583_s0 + $0x38] sm:$0xff]  ;;  %v5980_v18 = vcombine.low %v9320_v21, %v9320_v21 }
 0x185   :  { %5131 = vmatprep.mubr.bf16.mxu0 %v5981_v25  ;;  %5664 = vmatprep.mubr.bf16.mxu1 %v5981_v25  ;;  %v7567_v25 = vld [vmem:[%s10582_s1 + $0xe00] ss:$16 sps:$4 sm:$0xff]   ;;  %v7578_v21 = vld [vmem:[%s10582_s1 + $0xe2c] ss:$16 sps:$4 sm:$0xff]  }
 0x187   :  { %5102 = vmatpush1.bf16.msra.mxu0 %v7475_v26  ;;  %5635 = vmatpush1.bf16.msra.mxu1 %v7478_v27  ;;  %v7570_v26 = vld [vmem:[%s10582_s1 + $0xe08] ss:$16 sps:$4 sm:$0xff]   ;;  %v7575_v27 = vld [vmem:[%s10582_s1 + $0xe24] ss:$16 sps:$4 sm:$0xff]  }
 0x188   :  { %5103 = vmatprep.subr.bf16.mxu0 %v7483_v28  ;;  %5636 = vmatprep.subr.bf16.mxu1 %v7486_v29  ;;  %v5983_v28 = vcombine.high %v9521_v24, %v9521_v24  ;;  %v7573_v29 = vld [vmem:[%s10582_s1 + $0xe20] ss:$16 sps:$4 sm:$0xff]  }
 0x18b   :  { %5104 = vmatpush1.bf16.msra.mxu0 %v7481_v30  ;;  %5637 = vmatpush1.bf16.msra.mxu1 %v7484_v31  ;;  %v7576_v30 = vld [vmem:[%s10582_s1 + $0xe28] ss:$16 sps:$4 sm:$0xff]   ;;  %v7581_v31 = vld [vmem:[%s10582_s1 + $0xe44] ss:$16 sps:$4 sm:$0xff]  }
 0x18c   :  { %5105 = vmatprep.subr.bf16.mxu0 %v7489_v32  ;;  %5638 = vmatprep.subr.bf16.mxu1 %v7492_v33  ;;  %v7584_v32 = vld [vmem:[%s10582_s1 + $0xe4c] ss:$16 sps:$4 sm:$0xff]   ;;  %v7579_v33 = vld [vmem:[%s10582_s1 + $0xe40] ss:$16 sps:$4 sm:$0xff]  }
 0x18f   :  { %5106 = vmatpush1.bf16.msra.mxu0 %v7487_v34  ;;  %5639 = vmatpush1.bf16.msra.mxu1 %v7490_v35  ;;  %v7582_v34 = vld [vmem:[%s10582_s1 + $0xe48] ss:$16 sps:$4 sm:$0xff]   ;;  %v7587_v35 = vld [vmem:[%s10582_s1 + $0xe64] ss:$16 sps:$4 sm:$0xff]  }
 0x190   :  { %5107 = vmatprep.subr.bf16.mxu0 %v7495_v36  ;;  %5640 = vmatprep.subr.bf16.mxu1 %v7498_v37  ;;  %v7590_v36 = vld [vmem:[%s10582_s1 + $0xe6c] ss:$16 sps:$4 sm:$0xff]   ;;  %v7585_v37 = vld [vmem:[%s10582_s1 + $0xe60] ss:$16 sps:$4 sm:$0xff]  }
 0x193   :  { %5108 = vmatpush1.bf16.msra.mxu0 %v7493_v38  ;;  %5641 = vmatpush1.bf16.msra.mxu1 %v7496_v39  ;;  %v7588_v38 = vld [vmem:[%s10582_s1 + $0xe68] ss:$16 sps:$4 sm:$0xff]   ;;  %v7593_v39 = vld [vmem:[%s10582_s1 + $0xe84] ss:$16 sps:$4 sm:$0xff]  }
 0x194   :  { %5109 = vmatprep.subr.bf16.mxu0 %v7501_v40  ;;  %5642 = vmatprep.subr.bf16.mxu1 %v7504_v41  ;;  %v7596_v40 = vld [vmem:[%s10582_s1 + $0xe8c] ss:$16 sps:$4 sm:$0xff]   ;;  %v7591_v41 = vld [vmem:[%s10582_s1 + $0xe80] ss:$16 sps:$4 sm:$0xff]  }
 0x197   :  { %5110 = vmatpush1.bf16.msra.mxu0 %v7499_v42  ;;  %5643 = vmatpush1.bf16.msra.mxu1 %v7502_v43  ;;  %v7594_v42 = vld [vmem:[%s10582_s1 + $0xe88] ss:$16 sps:$4 sm:$0xff]   ;;  %v7599_v43 = vld [vmem:[%s10582_s1 + $0xea4] ss:$16 sps:$4 sm:$0xff]  }
 0x198   :  { %5111 = vmatprep.subr.bf16.mxu0 %v7507_v44  ;;  %5644 = vmatprep.subr.bf16.mxu1 %v7510_v45  ;;  %v7602_v44 = vld [vmem:[%s10582_s1 + $0xeac] ss:$16 sps:$4 sm:$0xff]   ;;  %v7597_v45 = vld [vmem:[%s10582_s1 + $0xea0] ss:$16 sps:$4 sm:$0xff]  }
 0x19b   :  { %5112 = vmatpush1.bf16.msra.mxu0 %v7505_v46  ;;  %5645 = vmatpush1.bf16.msra.mxu1 %v7508_v47  ;;  %v7600_v46 = vld [vmem:[%s10582_s1 + $0xea8] ss:$16 sps:$4 sm:$0xff]   ;;  %v7605_v47 = vld [vmem:[%s10582_s1 + $0xec4] ss:$16 sps:$4 sm:$0xff]  }
 0x19c   :  { %5113 = vmatprep.subr.bf16.mxu0 %v7513_v48  ;;  %5646 = vmatprep.subr.bf16.mxu1 %v7516_v49  ;;  %v7608_v48 = vld [vmem:[%s10582_s1 + $0xecc] ss:$16 sps:$4 sm:$0xff]   ;;  %v7603_v49 = vld [vmem:[%s10582_s1 + $0xec0] ss:$16 sps:$4 sm:$0xff]  }
 0x19f   :  { %5114 = vmatpush1.bf16.msra.mxu0 %v7511_v50  ;;  %5647 = vmatpush1.bf16.msra.mxu1 %v7514_v51  ;;  %v7606_v50 = vld [vmem:[%s10582_s1 + $0xec8] ss:$16 sps:$4 sm:$0xff]   ;;  %v7611_v51 = vld [vmem:[%s10582_s1 + $0xee4] ss:$16 sps:$4 sm:$0xff]  }
 0x1a0   :  { %5115 = vmatprep.subr.bf16.mxu0 %v7519_v52  ;;  %5648 = vmatprep.subr.bf16.mxu1 %v7522_v53  ;;  %v7614_v52 = vld [vmem:[%s10582_s1 + $0xeec] ss:$16 sps:$4 sm:$0xff]   ;;  %v7609_v53 = vld [vmem:[%s10582_s1 + $0xee0] ss:$16 sps:$4 sm:$0xff]  }
 0x1a3   :  { %5116 = vmatpush1.bf16.msra.mxu0 %v7517_v54  ;;  %5649 = vmatpush1.bf16.msra.mxu1 %v7520_v55  ;;  %v7612_v54 = vld [vmem:[%s10582_s1 + $0xee8] ss:$16 sps:$4 sm:$0xff]   ;;  %v7617_v55 = vld [vmem:[%s10582_s1 + $0xf04] ss:$16 sps:$4 sm:$0xff]  }
 0x1a4   :  { %5117 = vmatprep.subr.bf16.mxu0 %v7525_v56  ;;  %5650 = vmatprep.subr.bf16.mxu1 %v7528_v57  ;;  %v7620_v56 = vld [vmem:[%s10582_s1 + $0xf0c] ss:$16 sps:$4 sm:$0xff]   ;;  %v7615_v57 = vld [vmem:[%s10582_s1 + $0xf00] ss:$16 sps:$4 sm:$0xff]  }
 0x1a7   :  { %5118 = vmatpush1.bf16.msra.mxu0 %v7523_v58  ;;  %5651 = vmatpush1.bf16.msra.mxu1 %v7526_v59  ;;  %v7618_v58 = vld [vmem:[%s10582_s1 + $0xf08] ss:$16 sps:$4 sm:$0xff]   ;;  %v7623_v59 = vld [vmem:[%s10582_s1 + $0xf24] ss:$16 sps:$4 sm:$0xff]  }
 0x1a8   :  { %5119 = vmatprep.subr.bf16.mxu0 %v7531_v60  ;;  %5652 = vmatprep.subr.bf16.mxu1 %v7534_v61  ;;  %v7626_v60 = vld [vmem:[%s10582_s1 + $0xf2c] ss:$16 sps:$4 sm:$0xff]   ;;  %v7621_v61 = vld [vmem:[%s10582_s1 + $0xf20] ss:$16 sps:$4 sm:$0xff]  }
 0x1ab   :  { %5120 = vmatpush1.bf16.msra.mxu0 %v7529_v62  ;;  %5653 = vmatpush1.bf16.msra.mxu1 %v7532_v63  ;;  %v7624_v62 = vld [vmem:[%s10582_s1 + $0xf28] ss:$16 sps:$4 sm:$0xff]   ;;  %v7629_v63 = vld [vmem:[%s10582_s1 + $0xf44] ss:$16 sps:$4 sm:$0xff]  }
 0x1ac   :  { %5121 = vmatprep.subr.bf16.mxu0 %v7537_v0  ;;  %5654 = vmatprep.subr.bf16.mxu1 %v7540_v1  ;;  %v7632_v0 = vld [vmem:[%s10582_s1 + $0xf4c] ss:$16 sps:$4 sm:$0xff]   ;;  %v7627_v1 = vld [vmem:[%s10582_s1 + $0xf40] ss:$16 sps:$4 sm:$0xff]  }
 0x1af   :  { %5122 = vmatpush1.bf16.msra.mxu0 %v7535_v2  ;;  %5655 = vmatpush1.bf16.msra.mxu1 %v7538_v3  ;;  %v7630_v2 = vld [vmem:[%s10582_s1 + $0xf48] ss:$16 sps:$4 sm:$0xff]   ;;  %v7635_v3 = vld [vmem:[%s10582_s1 + $0xf64] ss:$16 sps:$4 sm:$0xff]  }
 0x1b0   :  { %5123 = vmatprep.subr.bf16.mxu0 %v7543_v4  ;;  %5656 = vmatprep.subr.bf16.mxu1 %v7546_v5  ;;  %v7638_v4 = vld [vmem:[%s10582_s1 + $0xf6c] ss:$16 sps:$4 sm:$0xff]   ;;  %v7633_v5 = vld [vmem:[%s10582_s1 + $0xf60] ss:$16 sps:$4 sm:$0xff]  }
 0x1b3   :  { %5124 = vmatpush1.bf16.msra.mxu0 %v7541_v6  ;;  %5657 = vmatpush1.bf16.msra.mxu1 %v7544_v7  ;;  %v7636_v6 = vld [vmem:[%s10582_s1 + $0xf68] ss:$16 sps:$4 sm:$0xff]   ;;  %v7641_v7 = vld [vmem:[%s10582_s1 + $0xf84] ss:$16 sps:$4 sm:$0xff]  }
 0x1b4   :  { %5125 = vmatprep.subr.bf16.mxu0 %v7549_v8  ;;  %5658 = vmatprep.subr.bf16.mxu1 %v7552_v9  ;;  %v7644_v8 = vld [vmem:[%s10582_s1 + $0xf8c] ss:$16 sps:$4 sm:$0xff]   ;;  %v7639_v9 = vld [vmem:[%s10582_s1 + $0xf80] ss:$16 sps:$4 sm:$0xff]  }
 0x1b7   :  { %5126 = vmatpush1.bf16.msra.mxu0 %v7547_v10  ;;  %5659 = vmatpush1.bf16.msra.mxu1 %v7550_v12  ;;  %v7642_v10 = vld [vmem:[%s10582_s1 + $0xf88] ss:$16 sps:$4 sm:$0xff]   ;;  %v7647_v12 = vld [vmem:[%s10582_s1 + $0xfa4] ss:$16 sps:$4 sm:$0xff]  }
 0x1b8   :  { %5127 = vmatprep.subr.bf16.mxu0 %v7555_v13  ;;  %5660 = vmatprep.subr.bf16.mxu1 %v7558_v15  ;;  %v7650_v13 = vld [vmem:[%s10582_s1 + $0xfac] ss:$16 sps:$4 sm:$0xff]   ;;  %v7645_v15 = vld [vmem:[%s10582_s1 + $0xfa0] ss:$16 sps:$4 sm:$0xff]  }
 0x1bb   :  { %5128 = vmatpush1.bf16.msra.mxu0 %v7553_v11  ;;  %5661 = vmatpush1.bf16.msra.mxu1 %v7556_v17  ;;  %v7648_v11 = vld [vmem:[%s10582_s1 + $0xfa8] ss:$16 sps:$4 sm:$0xff]   ;;  %v7653_v17 = vld [vmem:[%s10582_s1 + $0xfc4] ss:$16 sps:$4 sm:$0xff]  }
 0x1bc   :  { %5129 = vmatprep.subr.bf16.mxu0 %v7561_v14  ;;  %5662 = vmatprep.subr.bf16.mxu1 %v7564_v19  ;;  %v7656_v14 = vld [vmem:[%s10582_s1 + $0xfcc] ss:$16 sps:$4 sm:$0xff]   ;;  %v7651_v19 = vld [vmem:[%s10582_s1 + $0xfc0] ss:$16 sps:$4 sm:$0xff]  }
 0x1bf   :  { %5130 = vmatpush1.bf16.msra.mxu0 %v7559_v20  ;;  %5663 = vmatpush1.bf16.msra.mxu1 %v7562_v16  ;;  %v7654_v20 = vld [vmem:[%s10582_s1 + $0xfc8] ss:$16 sps:$4 sm:$0xff]   ;;  %v7659_v16 = vld [vmem:[%s10582_s1 + $0xfe4] ss:$16 sps:$4 sm:$0xff]  }
 0x1c0   :  { %5140 = vmatprep.subr.bf16.mxu0 %v7569_v22  ;;  %5673 = vmatprep.subr.bf16.mxu1 %v7572_v23  ;;  %v7662_v22 = vld [vmem:[%s10582_s1 + $0xfec] ss:$16 sps:$4 sm:$0xff]   ;;  %v7657_v23 = vld [vmem:[%s10582_s1 + $0xfe0] ss:$16 sps:$4 sm:$0xff]  }
 0x1c2   :  { %5132 = vmatmul.mubr.bf16.vlgmr.msra.gmra.mrb[0].mxu0 %v5980_v18  ;;  %5665 = vmatmul.mubr.bf16.vlgmr.msra.gmra.mrb[0].mxu1 %v5980_v18  ;;  %v7660_v18 = vld [vmem:[%s10582_s1 + $0xfe8] ss:$16 sps:$4 sm:$0xff]  }
 0x1c3   :  { %5141 = vmatpush1.bf16.msra.mxu0 %v7567_v25  ;;  %5674 = vmatpush1.bf16.msra.mxu1 %v7570_v26  ;;  %v7667_v25 = vld [vmem:[%s10582_s1 + $0x1004] ss:$16 sps:$4 sm:$0xff]   ;;  %v7670_v26 = vld [vmem:[%s10582_s1 + $0x100c] ss:$16 sps:$4 sm:$0xff]  }
 0x1c4   :  { %5142 = vmatprep.subr.bf16.mxu0 %v7575_v27  ;;  %5675 = vmatprep.subr.bf16.mxu1 %v7578_v21  ;;  %v5982_v27 = vcombine.low %v9521_v24, %v9521_v24  ;;  %v9724_v21 = vld [vmem:[%s10583_s0 + $0x40] sm:$0xff] }
 0x1c5   :  { %5172 = vmatprep.mubr.bf16.mxu0 %v5983_v28  ;;  %5705 = vmatprep.mubr.bf16.mxu1 %v5983_v28  ;;  %v7665_v28 = vld [vmem:[%s10582_s1 + $0x1000] ss:$16 sps:$4 sm:$0xff]   ;;  %v7673_v24 = vld [vmem:[%s10582_s1 + $0x1024] ss:$16 sps:$4 sm:$0xff]  }
 0x1c7   :  { %5143 = vmatpush1.bf16.msra.mxu0 %v7573_v29  ;;  %5676 = vmatpush1.bf16.msra.mxu1 %v7576_v30  ;;  %v7668_v29 = vld [vmem:[%s10582_s1 + $0x1008] ss:$16 sps:$4 sm:$0xff]   ;;  %v7676_v30 = vld [vmem:[%s10582_s1 + $0x102c] ss:$16 sps:$4 sm:$0xff]  }
 0x1c8   :  { %5144 = vmatprep.subr.bf16.mxu0 %v7581_v31  ;;  %5677 = vmatprep.subr.bf16.mxu1 %v7584_v32  ;;  %v5985_v31 = vcombine.high %v9724_v21, %v9724_v21  ;;  %v7671_v32 = vld [vmem:[%s10582_s1 + $0x1020] ss:$16 sps:$4 sm:$0xff]  }
 0x1cb   :  { %5145 = vmatpush1.bf16.msra.mxu0 %v7579_v33  ;;  %5678 = vmatpush1.bf16.msra.mxu1 %v7582_v34  ;;  %v7674_v33 = vld [vmem:[%s10582_s1 + $0x1028] ss:$16 sps:$4 sm:$0xff]   ;;  %v7679_v34 = vld [vmem:[%s10582_s1 + $0x1044] ss:$16 sps:$4 sm:$0xff]  }
 0x1cc   :  { %5146 = vmatprep.subr.bf16.mxu0 %v7587_v35  ;;  %5679 = vmatprep.subr.bf16.mxu1 %v7590_v36  ;;  %v7682_v35 = vld [vmem:[%s10582_s1 + $0x104c] ss:$16 sps:$4 sm:$0xff]   ;;  %v7677_v36 = vld [vmem:[%s10582_s1 + $0x1040] ss:$16 sps:$4 sm:$0xff]  }
 0x1cf   :  { %5147 = vmatpush1.bf16.msra.mxu0 %v7585_v37  ;;  %5680 = vmatpush1.bf16.msra.mxu1 %v7588_v38  ;;  %v7680_v37 = vld [vmem:[%s10582_s1 + $0x1048] ss:$16 sps:$4 sm:$0xff]   ;;  %v7685_v38 = vld [vmem:[%s10582_s1 + $0x1064] ss:$16 sps:$4 sm:$0xff]  }
 0x1d0   :  { %5148 = vmatprep.subr.bf16.mxu0 %v7593_v39  ;;  %5681 = vmatprep.subr.bf16.mxu1 %v7596_v40  ;;  %v7688_v39 = vld [vmem:[%s10582_s1 + $0x106c] ss:$16 sps:$4 sm:$0xff]   ;;  %v7683_v40 = vld [vmem:[%s10582_s1 + $0x1060] ss:$16 sps:$4 sm:$0xff]  }
 0x1d3   :  { %5149 = vmatpush1.bf16.msra.mxu0 %v7591_v41  ;;  %5682 = vmatpush1.bf16.msra.mxu1 %v7594_v42  ;;  %v7686_v41 = vld [vmem:[%s10582_s1 + $0x1068] ss:$16 sps:$4 sm:$0xff]   ;;  %v7691_v42 = vld [vmem:[%s10582_s1 + $0x1084] ss:$16 sps:$4 sm:$0xff]  }
 0x1d4   :  { %5150 = vmatprep.subr.bf16.mxu0 %v7599_v43  ;;  %5683 = vmatprep.subr.bf16.mxu1 %v7602_v44  ;;  %v7694_v43 = vld [vmem:[%s10582_s1 + $0x108c] ss:$16 sps:$4 sm:$0xff]   ;;  %v7689_v44 = vld [vmem:[%s10582_s1 + $0x1080] ss:$16 sps:$4 sm:$0xff]  }
 0x1d7   :  { %5151 = vmatpush1.bf16.msra.mxu0 %v7597_v45  ;;  %5684 = vmatpush1.bf16.msra.mxu1 %v7600_v46  ;;  %v7692_v45 = vld [vmem:[%s10582_s1 + $0x1088] ss:$16 sps:$4 sm:$0xff]   ;;  %v7697_v46 = vld [vmem:[%s10582_s1 + $0x10a4] ss:$16 sps:$4 sm:$0xff]  }
 0x1d8   :  { %5152 = vmatprep.subr.bf16.mxu0 %v7605_v47  ;;  %5685 = vmatprep.subr.bf16.mxu1 %v7608_v48  ;;  %v7700_v47 = vld [vmem:[%s10582_s1 + $0x10ac] ss:$16 sps:$4 sm:$0xff]   ;;  %v7695_v48 = vld [vmem:[%s10582_s1 + $0x10a0] ss:$16 sps:$4 sm:$0xff]  }
 0x1db   :  { %5153 = vmatpush1.bf16.msra.mxu0 %v7603_v49  ;;  %5686 = vmatpush1.bf16.msra.mxu1 %v7606_v50  ;;  %v7698_v49 = vld [vmem:[%s10582_s1 + $0x10a8] ss:$16 sps:$4 sm:$0xff]   ;;  %v7703_v50 = vld [vmem:[%s10582_s1 + $0x10c4] ss:$16 sps:$4 sm:$0xff]  }
 0x1dc   :  { %5154 = vmatprep.subr.bf16.mxu0 %v7611_v51  ;;  %5687 = vmatprep.subr.bf16.mxu1 %v7614_v52  ;;  %v7706_v51 = vld [vmem:[%s10582_s1 + $0x10cc] ss:$16 sps:$4 sm:$0xff]   ;;  %v7701_v52 = vld [vmem:[%s10582_s1 + $0x10c0] ss:$16 sps:$4 sm:$0xff]  }
 0x1df   :  { %5155 = vmatpush1.bf16.msra.mxu0 %v7609_v53  ;;  %5688 = vmatpush1.bf16.msra.mxu1 %v7612_v54  ;;  %v7704_v53 = vld [vmem:[%s10582_s1 + $0x10c8] ss:$16 sps:$4 sm:$0xff]   ;;  %v7709_v54 = vld [vmem:[%s10582_s1 + $0x10e4] ss:$16 sps:$4 sm:$0xff]  }
 0x1e0   :  { %5156 = vmatprep.subr.bf16.mxu0 %v7617_v55  ;;  %5689 = vmatprep.subr.bf16.mxu1 %v7620_v56  ;;  %v7712_v55 = vld [vmem:[%s10582_s1 + $0x10ec] ss:$16 sps:$4 sm:$0xff]   ;;  %v7707_v56 = vld [vmem:[%s10582_s1 + $0x10e0] ss:$16 sps:$4 sm:$0xff]  }
 0x1e3   :  { %5157 = vmatpush1.bf16.msra.mxu0 %v7615_v57  ;;  %5690 = vmatpush1.bf16.msra.mxu1 %v7618_v58  ;;  %v7710_v57 = vld [vmem:[%s10582_s1 + $0x10e8] ss:$16 sps:$4 sm:$0xff]   ;;  %v7715_v58 = vld [vmem:[%s10582_s1 + $0x1104] ss:$16 sps:$4 sm:$0xff]  }
 0x1e4   :  { %5158 = vmatprep.subr.bf16.mxu0 %v7623_v59  ;;  %5691 = vmatprep.subr.bf16.mxu1 %v7626_v60  ;;  %v7718_v59 = vld [vmem:[%s10582_s1 + $0x110c] ss:$16 sps:$4 sm:$0xff]   ;;  %v7713_v60 = vld [vmem:[%s10582_s1 + $0x1100] ss:$16 sps:$4 sm:$0xff]  }
 0x1e7   :  { %5159 = vmatpush1.bf16.msra.mxu0 %v7621_v61  ;;  %5692 = vmatpush1.bf16.msra.mxu1 %v7624_v62  ;;  %v7716_v61 = vld [vmem:[%s10582_s1 + $0x1108] ss:$16 sps:$4 sm:$0xff]   ;;  %v7721_v62 = vld [vmem:[%s10582_s1 + $0x1124] ss:$16 sps:$4 sm:$0xff]  }
 0x1e8   :  { %5160 = vmatprep.subr.bf16.mxu0 %v7629_v63  ;;  %5693 = vmatprep.subr.bf16.mxu1 %v7632_v0  ;;  %v7724_v63 = vld [vmem:[%s10582_s1 + $0x112c] ss:$16 sps:$4 sm:$0xff]   ;;  %v7719_v0 = vld [vmem:[%s10582_s1 + $0x1120] ss:$16 sps:$4 sm:$0xff]  }
 0x1eb   :  { %5161 = vmatpush1.bf16.msra.mxu0 %v7627_v1  ;;  %5694 = vmatpush1.bf16.msra.mxu1 %v7630_v2  ;;  %v7722_v1 = vld [vmem:[%s10582_s1 + $0x1128] ss:$16 sps:$4 sm:$0xff]   ;;  %v7727_v2 = vld [vmem:[%s10582_s1 + $0x1144] ss:$16 sps:$4 sm:$0xff]  }
 0x1ec   :  { %5162 = vmatprep.subr.bf16.mxu0 %v7635_v3  ;;  %5695 = vmatprep.subr.bf16.mxu1 %v7638_v4  ;;  %v7730_v3 = vld [vmem:[%s10582_s1 + $0x114c] ss:$16 sps:$4 sm:$0xff]   ;;  %v7725_v4 = vld [vmem:[%s10582_s1 + $0x1140] ss:$16 sps:$4 sm:$0xff]  }
 0x1ef   :  { %5163 = vmatpush1.bf16.msra.mxu0 %v7633_v5  ;;  %5696 = vmatpush1.bf16.msra.mxu1 %v7636_v6  ;;  %v7728_v5 = vld [vmem:[%s10582_s1 + $0x1148] ss:$16 sps:$4 sm:$0xff]   ;;  %v7733_v6 = vld [vmem:[%s10582_s1 + $0x1164] ss:$16 sps:$4 sm:$0xff]  }
 0x1f0   :  { %5164 = vmatprep.subr.bf16.mxu0 %v7641_v7  ;;  %5697 = vmatprep.subr.bf16.mxu1 %v7644_v8  ;;  %v7736_v7 = vld [vmem:[%s10582_s1 + $0x116c] ss:$16 sps:$4 sm:$0xff]   ;;  %v7731_v8 = vld [vmem:[%s10582_s1 + $0x1160] ss:$16 sps:$4 sm:$0xff]  }
 0x1f3   :  { %5165 = vmatpush1.bf16.msra.mxu0 %v7639_v9  ;;  %5698 = vmatpush1.bf16.msra.mxu1 %v7642_v10  ;;  %v7734_v9 = vld [vmem:[%s10582_s1 + $0x1168] ss:$16 sps:$4 sm:$0xff]   ;;  %v7739_v10 = vld [vmem:[%s10582_s1 + $0x1184] ss:$16 sps:$4 sm:$0xff]  }
 0x1f4   :  { %5166 = vmatprep.subr.bf16.mxu0 %v7647_v12  ;;  %5699 = vmatprep.subr.bf16.mxu1 %v7650_v13  ;;  %v7742_v12 = vld [vmem:[%s10582_s1 + $0x118c] ss:$16 sps:$4 sm:$0xff]   ;;  %v7737_v13 = vld [vmem:[%s10582_s1 + $0x1180] ss:$16 sps:$4 sm:$0xff]  }
 0x1f7   :  { %5167 = vmatpush1.bf16.msra.mxu0 %v7645_v15  ;;  %5700 = vmatpush1.bf16.msra.mxu1 %v7648_v11  ;;  %v7740_v15 = vld [vmem:[%s10582_s1 + $0x1188] ss:$16 sps:$4 sm:$0xff]   ;;  %v7745_v11 = vld [vmem:[%s10582_s1 + $0x11a4] ss:$16 sps:$4 sm:$0xff]  }
 0x1f8   :  { %5168 = vmatprep.subr.bf16.mxu0 %v7653_v17  ;;  %5701 = vmatprep.subr.bf16.mxu1 %v7656_v14  ;;  %v7748_v17 = vld [vmem:[%s10582_s1 + $0x11ac] ss:$16 sps:$4 sm:$0xff]   ;;  %v7743_v14 = vld [vmem:[%s10582_s1 + $0x11a0] ss:$16 sps:$4 sm:$0xff]  }
 0x1fb   :  { %5169 = vmatpush1.bf16.msra.mxu0 %v7651_v19  ;;  %5702 = vmatpush1.bf16.msra.mxu1 %v7654_v20  ;;  %v7746_v19 = vld [vmem:[%s10582_s1 + $0x11a8] ss:$16 sps:$4 sm:$0xff]   ;;  %v7751_v20 = vld [vmem:[%s10582_s1 + $0x11c4] ss:$16 sps:$4 sm:$0xff]  }
 0x1fc   :  { %5170 = vmatprep.subr.bf16.mxu0 %v7659_v16  ;;  %5703 = vmatprep.subr.bf16.mxu1 %v7662_v22  ;;  %v7754_v16 = vld [vmem:[%s10582_s1 + $0x11cc] ss:$16 sps:$4 sm:$0xff]   ;;  %v7749_v22 = vld [vmem:[%s10582_s1 + $0x11c0] ss:$16 sps:$4 sm:$0xff]  }
 0x1ff   :  { %5171 = vmatpush1.bf16.msra.mxu0 %v7657_v23  ;;  %5704 = vmatpush1.bf16.msra.mxu1 %v7660_v18  ;;  %v7752_v23 = vld [vmem:[%s10582_s1 + $0x11c8] ss:$16 sps:$4 sm:$0xff]   ;;  %v7757_v18 = vld [vmem:[%s10582_s1 + $0x11e4] ss:$16 sps:$4 sm:$0xff]  }
 0x200   :  { %5181 = vmatprep.subr.bf16.mxu0 %v7667_v25  ;;  %5714 = vmatprep.subr.bf16.mxu1 %v7670_v26  ;;  %v7760_v25 = vld [vmem:[%s10582_s1 + $0x11ec] ss:$16 sps:$4 sm:$0xff]   ;;  %v7755_v26 = vld [vmem:[%s10582_s1 + $0x11e0] ss:$16 sps:$4 sm:$0xff]  }
 0x202   :  { %5173 = vmatmul.mubr.bf16.vlgmr.msra.gmra.mrb[0].mxu0 %v5982_v27  ;;  %5706 = vmatmul.mubr.bf16.vlgmr.msra.gmra.mrb[0].mxu1 %v5982_v27  ;;  %v7758_v27 = vld [vmem:[%s10582_s1 + $0x11e8] ss:$16 sps:$4 sm:$0xff]  }
 0x203   :  { %5182 = vmatpush1.bf16.msra.mxu0 %v7665_v28  ;;  %5715 = vmatpush1.bf16.msra.mxu1 %v7668_v29  ;;  %v7765_v28 = vld [vmem:[%s10582_s1 + $0x1204] ss:$16 sps:$4 sm:$0xff]   ;;  %v7768_v29 = vld [vmem:[%s10582_s1 + $0x120c] ss:$16 sps:$4 sm:$0xff]  }
 0x204   :  { %5183 = vmatprep.subr.bf16.mxu0 %v7673_v24  ;;  %5716 = vmatprep.subr.bf16.mxu1 %v7676_v30  ;;  %v5984_v24 = vcombine.low %v9724_v21, %v9724_v21  ;;  %v9925_v30 = vld [vmem:[%s10583_s0 + $0x48] sm:$0xff]  ;;  %v7771_v21 = vld [vmem:[%s10582_s1 + $0x1224] ss:$16 sps:$4 sm:$0xff]  }
 0x205   :  { %5213 = vmatprep.mubr.bf16.mxu0 %v5985_v31  ;;  %5746 = vmatprep.mubr.bf16.mxu1 %v5985_v31  ;;  %v7763_v31 = vld [vmem:[%s10582_s1 + $0x1200] ss:$16 sps:$4 sm:$0xff]  }
 0x207   :  { %5184 = vmatpush1.bf16.msra.mxu0 %v7671_v32  ;;  %5717 = vmatpush1.bf16.msra.mxu1 %v7674_v33  ;;  %v7766_v32 = vld [vmem:[%s10582_s1 + $0x1208] ss:$16 sps:$4 sm:$0xff]   ;;  %v7774_v33 = vld [vmem:[%s10582_s1 + $0x122c] ss:$16 sps:$4 sm:$0xff]  }
 0x208   :  { %5185 = vmatprep.subr.bf16.mxu0 %v7679_v34  ;;  %5718 = vmatprep.subr.bf16.mxu1 %v7682_v35  ;;  %v5987_v34 = vcombine.high %v9925_v30, %v9925_v30  ;;  %v7769_v35 = vld [vmem:[%s10582_s1 + $0x1220] ss:$16 sps:$4 sm:$0xff]  }
 0x20b   :  { %5186 = vmatpush1.bf16.msra.mxu0 %v7677_v36  ;;  %5719 = vmatpush1.bf16.msra.mxu1 %v7680_v37  ;;  %v7772_v36 = vld [vmem:[%s10582_s1 + $0x1228] ss:$16 sps:$4 sm:$0xff]   ;;  %v7777_v37 = vld [vmem:[%s10582_s1 + $0x1244] ss:$16 sps:$4 sm:$0xff]  }
 0x20c   :  { %5187 = vmatprep.subr.bf16.mxu0 %v7685_v38  ;;  %5720 = vmatprep.subr.bf16.mxu1 %v7688_v39  ;;  %v7780_v38 = vld [vmem:[%s10582_s1 + $0x124c] ss:$16 sps:$4 sm:$0xff]   ;;  %v7775_v39 = vld [vmem:[%s10582_s1 + $0x1240] ss:$16 sps:$4 sm:$0xff]  }
 0x20f   :  { %5188 = vmatpush1.bf16.msra.mxu0 %v7683_v40  ;;  %5721 = vmatpush1.bf16.msra.mxu1 %v7686_v41  ;;  %v7778_v40 = vld [vmem:[%s10582_s1 + $0x1248] ss:$16 sps:$4 sm:$0xff]   ;;  %v7783_v41 = vld [vmem:[%s10582_s1 + $0x1264] ss:$16 sps:$4 sm:$0xff]  }
 0x210   :  { %5189 = vmatprep.subr.bf16.mxu0 %v7691_v42  ;;  %5722 = vmatprep.subr.bf16.mxu1 %v7694_v43  ;;  %v7786_v42 = vld [vmem:[%s10582_s1 + $0x126c] ss:$16 sps:$4 sm:$0xff]   ;;  %v7781_v43 = vld [vmem:[%s10582_s1 + $0x1260] ss:$16 sps:$4 sm:$0xff]  }
 0x213   :  { %5190 = vmatpush1.bf16.msra.mxu0 %v7689_v44  ;;  %5723 = vmatpush1.bf16.msra.mxu1 %v7692_v45  ;;  %v7784_v44 = vld [vmem:[%s10582_s1 + $0x1268] ss:$16 sps:$4 sm:$0xff]   ;;  %v7789_v45 = vld [vmem:[%s10582_s1 + $0x1284] ss:$16 sps:$4 sm:$0xff]  }
 0x214   :  { %5191 = vmatprep.subr.bf16.mxu0 %v7697_v46  ;;  %5724 = vmatprep.subr.bf16.mxu1 %v7700_v47  ;;  %v7792_v46 = vld [vmem:[%s10582_s1 + $0x128c] ss:$16 sps:$4 sm:$0xff]   ;;  %v7787_v47 = vld [vmem:[%s10582_s1 + $0x1280] ss:$16 sps:$4 sm:$0xff]  }
 0x217   :  { %5192 = vmatpush1.bf16.msra.mxu0 %v7695_v48  ;;  %5725 = vmatpush1.bf16.msra.mxu1 %v7698_v49  ;;  %v7790_v48 = vld [vmem:[%s10582_s1 + $0x1288] ss:$16 sps:$4 sm:$0xff]   ;;  %v7795_v49 = vld [vmem:[%s10582_s1 + $0x12a4] ss:$16 sps:$4 sm:$0xff]  }
 0x218   :  { %5193 = vmatprep.subr.bf16.mxu0 %v7703_v50  ;;  %5726 = vmatprep.subr.bf16.mxu1 %v7706_v51  ;;  %v7798_v50 = vld [vmem:[%s10582_s1 + $0x12ac] ss:$16 sps:$4 sm:$0xff]   ;;  %v7793_v51 = vld [vmem:[%s10582_s1 + $0x12a0] ss:$16 sps:$4 sm:$0xff]  }
 0x21b   :  { %5194 = vmatpush1.bf16.msra.mxu0 %v7701_v52  ;;  %5727 = vmatpush1.bf16.msra.mxu1 %v7704_v53  ;;  %v7796_v52 = vld [vmem:[%s10582_s1 + $0x12a8] ss:$16 sps:$4 sm:$0xff]   ;;  %v7801_v53 = vld [vmem:[%s10582_s1 + $0x12c4] ss:$16 sps:$4 sm:$0xff]  }
 0x21c   :  { %5195 = vmatprep.subr.bf16.mxu0 %v7709_v54  ;;  %5728 = vmatprep.subr.bf16.mxu1 %v7712_v55  ;;  %v7804_v54 = vld [vmem:[%s10582_s1 + $0x12cc] ss:$16 sps:$4 sm:$0xff]   ;;  %v7799_v55 = vld [vmem:[%s10582_s1 + $0x12c0] ss:$16 sps:$4 sm:$0xff]  }
 0x21f   :  { %5196 = vmatpush1.bf16.msra.mxu0 %v7707_v56  ;;  %5729 = vmatpush1.bf16.msra.mxu1 %v7710_v57  ;;  %v7802_v56 = vld [vmem:[%s10582_s1 + $0x12c8] ss:$16 sps:$4 sm:$0xff]   ;;  %v7807_v57 = vld [vmem:[%s10582_s1 + $0x12e4] ss:$16 sps:$4 sm:$0xff]  }
 0x220   :  { %5197 = vmatprep.subr.bf16.mxu0 %v7715_v58  ;;  %5730 = vmatprep.subr.bf16.mxu1 %v7718_v59  ;;  %v7810_v58 = vld [vmem:[%s10582_s1 + $0x12ec] ss:$16 sps:$4 sm:$0xff]   ;;  %v7805_v59 = vld [vmem:[%s10582_s1 + $0x12e0] ss:$16 sps:$4 sm:$0xff]  }
 0x223   :  { %5198 = vmatpush1.bf16.msra.mxu0 %v7713_v60  ;;  %5731 = vmatpush1.bf16.msra.mxu1 %v7716_v61  ;;  %v7808_v60 = vld [vmem:[%s10582_s1 + $0x12e8] ss:$16 sps:$4 sm:$0xff]   ;;  %v7813_v61 = vld [vmem:[%s10582_s1 + $0x1304] ss:$16 sps:$4 sm:$0xff]  }
 0x224   :  { %5199 = vmatprep.subr.bf16.mxu0 %v7721_v62  ;;  %5732 = vmatprep.subr.bf16.mxu1 %v7724_v63  ;;  %v7816_v62 = vld [vmem:[%s10582_s1 + $0x130c] ss:$16 sps:$4 sm:$0xff]   ;;  %v7811_v63 = vld [vmem:[%s10582_s1 + $0x1300] ss:$16 sps:$4 sm:$0xff]  }
 0x227   :  { %5200 = vmatpush1.bf16.msra.mxu0 %v7719_v0  ;;  %5733 = vmatpush1.bf16.msra.mxu1 %v7722_v1  ;;  %v7814_v0 = vld [vmem:[%s10582_s1 + $0x1308] ss:$16 sps:$4 sm:$0xff]   ;;  %v7819_v1 = vld [vmem:[%s10582_s1 + $0x1324] ss:$16 sps:$4 sm:$0xff]  }
 0x228   :  { %5201 = vmatprep.subr.bf16.mxu0 %v7727_v2  ;;  %5734 = vmatprep.subr.bf16.mxu1 %v7730_v3  ;;  %v7822_v2 = vld [vmem:[%s10582_s1 + $0x132c] ss:$16 sps:$4 sm:$0xff]   ;;  %v7817_v3 = vld [vmem:[%s10582_s1 + $0x1320] ss:$16 sps:$4 sm:$0xff]  }
 0x22b   :  { %5202 = vmatpush1.bf16.msra.mxu0 %v7725_v4  ;;  %5735 = vmatpush1.bf16.msra.mxu1 %v7728_v5  ;;  %v7820_v4 = vld [vmem:[%s10582_s1 + $0x1328] ss:$16 sps:$4 sm:$0xff]   ;;  %v7825_v5 = vld [vmem:[%s10582_s1 + $0x1344] ss:$16 sps:$4 sm:$0xff]  }
 0x22c   :  { %5203 = vmatprep.subr.bf16.mxu0 %v7733_v6  ;;  %5736 = vmatprep.subr.bf16.mxu1 %v7736_v7  ;;  %v7828_v6 = vld [vmem:[%s10582_s1 + $0x134c] ss:$16 sps:$4 sm:$0xff]   ;;  %v7823_v7 = vld [vmem:[%s10582_s1 + $0x1340] ss:$16 sps:$4 sm:$0xff]  }
 0x22f   :  { %5204 = vmatpush1.bf16.msra.mxu0 %v7731_v8  ;;  %5737 = vmatpush1.bf16.msra.mxu1 %v7734_v9  ;;  %v7826_v8 = vld [vmem:[%s10582_s1 + $0x1348] ss:$16 sps:$4 sm:$0xff]   ;;  %v7831_v9 = vld [vmem:[%s10582_s1 + $0x1364] ss:$16 sps:$4 sm:$0xff]  }
 0x230   :  { %5205 = vmatprep.subr.bf16.mxu0 %v7739_v10  ;;  %5738 = vmatprep.subr.bf16.mxu1 %v7742_v12  ;;  %v7834_v10 = vld [vmem:[%s10582_s1 + $0x136c] ss:$16 sps:$4 sm:$0xff]   ;;  %v7829_v12 = vld [vmem:[%s10582_s1 + $0x1360] ss:$16 sps:$4 sm:$0xff]  }
 0x233   :  { %5206 = vmatpush1.bf16.msra.mxu0 %v7737_v13  ;;  %5739 = vmatpush1.bf16.msra.mxu1 %v7740_v15  ;;  %v7832_v13 = vld [vmem:[%s10582_s1 + $0x1368] ss:$16 sps:$4 sm:$0xff]   ;;  %v7837_v15 = vld [vmem:[%s10582_s1 + $0x1384] ss:$16 sps:$4 sm:$0xff]  }
 0x234   :  { %5207 = vmatprep.subr.bf16.mxu0 %v7745_v11  ;;  %5740 = vmatprep.subr.bf16.mxu1 %v7748_v17  ;;  %v7840_v11 = vld [vmem:[%s10582_s1 + $0x138c] ss:$16 sps:$4 sm:$0xff]   ;;  %v7835_v17 = vld [vmem:[%s10582_s1 + $0x1380] ss:$16 sps:$4 sm:$0xff]  }
 0x237   :  { %5208 = vmatpush1.bf16.msra.mxu0 %v7743_v14  ;;  %5741 = vmatpush1.bf16.msra.mxu1 %v7746_v19  ;;  %v7838_v14 = vld [vmem:[%s10582_s1 + $0x1388] ss:$16 sps:$4 sm:$0xff]   ;;  %v7843_v19 = vld [vmem:[%s10582_s1 + $0x13a4] ss:$16 sps:$4 sm:$0xff]  }
 0x238   :  { %5209 = vmatprep.subr.bf16.mxu0 %v7751_v20  ;;  %5742 = vmatprep.subr.bf16.mxu1 %v7754_v16  ;;  %v7846_v20 = vld [vmem:[%s10582_s1 + $0x13ac] ss:$16 sps:$4 sm:$0xff]   ;;  %v7841_v16 = vld [vmem:[%s10582_s1 + $0x13a0] ss:$16 sps:$4 sm:$0xff]  }
 0x23b   :  { %5210 = vmatpush1.bf16.msra.mxu0 %v7749_v22  ;;  %5743 = vmatpush1.bf16.msra.mxu1 %v7752_v23  ;;  %v7844_v22 = vld [vmem:[%s10582_s1 + $0x13a8] ss:$16 sps:$4 sm:$0xff]   ;;  %v7849_v23 = vld [vmem:[%s10582_s1 + $0x13c4] ss:$16 sps:$4 sm:$0xff]  }
 0x23c   :  { %5211 = vmatprep.subr.bf16.mxu0 %v7757_v18  ;;  %5744 = vmatprep.subr.bf16.mxu1 %v7760_v25  ;;  %v7852_v18 = vld [vmem:[%s10582_s1 + $0x13cc] ss:$16 sps:$4 sm:$0xff]   ;;  %v7847_v25 = vld [vmem:[%s10582_s1 + $0x13c0] ss:$16 sps:$4 sm:$0xff]  }
 0x23f   :  { %5212 = vmatpush1.bf16.msra.mxu0 %v7755_v26  ;;  %5745 = vmatpush1.bf16.msra.mxu1 %v7758_v27  ;;  %v7850_v26 = vld [vmem:[%s10582_s1 + $0x13c8] ss:$16 sps:$4 sm:$0xff]   ;;  %v7855_v27 = vld [vmem:[%s10582_s1 + $0x13e4] ss:$16 sps:$4 sm:$0xff]  }
 0x240   :  { %5222 = vmatprep.subr.bf16.mxu0 %v7765_v28  ;;  %5755 = vmatprep.subr.bf16.mxu1 %v7768_v29  ;;  %v7858_v28 = vld [vmem:[%s10582_s1 + $0x13ec] ss:$16 sps:$4 sm:$0xff]   ;;  %v7853_v29 = vld [vmem:[%s10582_s1 + $0x13e0] ss:$16 sps:$4 sm:$0xff]  }
 0x242   :  { %5214 = vmatmul.mubr.bf16.vlgmr.msra.gmra.mrb[0].mxu0 %v5984_v24  ;;  %5747 = vmatmul.mubr.bf16.vlgmr.msra.gmra.mrb[0].mxu1 %v5984_v24  ;;  %v7856_v24 = vld [vmem:[%s10582_s1 + $0x13e8] ss:$16 sps:$4 sm:$0xff]  }
 0x243   :  { %5223 = vmatpush1.bf16.msra.mxu0 %v7763_v31  ;;  %5756 = vmatpush1.bf16.msra.mxu1 %v7766_v32  ;;  %v7863_v31 = vld [vmem:[%s10582_s1 + $0x1404] ss:$16 sps:$4 sm:$0xff]   ;;  %v7866_v32 = vld [vmem:[%s10582_s1 + $0x140c] ss:$16 sps:$4 sm:$0xff]  }
 0x244   :  { %5224 = vmatprep.subr.bf16.mxu0 %v7771_v21  ;;  %5757 = vmatprep.subr.bf16.mxu1 %v7774_v33  ;;  %v5986_v21 = vcombine.low %v9925_v30, %v9925_v30  ;;  %v10126_v33 = vld [vmem:[%s10583_s0 + $0x50] sm:$0xff] }
 0x245   :  { %5254 = vmatprep.mubr.bf16.mxu0 %v5987_v34  ;;  %5787 = vmatprep.mubr.bf16.mxu1 %v5987_v34  ;;  %v7861_v34 = vld [vmem:[%s10582_s1 + $0x1400] ss:$16 sps:$4 sm:$0xff]   ;;  %v7869_v30 = vld [vmem:[%s10582_s1 + $0x1424] ss:$16 sps:$4 sm:$0xff]  }
 0x247   :  { %5225 = vmatpush1.bf16.msra.mxu0 %v7769_v35  ;;  %5758 = vmatpush1.bf16.msra.mxu1 %v7772_v36  ;;  %v7864_v35 = vld [vmem:[%s10582_s1 + $0x1408] ss:$16 sps:$4 sm:$0xff]   ;;  %v7872_v36 = vld [vmem:[%s10582_s1 + $0x142c] ss:$16 sps:$4 sm:$0xff]  }
 0x248   :  { %5226 = vmatprep.subr.bf16.mxu0 %v7777_v37  ;;  %5759 = vmatprep.subr.bf16.mxu1 %v7780_v38  ;;  %v5989_v37 = vcombine.high %v10126_v33, %v10126_v33  ;;  %v7867_v38 = vld [vmem:[%s10582_s1 + $0x1420] ss:$16 sps:$4 sm:$0xff]  }
 0x24b   :  { %5227 = vmatpush1.bf16.msra.mxu0 %v7775_v39  ;;  %5760 = vmatpush1.bf16.msra.mxu1 %v7778_v40  ;;  %v7870_v39 = vld [vmem:[%s10582_s1 + $0x1428] ss:$16 sps:$4 sm:$0xff]   ;;  %v7875_v40 = vld [vmem:[%s10582_s1 + $0x1444] ss:$16 sps:$4 sm:$0xff]  }
 0x24c   :  { %5228 = vmatprep.subr.bf16.mxu0 %v7783_v41  ;;  %5761 = vmatprep.subr.bf16.mxu1 %v7786_v42  ;;  %v7878_v41 = vld [vmem:[%s10582_s1 + $0x144c] ss:$16 sps:$4 sm:$0xff]   ;;  %v7873_v42 = vld [vmem:[%s10582_s1 + $0x1440] ss:$16 sps:$4 sm:$0xff]  }
 0x24f   :  { %5229 = vmatpush1.bf16.msra.mxu0 %v7781_v43  ;;  %5762 = vmatpush1.bf16.msra.mxu1 %v7784_v44  ;;  %v7876_v43 = vld [vmem:[%s10582_s1 + $0x1448] ss:$16 sps:$4 sm:$0xff]   ;;  %v7881_v44 = vld [vmem:[%s10582_s1 + $0x1464] ss:$16 sps:$4 sm:$0xff]  }
 0x250   :  { %5230 = vmatprep.subr.bf16.mxu0 %v7789_v45  ;;  %5763 = vmatprep.subr.bf16.mxu1 %v7792_v46  ;;  %v7884_v45 = vld [vmem:[%s10582_s1 + $0x146c] ss:$16 sps:$4 sm:$0xff]   ;;  %v7879_v46 = vld [vmem:[%s10582_s1 + $0x1460] ss:$16 sps:$4 sm:$0xff]  }
 0x253   :  { %5231 = vmatpush1.bf16.msra.mxu0 %v7787_v47  ;;  %5764 = vmatpush1.bf16.msra.mxu1 %v7790_v48  ;;  %v7882_v47 = vld [vmem:[%s10582_s1 + $0x1468] ss:$16 sps:$4 sm:$0xff]   ;;  %v7887_v48 = vld [vmem:[%s10582_s1 + $0x1484] ss:$16 sps:$4 sm:$0xff]  }
 0x254   :  { %5232 = vmatprep.subr.bf16.mxu0 %v7795_v49  ;;  %5765 = vmatprep.subr.bf16.mxu1 %v7798_v50  ;;  %v7890_v49 = vld [vmem:[%s10582_s1 + $0x148c] ss:$16 sps:$4 sm:$0xff]   ;;  %v7885_v50 = vld [vmem:[%s10582_s1 + $0x1480] ss:$16 sps:$4 sm:$0xff]  }
 0x257   :  { %5233 = vmatpush1.bf16.msra.mxu0 %v7793_v51  ;;  %5766 = vmatpush1.bf16.msra.mxu1 %v7796_v52  ;;  %v7888_v51 = vld [vmem:[%s10582_s1 + $0x1488] ss:$16 sps:$4 sm:$0xff]   ;;  %v7893_v52 = vld [vmem:[%s10582_s1 + $0x14a4] ss:$16 sps:$4 sm:$0xff]  }
 0x258   :  { %5234 = vmatprep.subr.bf16.mxu0 %v7801_v53  ;;  %5767 = vmatprep.subr.bf16.mxu1 %v7804_v54  ;;  %v7896_v53 = vld [vmem:[%s10582_s1 + $0x14ac] ss:$16 sps:$4 sm:$0xff]   ;;  %v7891_v54 = vld [vmem:[%s10582_s1 + $0x14a0] ss:$16 sps:$4 sm:$0xff]  }
 0x25b   :  { %5235 = vmatpush1.bf16.msra.mxu0 %v7799_v55  ;;  %5768 = vmatpush1.bf16.msra.mxu1 %v7802_v56  ;;  %v7894_v55 = vld [vmem:[%s10582_s1 + $0x14a8] ss:$16 sps:$4 sm:$0xff]   ;;  %v7899_v56 = vld [vmem:[%s10582_s1 + $0x14c4] ss:$16 sps:$4 sm:$0xff]  }
 0x25c   :  { %5236 = vmatprep.subr.bf16.mxu0 %v7807_v57  ;;  %5769 = vmatprep.subr.bf16.mxu1 %v7810_v58  ;;  %v7902_v57 = vld [vmem:[%s10582_s1 + $0x14cc] ss:$16 sps:$4 sm:$0xff]   ;;  %v7897_v58 = vld [vmem:[%s10582_s1 + $0x14c0] ss:$16 sps:$4 sm:$0xff]  }
 0x25f   :  { %5237 = vmatpush1.bf16.msra.mxu0 %v7805_v59  ;;  %5770 = vmatpush1.bf16.msra.mxu1 %v7808_v60  ;;  %v7900_v59 = vld [vmem:[%s10582_s1 + $0x14c8] ss:$16 sps:$4 sm:$0xff]   ;;  %v7905_v60 = vld [vmem:[%s10582_s1 + $0x14e4] ss:$16 sps:$4 sm:$0xff]  }
 0x260   :  { %5238 = vmatprep.subr.bf16.mxu0 %v7813_v61  ;;  %5771 = vmatprep.subr.bf16.mxu1 %v7816_v62  ;;  %v7908_v61 = vld [vmem:[%s10582_s1 + $0x14ec] ss:$16 sps:$4 sm:$0xff]   ;;  %v7903_v62 = vld [vmem:[%s10582_s1 + $0x14e0] ss:$16 sps:$4 sm:$0xff]  }
 0x263   :  { %5239 = vmatpush1.bf16.msra.mxu0 %v7811_v63  ;;  %5772 = vmatpush1.bf16.msra.mxu1 %v7814_v0  ;;  %v7906_v63 = vld [vmem:[%s10582_s1 + $0x14e8] ss:$16 sps:$4 sm:$0xff]   ;;  %v7911_v0 = vld [vmem:[%s10582_s1 + $0x1504] ss:$16 sps:$4 sm:$0xff]  }
 0x264   :  { %5240 = vmatprep.subr.bf16.mxu0 %v7819_v1  ;;  %5773 = vmatprep.subr.bf16.mxu1 %v7822_v2  ;;  %v7914_v1 = vld [vmem:[%s10582_s1 + $0x150c] ss:$16 sps:$4 sm:$0xff]   ;;  %v7909_v2 = vld [vmem:[%s10582_s1 + $0x1500] ss:$16 sps:$4 sm:$0xff]  }
 0x267   :  { %5241 = vmatpush1.bf16.msra.mxu0 %v7817_v3  ;;  %5774 = vmatpush1.bf16.msra.mxu1 %v7820_v4  ;;  %v7912_v3 = vld [vmem:[%s10582_s1 + $0x1508] ss:$16 sps:$4 sm:$0xff]   ;;  %v7917_v4 = vld [vmem:[%s10582_s1 + $0x1524] ss:$16 sps:$4 sm:$0xff]  }
 0x268   :  { %5242 = vmatprep.subr.bf16.mxu0 %v7825_v5  ;;  %5775 = vmatprep.subr.bf16.mxu1 %v7828_v6  ;;  %v7920_v5 = vld [vmem:[%s10582_s1 + $0x152c] ss:$16 sps:$4 sm:$0xff]   ;;  %v7915_v6 = vld [vmem:[%s10582_s1 + $0x1520] ss:$16 sps:$4 sm:$0xff]  }
 0x26b   :  { %5243 = vmatpush1.bf16.msra.mxu0 %v7823_v7  ;;  %5776 = vmatpush1.bf16.msra.mxu1 %v7826_v8  ;;  %v7918_v7 = vld [vmem:[%s10582_s1 + $0x1528] ss:$16 sps:$4 sm:$0xff]   ;;  %v7923_v8 = vld [vmem:[%s10582_s1 + $0x1544] ss:$16 sps:$4 sm:$0xff]  }
 0x26c   :  { %5244 = vmatprep.subr.bf16.mxu0 %v7831_v9  ;;  %5777 = vmatprep.subr.bf16.mxu1 %v7834_v10  ;;  %v7926_v9 = vld [vmem:[%s10582_s1 + $0x154c] ss:$16 sps:$4 sm:$0xff]   ;;  %v7921_v10 = vld [vmem:[%s10582_s1 + $0x1540] ss:$16 sps:$4 sm:$0xff]  }
 0x26f   :  { %5245 = vmatpush1.bf16.msra.mxu0 %v7829_v12  ;;  %5778 = vmatpush1.bf16.msra.mxu1 %v7832_v13  ;;  %v7924_v12 = vld [vmem:[%s10582_s1 + $0x1548] ss:$16 sps:$4 sm:$0xff]   ;;  %v7929_v13 = vld [vmem:[%s10582_s1 + $0x1564] ss:$16 sps:$4 sm:$0xff]  }
 0x270   :  { %5246 = vmatprep.subr.bf16.mxu0 %v7837_v15  ;;  %5779 = vmatprep.subr.bf16.mxu1 %v7840_v11  ;;  %v7932_v15 = vld [vmem:[%s10582_s1 + $0x156c] ss:$16 sps:$4 sm:$0xff]   ;;  %v7927_v11 = vld [vmem:[%s10582_s1 + $0x1560] ss:$16 sps:$4 sm:$0xff]  }
 0x273   :  { %5247 = vmatpush1.bf16.msra.mxu0 %v7835_v17  ;;  %5780 = vmatpush1.bf16.msra.mxu1 %v7838_v14  ;;  %v7930_v17 = vld [vmem:[%s10582_s1 + $0x1568] ss:$16 sps:$4 sm:$0xff]   ;;  %v7935_v14 = vld [vmem:[%s10582_s1 + $0x1584] ss:$16 sps:$4 sm:$0xff]  }
 0x274   :  { %5248 = vmatprep.subr.bf16.mxu0 %v7843_v19  ;;  %5781 = vmatprep.subr.bf16.mxu1 %v7846_v20  ;;  %v7938_v19 = vld [vmem:[%s10582_s1 + $0x158c] ss:$16 sps:$4 sm:$0xff]   ;;  %v7933_v20 = vld [vmem:[%s10582_s1 + $0x1580] ss:$16 sps:$4 sm:$0xff]  }
 0x277   :  { %5249 = vmatpush1.bf16.msra.mxu0 %v7841_v16  ;;  %5782 = vmatpush1.bf16.msra.mxu1 %v7844_v22  ;;  %v7936_v16 = vld [vmem:[%s10582_s1 + $0x1588] ss:$16 sps:$4 sm:$0xff]   ;;  %v7941_v22 = vld [vmem:[%s10582_s1 + $0x15a4] ss:$16 sps:$4 sm:$0xff]  }
 0x278   :  { %5250 = vmatprep.subr.bf16.mxu0 %v7849_v23  ;;  %5783 = vmatprep.subr.bf16.mxu1 %v7852_v18  ;;  %v7944_v23 = vld [vmem:[%s10582_s1 + $0x15ac] ss:$16 sps:$4 sm:$0xff]   ;;  %v7939_v18 = vld [vmem:[%s10582_s1 + $0x15a0] ss:$16 sps:$4 sm:$0xff]  }
 0x27b   :  { %5251 = vmatpush1.bf16.msra.mxu0 %v7847_v25  ;;  %5784 = vmatpush1.bf16.msra.mxu1 %v7850_v26  ;;  %v7942_v25 = vld [vmem:[%s10582_s1 + $0x15a8] ss:$16 sps:$4 sm:$0xff]   ;;  %v7947_v26 = vld [vmem:[%s10582_s1 + $0x15c4] ss:$16 sps:$4 sm:$0xff]  }
 0x27c   :  { %5252 = vmatprep.subr.bf16.mxu0 %v7855_v27  ;;  %5785 = vmatprep.subr.bf16.mxu1 %v7858_v28  ;;  %v7950_v27 = vld [vmem:[%s10582_s1 + $0x15cc] ss:$16 sps:$4 sm:$0xff]   ;;  %v7945_v28 = vld [vmem:[%s10582_s1 + $0x15c0] ss:$16 sps:$4 sm:$0xff]  }
 0x27f   :  { %5253 = vmatpush1.bf16.msra.mxu0 %v7853_v29  ;;  %5786 = vmatpush1.bf16.msra.mxu1 %v7856_v24  ;;  %v7948_v29 = vld [vmem:[%s10582_s1 + $0x15c8] ss:$16 sps:$4 sm:$0xff]   ;;  %v7953_v24 = vld [vmem:[%s10582_s1 + $0x15e4] ss:$16 sps:$4 sm:$0xff]  }
 0x280   :  { %5263 = vmatprep.subr.bf16.mxu0 %v7863_v31  ;;  %5796 = vmatprep.subr.bf16.mxu1 %v7866_v32  ;;  %v7956_v31 = vld [vmem:[%s10582_s1 + $0x15ec] ss:$16 sps:$4 sm:$0xff]   ;;  %v7951_v32 = vld [vmem:[%s10582_s1 + $0x15e0] ss:$16 sps:$4 sm:$0xff]  }
 0x282   :  { %5255 = vmatmul.mubr.bf16.vlgmr.msra.gmra.mrb[0].mxu0 %v5986_v21  ;;  %5788 = vmatmul.mubr.bf16.vlgmr.msra.gmra.mrb[0].mxu1 %v5986_v21  ;;  %v7954_v21 = vld [vmem:[%s10582_s1 + $0x15e8] ss:$16 sps:$4 sm:$0xff]  }
 0x283   :  { %5264 = vmatpush1.bf16.msra.mxu0 %v7861_v34  ;;  %5797 = vmatpush1.bf16.msra.mxu1 %v7864_v35  ;;  %v7961_v34 = vld [vmem:[%s10582_s1 + $0x1604] ss:$16 sps:$4 sm:$0xff]   ;;  %v7964_v35 = vld [vmem:[%s10582_s1 + $0x160c] ss:$16 sps:$4 sm:$0xff]  }
 0x284   :  { %5265 = vmatprep.subr.bf16.mxu0 %v7869_v30  ;;  %5798 = vmatprep.subr.bf16.mxu1 %v7872_v36  ;;  %v5988_v30 = vcombine.low %v10126_v33, %v10126_v33  ;;  %v10327_v36 = vld [vmem:[%s10583_s0 + $0x58] sm:$0xff]  ;;  %v7967_v33 = vld [vmem:[%s10582_s1 + $0x1624] ss:$16 sps:$4 sm:$0xff]  }
 0x285   :  { %5295 = vmatprep.mubr.bf16.mxu0 %v5989_v37  ;;  %5828 = vmatprep.mubr.bf16.mxu1 %v5989_v37  ;;  %v7959_v37 = vld [vmem:[%s10582_s1 + $0x1600] ss:$16 sps:$4 sm:$0xff]  }
 0x287   :  { %5266 = vmatpush1.bf16.msra.mxu0 %v7867_v38  ;;  %5799 = vmatpush1.bf16.msra.mxu1 %v7870_v39  ;;  %v7962_v38 = vld [vmem:[%s10582_s1 + $0x1608] ss:$16 sps:$4 sm:$0xff]   ;;  %v7970_v39 = vld [vmem:[%s10582_s1 + $0x162c] ss:$16 sps:$4 sm:$0xff]  }
 0x288   :  { %5267 = vmatprep.subr.bf16.mxu0 %v7875_v40  ;;  %5800 = vmatprep.subr.bf16.mxu1 %v7878_v41  ;;  %v5991_v40 = vcombine.high %v10327_v36, %v10327_v36  ;;  %v7965_v41 = vld [vmem:[%s10582_s1 + $0x1620] ss:$16 sps:$4 sm:$0xff]  }
 0x28b   :  { %5268 = vmatpush1.bf16.msra.mxu0 %v7873_v42  ;;  %5801 = vmatpush1.bf16.msra.mxu1 %v7876_v43  ;;  %v7968_v42 = vld [vmem:[%s10582_s1 + $0x1628] ss:$16 sps:$4 sm:$0xff]   ;;  %v7973_v43 = vld [vmem:[%s10582_s1 + $0x1644] ss:$16 sps:$4 sm:$0xff]  }
 0x28c   :  { %5269 = vmatprep.subr.bf16.mxu0 %v7881_v44  ;;  %5802 = vmatprep.subr.bf16.mxu1 %v7884_v45  ;;  %v7976_v44 = vld [vmem:[%s10582_s1 + $0x164c] ss:$16 sps:$4 sm:$0xff]   ;;  %v7971_v45 = vld [vmem:[%s10582_s1 + $0x1640] ss:$16 sps:$4 sm:$0xff]  }
 0x28f   :  { %5270 = vmatpush1.bf16.msra.mxu0 %v7879_v46  ;;  %5803 = vmatpush1.bf16.msra.mxu1 %v7882_v47  ;;  %v7974_v46 = vld [vmem:[%s10582_s1 + $0x1648] ss:$16 sps:$4 sm:$0xff]   ;;  %v7979_v47 = vld [vmem:[%s10582_s1 + $0x1664] ss:$16 sps:$4 sm:$0xff]  }
 0x290   :  { %5271 = vmatprep.subr.bf16.mxu0 %v7887_v48  ;;  %5804 = vmatprep.subr.bf16.mxu1 %v7890_v49  ;;  %v7982_v48 = vld [vmem:[%s10582_s1 + $0x166c] ss:$16 sps:$4 sm:$0xff]   ;;  %v7977_v49 = vld [vmem:[%s10582_s1 + $0x1660] ss:$16 sps:$4 sm:$0xff]  }
 0x293   :  { %5272 = vmatpush1.bf16.msra.mxu0 %v7885_v50  ;;  %5805 = vmatpush1.bf16.msra.mxu1 %v7888_v51  ;;  %v7980_v50 = vld [vmem:[%s10582_s1 + $0x1668] ss:$16 sps:$4 sm:$0xff]   ;;  %v7985_v51 = vld [vmem:[%s10582_s1 + $0x1684] ss:$16 sps:$4 sm:$0xff]  }
 0x294   :  { %5273 = vmatprep.subr.bf16.mxu0 %v7893_v52  ;;  %5806 = vmatprep.subr.bf16.mxu1 %v7896_v53  ;;  %v7988_v52 = vld [vmem:[%s10582_s1 + $0x168c] ss:$16 sps:$4 sm:$0xff]   ;;  %v7983_v53 = vld [vmem:[%s10582_s1 + $0x1680] ss:$16 sps:$4 sm:$0xff]  }
 0x297   :  { %5274 = vmatpush1.bf16.msra.mxu0 %v7891_v54  ;;  %5807 = vmatpush1.bf16.msra.mxu1 %v7894_v55  ;;  %v7986_v54 = vld [vmem:[%s10582_s1 + $0x1688] ss:$16 sps:$4 sm:$0xff]   ;;  %v7991_v55 = vld [vmem:[%s10582_s1 + $0x16a4] ss:$16 sps:$4 sm:$0xff]  }
 0x298   :  { %5275 = vmatprep.subr.bf16.mxu0 %v7899_v56  ;;  %5808 = vmatprep.subr.bf16.mxu1 %v7902_v57  ;;  %v7994_v56 = vld [vmem:[%s10582_s1 + $0x16ac] ss:$16 sps:$4 sm:$0xff]   ;;  %v7989_v57 = vld [vmem:[%s10582_s1 + $0x16a0] ss:$16 sps:$4 sm:$0xff]  }
 0x29b   :  { %5276 = vmatpush1.bf16.msra.mxu0 %v7897_v58  ;;  %5809 = vmatpush1.bf16.msra.mxu1 %v7900_v59  ;;  %v7992_v58 = vld [vmem:[%s10582_s1 + $0x16a8] ss:$16 sps:$4 sm:$0xff]   ;;  %v7997_v59 = vld [vmem:[%s10582_s1 + $0x16c4] ss:$16 sps:$4 sm:$0xff]  }
 0x29c   :  { %5277 = vmatprep.subr.bf16.mxu0 %v7905_v60  ;;  %5810 = vmatprep.subr.bf16.mxu1 %v7908_v61  ;;  %v8000_v60 = vld [vmem:[%s10582_s1 + $0x16cc] ss:$16 sps:$4 sm:$0xff]   ;;  %v7995_v61 = vld [vmem:[%s10582_s1 + $0x16c0] ss:$16 sps:$4 sm:$0xff]  }
 0x29f   :  { %5278 = vmatpush1.bf16.msra.mxu0 %v7903_v62  ;;  %5811 = vmatpush1.bf16.msra.mxu1 %v7906_v63  ;;  %v7998_v62 = vld [vmem:[%s10582_s1 + $0x16c8] ss:$16 sps:$4 sm:$0xff]   ;;  %v8003_v63 = vld [vmem:[%s10582_s1 + $0x16e4] ss:$16 sps:$4 sm:$0xff]  }
 0x2a0   :  { %5279 = vmatprep.subr.bf16.mxu0 %v7911_v0  ;;  %5812 = vmatprep.subr.bf16.mxu1 %v7914_v1  ;;  %v8006_v0 = vld [vmem:[%s10582_s1 + $0x16ec] ss:$16 sps:$4 sm:$0xff]   ;;  %v8001_v1 = vld [vmem:[%s10582_s1 + $0x16e0] ss:$16 sps:$4 sm:$0xff]  }
 0x2a3   :  { %5280 = vmatpush1.bf16.msra.mxu0 %v7909_v2  ;;  %5813 = vmatpush1.bf16.msra.mxu1 %v7912_v3  ;;  %v8004_v2 = vld [vmem:[%s10582_s1 + $0x16e8] ss:$16 sps:$4 sm:$0xff]   ;;  %v8009_v3 = vld [vmem:[%s10582_s1 + $0x1704] ss:$16 sps:$4 sm:$0xff]  }
 0x2a4   :  { %5281 = vmatprep.subr.bf16.mxu0 %v7917_v4  ;;  %5814 = vmatprep.subr.bf16.mxu1 %v7920_v5  ;;  %v8012_v4 = vld [vmem:[%s10582_s1 + $0x170c] ss:$16 sps:$4 sm:$0xff]   ;;  %v8007_v5 = vld [vmem:[%s10582_s1 + $0x1700] ss:$16 sps:$4 sm:$0xff]  }
 0x2a7   :  { %5282 = vmatpush1.bf16.msra.mxu0 %v7915_v6  ;;  %5815 = vmatpush1.bf16.msra.mxu1 %v7918_v7  ;;  %v8010_v6 = vld [vmem:[%s10582_s1 + $0x1708] ss:$16 sps:$4 sm:$0xff]   ;;  %v8015_v7 = vld [vmem:[%s10582_s1 + $0x1724] ss:$16 sps:$4 sm:$0xff]  }
 0x2a8   :  { %5283 = vmatprep.subr.bf16.mxu0 %v7923_v8  ;;  %5816 = vmatprep.subr.bf16.mxu1 %v7926_v9  ;;  %v8018_v8 = vld [vmem:[%s10582_s1 + $0x172c] ss:$16 sps:$4 sm:$0xff]   ;;  %v8013_v9 = vld [vmem:[%s10582_s1 + $0x1720] ss:$16 sps:$4 sm:$0xff]  }
 0x2ab   :  { %5284 = vmatpush1.bf16.msra.mxu0 %v7921_v10  ;;  %5817 = vmatpush1.bf16.msra.mxu1 %v7924_v12  ;;  %v8016_v10 = vld [vmem:[%s10582_s1 + $0x1728] ss:$16 sps:$4 sm:$0xff]   ;;  %v8021_v12 = vld [vmem:[%s10582_s1 + $0x1744] ss:$16 sps:$4 sm:$0xff]  }
 0x2ac   :  { %5285 = vmatprep.subr.bf16.mxu0 %v7929_v13  ;;  %5818 = vmatprep.subr.bf16.mxu1 %v7932_v15  ;;  %v8024_v13 = vld [vmem:[%s10582_s1 + $0x174c] ss:$16 sps:$4 sm:$0xff]   ;;  %v8019_v15 = vld [vmem:[%s10582_s1 + $0x1740] ss:$16 sps:$4 sm:$0xff]  }
 0x2af   :  { %5286 = vmatpush1.bf16.msra.mxu0 %v7927_v11  ;;  %5819 = vmatpush1.bf16.msra.mxu1 %v7930_v17  ;;  %v8022_v11 = vld [vmem:[%s10582_s1 + $0x1748] ss:$16 sps:$4 sm:$0xff]   ;;  %v8027_v17 = vld [vmem:[%s10582_s1 + $0x1764] ss:$16 sps:$4 sm:$0xff]  }
 0x2b0   :  { %5287 = vmatprep.subr.bf16.mxu0 %v7935_v14  ;;  %5820 = vmatprep.subr.bf16.mxu1 %v7938_v19  ;;  %v8030_v14 = vld [vmem:[%s10582_s1 + $0x176c] ss:$16 sps:$4 sm:$0xff]   ;;  %v8025_v19 = vld [vmem:[%s10582_s1 + $0x1760] ss:$16 sps:$4 sm:$0xff]  }
 0x2b3   :  { %5288 = vmatpush1.bf16.msra.mxu0 %v7933_v20  ;;  %5821 = vmatpush1.bf16.msra.mxu1 %v7936_v16  ;;  %v8028_v20 = vld [vmem:[%s10582_s1 + $0x1768] ss:$16 sps:$4 sm:$0xff]   ;;  %v8033_v16 = vld [vmem:[%s10582_s1 + $0x1784] ss:$16 sps:$4 sm:$0xff]  }
 0x2b4   :  { %5289 = vmatprep.subr.bf16.mxu0 %v7941_v22  ;;  %5822 = vmatprep.subr.bf16.mxu1 %v7944_v23  ;;  %v8036_v22 = vld [vmem:[%s10582_s1 + $0x178c] ss:$16 sps:$4 sm:$0xff]   ;;  %v8031_v23 = vld [vmem:[%s10582_s1 + $0x1780] ss:$16 sps:$4 sm:$0xff]  }
 0x2b7   :  { %5290 = vmatpush1.bf16.msra.mxu0 %v7939_v18  ;;  %5823 = vmatpush1.bf16.msra.mxu1 %v7942_v25  ;;  %v8034_v18 = vld [vmem:[%s10582_s1 + $0x1788] ss:$16 sps:$4 sm:$0xff]   ;;  %v8039_v25 = vld [vmem:[%s10582_s1 + $0x17a4] ss:$16 sps:$4 sm:$0xff]  }
 0x2b8   :  { %5291 = vmatprep.subr.bf16.mxu0 %v7947_v26  ;;  %5824 = vmatprep.subr.bf16.mxu1 %v7950_v27  ;;  %v8042_v26 = vld [vmem:[%s10582_s1 + $0x17ac] ss:$16 sps:$4 sm:$0xff]   ;;  %v8037_v27 = vld [vmem:[%s10582_s1 + $0x17a0] ss:$16 sps:$4 sm:$0xff]  }
 0x2bb   :  { %5292 = vmatpush1.bf16.msra.mxu0 %v7945_v28  ;;  %5825 = vmatpush1.bf16.msra.mxu1 %v7948_v29  ;;  %v8040_v28 = vld [vmem:[%s10582_s1 + $0x17a8] ss:$16 sps:$4 sm:$0xff]   ;;  %v8045_v29 = vld [vmem:[%s10582_s1 + $0x17c4] ss:$16 sps:$4 sm:$0xff]  }
 0x2bc   :  { %5293 = vmatprep.subr.bf16.mxu0 %v7953_v24  ;;  %5826 = vmatprep.subr.bf16.mxu1 %v7956_v31  ;;  %v8048_v24 = vld [vmem:[%s10582_s1 + $0x17cc] ss:$16 sps:$4 sm:$0xff]   ;;  %v8043_v31 = vld [vmem:[%s10582_s1 + $0x17c0] ss:$16 sps:$4 sm:$0xff]  }
 0x2bf   :  { %5294 = vmatpush1.bf16.msra.mxu0 %v7951_v32  ;;  %5827 = vmatpush1.bf16.msra.mxu1 %v7954_v21  ;;  %v8046_v32 = vld [vmem:[%s10582_s1 + $0x17c8] ss:$16 sps:$4 sm:$0xff]   ;;  %v8051_v21 = vld [vmem:[%s10582_s1 + $0x17e4] ss:$16 sps:$4 sm:$0xff]  }
 0x2c0   :  { %5304 = vmatprep.subr.bf16.mxu0 %v7961_v34  ;;  %5837 = vmatprep.subr.bf16.mxu1 %v7964_v35  ;;  %v8054_v34 = vld [vmem:[%s10582_s1 + $0x17ec] ss:$16 sps:$4 sm:$0xff]   ;;  %v8049_v35 = vld [vmem:[%s10582_s1 + $0x17e0] ss:$16 sps:$4 sm:$0xff]  }
 0x2c2   :  { %5296 = vmatmul.mubr.bf16.vlgmr.msra.gmra.mrb[0].mxu0 %v5988_v30  ;;  %5829 = vmatmul.mubr.bf16.vlgmr.msra.gmra.mrb[0].mxu1 %v5988_v30  ;;  %v8052_v30 = vld [vmem:[%s10582_s1 + $0x17e8] ss:$16 sps:$4 sm:$0xff]  }
 0x2c3   :  { %5305 = vmatpush1.bf16.msra.mxu0 %v7959_v37  ;;  %5838 = vmatpush1.bf16.msra.mxu1 %v7962_v38  ;;  %v8059_v37 = vld [vmem:[%s10582_s1 + $0x1804] ss:$16 sps:$4 sm:$0xff]   ;;  %v8062_v38 = vld [vmem:[%s10582_s1 + $0x180c] ss:$16 sps:$4 sm:$0xff]  }
 0x2c4   :  { %5306 = vmatprep.subr.bf16.mxu0 %v7967_v33  ;;  %5839 = vmatprep.subr.bf16.mxu1 %v7970_v39  ;;  %v5990_v33 = vcombine.low %v10327_v36, %v10327_v36  ;;  %v8057_v39 = vld [vmem:[%s10582_s1 + $0x1800] ss:$16 sps:$4 sm:$0xff]   ;;  %v8068_v36 = vld [vmem:[%s10582_s1 + $0x182c] ss:$16 sps:$4 sm:$0xff]  }
 0x2c5   :  { %5336 = vmatprep.mubr.bf16.mxu0 %v5991_v40  ;;  %5869 = vmatprep.mubr.bf16.mxu1 %v5991_v40  ;;  %v8060_v40 = vld [vmem:[%s10582_s1 + $0x1808] ss:$16 sps:$4 sm:$0xff]  }
 0x2c7   :  { %5307 = vmatpush1.bf16.msra.mxu0 %v7965_v41  ;;  %5840 = vmatpush1.bf16.msra.mxu1 %v7968_v42  ;;  %v8065_v41 = vld [vmem:[%s10582_s1 + $0x1824] ss:$16 sps:$4 sm:$0xff]   ;;  %v8063_v42 = vld [vmem:[%s10582_s1 + $0x1820] ss:$16 sps:$4 sm:$0xff]  }
 0x2c8   :  { %5308 = vmatprep.subr.bf16.mxu0 %v7973_v43  ;;  %5841 = vmatprep.subr.bf16.mxu1 %v7976_v44  ;;  %v8066_v43 = vld [vmem:[%s10582_s1 + $0x1828] ss:$16 sps:$4 sm:$0xff]   ;;  %v8071_v44 = vld [vmem:[%s10582_s1 + $0x1844] ss:$16 sps:$4 sm:$0xff]  }
 0x2cb   :  { %5309 = vmatpush1.bf16.msra.mxu0 %v7971_v45  ;;  %5842 = vmatpush1.bf16.msra.mxu1 %v7974_v46  ;;  %v8074_v45 = vld [vmem:[%s10582_s1 + $0x184c] ss:$16 sps:$4 sm:$0xff]   ;;  %v8082_v46 = vmov 0  }
 0x2cc   :  { %5310 = vmatprep.subr.bf16.mxu0 %v7979_v47  ;;  %5843 = vmatprep.subr.bf16.mxu1 %v7982_v48  ;;  %v8069_v47 = vld [vmem:[%s10582_s1 + $0x1840] ss:$16 sps:$4 sm:$0xff]   ;;  %v8072_v48 = vld [vmem:[%s10582_s1 + $0x1848] ss:$16 sps:$4 sm:$0xff]  }
 0x2cf   :  { %5311 = vmatpush1.bf16.msra.mxu0 %v7977_v49  ;;  %5844 = vmatpush1.bf16.msra.mxu1 %v7980_v50  ;;  %v8077_v49 = vld [vmem:[%s10582_s1 + $0x1864] ss:$16 sps:$4 sm:$0xff]   ;;  %v8080_v50 = vld [vmem:[%s10582_s1 + $0x186c] ss:$16 sps:$4 sm:$0xff]  }
 0x2d0   :  { %5312 = vmatprep.subr.bf16.mxu0 %v7985_v51  ;;  %5845 = vmatprep.subr.bf16.mxu1 %v7988_v52  ;;  %v8075_v51 = vld [vmem:[%s10582_s1 + $0x1860] ss:$16 sps:$4 sm:$0xff]   ;;  %v8078_v52 = vld [vmem:[%s10582_s1 + $0x1868] ss:$16 sps:$4 sm:$0xff]  }
 0x2d3   :  { %5313 = vmatpush1.bf16.msra.mxu0 %v7983_v53  ;;  %5846 = vmatpush1.bf16.msra.mxu1 %v7986_v54  ;;  %v8081_v53 = vld [vmem:[%s10583_s0 + $0x60] ss:$0 sps:$4 sm:$0xff]   ;;  %v10_v54 = vstv %s10584_s4 }
 0x2d4   :  { %5314 = vmatprep.subr.bf16.mxu0 %v7991_v55  ;;  %5847 = vmatprep.subr.bf16.mxu1 %v7994_v56  ;;  %11 = vst [vmem:[#allocation2] sm:$0x1] %v10_v54  ;;  %v822_v55 = vlaneseq }
 0x2d6   :  { %v823_v56 = vshrl.u32 %v822_v55, 7 }
 0x2d7   :  { %5315 = vmatpush1.bf16.msra.mxu0 %v7989_v57  ;;  %5848 = vmatpush1.bf16.msra.mxu1 %v7992_v58 }
 0x2d8   :  { %5316 = vmatprep.subr.bf16.mxu0 %v7997_v59  ;;  %5849 = vmatprep.subr.bf16.mxu1 %v8000_v60  ;;  %v824_v57 = vsub.s32 0, %v823_v56  ;;  %v832_v58 = vsub.s32 2, %v823_v56  ;;  %v820_v59 = vld [vmem:[%s10585_s2] sm:$0xf]  ;;  %v828_v60 = vsub.s32 1, %v823_v56 }
 0x2db   :  { %5317 = vmatpush1.bf16.msra.mxu0 %v7995_v61  ;;  %5850 = vmatpush1.bf16.msra.mxu1 %v7998_v62  ;;  %v836_v61 = vsub.s32 3, %v823_v56  ;;  %v825_v62 = vrot.slane %v820_v59, %v824_v57 }
 0x2dc   :  { %5318 = vmatprep.subr.bf16.mxu0 %v8003_v63  ;;  %5851 = vmatprep.subr.bf16.mxu1 %v8006_v0  ;;  %v833_v63 = vrot.slane %v820_v59, %v832_v58  ;;  %v5923_v0 = vld [vmem:[%s10586_s3] sm:$0xf] }
 0x2df   :  { %5319 = vmatpush1.bf16.msra.mxu0 %v8001_v1  ;;  %5852 = vmatpush1.bf16.msra.mxu1 %v8004_v2  ;;  %v829_v1 = vrot.slane %v820_v59, %v828_v60  ;;  %v837_v2 = vrot.slane %v820_v59, %v836_v61 }
 0x2e0   :  { %5320 = vmatprep.subr.bf16.mxu0 %v8009_v3  ;;  %5853 = vmatprep.subr.bf16.mxu1 %v8012_v4 }
 0x2e3   :  { %5321 = vmatpush1.bf16.msra.mxu0 %v8007_v5  ;;  %5854 = vmatpush1.bf16.msra.mxu1 %v8010_v6  ;;  %v5928_v6 = vrot.slane %v5923_v0, %v824_v57 }
 0x2e4   :  { %5322 = vmatprep.subr.bf16.mxu0 %v8015_v7  ;;  %5855 = vmatprep.subr.bf16.mxu1 %v8018_v8 }
 0x2e7   :  { %5323 = vmatpush1.bf16.msra.mxu0 %v8013_v9  ;;  %5856 = vmatpush1.bf16.msra.mxu1 %v8016_v10 }
 0x2e8   :  { %5324 = vmatprep.subr.bf16.mxu0 %v8021_v12  ;;  %5857 = vmatprep.subr.bf16.mxu1 %v8024_v13  ;;  %v5932_v12 = vrot.slane %v5923_v0, %v828_v60 }
 0x2eb   :  { %5325 = vmatpush1.bf16.msra.mxu0 %v8019_v15  ;;  %5858 = vmatpush1.bf16.msra.mxu1 %v8022_v11 }
 0x2ec   :  { %5326 = vmatprep.subr.bf16.mxu0 %v8027_v17  ;;  %5859 = vmatprep.subr.bf16.mxu1 %v8030_v14 }
 0x2ef   :  { %5327 = vmatpush1.bf16.msra.mxu0 %v8025_v19  ;;  %5860 = vmatpush1.bf16.msra.mxu1 %v8028_v20 }
 0x2f0   :  { %5328 = vmatprep.subr.bf16.mxu0 %v8033_v16  ;;  %5861 = vmatprep.subr.bf16.mxu1 %v8036_v22  ;;  %v5936_v16 = vrot.slane %v5923_v0, %v832_v58 }
 0x2f3   :  { %5329 = vmatpush1.bf16.msra.mxu0 %v8031_v23  ;;  %5862 = vmatpush1.bf16.msra.mxu1 %v8034_v18 }
 0x2f4   :  { %5330 = vmatprep.subr.bf16.mxu0 %v8039_v25  ;;  %5863 = vmatprep.subr.bf16.mxu1 %v8042_v26  ;;  %v5940_v26 = vrot.slane %v5923_v0, %v836_v61 }
 0x2f7   :  { %5331 = vmatpush1.bf16.msra.mxu0 %v8037_v27  ;;  %5864 = vmatpush1.bf16.msra.mxu1 %v8040_v28 }
 0x2f8   :  { %5332 = vmatprep.subr.bf16.mxu0 %v8045_v29  ;;  %5865 = vmatprep.subr.bf16.mxu1 %v8048_v24 }
 0x2fb   :  { %5333 = vmatpush1.bf16.msra.mxu0 %v8043_v31  ;;  %5866 = vmatpush1.bf16.msra.mxu1 %v8046_v32  ;;  %v6779_v32 = vld [vmem:[#allocation2] ss:$0 sm:$0xff] }
 0x2fc   :  { %5334 = vmatprep.subr.bf16.mxu0 %v8051_v21  ;;  %5867 = vmatprep.subr.bf16.mxu1 %v8054_v34 }
 0x2ff   :  { %5335 = vmatpush1.bf16.msra.mxu0 %v8049_v35  ;;  %5868 = vmatpush1.bf16.msra.mxu1 %v8052_v30 }
 0x300   :  { %5345 = vmatprep.subr.bf16.mxu0 %v8059_v37  ;;  %5878 = vmatprep.subr.bf16.mxu1 %v8062_v38 }
 0x302   :  { %5337 = vmatmul.mubr.bf16.vlgmr.msra.gmra.mrb[0].mxu0 %v5990_v33  ;;  %5870 = vmatmul.mubr.bf16.vlgmr.msra.gmra.mrb[0].mxu1 %v5990_v33 }
 0x303   :  { %5346 = vmatpush1.bf16.msra.mxu0 %v8057_v39  ;;  %5879 = vmatpush1.bf16.msra.mxu1 %v8060_v40 }
 0x304   :  { %5347 = vmatprep.subr.bf16.mxu0 %v8065_v41  ;;  %5880 = vmatprep.subr.bf16.mxu1 %v8068_v36 }
 0x305   :  { %5377 = vmatprep.mubr.bf16.mxu0 %v8082_v46  ;;  %5910 = vmatprep.mubr.bf16.mxu1 %v8082_v46 }
 0x307   :  { %5348 = vmatpush1.bf16.msra.mxu0 %v8063_v42  ;;  %5881 = vmatpush1.bf16.msra.mxu1 %v8066_v43 }
 0x308   :  { %5349 = vmatprep.subr.bf16.mxu0 %v8071_v44  ;;  %5882 = vmatprep.subr.bf16.mxu1 %v8074_v45 }
 0x30b   :  { %5350 = vmatpush1.bf16.msra.mxu0 %v8069_v47  ;;  %5883 = vmatpush1.bf16.msra.mxu1 %v8072_v48 }
 0x30c   :  { %5351 = vmatprep.subr.bf16.mxu0 %v8077_v49  ;;  %5884 = vmatprep.subr.bf16.mxu1 %v8080_v50 }
 0x30f   :  { %5352 = vmatpush1.bf16.msra.mxu0 %v8075_v51  ;;  %5885 = vmatpush1.bf16.msra.mxu1 %v8078_v52 }
 0x312   :  { %6777 = vmatmul.mubr.msk.bf16.vlgmr.msra.gmra.mrb[0].mxu0 %vm4849_vm0, %v8081_v53  ;;  %6778 = vmatmul.mubr.msk.bf16.vlgmr.msra.gmra.mrb[0].mxu1 %vm4849_vm0, %v8081_v53 }
 0x3e5   :  { %v5379_v3 = vpop.f32.mrb[0].mxu0  ;;  %v5912_v4 = vpop.f32.mrb[0].mxu1 }
 0x3e6   :  { %v6780_v5 = vadd.f32 %v5379_v3, %v825_v62  ;;  %v6782_v7 = vadd.f32 %v5912_v4, %v833_v63  ;;  %v5381_v8 = vpop.f32.mrb[1].mxu0  ;;  %v5914_v9 = vpop.f32.mrb[1].mxu1 }
 0x3e7   :  { %v6781_v10 = vadd.f32 %v5381_v8, %v829_v1  ;;  %v6783_v13 = vadd.f32 %v5914_v9, %v837_v2  ;;  %v5383_v15 = vpop.f32.mrb[2].mxu0  ;;  %v5916_v11 = vpop.f32.mrb[2].mxu1 }
 0x3e8   :  { %v5919_v17 = vmax.f32 %v6780_v5, 0.0  ;;  %v5384_v14 = vpop.f32.mrb[3].mxu0  ;;  %v5917_v19 = vpop.f32.mrb[3].mxu1  ;;  %v5921_v20 = vmax.f32 %v6782_v7, 0.0 }
 0x3e9   :  { %v5920_v22 = vmax.f32 %v6781_v10, 0.0  ;;  %v5922_v25 = vmax.f32 %v6783_v13, 0.0 }
 0x3ea   :  { %v5945_v23 = vmul.f32 %v5928_v6, %v5919_v17  ;;  %v5947_v27 = vmul.f32 %v5936_v16, %v5921_v20 }
 0x3eb   :  { %v5946_v18 = vmul.f32 %v5932_v12, %v5920_v22  ;;  %v5948_v29 = vmul.f32 %v5940_v26, %v5922_v25 }
 0x3ed   :  { %v5949_v28 = vadd.f32 %v5946_v18, %v5945_v23 }
 0x3ef   :  { %v5950_v24 = vadd.f32 %v5949_v28, %v5947_v27 }
 0x3f1   :  { %v5951_v31 = vadd.f32 %v5950_v24, %v5948_v29 }
 0x3f3   :  { %5952 = vadd.xlane.f32.xlu0 %v5951_v31 }
 0x480   :  { %v5953_v21 = vpop.xlane.xlu0 %5952 }
 0x481   :  { %v5961_v34 = vadd.f32 %v6779_v32, %v5953_v21 }
 0x483   :  { %5963 = vst.msk [vmem:[%s10587_s5] sm:$0xff] %vm5962_vm1, %v5961_v34 }

</bundles_post_ra>
